<compile_context>
chip_gen: v5e
topology: v5e:2x2
jax: 0.10.0
libtpu: 0.0.40
codegen_flags: <defaults>
</compile_context>

<pallas_src>
import functools

import jax
import jax.numpy as jnp
import numpy as np
from jax import lax
from jax.experimental import pallas as pl
from jax.experimental.pallas import tpu as pltpu

BN_EPS = 1e-5
KSIZE = 5
STRIDE = 2
PAD = 2


def _round_up(x, m):
    return ((x + m - 1) // m) * m


def _tpu_vmem_budget():
    """Generation-aware (vmem_limit_bytes, tile-size budget)."""
    try:
        phys = pltpu.get_tpu_info().vmem_capacity_bytes
    except Exception:
        phys = 64 * 1024 * 1024          # conservative fallback (v7x per-TC VMEM)
    # Leave headroom below physical; cap at ~100 MiB on 128 MiB parts (v5e/v6e),
    # ~48 MiB on v7x (64 MiB physical).
    limit = int(min(phys - 16 * 1024 * 1024, 100 * 1024 * 1024))
    budget = int(limit * 0.80)           # what the tile-size chooser may spend
    return limit, budget


def _choose_tm(M, K_pad, C_pad, budget_bytes, tm_cap=1024):
    """Largest M-tile whose pass-1 working set (double-buffered bf16 patch tile,
    double-buffered bf16 y tile, resident bf16 weight) fits the VMEM budget."""
    per_row = 2 * K_pad * 2 + 2 * C_pad * 2            # bytes per row of tm
    fixed = 2 * K_pad * C_pad * 2 + 4 * 2 * C_pad * 4  # weight (x2) + stats/bias
    avail = max(budget_bytes - fixed, 8 * per_row)
    tm = (avail // per_row) // 8 * 8
    tm = int(max(8, min(tm_cap, tm)))
    return min(tm, _round_up(M, 8))


# --------------------------------------------------------------------------
# Pass 1: conv-as-matmul (+bias), bf16 y store, per-tile BN partial statistics
# --------------------------------------------------------------------------
def _conv_stats_kernel(p_ref, w_ref, b_ref, y_ref, stats_ref, *, m_true):
    """p_ref: [TM, Kp] bf16; w_ref: [Kp, Cp] bf16 (grid-invariant);
    b_ref: [1, Cp] f32 conv bias (grid-invariant);
    y_ref: [TM, Cp] bf16 pre-activation tile (HBM traffic halved vs f32);
    stats_ref: [2, Cp] f32 per-tile (sum, sum-of-squares) partials."""
    i = pl.program_id(0)
    tm = y_ref.shape[0]

    # MXU: bf16 x bf16 -> f32 accumulation, then per-channel bias.
    y = jnp.dot(p_ref[...], w_ref[...], preferred_element_type=jnp.float32)
    y = y + b_ref[...]

    # bf16 store of the pre-activation; statistics below use the exact f32
    # value still in registers, so batch statistics stay exact.
    y_ref[...] = y.astype(y_ref.dtype)

    # Mask zero-padded rows (they carry the bias after the add above).
    row = i * tm + lax.broadcasted_iota(jnp.int32, y.shape, 0)
    yv = jnp.where(row < m_true, y, 0.0)
    stats_ref[0:1, :] = jnp.sum(yv, axis=0, keepdims=True)
    stats_ref[1:2, :] = jnp.sum(yv * y, axis=0, keepdims=True)   # = valid * y^2


# --------------------------------------------------------------------------
# Pass 2 (final layer only): normalize + ReLU epilogue
# --------------------------------------------------------------------------
def _bn_relu_kernel(y_ref, scale_ref, shift_ref, o_ref):
    y = y_ref[...].astype(jnp.float32)
    o_ref[...] = jnp.maximum(y * scale_ref[...] + shift_ref[...], 0.0)


# --------------------------------------------------------------------------
# One conv layer: glue im2col + Pallas pass 1
# --------------------------------------------------------------------------
def _conv_layer(x_act_bf16, w, b):
    """x_act_bf16: [N, H, W, Cin] bf16 activation; w: [Cout, Cin, 5, 5] (OIHW).
    Returns (y [M_pad, C_pad] bf16, stats [n_tiles, 2, C_pad] f32, meta)."""
    N, H, W, Cin = x_act_bf16.shape
    Cout = w.shape[0]
    OH = (H + 2 * PAD - KSIZE) // STRIDE + 1
    OW = (W + 2 * PAD - KSIZE) // STRIDE + 1

    M = N * OH * OW
    K = KSIZE * KSIZE * Cin
    K_pad = _round_up(K, 128)
    C_pad = _round_up(Cout, 128)

    vmem_limit, budget = _tpu_vmem_budget()
    tm = _choose_tm(M, K_pad, C_pad, budget)
    M_pad = _round_up(M, tm)
    n_tiles = M_pad // tm

    # --- glue: im2col in bf16 (XLA fuses this with the folded BN+ReLU of the
    # previous layer; see encoder_cnn_forward) ---
    xp = jnp.pad(x_act_bf16, ((0, 0), (PAD, PAD), (PAD, PAD), (0, 0)))
    patches = []
    for kh in range(KSIZE):
        for kw in range(KSIZE):
            patches.append(
                xp[:, kh:kh + STRIDE * (OH - 1) + 1:STRIDE,
                      kw:kw + STRIDE * (OW - 1) + 1:STRIDE, :])
    # [N, OH, OW, 25, Cin] -> [M, 25*Cin], ordering (kh, kw, cin)
    p = jnp.stack(patches, axis=3).reshape(M, K)
    p = jnp.pad(p, ((0, M_pad - M), (0, K_pad - K)))

    # weight [Cout, Cin, KH, KW] -> [KH, KW, Cin, Cout] -> [25*Cin, Cout] (bf16)
    wmat = jnp.transpose(w, (2, 3, 1, 0)).reshape(K, Cout).astype(jnp.bfloat16)
    wmat = jnp.pad(wmat, ((0, K_pad - K), (0, C_pad - Cout)))
    bvec = jnp.pad(b.astype(jnp.float32), (0, C_pad - Cout)).reshape(1, C_pad)

    y, stats = pl.pallas_call(
        functools.partial(_conv_stats_kernel, m_true=int(M)),
        out_shape=(jax.ShapeDtypeStruct((M_pad, C_pad), jnp.bfloat16),
                   jax.ShapeDtypeStruct((n_tiles, 2, C_pad), jnp.float32)),
        grid=(n_tiles,),
        in_specs=[
            pl.BlockSpec((tm, K_pad), lambda i: (i, 0)),     # patch tile
            pl.BlockSpec((K_pad, C_pad), lambda i: (0, 0)),  # weight (resident)
            pl.BlockSpec((1, C_pad), lambda i: (0, 0)),      # bias (resident)
        ],
        out_specs=(
            pl.BlockSpec((tm, C_pad), lambda i: (i, 0)),         # bf16 y tile
            pl.BlockSpec((None, 2, C_pad), lambda i: (i, 0, 0)),  # per-tile stats
        ),
        compiler_params=pltpu.CompilerParams(
            dimension_semantics=("parallel",),   # no cross-step state -> megacore on v7x
            vmem_limit_bytes=vmem_limit),
    )(p, wmat, bvec)

    meta = dict(N=N, OH=OH, OW=OW, M=M, M_pad=M_pad, Cout=Cout, C_pad=C_pad,
                tm=tm, n_tiles=n_tiles, vmem_limit=vmem_limit)
    return y, stats, meta


def _scale_shift(stats, gamma, beta, meta):
    """Tiny XLA reduce: fold per-tile partials into per-channel scale/shift."""
    M, Cout, C_pad = meta["M"], meta["Cout"], meta["C_pad"]
    sums = jnp.sum(stats[:, 0, :], axis=0)
    sumsq = jnp.sum(stats[:, 1, :], axis=0)
    inv_m = jnp.float32(1.0 / M)
    mean = sums * inv_m
    var = jnp.maximum(sumsq * inv_m - mean * mean, 0.0)
    g = jnp.pad(gamma.astype(jnp.float32), (0, C_pad - Cout))
    bt = jnp.pad(beta.astype(jnp.float32), (0, C_pad - Cout))
    scale = g * lax.rsqrt(var + BN_EPS)
    shift = bt - mean * scale
    return scale, shift


def _bn_relu_glue(y, scale, shift, meta):
    """Layers 1..3: epilogue folded into the next layer's im2col fusion."""
    N, OH, OW, M, Cout = meta["N"], meta["OH"], meta["OW"], meta["M"], meta["Cout"]
    yv = y[:M, :Cout].astype(jnp.float32).reshape(N, OH, OW, Cout)
    act = jnp.maximum(yv * scale[:Cout] + shift[:Cout], 0.0)
    return act.astype(jnp.bfloat16)


def _bn_relu_pallas(y, scale, shift, meta):
    """Final layer: Pallas BN+ReLU epilogue producing the f32 network output."""
    M_pad, C_pad, tm, n_tiles = (meta["M_pad"], meta["C_pad"],
                                 meta["tm"], meta["n_tiles"])
    out = pl.pallas_call(
        _bn_relu_kernel,
        out_shape=jax.ShapeDtypeStruct((M_pad, C_pad), jnp.float32),
        grid=(n_tiles,),
        in_specs=[
            pl.BlockSpec((tm, C_pad), lambda i: (i, 0)),
            pl.BlockSpec((1, C_pad), lambda i: (0, 0)),
            pl.BlockSpec((1, C_pad), lambda i: (0, 0)),
        ],
        out_specs=pl.BlockSpec((tm, C_pad), lambda i: (i, 0)),
        compiler_params=pltpu.CompilerParams(
            dimension_semantics=("parallel",),
            vmem_limit_bytes=meta["vmem_limit"]),
    )(y, scale.reshape(1, C_pad), shift.reshape(1, C_pad))
    N, OH, OW, M, Cout = meta["N"], meta["OH"], meta["OW"], meta["M"], meta["Cout"]
    return out[:M, :Cout].reshape(N, OH, OW, Cout)


# --------------------------------------------------------------------------
# Parameters & forward
# --------------------------------------------------------------------------
def init_encoder_params(key, in_channels, out_channels):
    """Deterministic synthetic parameters with the same shapes as the PyTorch module."""
    channel_list = [in_channels, 64, 128, 256, out_channels]
    params = []
    for in_c, out_c in zip(channel_list[:-1], channel_list[1:]):
        key, kw, kb, kg, kbe = jax.random.split(key, 5)
        fan_in = in_c * KSIZE * KSIZE
        s = 1.0 / np.sqrt(fan_in)
        w = jax.random.uniform(kw, (out_c, in_c, KSIZE, KSIZE),
                               jnp.float32, -s, s)
        b = jax.random.uniform(kb, (out_c,), jnp.float32, -s, s)
        gamma = 1.0 + 0.1 * jax.random.normal(kg, (out_c,), jnp.float32)
        beta = 0.1 * jax.random.normal(kbe, (out_c,), jnp.float32)
        params.append((w, b, gamma, beta))
    return params


@jax.jit
def encoder_cnn_forward(x_nchw, params):
    """Pallas implementation of EncoderCNN.forward.  x_nchw: [N, C, H, W]."""
    x = jnp.transpose(x_nchw, (0, 2, 3, 1)).astype(jnp.bfloat16)  # NCHW -> NHWC
    n_layers = len(params)
    for idx, (w, b, gamma, beta) in enumerate(params):
        y, stats, meta = _conv_layer(x, w, b)
        scale, shift = _scale_shift(stats, gamma, beta, meta)
        if idx + 1 < n_layers:
            # Fold BN+ReLU into the next layer's im2col glue (single XLA fusion)
            # -> removes a full HBM read+write of the activation per layer.
            x = _bn_relu_glue(y, scale, shift, meta)
        else:
            x = _bn_relu_pallas(y, scale, shift, meta)
    return jnp.transpose(x, (0, 3, 1, 2)).astype(jnp.float32)     # NHWC -> NCHW


def _reference_forward(x_nchw, params):
    """Pure-JAX (XLA) reference at matched precision: bf16 conv inputs, f32
    accumulation, batch statistics from the f32 pre-activation, pre-activation
    rounded to bf16 before the affine+ReLU (mirrors the kernel's bf16 y store)."""
    x = x_nchw.astype(jnp.float32)
    for (w, b, gamma, beta) in params:
        y = lax.conv_general_dilated(
            x.astype(jnp.bfloat16), w.astype(jnp.bfloat16),
            window_strides=(STRIDE, STRIDE),
            padding=((PAD, PAD), (PAD, PAD)),
            dimension_numbers=("NCHW", "OIHW", "NCHW"),
            preferred_element_type=jnp.float32)
        y = y + b[None, :, None, None]
        mean = jnp.mean(y, axis=(0, 2, 3), keepdims=True)
        var = jnp.mean((y - mean) ** 2, axis=(0, 2, 3), keepdims=True)
        scale = gamma[None, :, None, None] * lax.rsqrt(var + BN_EPS)
        shift = beta[None, :, None, None] - mean * scale
        yq = y.astype(jnp.bfloat16).astype(jnp.float32)
        x = jnp.maximum(yq * scale + shift, 0.0)
    return x


if __name__ == "__main__":
    in_channels, out_channels = 4, 8
    N, H, W = 2, 16, 16   # 4 stride-2 layers -> final spatial = H/16 = 1

    key = jax.random.PRNGKey(0)
    key, kx = jax.random.split(key)
    x = jax.random.normal(kx, (N, in_channels, H, W), jnp.float32)

    params = init_encoder_params(key, in_channels, out_channels)

    out = jax.block_until_ready(encoder_cnn_forward(x, params))
    assert out.shape == (N, out_channels, H // 16, W // 16), out.shape

    ref = jax.block_until_ready(_reference_forward(x, params))
    np.testing.assert_allclose(np.asarray(out), np.asarray(ref),
                               rtol=2e-2, atol=2e-2)

    print("KERNEL_OK")
</pallas_src>

<mosaic_0001>
module attributes {stable_mosaic.version = 11 : i64} {
  func.func @_conv_stats_kernel(%arg0: i32, %arg1: memref<128x128xbf16, #tpu.memory_space<vmem>>, %arg2: memref<128x128xbf16, #tpu.memory_space<vmem>>, %arg3: memref<1x128xf32, #tpu.memory_space<vmem>>, %arg4: memref<128x128xbf16, #tpu.memory_space<vmem>>, %arg5: memref<1x2x128xf32, #tpu.memory_space<vmem>>) attributes {dimension_semantics = [#tpu.dimension_semantics<parallel>], iteration_bounds = array<i64: 1>, scalar_prefetch = 0 : i64, scratch_operands = 0 : i64, tpu.core_type = #tpu.core_type<tc>, window_params = [{transform_indices = @transform_0, window_bounds = array<i64: 128, 128>}, {pipeline_mode = #tpu.pipeline_mode<synchronous>, transform_indices = @transform_1, window_bounds = array<i64: 128, 128>}, {pipeline_mode = #tpu.pipeline_mode<synchronous>, transform_indices = @transform_2, window_bounds = array<i64: 1, 128>}, {transform_indices = @transform_3, window_bounds = array<i64: 128, 128>}, {transform_indices = @transform_4, window_bounds = array<i64: 1, 2, 128>}]} {
    %c0 = arith.constant 0 : index
    %c0_0 = arith.constant 0 : index
    %0 = vector.load %arg1[%c0, %c0_0] : memref<128x128xbf16, #tpu.memory_space<vmem>>, vector<128x128xbf16>
    %c0_1 = arith.constant 0 : index
    %c0_2 = arith.constant 0 : index
    %1 = vector.load %arg2[%c0_1, %c0_2] : memref<128x128xbf16, #tpu.memory_space<vmem>>, vector<128x128xbf16>
    %cst = arith.constant dense<0.000000e+00> : vector<128x128xf32>
    %2 = tpu.matmul %0, %1, %cst {dimension_numbers = #tpu.dot_dimension_numbers<[1], [0], [0], [1], [0, 0, 1, 1], [], []>} : vector<128x128xbf16>, vector<128x128xbf16>, vector<128x128xf32> -> vector<128x128xf32>
    %c0_3 = arith.constant 0 : index
    %c0_4 = arith.constant 0 : index
    %3 = vector.load %arg3[%c0_3, %c0_4] : memref<1x128xf32, #tpu.memory_space<vmem>>, vector<1x128xf32>
    %4 = vector.broadcast %3 : vector<1x128xf32> to vector<128x128xf32>
    %5 = arith.addf %2, %4 : vector<128x128xf32>
    %6 = arith.truncf %5 : vector<128x128xf32> to vector<128x128xbf16>
    %c0_5 = arith.constant 0 : index
    %c0_6 = arith.constant 0 : index
    %7 = vector.load %arg4[%c0_5, %c0_6] : memref<128x128xbf16, #tpu.memory_space<vmem>>, vector<128x128xbf16>
    tpu.vector_store %arg4[%c0_5, %c0_6], %6 {strides = array<i32>} : memref<128x128xbf16, #tpu.memory_space<vmem>>, vector<128x128xbf16>,
    %c128_i32 = arith.constant 128 : i32
    %8 = arith.muli %arg0, %c128_i32 : i32
    %9 = tpu.iota {dimensions = array<i32: 0>} : vector<128x128xi32>
    %10 = vector.broadcast %8 : i32 to vector<128x128xi32>
    %11 = arith.addi %10, %9 : vector<128x128xi32>
    %c128_i32_7 = arith.constant 128 : i32
    %12 = vector.broadcast %c128_i32_7 : i32 to vector<128x128xi32>
    %13 = arith.cmpi slt, %11, %12 : vector<128x128xi32>
    %cst_8 = arith.constant 0.000000e+00 : f32
    %14 = vector.broadcast %cst_8 : f32 to vector<128x128xf32>
    %15 = arith.select %13, %5, %14 : vector<128x128xi1>, vector<128x128xf32>
    %cst_9 = arith.constant dense<0.000000e+00> : vector<128xf32>
    %16 = vector.multi_reduction <add>, %15, %cst_9 [0] : vector<128x128xf32> to vector<128xf32>
    %17 = vector.shape_cast %16 : vector<128xf32> to vector<1x128xf32>
    %c0_10 = arith.constant 0 : index
    %c0_11 = arith.constant 0 : index
    %c0_12 = arith.constant 0 : index
    %18 = vector.load %arg5[%c0_10, %c0_11, %c0_12] : memref<1x2x128xf32, #tpu.memory_space<vmem>>, vector<1x1x128xf32>
    %19 = vector.shape_cast %18 : vector<1x1x128xf32> to vector<1x128xf32>
    %20 = vector.shape_cast %17 : vector<1x128xf32> to vector<1x1x128xf32>
    tpu.vector_store %arg5[%c0_10, %c0_11, %c0_12], %20 {strides = array<i32>} : memref<1x2x128xf32, #tpu.memory_space<vmem>>, vector<1x1x128xf32>,
    %21 = arith.mulf %15, %5 : vector<128x128xf32>
    %cst_13 = arith.constant dense<0.000000e+00> : vector<128xf32>
    %22 = vector.multi_reduction <add>, %21, %cst_13 [0] : vector<128x128xf32> to vector<128xf32>
    %23 = vector.shape_cast %22 : vector<128xf32> to vector<1x128xf32>
    %c0_14 = arith.constant 0 : index
    %c1 = arith.constant 1 : index
    %c0_15 = arith.constant 0 : index
    %24 = vector.load %arg5[%c0_14, %c1, %c0_15] : memref<1x2x128xf32, #tpu.memory_space<vmem>>, vector<1x1x128xf32>
    %25 = vector.shape_cast %24 : vector<1x1x128xf32> to vector<1x128xf32>
    %26 = vector.shape_cast %23 : vector<1x128xf32> to vector<1x1x128xf32>
    tpu.vector_store %arg5[%c0_14, %c1, %c0_15], %26 {strides = array<i32>} : memref<1x2x128xf32, #tpu.memory_space<vmem>>, vector<1x1x128xf32>,
    return
  }
  func.func @transform_0(%arg0: i32) -> (i32, i32) {
    %c0_i32 = arith.constant 0 : i32
    %c0_i32_0 = arith.constant 0 : i32
    return %arg0, %c0_i32 : i32, i32
  }
  func.func @transform_1(%arg0: i32) -> (i32, i32) {
    %c0_i32 = arith.constant 0 : i32
    %c0_i32_0 = arith.constant 0 : i32
    %c0_i32_1 = arith.constant 0 : i32
    return %c0_i32, %c0_i32_0 : i32, i32
  }
  func.func @transform_2(%arg0: i32) -> (i32, i32) {
    %c0_i32 = arith.constant 0 : i32
    %c0_i32_0 = arith.constant 0 : i32
    %c0_i32_1 = arith.constant 0 : i32
    return %c0_i32, %c0_i32_0 : i32, i32
  }
  func.func @transform_3(%arg0: i32) -> (i32, i32) {
    %c0_i32 = arith.constant 0 : i32
    %c0_i32_0 = arith.constant 0 : i32
    return %arg0, %c0_i32 : i32, i32
  }
  func.func @transform_4(%arg0: i32) -> (i32, i32, i32) {
    %c0_i32 = arith.constant 0 : i32
    %c0_i32_0 = arith.constant 0 : i32
    %c0_i32_1 = arith.constant 0 : i32
    return %arg0, %c0_i32, %c0_i32_0 : i32, i32, i32
  }
}

module attributes {stable_mosaic.version = 11 : i64} {
  func.func @_conv_stats_kernel(%arg0: i32, %arg1: memref<32x1664xbf16, #tpu.memory_space<vmem>>, %arg2: memref<1664x128xbf16, #tpu.memory_space<vmem>>, %arg3: memref<1x128xf32, #tpu.memory_space<vmem>>, %arg4: memref<32x128xbf16, #tpu.memory_space<vmem>>, %arg5: memref<1x2x128xf32, #tpu.memory_space<vmem>>) attributes {dimension_semantics = [#tpu.dimension_semantics<parallel>], iteration_bounds = array<i64: 1>, scalar_prefetch = 0 : i64, scratch_operands = 0 : i64, tpu.core_type = #tpu.core_type<tc>, window_params = [{transform_indices = @transform_0, window_bounds = array<i64: 32, 1664>}, {pipeline_mode = #tpu.pipeline_mode<synchronous>, transform_indices = @transform_1, window_bounds = array<i64: 1664, 128>}, {pipeline_mode = #tpu.pipeline_mode<synchronous>, transform_indices = @transform_2, window_bounds = array<i64: 1, 128>}, {transform_indices = @transform_3, window_bounds = array<i64: 32, 128>}, {transform_indices = @transform_4, window_bounds = array<i64: 1, 2, 128>}]} {
    %c0 = arith.constant 0 : index
    %c0_0 = arith.constant 0 : index
    %0 = vector.load %arg1[%c0, %c0_0] : memref<32x1664xbf16, #tpu.memory_space<vmem>>, vector<32x1664xbf16>
    %c0_1 = arith.constant 0 : index
    %c0_2 = arith.constant 0 : index
    %1 = vector.load %arg2[%c0_1, %c0_2] : memref<1664x128xbf16, #tpu.memory_space<vmem>>, vector<1664x128xbf16>
    %cst = arith.constant dense<0.000000e+00> : vector<32x128xf32>
    %2 = tpu.matmul %0, %1, %cst {dimension_numbers = #tpu.dot_dimension_numbers<[1], [0], [0], [1], [0, 0, 1, 1], [], []>} : vector<32x1664xbf16>, vector<1664x128xbf16>, vector<32x128xf32> -> vector<32x128xf32>
    %c0_3 = arith.constant 0 : index
    %c0_4 = arith.constant 0 : index
    %3 = vector.load %arg3[%c0_3, %c0_4] : memref<1x128xf32, #tpu.memory_space<vmem>>, vector<1x128xf32>
    %4 = vector.broadcast %3 : vector<1x128xf32> to vector<32x128xf32>
    %5 = arith.addf %2, %4 : vector<32x128xf32>
    %6 = arith.truncf %5 : vector<32x128xf32> to vector<32x128xbf16>
    %c0_5 = arith.constant 0 : index
    %c0_6 = arith.constant 0 : index
    %7 = vector.load %arg4[%c0_5, %c0_6] : memref<32x128xbf16, #tpu.memory_space<vmem>>, vector<32x128xbf16>
    tpu.vector_store %arg4[%c0_5, %c0_6], %6 {strides = array<i32>} : memref<32x128xbf16, #tpu.memory_space<vmem>>, vector<32x128xbf16>,
    %c32_i32 = arith.constant 32 : i32
    %8 = arith.muli %arg0, %c32_i32 : i32
    %9 = tpu.iota {dimensions = array<i32: 0>} : vector<32x128xi32>
    %10 = vector.broadcast %8 : i32 to vector<32x128xi32>
    %11 = arith.addi %10, %9 : vector<32x128xi32>
    %c32_i32_7 = arith.constant 32 : i32
    %12 = vector.broadcast %c32_i32_7 : i32 to vector<32x128xi32>
    %13 = arith.cmpi slt, %11, %12 : vector<32x128xi32>
    %cst_8 = arith.constant 0.000000e+00 : f32
    %14 = vector.broadcast %cst_8 : f32 to vector<32x128xf32>
    %15 = arith.select %13, %5, %14 : vector<32x128xi1>, vector<32x128xf32>
    %cst_9 = arith.constant dense<0.000000e+00> : vector<128xf32>
    %16 = vector.multi_reduction <add>, %15, %cst_9 [0] : vector<32x128xf32> to vector<128xf32>
    %17 = vector.shape_cast %16 : vector<128xf32> to vector<1x128xf32>
    %c0_10 = arith.constant 0 : index
    %c0_11 = arith.constant 0 : index
    %c0_12 = arith.constant 0 : index
    %18 = vector.load %arg5[%c0_10, %c0_11, %c0_12] : memref<1x2x128xf32, #tpu.memory_space<vmem>>, vector<1x1x128xf32>
    %19 = vector.shape_cast %18 : vector<1x1x128xf32> to vector<1x128xf32>
    %20 = vector.shape_cast %17 : vector<1x128xf32> to vector<1x1x128xf32>
    tpu.vector_store %arg5[%c0_10, %c0_11, %c0_12], %20 {strides = array<i32>} : memref<1x2x128xf32, #tpu.memory_space<vmem>>, vector<1x1x128xf32>,
    %21 = arith.mulf %15, %5 : vector<32x128xf32>
    %cst_13 = arith.constant dense<0.000000e+00> : vector<128xf32>
    %22 = vector.multi_reduction <add>, %21, %cst_13 [0] : vector<32x128xf32> to vector<128xf32>
    %23 = vector.shape_cast %22 : vector<128xf32> to vector<1x128xf32>
    %c0_14 = arith.constant 0 : index
    %c1 = arith.constant 1 : index
    %c0_15 = arith.constant 0 : index
    %24 = vector.load %arg5[%c0_14, %c1, %c0_15] : memref<1x2x128xf32, #tpu.memory_space<vmem>>, vector<1x1x128xf32>
    %25 = vector.shape_cast %24 : vector<1x1x128xf32> to vector<1x128xf32>
    %26 = vector.shape_cast %23 : vector<1x128xf32> to vector<1x1x128xf32>
    tpu.vector_store %arg5[%c0_14, %c1, %c0_15], %26 {strides = array<i32>} : memref<1x2x128xf32, #tpu.memory_space<vmem>>, vector<1x1x128xf32>,
    return
  }
  func.func @transform_0(%arg0: i32) -> (i32, i32) {
    %c0_i32 = arith.constant 0 : i32
    %c0_i32_0 = arith.constant 0 : i32
    return %arg0, %c0_i32 : i32, i32
  }
  func.func @transform_1(%arg0: i32) -> (i32, i32) {
    %c0_i32 = arith.constant 0 : i32
    %c0_i32_0 = arith.constant 0 : i32
    %c0_i32_1 = arith.constant 0 : i32
    return %c0_i32, %c0_i32_0 : i32, i32
  }
  func.func @transform_2(%arg0: i32) -> (i32, i32) {
    %c0_i32 = arith.constant 0 : i32
    %c0_i32_0 = arith.constant 0 : i32
    %c0_i32_1 = arith.constant 0 : i32
    return %c0_i32, %c0_i32_0 : i32, i32
  }
  func.func @transform_3(%arg0: i32) -> (i32, i32) {
    %c0_i32 = arith.constant 0 : i32
    %c0_i32_0 = arith.constant 0 : i32
    return %arg0, %c0_i32 : i32, i32
  }
  func.func @transform_4(%arg0: i32) -> (i32, i32, i32) {
    %c0_i32 = arith.constant 0 : i32
    %c0_i32_0 = arith.constant 0 : i32
    %c0_i32_1 = arith.constant 0 : i32
    return %arg0, %c0_i32, %c0_i32_0 : i32, i32, i32
  }
}

module attributes {stable_mosaic.version = 11 : i64} {
  func.func @_conv_stats_kernel(%arg0: i32, %arg1: memref<8x3200xbf16, #tpu.memory_space<vmem>>, %arg2: memref<3200x256xbf16, #tpu.memory_space<vmem>>, %arg3: memref<1x256xf32, #tpu.memory_space<vmem>>, %arg4: memref<8x256xbf16, #tpu.memory_space<vmem>>, %arg5: memref<1x2x256xf32, #tpu.memory_space<vmem>>) attributes {dimension_semantics = [#tpu.dimension_semantics<parallel>], iteration_bounds = array<i64: 1>, scalar_prefetch = 0 : i64, scratch_operands = 0 : i64, tpu.core_type = #tpu.core_type<tc>, window_params = [{transform_indices = @transform_0, window_bounds = array<i64: 8, 3200>}, {pipeline_mode = #tpu.pipeline_mode<synchronous>, transform_indices = @transform_1, window_bounds = array<i64: 3200, 256>}, {pipeline_mode = #tpu.pipeline_mode<synchronous>, transform_indices = @transform_2, window_bounds = array<i64: 1, 256>}, {transform_indices = @transform_3, window_bounds = array<i64: 8, 256>}, {transform_indices = @transform_4, window_bounds = array<i64: 1, 2, 256>}]} {
    %c0 = arith.constant 0 : index
    %c0_0 = arith.constant 0 : index
    %0 = vector.load %arg1[%c0, %c0_0] : memref<8x3200xbf16, #tpu.memory_space<vmem>>, vector<8x3200xbf16>
    %c0_1 = arith.constant 0 : index
    %c0_2 = arith.constant 0 : index
    %1 = vector.load %arg2[%c0_1, %c0_2] : memref<3200x256xbf16, #tpu.memory_space<vmem>>, vector<3200x256xbf16>
    %cst = arith.constant dense<0.000000e+00> : vector<8x256xf32>
    %2 = tpu.matmul %0, %1, %cst {dimension_numbers = #tpu.dot_dimension_numbers<[1], [0], [0], [1], [0, 0, 1, 1], [], []>} : vector<8x3200xbf16>, vector<3200x256xbf16>, vector<8x256xf32> -> vector<8x256xf32>
    %c0_3 = arith.constant 0 : index
    %c0_4 = arith.constant 0 : index
    %3 = vector.load %arg3[%c0_3, %c0_4] : memref<1x256xf32, #tpu.memory_space<vmem>>, vector<1x256xf32>
    %4 = vector.broadcast %3 : vector<1x256xf32> to vector<8x256xf32>
    %5 = arith.addf %2, %4 : vector<8x256xf32>
    %6 = arith.truncf %5 : vector<8x256xf32> to vector<8x256xbf16>
    %c0_5 = arith.constant 0 : index
    %c0_6 = arith.constant 0 : index
    %7 = vector.load %arg4[%c0_5, %c0_6] : memref<8x256xbf16, #tpu.memory_space<vmem>>, vector<8x256xbf16>
    tpu.vector_store %arg4[%c0_5, %c0_6], %6 {strides = array<i32>} : memref<8x256xbf16, #tpu.memory_space<vmem>>, vector<8x256xbf16>,
    %c8_i32 = arith.constant 8 : i32
    %8 = arith.muli %arg0, %c8_i32 : i32
    %9 = tpu.iota {dimensions = array<i32: 0>} : vector<8x256xi32>
    %10 = vector.broadcast %8 : i32 to vector<8x256xi32>
    %11 = arith.addi %10, %9 : vector<8x256xi32>
    %c8_i32_7 = arith.constant 8 : i32
    %12 = vector.broadcast %c8_i32_7 : i32 to vector<8x256xi32>
    %13 = arith.cmpi slt, %11, %12 : vector<8x256xi32>
    %cst_8 = arith.constant 0.000000e+00 : f32
    %14 = vector.broadcast %cst_8 : f32 to vector<8x256xf32>
    %15 = arith.select %13, %5, %14 : vector<8x256xi1>, vector<8x256xf32>
    %cst_9 = arith.constant dense<0.000000e+00> : vector<256xf32>
    %16 = vector.multi_reduction <add>, %15, %cst_9 [0] : vector<8x256xf32> to vector<256xf32>
    %17 = vector.shape_cast %16 : vector<256xf32> to vector<1x256xf32>
    %c0_10 = arith.constant 0 : index
    %c0_11 = arith.constant 0 : index
    %c0_12 = arith.constant 0 : index
    %18 = vector.load %arg5[%c0_10, %c0_11, %c0_12] : memref<1x2x256xf32, #tpu.memory_space<vmem>>, vector<1x1x256xf32>
    %19 = vector.shape_cast %18 : vector<1x1x256xf32> to vector<1x256xf32>
    %20 = vector.shape_cast %17 : vector<1x256xf32> to vector<1x1x256xf32>
    tpu.vector_store %arg5[%c0_10, %c0_11, %c0_12], %20 {strides = array<i32>} : memref<1x2x256xf32, #tpu.memory_space<vmem>>, vector<1x1x256xf32>,
    %21 = arith.mulf %15, %5 : vector<8x256xf32>
    %cst_13 = arith.constant dense<0.000000e+00> : vector<256xf32>
    %22 = vector.multi_reduction <add>, %21, %cst_13 [0] : vector<8x256xf32> to vector<256xf32>
    %23 = vector.shape_cast %22 : vector<256xf32> to vector<1x256xf32>
    %c0_14 = arith.constant 0 : index
    %c1 = arith.constant 1 : index
    %c0_15 = arith.constant 0 : index
    %24 = vector.load %arg5[%c0_14, %c1, %c0_15] : memref<1x2x256xf32, #tpu.memory_space<vmem>>, vector<1x1x256xf32>
    %25 = vector.shape_cast %24 : vector<1x1x256xf32> to vector<1x256xf32>
    %26 = vector.shape_cast %23 : vector<1x256xf32> to vector<1x1x256xf32>
    tpu.vector_store %arg5[%c0_14, %c1, %c0_15], %26 {strides = array<i32>} : memref<1x2x256xf32, #tpu.memory_space<vmem>>, vector<1x1x256xf32>,
    return
  }
  func.func @transform_0(%arg0: i32) -> (i32, i32) {
    %c0_i32 = arith.constant 0 : i32
    %c0_i32_0 = arith.constant 0 : i32
    return %arg0, %c0_i32 : i32, i32
  }
  func.func @transform_1(%arg0: i32) -> (i32, i32) {
    %c0_i32 = arith.constant 0 : i32
    %c0_i32_0 = arith.constant 0 : i32
    %c0_i32_1 = arith.constant 0 : i32
    return %c0_i32, %c0_i32_0 : i32, i32
  }
  func.func @transform_2(%arg0: i32) -> (i32, i32) {
    %c0_i32 = arith.constant 0 : i32
    %c0_i32_0 = arith.constant 0 : i32
    %c0_i32_1 = arith.constant 0 : i32
    return %c0_i32, %c0_i32_0 : i32, i32
  }
  func.func @transform_3(%arg0: i32) -> (i32, i32) {
    %c0_i32 = arith.constant 0 : i32
    %c0_i32_0 = arith.constant 0 : i32
    return %arg0, %c0_i32 : i32, i32
  }
  func.func @transform_4(%arg0: i32) -> (i32, i32, i32) {
    %c0_i32 = arith.constant 0 : i32
    %c0_i32_0 = arith.constant 0 : i32
    %c0_i32_1 = arith.constant 0 : i32
    return %arg0, %c0_i32, %c0_i32_0 : i32, i32, i32
  }
}

module attributes {stable_mosaic.version = 11 : i64} {
  func.func @_conv_stats_kernel(%arg0: i32, %arg1: memref<8x6400xbf16, #tpu.memory_space<vmem>>, %arg2: memref<6400x128xbf16, #tpu.memory_space<vmem>>, %arg3: memref<1x128xf32, #tpu.memory_space<vmem>>, %arg4: memref<8x128xbf16, #tpu.memory_space<vmem>>, %arg5: memref<1x2x128xf32, #tpu.memory_space<vmem>>) attributes {dimension_semantics = [#tpu.dimension_semantics<parallel>], iteration_bounds = array<i64: 1>, scalar_prefetch = 0 : i64, scratch_operands = 0 : i64, tpu.core_type = #tpu.core_type<tc>, window_params = [{transform_indices = @transform_0, window_bounds = array<i64: 8, 6400>}, {pipeline_mode = #tpu.pipeline_mode<synchronous>, transform_indices = @transform_1, window_bounds = array<i64: 6400, 128>}, {pipeline_mode = #tpu.pipeline_mode<synchronous>, transform_indices = @transform_2, window_bounds = array<i64: 1, 128>}, {transform_indices = @transform_3, window_bounds = array<i64: 8, 128>}, {transform_indices = @transform_4, window_bounds = array<i64: 1, 2, 128>}]} {
    %c0 = arith.constant 0 : index
    %c0_0 = arith.constant 0 : index
    %0 = vector.load %arg1[%c0, %c0_0] : memref<8x6400xbf16, #tpu.memory_space<vmem>>, vector<8x6400xbf16>
    %c0_1 = arith.constant 0 : index
    %c0_2 = arith.constant 0 : index
    %1 = vector.load %arg2[%c0_1, %c0_2] : memref<6400x128xbf16, #tpu.memory_space<vmem>>, vector<6400x128xbf16>
    %cst = arith.constant dense<0.000000e+00> : vector<8x128xf32>
    %2 = tpu.matmul %0, %1, %cst {dimension_numbers = #tpu.dot_dimension_numbers<[1], [0], [0], [1], [0, 0, 1, 1], [], []>} : vector<8x6400xbf16>, vector<6400x128xbf16>, vector<8x128xf32> -> vector<8x128xf32>
    %c0_3 = arith.constant 0 : index
    %c0_4 = arith.constant 0 : index
    %3 = vector.load %arg3[%c0_3, %c0_4] : memref<1x128xf32, #tpu.memory_space<vmem>>, vector<1x128xf32>
    %4 = vector.broadcast %3 : vector<1x128xf32> to vector<8x128xf32>
    %5 = arith.addf %2, %4 : vector<8x128xf32>
    %6 = arith.truncf %5 : vector<8x128xf32> to vector<8x128xbf16>
    %c0_5 = arith.constant 0 : index
    %c0_6 = arith.constant 0 : index
    %7 = vector.load %arg4[%c0_5, %c0_6] : memref<8x128xbf16, #tpu.memory_space<vmem>>, vector<8x128xbf16>
    tpu.vector_store %arg4[%c0_5, %c0_6], %6 {strides = array<i32>} : memref<8x128xbf16, #tpu.memory_space<vmem>>, vector<8x128xbf16>,
    %c8_i32 = arith.constant 8 : i32
    %8 = arith.muli %arg0, %c8_i32 : i32
    %9 = tpu.iota {dimensions = array<i32: 0>} : vector<8x128xi32>
    %10 = vector.broadcast %8 : i32 to vector<8x128xi32>
    %11 = arith.addi %10, %9 : vector<8x128xi32>
    %c2_i32 = arith.constant 2 : i32
    %12 = vector.broadcast %c2_i32 : i32 to vector<8x128xi32>
    %13 = arith.cmpi slt, %11, %12 : vector<8x128xi32>
    %cst_7 = arith.constant 0.000000e+00 : f32
    %14 = vector.broadcast %cst_7 : f32 to vector<8x128xf32>
    %15 = arith.select %13, %5, %14 : vector<8x128xi1>, vector<8x128xf32>
    %cst_8 = arith.constant dense<0.000000e+00> : vector<128xf32>
    %16 = vector.multi_reduction <add>, %15, %cst_8 [0] : vector<8x128xf32> to vector<128xf32>
    %17 = vector.shape_cast %16 : vector<128xf32> to vector<1x128xf32>
    %c0_9 = arith.constant 0 : index
    %c0_10 = arith.constant 0 : index
    %c0_11 = arith.constant 0 : index
    %18 = vector.load %arg5[%c0_9, %c0_10, %c0_11] : memref<1x2x128xf32, #tpu.memory_space<vmem>>, vector<1x1x128xf32>
    %19 = vector.shape_cast %18 : vector<1x1x128xf32> to vector<1x128xf32>
    %20 = vector.shape_cast %17 : vector<1x128xf32> to vector<1x1x128xf32>
    tpu.vector_store %arg5[%c0_9, %c0_10, %c0_11], %20 {strides = array<i32>} : memref<1x2x128xf32, #tpu.memory_space<vmem>>, vector<1x1x128xf32>,
    %21 = arith.mulf %15, %5 : vector<8x128xf32>
    %cst_12 = arith.constant dense<0.000000e+00> : vector<128xf32>
    %22 = vector.multi_reduction <add>, %21, %cst_12 [0] : vector<8x128xf32> to vector<128xf32>
    %23 = vector.shape_cast %22 : vector<128xf32> to vector<1x128xf32>
    %c0_13 = arith.constant 0 : index
    %c1 = arith.constant 1 : index
    %c0_14 = arith.constant 0 : index
    %24 = vector.load %arg5[%c0_13, %c1, %c0_14] : memref<1x2x128xf32, #tpu.memory_space<vmem>>, vector<1x1x128xf32>
    %25 = vector.shape_cast %24 : vector<1x1x128xf32> to vector<1x128xf32>
    %26 = vector.shape_cast %23 : vector<1x128xf32> to vector<1x1x128xf32>
    tpu.vector_store %arg5[%c0_13, %c1, %c0_14], %26 {strides = array<i32>} : memref<1x2x128xf32, #tpu.memory_space<vmem>>, vector<1x1x128xf32>,
    return
  }
  func.func @transform_0(%arg0: i32) -> (i32, i32) {
    %c0_i32 = arith.constant 0 : i32
    %c0_i32_0 = arith.constant 0 : i32
    return %arg0, %c0_i32 : i32, i32
  }
  func.func @transform_1(%arg0: i32) -> (i32, i32) {
    %c0_i32 = arith.constant 0 : i32
    %c0_i32_0 = arith.constant 0 : i32
    %c0_i32_1 = arith.constant 0 : i32
    return %c0_i32, %c0_i32_0 : i32, i32
  }
  func.func @transform_2(%arg0: i32) -> (i32, i32) {
    %c0_i32 = arith.constant 0 : i32
    %c0_i32_0 = arith.constant 0 : i32
    %c0_i32_1 = arith.constant 0 : i32
    return %c0_i32, %c0_i32_0 : i32, i32
  }
  func.func @transform_3(%arg0: i32) -> (i32, i32) {
    %c0_i32 = arith.constant 0 : i32
    %c0_i32_0 = arith.constant 0 : i32
    return %arg0, %c0_i32 : i32, i32
  }
  func.func @transform_4(%arg0: i32) -> (i32, i32, i32) {
    %c0_i32 = arith.constant 0 : i32
    %c0_i32_0 = arith.constant 0 : i32
    %c0_i32_1 = arith.constant 0 : i32
    return %arg0, %c0_i32, %c0_i32_0 : i32, i32, i32
  }
}

module attributes {stable_mosaic.version = 11 : i64} {
  func.func @_bn_relu_kernel(%arg0: i32, %arg1: memref<8x128xbf16, #tpu.memory_space<vmem>>, %arg2: memref<1x128xf32, #tpu.memory_space<vmem>>, %arg3: memref<1x128xf32, #tpu.memory_space<vmem>>, %arg4: memref<8x128xf32, #tpu.memory_space<vmem>>) attributes {dimension_semantics = [#tpu.dimension_semantics<parallel>], iteration_bounds = array<i64: 1>, scalar_prefetch = 0 : i64, scratch_operands = 0 : i64, tpu.core_type = #tpu.core_type<tc>, window_params = [{transform_indices = @transform_0, window_bounds = array<i64: 8, 128>}, {pipeline_mode = #tpu.pipeline_mode<synchronous>, transform_indices = @transform_1, window_bounds = array<i64: 1, 128>}, {pipeline_mode = #tpu.pipeline_mode<synchronous>, transform_indices = @transform_2, window_bounds = array<i64: 1, 128>}, {transform_indices = @transform_3, window_bounds = array<i64: 8, 128>}]} {
    %c0 = arith.constant 0 : index
    %c0_0 = arith.constant 0 : index
    %0 = vector.load %arg1[%c0, %c0_0] : memref<8x128xbf16, #tpu.memory_space<vmem>>, vector<8x128xbf16>
    %1 = arith.extf %0 : vector<8x128xbf16> to vector<8x128xf32>
    %c0_1 = arith.constant 0 : index
    %c0_2 = arith.constant 0 : index
    %2 = vector.load %arg2[%c0_1, %c0_2] : memref<1x128xf32, #tpu.memory_space<vmem>>, vector<1x128xf32>
    %3 = vector.broadcast %2 : vector<1x128xf32> to vector<8x128xf32>
    %4 = arith.mulf %1, %3 : vector<8x128xf32>
    %c0_3 = arith.constant 0 : index
    %c0_4 = arith.constant 0 : index
    %5 = vector.load %arg3[%c0_3, %c0_4] : memref<1x128xf32, #tpu.memory_space<vmem>>, vector<1x128xf32>
    %6 = vector.broadcast %5 : vector<1x128xf32> to vector<8x128xf32>
    %7 = arith.addf %4, %6 : vector<8x128xf32>
    %cst = arith.constant 0.000000e+00 : f32
    %8 = vector.broadcast %cst : f32 to vector<8x128xf32>
    %9 = arith.maximumf %7, %8 : vector<8x128xf32>
    %c0_5 = arith.constant 0 : index
    %c0_6 = arith.constant 0 : index
    %10 = vector.load %arg4[%c0_5, %c0_6] : memref<8x128xf32, #tpu.memory_space<vmem>>, vector<8x128xf32>
    tpu.vector_store %arg4[%c0_5, %c0_6], %9 {strides = array<i32>} : memref<8x128xf32, #tpu.memory_space<vmem>>, vector<8x128xf32>,
    return
  }
  func.func @transform_0(%arg0: i32) -> (i32, i32) {
    %c0_i32 = arith.constant 0 : i32
    %c0_i32_0 = arith.constant 0 : i32
    return %arg0, %c0_i32 : i32, i32
  }
  func.func @transform_1(%arg0: i32) -> (i32, i32) {
    %c0_i32 = arith.constant 0 : i32
    %c0_i32_0 = arith.constant 0 : i32
    %c0_i32_1 = arith.constant 0 : i32
    return %c0_i32, %c0_i32_0 : i32, i32
  }
  func.func @transform_2(%arg0: i32) -> (i32, i32) {
    %c0_i32 = arith.constant 0 : i32
    %c0_i32_0 = arith.constant 0 : i32
    %c0_i32_1 = arith.constant 0 : i32
    return %c0_i32, %c0_i32_0 : i32, i32
  }
  func.func @transform_3(%arg0: i32) -> (i32, i32) {
    %c0_i32 = arith.constant 0 : i32
    %c0_i32_0 = arith.constant 0 : i32
    return %arg0, %c0_i32 : i32, i32
  }
}

</mosaic_0001>

<bundles_post_ra>
// kernel: encoder_cnn_forward.5
= control target key start
LH: loop header
LB: loop body
LE: loop exit
PB: predicated region body
PF: predicated region fallthrough
CT: control target
= control target key end

     0   :  { %s634_s1 = inlined_call_operand.vmem [shape: bf16[128,128], index: 1, kind: input, shape index: {}]   ;;  %s635_s2 = inlined_call_operand.vmem [shape: f32[1,128], index: 2, kind: input, shape index: {}]   ;;  %s636_s0 = inlined_call_operand.vmem [shape: bf16[128,128], index: 0, kind: input, shape index: {}]   ;;  %s637_s3 = inlined_call_operand.vmem [shape: bf16[128,128], index: 3, kind: output, shape index: {0}]   ;;  %s638_s4 = inlined_call_operand.vmem [shape: f32[1,2,128], index: 4, kind: output, shape index: {1}]  }
   0x1   :  { %v443_v0 = vld [vmem:[%s634_s1 + $0x38] sm:$0xff]  ;;  %v442_v1 = vld [vmem:[%s634_s1 + $0x30] sm:$0xff]  ;;  %v441_v2 = vld [vmem:[%s634_s1 + $0x28] sm:$0xff] }
   0x2   :  { %148 = vmatpush.bf16.msra.mxu0 %v443_v0  ;;  %491 = vmatpush.bf16.msra.mxu1 %v443_v0  ;;  %v440_v3 = vld [vmem:[%s634_s1 + $0x20] sm:$0xff]  ;;  %v439_v4 = vld [vmem:[%s634_s1 + $0x18] sm:$0xff]  ;;  %v438_v5 = vld [vmem:[%s634_s1 + $0x10] sm:$0xff] }
   0x3   :  { %492 = vmatpush.bf16.msra.mxu2 %v443_v0  ;;  %493 = vmatpush.bf16.msra.mxu3 %v443_v0  ;;  %v437_v6 = vld [vmem:[%s634_s1 + $0x8] sm:$0xff]  ;;  %v436_v7 = vld [vmem:[%s634_s1] sm:$0xff]  ;;  %v430_v9 = vld [vmem:[%s636_s0 + $0x10] sm:$0xff] }
   0x4   :  { %v428_v8 = vld [vmem:[%s636_s0] sm:$0xff]  ;;  %v434_v11 = vld [vmem:[%s636_s0 + $0x30] sm:$0xff]  ;;  %v429_v12 = vld [vmem:[%s636_s0 + $0x8] sm:$0xff] }
   0x5   :  { %v432_v10 = vld [vmem:[%s636_s0 + $0x20] sm:$0xff]  ;;  %v431_v13 = vld [vmem:[%s636_s0 + $0x18] sm:$0xff]  ;;  %v433_v14 = vld [vmem:[%s636_s0 + $0x28] sm:$0xff] }
   0x6   :  { %149 = vmatpush.bf16.msra.mxu0 %v442_v1  ;;  %494 = vmatpush.bf16.msra.mxu1 %v442_v1  ;;  %v435_v15 = vld [vmem:[%s636_s0 + $0x38] sm:$0xff]  ;;  %v515_v18 = vld [vmem:[%s635_s2] ss:$0 sm:$0xff] }
   0x7   :  { %495 = vmatpush.bf16.msra.mxu2 %v442_v1  ;;  %496 = vmatpush.bf16.msra.mxu3 %v442_v1 }
   0xa   :  { %150 = vmatpush.bf16.msra.mxu0 %v441_v2  ;;  %497 = vmatpush.bf16.msra.mxu1 %v441_v2 }
   0xb   :  { %498 = vmatpush.bf16.msra.mxu2 %v441_v2  ;;  %499 = vmatpush.bf16.msra.mxu3 %v441_v2 }
   0xe   :  { %151 = vmatpush.bf16.msra.mxu0 %v440_v3  ;;  %500 = vmatpush.bf16.msra.mxu1 %v440_v3 }
   0xf   :  { %501 = vmatpush.bf16.msra.mxu2 %v440_v3  ;;  %502 = vmatpush.bf16.msra.mxu3 %v440_v3 }
  0x12   :  { %152 = vmatpush.bf16.msra.mxu0 %v439_v4  ;;  %503 = vmatpush.bf16.msra.mxu1 %v439_v4 }
  0x13   :  { %504 = vmatpush.bf16.msra.mxu2 %v439_v4  ;;  %505 = vmatpush.bf16.msra.mxu3 %v439_v4 }
  0x16   :  { %153 = vmatpush.bf16.msra.mxu0 %v438_v5  ;;  %506 = vmatpush.bf16.msra.mxu1 %v438_v5 }
  0x17   :  { %507 = vmatpush.bf16.msra.mxu2 %v438_v5  ;;  %508 = vmatpush.bf16.msra.mxu3 %v438_v5 }
  0x1a   :  { %154 = vmatpush.bf16.msra.mxu0 %v437_v6  ;;  %509 = vmatpush.bf16.msra.mxu1 %v437_v6 }
  0x1b   :  { %510 = vmatpush.bf16.msra.mxu2 %v437_v6  ;;  %511 = vmatpush.bf16.msra.mxu3 %v437_v6 }
  0x1e   :  { %155 = vmatpush.bf16.msra.mxu0 %v436_v7  ;;  %512 = vmatpush.bf16.msra.mxu1 %v436_v7 }
  0x1f   :  { %513 = vmatpush.bf16.msra.mxu2 %v436_v7  ;;  %514 = vmatpush.bf16.msra.mxu3 %v436_v7 }
  0x21   :  { %156 = vmatmul.bf16.vlgmr.msra.gmra.mxu0 %v428_v8  ;;  %166 = vmatmul.bf16.vlgmr.msra.gmra.mxu1 %v430_v9 }
  0x22   :  { %176 = vmatmul.bf16.vlgmr.msra.gmra.mxu2 %v432_v10  ;;  %186 = vmatmul.bf16.vlgmr.msra.gmra.mxu3 %v434_v11 }
  0x31   :  { %161 = vmatmul.bf16.gmra.mxu0 %v429_v12  ;;  %171 = vmatmul.bf16.gmra.mxu1 %v431_v13 }
  0x32   :  { %181 = vmatmul.bf16.gmra.mxu2 %v433_v14  ;;  %191 = vmatmul.bf16.gmra.mxu3 %v435_v15 }
  0x9e   :  { %v157_v16 = vpop.f32.mrf.mxu0  ;;  %v167_v17 = vpop.f32.mrf.mxu1 }
  0x9f   :  { %v168_v19 = vadd.f32 %v515_v18, %v167_v17  ;;  %v158_v24 = vadd.f32 %v515_v18, %v157_v16 }
  0xa1   :  { %v318_v41 = vmul.f32 %v158_v24, %v158_v24  ;;  %v322_v58 = vmul.f32 %v168_v19, %v168_v19 }
  0xa5   :  { %v177_v20 = vpop.f32.mrf.mxu2  ;;  %v187_v21 = vpop.f32.mrf.mxu3 }
  0xa6   :  { %v159_v22 = vpop.f32.mrf.mxu0  ;;  %v169_v23 = vpop.f32.mrf.mxu1  ;;  %v178_v29 = vadd.f32 %v515_v18, %v177_v20  ;;  %v598_v30 = vadd.f32 %v515_v18, %v187_v21 }
  0xa7   :  { %v160_v25 = vadd.f32 %v515_v18, %v159_v22  ;;  %v170_v26 = vadd.f32 %v515_v18, %v169_v23 }
  0xa8   :  { %v326_v14 = vmul.f32 %v178_v29, %v178_v29 }
  0xa9   :  { %v447_v27 = vpack.c.bf16 %v160_v25, %v158_v24  ;;  %v457_v28 = vpack.c.bf16 %v170_v26, %v168_v19  ;;  %v319_v40 = vmul.f32 %v160_v25, %v160_v25  ;;  %v296_v43 = vadd.f32 %v160_v25, %v158_v24 }
  0xaa   :  { %v323_v63 = vmul.f32 %v170_v26, %v170_v26 }
  0xab   :  { %448 = vst [vmem:[%s637_s3] sm:$0xff] %v447_v27   ;;  %v334_v47 = vadd.f32 %v319_v40, %v318_v41 }
  0xac   :  { %485 = vst [vmem:[%s637_s3 + $0x10] sm:$0xff] %v457_v28  }
  0xad   :  { %v179_v31 = vpop.f32.mrf.mxu2  ;;  %v189_v32 = vpop.f32.mrf.mxu3 }
  0xae   :  { %v162_v33 = vpop.f32.mrf.mxu0  ;;  %v172_v34 = vpop.f32.mrf.mxu1  ;;  %v180_v35 = vadd.f32 %v515_v18, %v179_v31  ;;  %v600_v36 = vadd.f32 %v515_v18, %v189_v32 }
  0xaf   :  { %v163_v37 = vadd.f32 %v515_v18, %v162_v33  ;;  %v173_v44 = vadd.f32 %v515_v18, %v172_v34 }
  0xb0   :  { %v467_v38 = vpack.c.bf16 %v180_v35, %v178_v29  ;;  %v477_v39 = vpack.c.bf16 %v600_v36, %v598_v30  ;;  %v327_v17 = vmul.f32 %v180_v35, %v180_v35 }
  0xb1   :  { %v320_v42 = vmul.f32 %v163_v37, %v163_v37  ;;  %v297_v50 = vadd.f32 %v296_v43, %v163_v37  ;;  %v324_v6 = vmul.f32 %v173_v44, %v173_v44 }
  0xb2   :  { %487 = vst [vmem:[%s637_s3 + $0x20] sm:$0xff] %v467_v38  }
  0xb3   :  { %489 = vst [vmem:[%s637_s3 + $0x30] sm:$0xff] %v477_v39   ;;  %v335_v53 = vadd.f32 %v334_v47, %v320_v42 }
  0xb5   :  { %v182_v45 = vpop.f32.mrf.mxu2  ;;  %v192_v46 = vpop.f32.mrf.mxu3 }
  0xb6   :  { %v164_v48 = vpop.f32.mrf.mxu0  ;;  %v174_v49 = vpop.f32.mrf.mxu1  ;;  %v183_v61 = vadd.f32 %v515_v18, %v182_v45  ;;  %v193_v62 = vadd.f32 %v515_v18, %v192_v46 }
  0xb7   :  { %v165_v51 = vadd.f32 %v515_v18, %v164_v48  ;;  %v175_v52 = vadd.f32 %v515_v18, %v174_v49 }
  0xb8   :  { %v328_v21 = vmul.f32 %v183_v61, %v183_v61  ;;  %v332_v34 = vmul.f32 %v193_v62, %v193_v62 }
  0xb9   :  { %v452_v54 = vpack.c.bf16 %v165_v51, %v163_v37  ;;  %v298_v55 = vadd.f32 %v297_v50, %v165_v51  ;;  %v321_v56 = vmul.f32 %v165_v51, %v165_v51  ;;  %v462_v57 = vpack.c.bf16 %v175_v52, %v173_v44 }
  0xba   :  { %v325_v12 = vmul.f32 %v175_v52, %v175_v52 }
  0xbb   :  { %484 = vst [vmem:[%s637_s3 + $0x8] sm:$0xff] %v452_v54   ;;  %v299_v59 = vadd.f32 %v298_v55, %v168_v19  ;;  %v336_v60 = vadd.f32 %v335_v53, %v321_v56 }
  0xbc   :  { %486 = vst [vmem:[%s637_s3 + $0x18] sm:$0xff] %v462_v57  }
  0xbd   :  { %v337_v0 = vadd.f32 %v336_v60, %v322_v58  ;;  %v300_v1 = vadd.f32 %v299_v59, %v170_v26  ;;  %v184_v2 = vpop.f32.mrf.mxu2  ;;  %v194_v3 = vpop.f32.mrf.mxu3  ;;  %v330_v26 = vmul.f32 %v598_v30, %v598_v30 }
  0xbe   :  { %v185_v4 = vadd.f32 %v515_v18, %v184_v2  ;;  %v195_v5 = vadd.f32 %v515_v18, %v194_v3 }
  0xbf   :  { %v301_v7 = vadd.f32 %v300_v1, %v173_v44  ;;  %v338_v8 = vadd.f32 %v337_v0, %v323_v63 }
  0xc0   :  { %v472_v9 = vpack.c.bf16 %v185_v4, %v183_v61  ;;  %v482_v10 = vpack.c.bf16 %v195_v5, %v193_v62  ;;  %v329_v25 = vmul.f32 %v185_v4, %v185_v4  ;;  %v333_v39 = vmul.f32 %v195_v5, %v195_v5 }
  0xc1   :  { %v302_v11 = vadd.f32 %v301_v7, %v175_v52  ;;  %v339_v13 = vadd.f32 %v338_v8, %v324_v6 }
  0xc2   :  { %488 = vst [vmem:[%s637_s3 + $0x28] sm:$0xff] %v472_v9  }
  0xc3   :  { %v303_v15 = vadd.f32 %v302_v11, %v178_v29  ;;  %v340_v16 = vadd.f32 %v339_v13, %v325_v12  ;;  %490 = vst [vmem:[%s637_s3 + $0x38] sm:$0xff] %v482_v10   ;;  %v331_v29 = vmul.f32 %v600_v36, %v600_v36 }
  0xc5   :  { %v341_v18 = vadd.f32 %v340_v16, %v326_v14  ;;  %v304_v19 = vadd.f32 %v303_v15, %v180_v35 }
  0xc7   :  { %v305_v20 = vadd.f32 %v304_v19, %v183_v61  ;;  %v342_v22 = vadd.f32 %v341_v18, %v327_v17 }
  0xc9   :  { %v343_v23 = vadd.f32 %v342_v22, %v328_v21  ;;  %v306_v24 = vadd.f32 %v305_v20, %v185_v4 }
  0xcb   :  { %v307_v27 = vadd.f32 %v306_v24, %v598_v30  ;;  %v344_v28 = vadd.f32 %v343_v23, %v329_v25 }
  0xcd   :  { %v345_v31 = vadd.f32 %v344_v28, %v330_v26  ;;  %v308_v32 = vadd.f32 %v307_v27, %v600_v36 }
  0xcf   :  { %v309_v33 = vadd.f32 %v308_v32, %v193_v62  ;;  %v346_v35 = vadd.f32 %v345_v31, %v331_v29 }
  0xd1   :  { %v347_v37 = vadd.f32 %v346_v35, %v332_v34  ;;  %v310_v38 = vadd.f32 %v309_v33, %v195_v5 }
  0xd3   :  { %v311_v40 = vrot.slane %v310_v38, 4  ;;  %v348_v41 = vadd.f32 %v347_v37, %v333_v39 }
  0xd5   :  { %v312_v42 = vadd.f32 %v311_v40, %v310_v38  ;;  %v349_v43 = vrot.slane %v348_v41, 4 }
  0xd7   :  { %v313_v44 = vrot.slane %v312_v42, 2  ;;  %v350_v45 = vadd.f32 %v349_v43, %v348_v41 }
  0xd9   :  { %v314_v30 = vadd.f32 %v313_v44, %v312_v42  ;;  %v351_v46 = vrot.slane %v350_v45, 2 }
  0xdb   :  { %v315_v47 = vrot.slane %v314_v30, 1  ;;  %v352_v48 = vadd.f32 %v351_v46, %v350_v45 }
  0xdd   :  { %v316_v49 = vadd.f32 %v315_v47, %v314_v30  ;;  %v353_v50 = vrot.slane %v352_v48, 1 }
  0xdf   :  { %317 = vst [vmem:[%s638_s4] sm:$0x1] %v316_v49  ;;  %v354_v36 = vadd.f32 %v353_v50, %v352_v48 }
  0xe1   :  { %355 = vst [vmem:[%s638_s4 + $0x1] sm:$0x1] %v354_v36 }

// kernel: encoder_cnn_forward.6
= control target key start
LH: loop header
LB: loop body
LE: loop exit
PB: predicated region body
PF: predicated region fallthrough
CT: control target
= control target key end

     0   :  { %s2496_s1 = inlined_call_operand.vmem [shape: bf16[1664,128], index: 1, kind: input, shape index: {}]   ;;  %s2497_s0 = inlined_call_operand.vmem [shape: bf16[32,1664], index: 0, kind: input, shape index: {}]   ;;  %s2498_s2 = inlined_call_operand.vmem [shape: f32[1,128], index: 2, kind: input, shape index: {}]   ;;  %s2499_s3 = inlined_call_operand.vmem [shape: bf16[32,128], index: 3, kind: output, shape index: {0}]   ;;  %s2500_s4 = inlined_call_operand.vmem [shape: f32[1,2,128], index: 4, kind: output, shape index: {1}]  }
   0x1   :  { %v1871_v0 = vld [vmem:[%s2496_s1 + $0x38] sm:$0xff]  ;;  %v1870_v4 = vld [vmem:[%s2496_s1 + $0x30] sm:$0xff]  ;;  %v1869_v8 = vld [vmem:[%s2496_s1 + $0x28] sm:$0xff] }
   0x2   :  { %v1879_v1 = vld [vmem:[%s2496_s1 + $0x78] sm:$0xff]  ;;  %1012 = vmatpush.bf16.msra.mxu0 %v1871_v0  ;;  %v1878_v5 = vld [vmem:[%s2496_s1 + $0x70] sm:$0xff]  ;;  %v1877_v9 = vld [vmem:[%s2496_s1 + $0x68] sm:$0xff] }
   0x3   :  { %v1887_v2 = vld [vmem:[%s2496_s1 + $0xb8] sm:$0xff]  ;;  %1031 = vmatpush.bf16.msra.mxu1 %v1879_v1  ;;  %v1886_v6 = vld [vmem:[%s2496_s1 + $0xb0] sm:$0xff]  ;;  %v1885_v10 = vld [vmem:[%s2496_s1 + $0xa8] sm:$0xff] }
   0x4   :  { %v1895_v3 = vld [vmem:[%s2496_s1 + $0xf8] sm:$0xff]  ;;  %1050 = vmatpush.bf16.msra.mxu2 %v1887_v2  ;;  %v1894_v7 = vld [vmem:[%s2496_s1 + $0xf0] sm:$0xff]  ;;  %v1893_v11 = vld [vmem:[%s2496_s1 + $0xe8] sm:$0xff] }
   0x5   :  { %1069 = vmatpush.bf16.msra.mxu3 %v1895_v3  ;;  %v1868_v12 = vld [vmem:[%s2496_s1 + $0x20] sm:$0xff]  ;;  %v1867_v16 = vld [vmem:[%s2496_s1 + $0x18] sm:$0xff]  ;;  %v1866_v20 = vld [vmem:[%s2496_s1 + $0x10] sm:$0xff] }
   0x6   :  { %1013 = vmatpush.bf16.msra.mxu0 %v1870_v4  ;;  %v1876_v13 = vld [vmem:[%s2496_s1 + $0x60] sm:$0xff]  ;;  %v1875_v17 = vld [vmem:[%s2496_s1 + $0x58] sm:$0xff]  ;;  %v1874_v21 = vld [vmem:[%s2496_s1 + $0x50] sm:$0xff] }
   0x7   :  { %1032 = vmatpush.bf16.msra.mxu1 %v1878_v5  ;;  %v1884_v14 = vld [vmem:[%s2496_s1 + $0xa0] sm:$0xff]  ;;  %v1883_v18 = vld [vmem:[%s2496_s1 + $0x98] sm:$0xff]  ;;  %v1882_v22 = vld [vmem:[%s2496_s1 + $0x90] sm:$0xff] }
   0x8   :  { %1051 = vmatpush.bf16.msra.mxu2 %v1886_v6  ;;  %v1892_v15 = vld [vmem:[%s2496_s1 + $0xe0] sm:$0xff]  ;;  %v1891_v19 = vld [vmem:[%s2496_s1 + $0xd8] sm:$0xff]  ;;  %v1890_v23 = vld [vmem:[%s2496_s1 + $0xd0] sm:$0xff] }
   0x9   :  { %1070 = vmatpush.bf16.msra.mxu3 %v1894_v7  ;;  %v1865_v24 = vld [vmem:[%s2496_s1 + $0x8] sm:$0xff]  ;;  %v1864_v28 = vld [vmem:[%s2496_s1] sm:$0xff]  ;;  %v1844_v33 = vld [vmem:[%s2497_s0 + $0x30] sm:$0xf0] }
   0xa   :  { %1014 = vmatpush.bf16.msra.mxu0 %v1869_v8  ;;  %v1873_v25 = vld [vmem:[%s2496_s1 + $0x48] sm:$0xff]  ;;  %v1872_v29 = vld [vmem:[%s2496_s1 + $0x40] sm:$0xff]  ;;  %v1322_v35 = vld [vmem:[%s2497_s0 + $0x34] sm:$0xf0] }
   0xb   :  { %1033 = vmatpush.bf16.msra.mxu1 %v1877_v9  ;;  %v1881_v26 = vld [vmem:[%s2496_s1 + $0x88] sm:$0xff]  ;;  %v1880_v30 = vld [vmem:[%s2496_s1 + $0x80] sm:$0xff]  ;;  %v1845_v37 = vld [vmem:[%s2497_s0 + $0x38] sm:$0xf0] }
   0xc   :  { %1052 = vmatpush.bf16.msra.mxu2 %v1885_v10  ;;  %v1889_v27 = vld [vmem:[%s2496_s1 + $0xc8] sm:$0xff]  ;;  %v1888_v31 = vld [vmem:[%s2496_s1 + $0xc0] sm:$0xff]  ;;  %v1903_v40 = vld [vmem:[%s2496_s1 + $0x138] sm:$0xff] }
   0xd   :  { %1071 = vmatpush.bf16.msra.mxu3 %v1893_v11  ;;  %v1320_v32 = vld [vmem:[%s2497_s0] sm:$0xf]  ;;  %v1838_v34 = vld [vmem:[%s2497_s0 + $0x4] sm:$0xf]  ;;  %v1328_v36 = vld [vmem:[%s2497_s0 + $0x8] sm:$0xf] }
   0xe   :  { %1015 = vmatpush.bf16.msra.mxu0 %v1868_v12  ;;  %v1839_v38 = vld [vmem:[%s2497_s0 + $0xc] sm:$0xf]  ;;  %v1330_v39 = vld [vmem:[%s2497_s0 + $0x3c] sm:$0xf0]  ;;  %v1911_v41 = vld [vmem:[%s2496_s1 + $0x178] sm:$0xff]  ;;  %v1321_v42 = vor.u32 %v1844_v33, %v1320_v32  ;;  %v1325_v43 = vor.u32 %v1838_v34, %v1322_v35  ;;  %v1329_v44 = vor.u32 %v1845_v37, %v1328_v36 }
   0xf   :  { %1034 = vmatpush.bf16.msra.mxu1 %v1876_v13  ;;  %v1333_v45 = vor.u32 %v1839_v38, %v1330_v39  ;;  %v1919_v46 = vld [vmem:[%s2496_s1 + $0x1b8] sm:$0xff]  ;;  %v1902_v48 = vld [vmem:[%s2496_s1 + $0x130] sm:$0xff]  ;;  %v1901_v52 = vld [vmem:[%s2496_s1 + $0x128] sm:$0xff] }
  0x10   :  { %1053 = vmatpush.bf16.msra.mxu2 %v1884_v14  ;;  %v1927_v47 = vld [vmem:[%s2496_s1 + $0x1f8] sm:$0xff]  ;;  %v1910_v49 = vld [vmem:[%s2496_s1 + $0x170] sm:$0xff]  ;;  %v1909_v53 = vld [vmem:[%s2496_s1 + $0x168] sm:$0xff] }
  0x11   :  { %1072 = vmatpush.bf16.msra.mxu3 %v1892_v15  ;;  %v1918_v50 = vld [vmem:[%s2496_s1 + $0x1b0] sm:$0xff]  ;;  %v1917_v54 = vld [vmem:[%s2496_s1 + $0x1a8] sm:$0xff]  ;;  %v1900_v56 = vld [vmem:[%s2496_s1 + $0x120] sm:$0xff] }
  0x12   :  { %1016 = vmatpush.bf16.msra.mxu0 %v1867_v16  ;;  %v1926_v51 = vld [vmem:[%s2496_s1 + $0x1f0] sm:$0xff]  ;;  %v1925_v55 = vld [vmem:[%s2496_s1 + $0x1e8] sm:$0xff]  ;;  %v1908_v57 = vld [vmem:[%s2496_s1 + $0x160] sm:$0xff] }
  0x13   :  { %1035 = vmatpush.bf16.msra.mxu1 %v1875_v17  ;;  %v1916_v58 = vld [vmem:[%s2496_s1 + $0x1a0] sm:$0xff]  ;;  %v1372_v60 = vld [vmem:[%s2497_s0 + $0x68] sm:$0xf]  ;;  %v1857_v61 = vld [vmem:[%s2497_s0 + $0x98] sm:$0xf0] }
  0x14   :  { %1054 = vmatpush.bf16.msra.mxu2 %v1883_v18  ;;  %v1924_v59 = vld [vmem:[%s2496_s1 + $0x1e0] sm:$0xff]  ;;  %v1851_v62 = vld [vmem:[%s2497_s0 + $0x6c] sm:$0xf]  ;;  %v1380_v0 = vld [vmem:[%s2497_s0 + $0x70] sm:$0xf]  ;;  %v1373_v6 = vor.u32 %v1857_v61, %v1372_v60 }
  0x15   :  { %1073 = vmatpush.bf16.msra.mxu3 %v1891_v19  ;;  %v1374_v63 = vld [vmem:[%s2497_s0 + $0x9c] sm:$0xf0]  ;;  %v1858_v1 = vld [vmem:[%s2497_s0 + $0xa0] sm:$0xf0]  ;;  %v1852_v2 = vld [vmem:[%s2497_s0 + $0x74] sm:$0xf] }
  0x16   :  { %1017 = vmatpush.bf16.msra.mxu0 %v1866_v20  ;;  %v1382_v3 = vld [vmem:[%s2497_s0 + $0xa4] sm:$0xf0]  ;;  %v1899_v4 = vld [vmem:[%s2496_s1 + $0x118] sm:$0xff]  ;;  %v1377_v7 = vor.u32 %v1851_v62, %v1374_v63  ;;  %v1381_v8 = vor.u32 %v1858_v1, %v1380_v0  ;;  %v1898_v12 = vld [vmem:[%s2496_s1 + $0x110] sm:$0xff] }
  0x17   :  { %1036 = vmatpush.bf16.msra.mxu1 %v1874_v21  ;;  %v1907_v5 = vld [vmem:[%s2496_s1 + $0x158] sm:$0xff]  ;;  %v1385_v9 = vor.u32 %v1852_v2, %v1382_v3  ;;  %v1906_v13 = vld [vmem:[%s2496_s1 + $0x150] sm:$0xff]  ;;  %v1897_v16 = vld [vmem:[%s2496_s1 + $0x108] sm:$0xff] }
  0x18   :  { %1055 = vmatpush.bf16.msra.mxu2 %v1882_v22  ;;  %v1915_v10 = vld [vmem:[%s2496_s1 + $0x198] sm:$0xff]  ;;  %v1914_v14 = vld [vmem:[%s2496_s1 + $0x190] sm:$0xff]  ;;  %v1905_v17 = vld [vmem:[%s2496_s1 + $0x148] sm:$0xff] }
  0x19   :  { %1074 = vmatpush.bf16.msra.mxu3 %v1890_v23  ;;  %v1923_v11 = vld [vmem:[%s2496_s1 + $0x1d8] sm:$0xff]  ;;  %v1922_v15 = vld [vmem:[%s2496_s1 + $0x1d0] sm:$0xff]  ;;  %v1913_v18 = vld [vmem:[%s2496_s1 + $0x188] sm:$0xff] }
  0x1a   :  { %1018 = vmatpush.bf16.msra.mxu0 %v1865_v24  ;;  %v1921_v19 = vld [vmem:[%s2496_s1 + $0x1c8] sm:$0xff]  ;;  %v1896_v20 = vld [vmem:[%s2496_s1 + $0x100] sm:$0xff]  ;;  %v1336_v22 = vld [vmem:[%s2497_s0 + $0x10] sm:$0xf] }
  0x1b   :  { %1037 = vmatpush.bf16.msra.mxu1 %v1873_v25  ;;  %v1904_v21 = vld [vmem:[%s2496_s1 + $0x140] sm:$0xff]  ;;  %v1841_v32 = vld [vmem:[%s2497_s0 + $0x1c] sm:$0xf]  ;;  %v1346_v33 = vld [vmem:[%s2497_s0 + $0x4c] sm:$0xf0] }
  0x1c   :  { %1056 = vmatpush.bf16.msra.mxu2 %v1881_v26  ;;  %v1912_v23 = vld [vmem:[%s2496_s1 + $0x180] sm:$0xff]  ;;  %v1935_v26 = vld [vmem:[%s2496_s1 + $0x238] sm:$0xff]  ;;  %v1349_v39 = vor.u32 %v1841_v32, %v1346_v33  ;;  %v1404_v32 = vld [vmem:[%s2497_s0 + $0x88] sm:$0xf] }
  0x1d   :  { %1075 = vmatpush.bf16.msra.mxu3 %v1889_v27  ;;  %v1920_v24 = vld [vmem:[%s2496_s1 + $0x1c0] sm:$0xff]  ;;  %v1943_v27 = vld [vmem:[%s2496_s1 + $0x278] sm:$0xff] }
  0x1e   :  { %1019 = vmatpush.bf16.msra.mxu0 %v1864_v28  ;;  %v1846_v25 = vld [vmem:[%s2497_s0 + $0x40] sm:$0xf0]  ;;  %v1840_v28 = vld [vmem:[%s2497_s0 + $0x14] sm:$0xf]  ;;  %v1951_v34 = vld [vmem:[%s2496_s1 + $0x2b8] sm:$0xff] }
  0x1f   :  { %1038 = vmatpush.bf16.msra.mxu1 %v1872_v29  ;;  %v1338_v29 = vld [vmem:[%s2497_s0 + $0x44] sm:$0xf0]  ;;  %v1959_v35 = vld [vmem:[%s2496_s1 + $0x2f8] sm:$0xff]  ;;  %v1337_v36 = vor.u32 %v1846_v25, %v1336_v22  ;;  %v1854_v60 = vld [vmem:[%s2497_s0 + $0x84] sm:$0xf] }
  0x20   :  { %1057 = vmatpush.bf16.msra.mxu2 %v1880_v30  ;;  %v1344_v30 = vld [vmem:[%s2497_s0 + $0x18] sm:$0xf]  ;;  %v1341_v37 = vor.u32 %v1840_v28, %v1338_v29  ;;  %v1849_v22 = vld [vmem:[%s2497_s0 + $0x58] sm:$0xf0]  ;;  %v1966_v29 = vld [vmem:[%s2496_s1 + $0x330] sm:$0xff] }
  0x21   :  { %1076 = vmatpush.bf16.msra.mxu3 %v1888_v31  ;;  %1020 = vmatmul.bf16.vlgmr.msra.gmra.mxu0 %v1321_v42  ;;  %v1847_v31 = vld [vmem:[%s2497_s0 + $0x48] sm:$0xf0]  ;;  %v1950_v42 = vld [vmem:[%s2496_s1 + $0x2b0] sm:$0xff]  ;;  %v1398_v61 = vld [vmem:[%s2497_s0 + $0xb4] sm:$0xf0] }
  0x22   :  { %1088 = vmatpush.bf16.msrb.mxu0 %v1903_v40  ;;  %1039 = vmatmul.bf16.vlgmr.msra.gmra.mxu1 %v1325_v43  ;;  %v1345_v38 = vor.u32 %v1847_v31, %v1344_v30  ;;  %v1934_v40 = vld [vmem:[%s2496_s1 + $0x230] sm:$0xff]  ;;  %v1947_v62 = vld [vmem:[%s2496_s1 + $0x298] sm:$0xff]  ;;  %v1401_v3 = vor.u32 %v1854_v60, %v1398_v61  ;;  %v1965_v30 = vld [vmem:[%s2496_s1 + $0x328] sm:$0xff] }
  0x23   :  { %1107 = vmatpush.bf16.msrb.mxu1 %v1911_v41  ;;  %1058 = vmatmul.bf16.vlgmr.msra.gmra.mxu2 %v1329_v44  ;;  %v1942_v41 = vld [vmem:[%s2496_s1 + $0x270] sm:$0xff]  ;;  %v1933_v44 = vld [vmem:[%s2496_s1 + $0x228] sm:$0xff]  ;;  %v1955_v63 = vld [vmem:[%s2496_s1 + $0x2d8] sm:$0xff] }
  0x24   :  { %1077 = vmatmul.bf16.vlgmr.msra.gmra.mxu3 %v1333_v45  ;;  %1126 = vmatpush.bf16.msrb.mxu2 %v1919_v46  ;;  %v1958_v43 = vld [vmem:[%s2496_s1 + $0x2f0] sm:$0xff]  ;;  %v1941_v45 = vld [vmem:[%s2496_s1 + $0x268] sm:$0xff]  ;;  %v1964_v31 = vld [vmem:[%s2496_s1 + $0x320] sm:$0xff] }
  0x25   :  { %1145 = vmatpush.bf16.msrb.mxu3 %v1927_v47  ;;  %v1949_v46 = vld [vmem:[%s2496_s1 + $0x2a8] sm:$0xff]  ;;  %v1861_v33 = vld [vmem:[%s2497_s0 + $0xb8] sm:$0xf0] }
  0x26   :  { %1089 = vmatpush.bf16.msrb.mxu0 %v1902_v48  ;;  %v1957_v47 = vld [vmem:[%s2496_s1 + $0x2e8] sm:$0xff]  ;;  %v1932_v48 = vld [vmem:[%s2496_s1 + $0x220] sm:$0xff] }
  0x27   :  { %1108 = vmatpush.bf16.msrb.mxu1 %v1910_v49  ;;  %v1940_v49 = vld [vmem:[%s2496_s1 + $0x260] sm:$0xff] }
  0x28   :  { %1127 = vmatpush.bf16.msrb.mxu2 %v1918_v50  ;;  %v1948_v50 = vld [vmem:[%s2496_s1 + $0x2a0] sm:$0xff] }
  0x29   :  { %1146 = vmatpush.bf16.msrb.mxu3 %v1926_v51  ;;  %v1956_v51 = vld [vmem:[%s2496_s1 + $0x2e0] sm:$0xff] }
  0x2a   :  { %1090 = vmatpush.bf16.msrb.mxu0 %v1901_v52  ;;  %v1388_v52 = vld [vmem:[%s2497_s0 + $0x78] sm:$0xf] }
  0x2b   :  { %1109 = vmatpush.bf16.msrb.mxu1 %v1909_v53  ;;  %v1859_v53 = vld [vmem:[%s2497_s0 + $0xa8] sm:$0xf0] }
  0x2c   :  { %1128 = vmatpush.bf16.msrb.mxu2 %v1917_v54  ;;  %v1853_v54 = vld [vmem:[%s2497_s0 + $0x7c] sm:$0xf]  ;;  %v1389_v0 = vor.u32 %v1859_v53, %v1388_v52 }
  0x2d   :  { %1147 = vmatpush.bf16.msrb.mxu3 %v1925_v55  ;;  %v1390_v55 = vld [vmem:[%s2497_s0 + $0xac] sm:$0xf0] }
  0x2e   :  { %1091 = vmatpush.bf16.msrb.mxu0 %v1900_v56  ;;  %v1396_v56 = vld [vmem:[%s2497_s0 + $0x80] sm:$0xf]  ;;  %v1393_v1 = vor.u32 %v1853_v54, %v1390_v55 }
  0x2f   :  { %1110 = vmatpush.bf16.msrb.mxu1 %v1908_v57  ;;  %v1860_v57 = vld [vmem:[%s2497_s0 + $0xb0] sm:$0xf0]  ;;  %v1987_v54 = vld [vmem:[%s2498_s2] ss:$0 sm:$0xff] }
  0x30   :  { %1129 = vmatpush.bf16.msrb.mxu2 %v1916_v58  ;;  %v1931_v58 = vld [vmem:[%s2496_s1 + $0x218] sm:$0xff]  ;;  %v1397_v2 = vor.u32 %v1860_v57, %v1396_v56 }
  0x31   :  { %1148 = vmatpush.bf16.msrb.mxu3 %v1924_v59  ;;  %1025 = vmatmul.bf16.gmra.mxu0 %v1373_v6  ;;  %v1939_v59 = vld [vmem:[%s2496_s1 + $0x258] sm:$0xff]  ;;  %v1946_v6 = vld [vmem:[%s2496_s1 + $0x290] sm:$0xff] }
  0x32   :  { %1092 = vmatpush.bf16.msrb.mxu0 %v1899_v4  ;;  %1044 = vmatmul.bf16.gmra.mxu1 %v1377_v7  ;;  %v1930_v4 = vld [vmem:[%s2496_s1 + $0x210] sm:$0xff] }
  0x33   :  { %1111 = vmatpush.bf16.msrb.mxu1 %v1907_v5  ;;  %1063 = vmatmul.bf16.gmra.mxu2 %v1381_v8  ;;  %v1938_v5 = vld [vmem:[%s2496_s1 + $0x250] sm:$0xff]  ;;  %v1929_v8 = vld [vmem:[%s2496_s1 + $0x208] sm:$0xff] }
  0x34   :  { %1082 = vmatmul.bf16.gmra.mxu3 %v1385_v9  ;;  %1130 = vmatpush.bf16.msrb.mxu2 %v1915_v10  ;;  %v1954_v7 = vld [vmem:[%s2496_s1 + $0x2d0] sm:$0xff]  ;;  %v1937_v9 = vld [vmem:[%s2496_s1 + $0x248] sm:$0xff] }
  0x35   :  { %1149 = vmatpush.bf16.msrb.mxu3 %v1923_v11  ;;  %v1945_v10 = vld [vmem:[%s2496_s1 + $0x288] sm:$0xff] }
  0x36   :  { %1093 = vmatpush.bf16.msrb.mxu0 %v1898_v12  ;;  %v1953_v11 = vld [vmem:[%s2496_s1 + $0x2c8] sm:$0xff]  ;;  %v1928_v12 = vld [vmem:[%s2496_s1 + $0x200] sm:$0xff] }
  0x37   :  { %1112 = vmatpush.bf16.msrb.mxu1 %v1906_v13  ;;  %v1936_v13 = vld [vmem:[%s2496_s1 + $0x240] sm:$0xff] }
  0x38   :  { %1131 = vmatpush.bf16.msrb.mxu2 %v1914_v14  ;;  %v1944_v14 = vld [vmem:[%s2496_s1 + $0x280] sm:$0xff] }
  0x39   :  { %1150 = vmatpush.bf16.msrb.mxu3 %v1922_v15  ;;  %v1952_v15 = vld [vmem:[%s2496_s1 + $0x2c0] sm:$0xff] }
  0x3a   :  { %1094 = vmatpush.bf16.msrb.mxu0 %v1897_v16  ;;  %v1352_v16 = vld [vmem:[%s2497_s0 + $0x20] sm:$0xf] }
  0x3b   :  { %1113 = vmatpush.bf16.msrb.mxu1 %v1905_v17  ;;  %v1848_v17 = vld [vmem:[%s2497_s0 + $0x50] sm:$0xf0] }
  0x3c   :  { %1132 = vmatpush.bf16.msrb.mxu2 %v1913_v18  ;;  %v1967_v18 = vld [vmem:[%s2496_s1 + $0x338] sm:$0xff]  ;;  %v1353_v25 = vor.u32 %v1848_v17, %v1352_v16 }
  0x3d   :  { %1151 = vmatpush.bf16.msrb.mxu3 %v1921_v19  ;;  %v1842_v19 = vld [vmem:[%s2497_s0 + $0x24] sm:$0xf] }
  0x3e   :  { %1095 = vmatpush.bf16.msrb.mxu0 %v1896_v20  ;;  %v1354_v20 = vld [vmem:[%s2497_s0 + $0x54] sm:$0xf0] }
  0x3f   :  { %1114 = vmatpush.bf16.msrb.mxu1 %v1904_v21  ;;  %v1360_v21 = vld [vmem:[%s2497_s0 + $0x28] sm:$0xf] }
  0x40   :  { %1133 = vmatpush.bf16.msrb.mxu2 %v1912_v23  ;;  %v1843_v23 = vld [vmem:[%s2497_s0 + $0x2c] sm:$0xf] }
  0x41   :  { %1152 = vmatpush.bf16.msrb.mxu3 %v1920_v24  ;;  %1096 = vmatmul.bf16.vlgmr.msrb.gmra.mxu0 %v1337_v36  ;;  %v1362_v24 = vld [vmem:[%s2497_s0 + $0x5c] sm:$0xf0]  ;;  %v1412_v36 = vld [vmem:[%s2497_s0 + $0x90] sm:$0xf] }
  0x42   :  { %1164 = vmatpush.bf16.msra.mxu0 %v1935_v26  ;;  %1115 = vmatmul.bf16.vlgmr.msrb.gmra.mxu1 %v1341_v37  ;;  %v1357_v26 = vor.u32 %v1842_v19, %v1354_v20  ;;  %v1365_v28 = vor.u32 %v1843_v23, %v1362_v24  ;;  %v1862_v37 = vld [vmem:[%s2497_s0 + $0xc0] sm:$0xf0] }
  0x43   :  { %1183 = vmatpush.bf16.msra.mxu1 %v1943_v27  ;;  %1134 = vmatmul.bf16.vlgmr.msrb.gmra.mxu2 %v1345_v38  ;;  %v1361_v27 = vor.u32 %v1849_v22, %v1360_v21  ;;  %v1963_v38 = vld [vmem:[%s2496_s1 + $0x318] sm:$0xff] }
  0x44   :  { %1202 = vmatpush.bf16.msra.mxu2 %v1951_v34  ;;  %1153 = vmatmul.bf16.vlgmr.msrb.gmra.mxu3 %v1349_v39  ;;  %v1855_v34 = vld [vmem:[%s2497_s0 + $0x8c] sm:$0xf]  ;;  %v1856_v39 = vld [vmem:[%s2497_s0 + $0x94] sm:$0xf] }
  0x45   :  { %1221 = vmatpush.bf16.msra.mxu3 %v1959_v35  ;;  %v1406_v35 = vld [vmem:[%s2497_s0 + $0xbc] sm:$0xf0] }
  0x46   :  { %1165 = vmatpush.bf16.msra.mxu0 %v1934_v40  ;;  %v1414_v40 = vld [vmem:[%s2497_s0 + $0xc4] sm:$0xf0] }
  0x47   :  { %1184 = vmatpush.bf16.msra.mxu1 %v1942_v41  ;;  %v1405_v41 = vor.u32 %v1861_v33, %v1404_v32 }
  0x48   :  { %1203 = vmatpush.bf16.msra.mxu2 %v1950_v42  ;;  %v1409_v42 = vor.u32 %v1855_v34, %v1406_v35 }
  0x49   :  { %1222 = vmatpush.bf16.msra.mxu3 %v1958_v43  ;;  %v1413_v43 = vor.u32 %v1862_v37, %v1412_v36 }
  0x4a   :  { %1166 = vmatpush.bf16.msra.mxu0 %v1933_v44  ;;  %v1417_v44 = vor.u32 %v1856_v39, %v1414_v40 }
  0x4b   :  { %1185 = vmatpush.bf16.msra.mxu1 %v1941_v45  ;;  %v1962_v45 = vld [vmem:[%s2496_s1 + $0x310] sm:$0xff] }
  0x4c   :  { %1204 = vmatpush.bf16.msra.mxu2 %v1949_v46  ;;  %v1961_v46 = vld [vmem:[%s2496_s1 + $0x308] sm:$0xff] }
  0x4d   :  { %1223 = vmatpush.bf16.msra.mxu3 %v1957_v47  ;;  %v1960_v47 = vld [vmem:[%s2496_s1 + $0x300] sm:$0xff] }
  0x4e   :  { %1167 = vmatpush.bf16.msra.mxu0 %v1932_v48  ;;  %v1368_v48 = vld [vmem:[%s2497_s0 + $0x30] sm:$0xf] }
  0x4f   :  { %1186 = vmatpush.bf16.msra.mxu1 %v1940_v49  ;;  %v1850_v49 = vld [vmem:[%s2497_s0 + $0x60] sm:$0xf0] }
  0x50   :  { %1205 = vmatpush.bf16.msra.mxu2 %v1948_v50  ;;  %v1420_v50 = vld [vmem:[%s2497_s0 + $0x98] sm:$0xf]  ;;  %v1369_v52 = vor.u32 %v1850_v49, %v1368_v48 }
  0x51   :  { %1224 = vmatpush.bf16.msra.mxu3 %v1956_v51  ;;  %1101 = vmatmul.bf16.gmra.mxu0 %v1389_v0  ;;  %v1863_v51 = vld [vmem:[%s2497_s0 + $0xc8] sm:$0xf0] }
  0x52   :  { %1168 = vmatpush.bf16.msra.mxu0 %v1931_v58  ;;  %1120 = vmatmul.bf16.gmra.mxu1 %v1393_v1  ;;  %v1421_v53 = vor.u32 %v1863_v51, %v1420_v50 }
  0x53   :  { %1187 = vmatpush.bf16.msra.mxu1 %v1939_v59  ;;  %1139 = vmatmul.bf16.gmra.mxu2 %v1397_v2 }
  0x54   :  { %1206 = vmatpush.bf16.msra.mxu2 %v1947_v62  ;;  %1158 = vmatmul.bf16.gmra.mxu3 %v1401_v3 }
  0x55   :  { %1225 = vmatpush.bf16.msra.mxu3 %v1955_v63 }
  0x56   :  { %1169 = vmatpush.bf16.msra.mxu0 %v1930_v4 }
  0x57   :  { %1188 = vmatpush.bf16.msra.mxu1 %v1938_v5 }
  0x58   :  { %1207 = vmatpush.bf16.msra.mxu2 %v1946_v6 }
  0x59   :  { %1226 = vmatpush.bf16.msra.mxu3 %v1954_v7 }
  0x5a   :  { %1170 = vmatpush.bf16.msra.mxu0 %v1929_v8 }
  0x5b   :  { %1189 = vmatpush.bf16.msra.mxu1 %v1937_v9 }
  0x5c   :  { %1208 = vmatpush.bf16.msra.mxu2 %v1945_v10 }
  0x5d   :  { %1227 = vmatpush.bf16.msra.mxu3 %v1953_v11 }
  0x5e   :  { %1171 = vmatpush.bf16.msra.mxu0 %v1928_v12 }
  0x5f   :  { %1190 = vmatpush.bf16.msra.mxu1 %v1936_v13 }
  0x60   :  { %1209 = vmatpush.bf16.msra.mxu2 %v1944_v14 }
  0x61   :  { %1228 = vmatpush.bf16.msra.mxu3 %v1952_v15  ;;  %1172 = vmatmul.bf16.vlgmr.msra.gmra.mxu0 %v1353_v25 }
  0x62   :  { %1240 = vmatpush.bf16.msrb.mxu0 %v1967_v18  ;;  %1191 = vmatmul.bf16.vlgmr.msra.gmra.mxu1 %v1357_v26 }
  0x63   :  { %1979 = vmatpush.bf16.msrb.mxu1 %v1967_v18  ;;  %1210 = vmatmul.bf16.vlgmr.msra.gmra.mxu2 %v1361_v27 }
  0x64   :  { %1229 = vmatmul.bf16.vlgmr.msra.gmra.mxu3 %v1365_v28 }
  0x66   :  { %1241 = vmatpush.bf16.msrb.mxu0 %v1966_v29 }
  0x67   :  { %1980 = vmatpush.bf16.msrb.mxu1 %v1966_v29 }
  0x6a   :  { %1242 = vmatpush.bf16.msrb.mxu0 %v1965_v30 }
  0x6b   :  { %1981 = vmatpush.bf16.msrb.mxu1 %v1965_v30 }
  0x6e   :  { %1243 = vmatpush.bf16.msrb.mxu0 %v1964_v31 }
  0x6f   :  { %1982 = vmatpush.bf16.msrb.mxu1 %v1964_v31 }
  0x71   :  { %1177 = vmatmul.bf16.gmra.mxu0 %v1405_v41 }
  0x72   :  { %1244 = vmatpush.bf16.msrb.mxu0 %v1963_v38  ;;  %1196 = vmatmul.bf16.gmra.mxu1 %v1409_v42 }
  0x73   :  { %1983 = vmatpush.bf16.msrb.mxu1 %v1963_v38  ;;  %1215 = vmatmul.bf16.gmra.mxu2 %v1413_v43 }
  0x74   :  { %1234 = vmatmul.bf16.gmra.mxu3 %v1417_v44 }
  0x76   :  { %1245 = vmatpush.bf16.msrb.mxu0 %v1962_v45 }
  0x77   :  { %1984 = vmatpush.bf16.msrb.mxu1 %v1962_v45 }
  0x7a   :  { %1246 = vmatpush.bf16.msrb.mxu0 %v1961_v46 }
  0x7b   :  { %1985 = vmatpush.bf16.msrb.mxu1 %v1961_v46 }
  0x7e   :  { %1247 = vmatpush.bf16.msrb.mxu0 %v1960_v47 }
  0x7f   :  { %1986 = vmatpush.bf16.msrb.mxu1 %v1960_v47 }
  0x81   :  { %1248 = vmatmul.bf16.vlgmr.msrb.gmra.mxu0 %v1369_v52 }
  0x82   :  { %1253 = vmatmul.bf16.vlgmr.msrb.gmra.mxu1 %v1421_v53 }
  0x9e   :  { %v1021_v55 = vpop.f32.mrf.mxu0 }
  0x9f   :  { %v1040_v56 = vpop.f32.mrf.mxu1  ;;  %v1022_v57 = vadd.f32 %v1987_v54, %v1021_v55 }
  0xa1   :  { %v1041_v58 = vadd.f32 %v1040_v56, %v1022_v57 }
  0xa6   :  { %v1059_v59 = vpop.f32.mrf.mxu2  ;;  %v1023_v62 = vpop.f32.mrf.mxu0 }
  0xa7   :  { %v1078_v60 = vpop.f32.mrf.mxu3  ;;  %v1060_v61 = vadd.f32 %v1059_v59, %v1041_v58  ;;  %v1042_v63 = vpop.f32.mrf.mxu1  ;;  %v1024_v0 = vadd.f32 %v1987_v54, %v1023_v62 }
  0xa9   :  { %v1079_v1 = vadd.f32 %v1078_v60, %v1060_v61  ;;  %v1043_v2 = vadd.f32 %v1042_v63, %v1024_v0 }
  0xae   :  { %v1061_v3 = vpop.f32.mrf.mxu2  ;;  %v1026_v5 = vpop.f32.mrf.mxu0 }
  0xaf   :  { %v1080_v4 = vpop.f32.mrf.mxu3  ;;  %v1045_v6 = vpop.f32.mrf.mxu1  ;;  %v1027_v7 = vadd.f32 %v1987_v54, %v1026_v5  ;;  %v1062_v39 = vadd.f32 %v1061_v3, %v1043_v2 }
  0xb1   :  { %v1046_v8 = vadd.f32 %v1045_v6, %v1027_v7  ;;  %v1081_v43 = vadd.f32 %v1080_v4, %v1062_v39 }
  0xb6   :  { %v1064_v9 = vpop.f32.mrf.mxu2  ;;  %v1028_v11 = vpop.f32.mrf.mxu0 }
  0xb7   :  { %v1083_v10 = vpop.f32.mrf.mxu3  ;;  %v1047_v12 = vpop.f32.mrf.mxu1  ;;  %v1029_v33 = vadd.f32 %v1987_v54, %v1028_v11  ;;  %v1065_v40 = vadd.f32 %v1064_v9, %v1046_v8 }
  0xb9   :  { %v1048_v38 = vadd.f32 %v1047_v12, %v1029_v33  ;;  %v1084_v44 = vadd.f32 %v1083_v10, %v1065_v40 }
  0xbe   :  { %v1066_v13 = vpop.f32.mrf.mxu2  ;;  %v1097_v15 = vpop.f32.mrf.mxu0 }
  0xbf   :  { %v1085_v14 = vpop.f32.mrf.mxu3  ;;  %v1116_v16 = vpop.f32.mrf.mxu1  ;;  %v1067_v41 = vadd.f32 %v1066_v13, %v1048_v38  ;;  %v1098_v42 = vadd.f32 %v1097_v15, %v1079_v1 }
  0xc1   :  { %v1086_v45 = vadd.f32 %v1085_v14, %v1067_v41  ;;  %v1117_v53 = vadd.f32 %v1116_v16, %v1098_v42 }
  0xc6   :  { %v1135_v17 = vpop.f32.mrf.mxu2  ;;  %v1099_v19 = vpop.f32.mrf.mxu0 }
  0xc7   :  { %v1154_v18 = vpop.f32.mrf.mxu3  ;;  %v1118_v20 = vpop.f32.mrf.mxu1  ;;  %v1100_v50 = vadd.f32 %v1099_v19, %v1081_v43  ;;  %v1136_v54 = vadd.f32 %v1135_v17, %v1117_v53 }
  0xc9   :  { %v1119_v55 = vadd.f32 %v1118_v20, %v1100_v50  ;;  %v1155_v62 = vadd.f32 %v1154_v18, %v1136_v54 }
  0xce   :  { %v1137_v21 = vpop.f32.mrf.mxu2  ;;  %v1102_v23 = vpop.f32.mrf.mxu0 }
  0xcf   :  { %v1156_v22 = vpop.f32.mrf.mxu3  ;;  %v1121_v24 = vpop.f32.mrf.mxu1  ;;  %v1103_v51 = vadd.f32 %v1102_v23, %v1084_v44  ;;  %v1138_v58 = vadd.f32 %v1137_v21, %v1119_v55 }
  0xd1   :  { %v1122_v56 = vadd.f32 %v1121_v24, %v1103_v51  ;;  %v1157_v3 = vadd.f32 %v1156_v22, %v1138_v58 }
  0xd6   :  { %v1140_v25 = vpop.f32.mrf.mxu2  ;;  %v1104_v27 = vpop.f32.mrf.mxu0 }
  0xd7   :  { %v1159_v26 = vpop.f32.mrf.mxu3  ;;  %v1123_v28 = vpop.f32.mrf.mxu1  ;;  %v1105_v52 = vadd.f32 %v1104_v27, %v1086_v45  ;;  %v1141_v59 = vadd.f32 %v1140_v25, %v1122_v56 }
  0xd9   :  { %v1124_v57 = vadd.f32 %v1123_v28, %v1105_v52  ;;  %v1160_v4 = vadd.f32 %v1159_v26, %v1141_v59 }
  0xde   :  { %v1142_v29 = vpop.f32.mrf.mxu2  ;;  %v1173_v31 = vpop.f32.mrf.mxu0 }
  0xdf   :  { %v1161_v30 = vpop.f32.mrf.mxu3  ;;  %v1192_v32 = vpop.f32.mrf.mxu1  ;;  %v1143_v60 = vadd.f32 %v1142_v29, %v1124_v57  ;;  %v1174_v1 = vadd.f32 %v1173_v31, %v1155_v62 }
  0xe1   :  { %v1162_v5 = vadd.f32 %v1161_v30, %v1143_v60  ;;  %v1193_v9 = vadd.f32 %v1192_v32, %v1174_v1 }
  0xe6   :  { %v1211_v34 = vpop.f32.mrf.mxu2  ;;  %v1175_v36 = vpop.f32.mrf.mxu0 }
  0xe7   :  { %v1230_v35 = vpop.f32.mrf.mxu3  ;;  %v1194_v37 = vpop.f32.mrf.mxu1  ;;  %v1176_v6 = vadd.f32 %v1175_v36, %v1157_v3  ;;  %v1212_v11 = vadd.f32 %v1211_v34, %v1193_v9 }
  0xe9   :  { %v1195_v14 = vadd.f32 %v1194_v37, %v1176_v6  ;;  %v1231_v20 = vadd.f32 %v1230_v35, %v1212_v11 }
  0xee   :  { %v1213_v46 = vpop.f32.mrf.mxu2  ;;  %v1178_v48 = vpop.f32.mrf.mxu0 }
  0xef   :  { %v1232_v47 = vpop.f32.mrf.mxu3  ;;  %v1197_v49 = vpop.f32.mrf.mxu1  ;;  %v1179_v7 = vadd.f32 %v1178_v48, %v1160_v4  ;;  %v1214_v17 = vadd.f32 %v1213_v46, %v1195_v14 }
  0xf1   :  { %v1198_v15 = vadd.f32 %v1197_v49, %v1179_v7  ;;  %v1233_v22 = vadd.f32 %v1232_v47, %v1214_v17 }
  0xf6   :  { %v1216_v61 = vpop.f32.mrf.mxu2  ;;  %v1180_v63 = vpop.f32.mrf.mxu0 }
  0xf7   :  { %v1199_v0 = vpop.f32.mrf.mxu1  ;;  %v1235_v2 = vpop.f32.mrf.mxu3  ;;  %v1181_v8 = vadd.f32 %v1180_v63, %v1162_v5  ;;  %v1217_v18 = vadd.f32 %v1216_v61, %v1198_v15 }
  0xf9   :  { %v1200_v16 = vadd.f32 %v1199_v0, %v1181_v8  ;;  %v1236_v24 = vadd.f32 %v1235_v2, %v1217_v18 }
  0xfe   :  { %v1218_v10 = vpop.f32.mrf.mxu2  ;;  %v1249_v12 = vpop.f32.mrf.mxu0 }
  0xff   :  { %v1254_v13 = vpop.f32.mrf.mxu1  ;;  %v1219_v19 = vadd.f32 %v1218_v10, %v1200_v16  ;;  %v1237_v21 = vpop.f32.mrf.mxu3  ;;  %v1250_v23 = vadd.f32 %v1249_v12, %v1231_v20 }
 0x100   :  { %v1255_v28 = vadd.f32 %v1254_v13, %v1236_v24 }
 0x101   :  { %v1238_v25 = vadd.f32 %v1237_v21, %v1219_v19  ;;  %v1296_v31 = vmul.f32 %v1250_v23, %v1250_v23 }
 0x102   :  { %v1298_v37 = vmul.f32 %v1255_v28, %v1255_v28 }
 0x106   :  { %v1251_v26 = vpop.f32.mrf.mxu0 }
 0x107   :  { %v1256_v27 = vpop.f32.mrf.mxu1  ;;  %v1252_v29 = vadd.f32 %v1251_v26, %v1233_v22 }
 0x108   :  { %v1257_v30 = vadd.f32 %v1256_v27, %v1238_v25 }
 0x109   :  { %v1971_v32 = vpack.c.bf16 %v1252_v29, %v1250_v23  ;;  %v1286_v33 = vadd.f32 %v1252_v29, %v1250_v23  ;;  %v1297_v34 = vmul.f32 %v1252_v29, %v1252_v29 }
 0x10a   :  { %v1976_v36 = vpack.c.bf16 %v1257_v30, %v1255_v28  ;;  %v1299_v40 = vmul.f32 %v1257_v30, %v1257_v30 }
 0x10b   :  { %1972 = vst [vmem:[%s2499_s3] sm:$0xff] %v1971_v32   ;;  %v1300_v35 = vadd.f32 %v1297_v34, %v1296_v31  ;;  %v1287_v38 = vadd.f32 %v1286_v33, %v1255_v28 }
 0x10c   :  { %1978 = vst [vmem:[%s2499_s3 + $0x8] sm:$0xff] %v1976_v36  }
 0x10d   :  { %v1288_v39 = vadd.f32 %v1287_v38, %v1257_v30  ;;  %v1301_v41 = vadd.f32 %v1300_v35, %v1298_v37 }
 0x10f   :  { %v1289_v42 = vrot.slane %v1288_v39, 4  ;;  %v1302_v43 = vadd.f32 %v1301_v41, %v1299_v40 }
 0x111   :  { %v1290_v44 = vadd.f32 %v1289_v42, %v1288_v39  ;;  %v1303_v45 = vrot.slane %v1302_v43, 4 }
 0x113   :  { %v1291_v46 = vrot.slane %v1290_v44, 2  ;;  %v1304_v47 = vadd.f32 %v1303_v45, %v1302_v43 }
 0x115   :  { %v1292_v48 = vadd.f32 %v1291_v46, %v1290_v44  ;;  %v1305_v49 = vrot.slane %v1304_v47, 2 }
 0x117   :  { %v1293_v50 = vrot.slane %v1292_v48, 1  ;;  %v1306_v51 = vadd.f32 %v1305_v49, %v1304_v47 }
 0x119   :  { %v1294_v52 = vadd.f32 %v1293_v50, %v1292_v48  ;;  %v1307_v53 = vrot.slane %v1306_v51, 1 }
 0x11b   :  { %1295 = vst [vmem:[%s2500_s4] sm:$0x1] %v1294_v52  ;;  %v1308_v54 = vadd.f32 %v1307_v53, %v1306_v51 }
 0x11d   :  { %1309 = vst [vmem:[%s2500_s4 + $0x1] sm:$0x1] %v1308_v54 }

// kernel: encoder_cnn_forward.7
= control target key start
LH: loop header
LB: loop body
LE: loop exit
PB: predicated region body
PF: predicated region fallthrough
CT: control target
= control target key end

     0   :  { %vm3198_vm0 = vcmask 1040384   ;;  %s7844_s1 = inlined_call_operand.vmem [shape: bf16[3200,256], index: 1, kind: input, shape index: {}]   ;;  %s7845_s0 = inlined_call_operand.vmem [shape: bf16[8,3200], index: 0, kind: input, shape index: {}]   ;;  %s7846_s2 = inlined_call_operand.vmem [shape: f32[1,256], index: 2, kind: input, shape index: {}]   ;;  %s7847_s3 = inlined_call_operand.vmem [shape: bf16[8,256], index: 3, kind: output, shape index: {0}]   ;;  %s7848_s4 = inlined_call_operand.vmem [shape: f32[1,2,256], index: 4, kind: output, shape index: {1}]  }
   0x1   :  { %v3293_v0 = vld [vmem:[%s7844_s1 + $0x70] sm:$0xf]  ;;  %v4851_v1 = vld [vmem:[%s7844_s1 + $0x74] sm:$0xf0]  ;;  %v3285_v11 = vld [vmem:[%s7844_s1 + $0x60] sm:$0xf] }
   0x2   :  { %v3357_v2 = vld [vmem:[%s7844_s1 + $0xf0] sm:$0xf]  ;;  %v3294_v3 = vor.u32 %v4851_v1, %v3293_v0  ;;  %v4867_v4 = vld [vmem:[%s7844_s1 + $0xf4] sm:$0xf0]  ;;  %v4849_v13 = vld [vmem:[%s7844_s1 + $0x64] sm:$0xf0] }
   0x3   :  { %v3421_v5 = vld [vmem:[%s7844_s1 + $0x170] sm:$0xf]  ;;  %v4883_v6 = vld [vmem:[%s7844_s1 + $0x174] sm:$0xf0]  ;;  %v3358_v7 = vor.u32 %v4867_v4, %v3357_v2  ;;  %v3349_v14 = vld [vmem:[%s7844_s1 + $0xe0] sm:$0xf]  ;;  %v3286_v16 = vor.u32 %v4849_v13, %v3285_v11 }
   0x4   :  { %v3422_v8 = vor.u32 %v4883_v6, %v3421_v5  ;;  %v3485_v9 = vld [vmem:[%s7844_s1 + $0x1f0] sm:$0xf]  ;;  %v4899_v10 = vld [vmem:[%s7844_s1 + $0x1f4] sm:$0xf0]  ;;  %2523 = vmatpush.bf16.msra.mxu0 %v3294_v3  ;;  %v4865_v15 = vld [vmem:[%s7844_s1 + $0xe4] sm:$0xf0] }
   0x5   :  { %v3486_v12 = vor.u32 %v4899_v10, %v3485_v9  ;;  %2536 = vmatpush.bf16.msra.mxu1 %v3358_v7  ;;  %v3350_v17 = vor.u32 %v4865_v15, %v3349_v14  ;;  %v3413_v18 = vld [vmem:[%s7844_s1 + $0x160] sm:$0xf]  ;;  %v4881_v19 = vld [vmem:[%s7844_s1 + $0x164] sm:$0xf0]  ;;  %v3277_v23 = vld [vmem:[%s7844_s1 + $0x50] sm:$0xf] }
   0x6   :  { %2549 = vmatpush.bf16.msra.mxu2 %v3422_v8  ;;  %v3477_v20 = vld [vmem:[%s7844_s1 + $0x1e0] sm:$0xf]  ;;  %v3414_v21 = vor.u32 %v4881_v19, %v3413_v18  ;;  %v4897_v22 = vld [vmem:[%s7844_s1 + $0x1e4] sm:$0xf0]  ;;  %v4847_v24 = vld [vmem:[%s7844_s1 + $0x54] sm:$0xf0] }
   0x7   :  { %2562 = vmatpush.bf16.msra.mxu3 %v3486_v12  ;;  %v3478_v25 = vor.u32 %v4897_v22, %v3477_v20  ;;  %v3341_v26 = vld [vmem:[%s7844_s1 + $0xd0] sm:$0xf]  ;;  %v4863_v27 = vld [vmem:[%s7844_s1 + $0xd4] sm:$0xf0]  ;;  %v3278_v29 = vor.u32 %v4847_v24, %v3277_v23  ;;  %v3269_v35 = vld [vmem:[%s7844_s1 + $0x40] sm:$0xf] }
   0x8   :  { %v3405_v28 = vld [vmem:[%s7844_s1 + $0x150] sm:$0xf]  ;;  %2524 = vmatpush.bf16.msra.mxu0 %v3286_v16  ;;  %v4879_v30 = vld [vmem:[%s7844_s1 + $0x154] sm:$0xf0]  ;;  %v3342_v33 = vor.u32 %v4863_v27, %v3341_v26  ;;  %v4845_v36 = vld [vmem:[%s7844_s1 + $0x44] sm:$0xf0] }
   0x9   :  { %v3469_v31 = vld [vmem:[%s7844_s1 + $0x1d0] sm:$0xf]  ;;  %v4895_v32 = vld [vmem:[%s7844_s1 + $0x1d4] sm:$0xf0]  ;;  %2537 = vmatpush.bf16.msra.mxu1 %v3350_v17  ;;  %v3406_v34 = vor.u32 %v4879_v30, %v3405_v28  ;;  %v3333_v37 = vld [vmem:[%s7844_s1 + $0xc0] sm:$0xf]  ;;  %v3270_v44 = vor.u32 %v4845_v36, %v3269_v35 }
   0xa   :  { %2550 = vmatpush.bf16.msra.mxu2 %v3414_v21  ;;  %v3470_v38 = vor.u32 %v4895_v32, %v3469_v31  ;;  %v4861_v39 = vld [vmem:[%s7844_s1 + $0xc4] sm:$0xf0]  ;;  %v3397_v40 = vld [vmem:[%s7844_s1 + $0x140] sm:$0xf]  ;;  %v3261_v47 = vld [vmem:[%s7844_s1 + $0x30] sm:$0xf] }
   0xb   :  { %2563 = vmatpush.bf16.msra.mxu3 %v3478_v25  ;;  %v4877_v41 = vld [vmem:[%s7844_s1 + $0x144] sm:$0xf0]  ;;  %v3461_v42 = vld [vmem:[%s7844_s1 + $0x1c0] sm:$0xf]  ;;  %v3334_v45 = vor.u32 %v4861_v39, %v3333_v37  ;;  %v4843_v48 = vld [vmem:[%s7844_s1 + $0x34] sm:$0xf0] }
   0xc   :  { %v4893_v43 = vld [vmem:[%s7844_s1 + $0x1c4] sm:$0xf0]  ;;  %2525 = vmatpush.bf16.msra.mxu0 %v3278_v29  ;;  %v3398_v46 = vor.u32 %v4877_v41, %v3397_v40  ;;  %v3325_v49 = vld [vmem:[%s7844_s1 + $0xb0] sm:$0xf]  ;;  %v4859_v51 = vld [vmem:[%s7844_s1 + $0xb4] sm:$0xf0]  ;;  %v3262_v56 = vor.u32 %v4843_v48, %v3261_v47 }
   0xd   :  { %2538 = vmatpush.bf16.msra.mxu1 %v3342_v33  ;;  %v3462_v50 = vor.u32 %v4893_v43, %v3461_v42  ;;  %v3389_v52 = vld [vmem:[%s7844_s1 + $0x130] sm:$0xf]  ;;  %v4875_v53 = vld [vmem:[%s7844_s1 + $0x134] sm:$0xf0]  ;;  %v3326_v57 = vor.u32 %v4859_v51, %v3325_v49  ;;  %v3253_v59 = vld [vmem:[%s7844_s1 + $0x20] sm:$0xf] }
   0xe   :  { %2551 = vmatpush.bf16.msra.mxu2 %v3406_v34  ;;  %v3453_v54 = vld [vmem:[%s7844_s1 + $0x1b0] sm:$0xf]  ;;  %v4891_v55 = vld [vmem:[%s7844_s1 + $0x1b4] sm:$0xf0]  ;;  %v3390_v58 = vor.u32 %v4875_v53, %v3389_v52  ;;  %v4841_v60 = vld [vmem:[%s7844_s1 + $0x24] sm:$0xf0] }
   0xf   :  { %2564 = vmatpush.bf16.msra.mxu3 %v3470_v38  ;;  %v3317_v61 = vld [vmem:[%s7844_s1 + $0xa0] sm:$0xf]  ;;  %v3454_v62 = vor.u32 %v4891_v55, %v3453_v54  ;;  %v4857_v63 = vld [vmem:[%s7844_s1 + $0xa4] sm:$0xf0]  ;;  %v3254_v4 = vor.u32 %v4841_v60, %v3253_v59  ;;  %v3245_v7 = vld [vmem:[%s7844_s1 + $0x10] sm:$0xf] }
  0x10   :  { %2526 = vmatpush.bf16.msra.mxu0 %v3270_v44  ;;  %v3381_v0 = vld [vmem:[%s7844_s1 + $0x120] sm:$0xf]  ;;  %v4873_v1 = vld [vmem:[%s7844_s1 + $0x124] sm:$0xf0]  ;;  %v3318_v5 = vor.u32 %v4857_v63, %v3317_v61  ;;  %v4839_v8 = vld [vmem:[%s7844_s1 + $0x14] sm:$0xf0] }
  0x11   :  { %2539 = vmatpush.bf16.msra.mxu1 %v3334_v45  ;;  %v3445_v2 = vld [vmem:[%s7844_s1 + $0x1a0] sm:$0xf]  ;;  %v4889_v3 = vld [vmem:[%s7844_s1 + $0x1a4] sm:$0xf0]  ;;  %v3382_v6 = vor.u32 %v4873_v1, %v3381_v0  ;;  %v3309_v9 = vld [vmem:[%s7844_s1 + $0x90] sm:$0xf]  ;;  %v3246_v16 = vor.u32 %v4839_v8, %v3245_v7 }
  0x12   :  { %2552 = vmatpush.bf16.msra.mxu2 %v3398_v46  ;;  %v3446_v10 = vor.u32 %v4889_v3, %v3445_v2  ;;  %v4855_v11 = vld [vmem:[%s7844_s1 + $0x94] sm:$0xf0]  ;;  %v3373_v12 = vld [vmem:[%s7844_s1 + $0x110] sm:$0xf]  ;;  %v3237_v17 = vld [vmem:[%s7844_s1] sm:$0xf] }
  0x13   :  { %2565 = vmatpush.bf16.msra.mxu3 %v3462_v50  ;;  %v4871_v13 = vld [vmem:[%s7844_s1 + $0x114] sm:$0xf0]  ;;  %v3437_v14 = vld [vmem:[%s7844_s1 + $0x190] sm:$0xf]  ;;  %v4837_v18 = vld [vmem:[%s7844_s1 + $0x4] sm:$0xf0]  ;;  %v3310_v19 = vor.u32 %v4855_v11, %v3309_v9 }
  0x14   :  { %2527 = vmatpush.bf16.msra.mxu0 %v3262_v56  ;;  %v4887_v15 = vld [vmem:[%s7844_s1 + $0x194] sm:$0xf0]  ;;  %v3374_v20 = vor.u32 %v4871_v13, %v3373_v12  ;;  %v3301_v21 = vld [vmem:[%s7844_s1 + $0x80] sm:$0xf]  ;;  %v4853_v22 = vld [vmem:[%s7844_s1 + $0x84] sm:$0xf0]  ;;  %v3238_v31 = vor.u32 %v4837_v18, %v3237_v17 }
  0x15   :  { %2540 = vmatpush.bf16.msra.mxu1 %v3326_v57  ;;  %v3365_v23 = vld [vmem:[%s7844_s1 + $0x100] sm:$0xf]  ;;  %v3438_v24 = vor.u32 %v4887_v15, %v3437_v14  ;;  %v4869_v25 = vld [vmem:[%s7844_s1 + $0x104] sm:$0xf0]  ;;  %v3549_v26 = vld [vmem:[%s7844_s1 + $0x270] sm:$0xf]  ;;  %v3302_v35 = vor.u32 %v4853_v22, %v3301_v21 }
  0x16   :  { %2553 = vmatpush.bf16.msra.mxu2 %v3390_v58  ;;  %v4915_v27 = vld [vmem:[%s7844_s1 + $0x274] sm:$0xf0]  ;;  %v3613_v28 = vld [vmem:[%s7844_s1 + $0x2f0] sm:$0xf]  ;;  %v3429_v33 = vld [vmem:[%s7844_s1 + $0x180] sm:$0xf]  ;;  %v3366_v36 = vor.u32 %v4869_v25, %v3365_v23 }
  0x17   :  { %2566 = vmatpush.bf16.msra.mxu3 %v3454_v62  ;;  %v4931_v29 = vld [vmem:[%s7844_s1 + $0x2f4] sm:$0xf0]  ;;  %v3677_v30 = vld [vmem:[%s7844_s1 + $0x370] sm:$0xf]  ;;  %v4885_v34 = vld [vmem:[%s7844_s1 + $0x184] sm:$0xf0]  ;;  %v3550_v39 = vor.u32 %v4915_v27, %v3549_v26 }
  0x18   :  { %2528 = vmatpush.bf16.msra.mxu0 %v3254_v4  ;;  %v4947_v32 = vld [vmem:[%s7844_s1 + $0x374] sm:$0xf0]  ;;  %v3741_v37 = vld [vmem:[%s7844_s1 + $0x3f0] sm:$0xf]  ;;  %v3614_v40 = vor.u32 %v4931_v29, %v3613_v28  ;;  %v3541_v41 = vld [vmem:[%s7844_s1 + $0x260] sm:$0xf]  ;;  %v3430_v43 = vor.u32 %v4885_v34, %v3429_v33 }
  0x19   :  { %2541 = vmatpush.bf16.msra.mxu1 %v3318_v5  ;;  %v4963_v38 = vld [vmem:[%s7844_s1 + $0x3f4] sm:$0xf0]  ;;  %v3678_v42 = vor.u32 %v4947_v32, %v3677_v30  ;;  %v4913_v44 = vld [vmem:[%s7844_s1 + $0x264] sm:$0xf0]  ;;  %v3605_v45 = vld [vmem:[%s7844_s1 + $0x2e0] sm:$0xf] }
  0x1a   :  { %2554 = vmatpush.bf16.msra.mxu2 %v3382_v6  ;;  %v4929_v46 = vld [vmem:[%s7844_s1 + $0x2e4] sm:$0xf0]  ;;  %v3742_v47 = vor.u32 %v4963_v38, %v3741_v37  ;;  %v3669_v48 = vld [vmem:[%s7844_s1 + $0x360] sm:$0xf]  ;;  %v3542_v52 = vor.u32 %v4913_v44, %v3541_v41  ;;  %v3533_v54 = vld [vmem:[%s7844_s1 + $0x250] sm:$0xf] }
  0x1b   :  { %2567 = vmatpush.bf16.msra.mxu3 %v3446_v10  ;;  %v4945_v49 = vld [vmem:[%s7844_s1 + $0x364] sm:$0xf0]  ;;  %v3733_v50 = vld [vmem:[%s7844_s1 + $0x3e0] sm:$0xf]  ;;  %v3606_v53 = vor.u32 %v4929_v46, %v3605_v45  ;;  %v4911_v55 = vld [vmem:[%s7844_s1 + $0x254] sm:$0xf0] }
  0x1c   :  { %2529 = vmatpush.bf16.msra.mxu0 %v3246_v16  ;;  %v4961_v51 = vld [vmem:[%s7844_s1 + $0x3e4] sm:$0xf0]  ;;  %v3670_v56 = vor.u32 %v4945_v49, %v3669_v48  ;;  %v3597_v57 = vld [vmem:[%s7844_s1 + $0x2d0] sm:$0xf]  ;;  %v4927_v58 = vld [vmem:[%s7844_s1 + $0x2d4] sm:$0xf0]  ;;  %v3534_v3 = vor.u32 %v4911_v55, %v3533_v54 }
  0x1d   :  { %2542 = vmatpush.bf16.msra.mxu1 %v3310_v19  ;;  %v17_v59 = vld [vmem:[%s7845_s0 + $0x8] sm:$0xff]  ;;  %v3734_v60 = vor.u32 %v4961_v51, %v3733_v50  ;;  %v3661_v61 = vld [vmem:[%s7844_s1 + $0x350] sm:$0xf]  ;;  %v4943_v62 = vld [vmem:[%s7844_s1 + $0x354] sm:$0xf0]  ;;  %v3598_v4 = vor.u32 %v4927_v58, %v3597_v57 }
  0x1e   :  { %2555 = vmatpush.bf16.msra.mxu2 %v3374_v20  ;;  %v450_v63 = vunpack.c.l.b16 %v17_v59  ;;  %v451_v0 = vunpack.c.h.b16 %v17_v59  ;;  %v3725_v1 = vld [vmem:[%s7844_s1 + $0x3d0] sm:$0xf]  ;;  %v4959_v2 = vld [vmem:[%s7844_s1 + $0x3d4] sm:$0xf0]  ;;  %v3525_v5 = vld [vmem:[%s7844_s1 + $0x240] sm:$0xf]  ;;  %v3662_v8 = vor.u32 %v4943_v62, %v3661_v61 }
  0x1f   :  { %2568 = vmatpush.bf16.msra.mxu3 %v3438_v24  ;;  %v16_v7 = vld [vmem:[%s7845_s0] sm:$0xff]  ;;  %v4909_v9 = vld [vmem:[%s7844_s1 + $0x244] sm:$0xf0]  ;;  %v3726_v15 = vor.u32 %v4959_v2, %v3725_v1  ;;  %v3517_v24 = vld [vmem:[%s7844_s1 + $0x230] sm:$0xf] }
  0x20   :  { %2530 = vmatpush.bf16.msra.mxu0 %v3238_v31  ;;  %v5532_v6 = vpack.c.b16 %v450_v63, %v450_v63  ;;  %v3589_v10 = vld [vmem:[%s7844_s1 + $0x2c0] sm:$0xf]  ;;  %v4925_v11 = vld [vmem:[%s7844_s1 + $0x2c4] sm:$0xf0]  ;;  %v448_v12 = vunpack.c.l.b16 %v16_v7  ;;  %v5546_v13 = vpack.c.b16 %v451_v0, %v451_v0  ;;  %v449_v14 = vunpack.c.h.b16 %v16_v7  ;;  %v4907_v26 = vld [vmem:[%s7844_s1 + $0x234] sm:$0xf0] }
  0x21   :  { %2543 = vmatpush.bf16.msra.mxu1 %v3302_v35  ;;  %v3653_v16 = vld [vmem:[%s7844_s1 + $0x340] sm:$0xf]  ;;  %v4941_v17 = vld [vmem:[%s7844_s1 + $0x344] sm:$0xf0]  ;;  %v3526_v22 = vor.u32 %v4909_v9, %v3525_v5  ;;  %v3590_v23 = vor.u32 %v4925_v11, %v3589_v10  ;;  %v3581_v27 = vld [vmem:[%s7844_s1 + $0x2b0] sm:$0xf]  ;;  %v3518_v34 = vor.u32 %v4907_v26, %v3517_v24 }
  0x22   :  { %2556 = vmatpush.bf16.msra.mxu2 %v3366_v36  ;;  %v3717_v18 = vld [vmem:[%s7844_s1 + $0x3c0] sm:$0xf]  ;;  %v4957_v19 = vld [vmem:[%s7844_s1 + $0x3c4] sm:$0xf0]  ;;  %v5561_v20 = vpack.c.b16 %v448_v12, %v448_v12  ;;  %v5564_v21 = vpack.c.b16 %v449_v14, %v449_v14  ;;  %v3654_v25 = vor.u32 %v4941_v17, %v3653_v16  ;;  %v4923_v28 = vld [vmem:[%s7844_s1 + $0x2b4] sm:$0xf0] }
  0x23   :  { %2569 = vmatpush.bf16.msra.mxu3 %v3430_v43  ;;  %v3718_v29 = vor.u32 %v4957_v19, %v3717_v18  ;;  %v3645_v30 = vld [vmem:[%s7844_s1 + $0x330] sm:$0xf]  ;;  %v4939_v31 = vld [vmem:[%s7844_s1 + $0x334] sm:$0xf0]  ;;  %v3582_v35 = vor.u32 %v4923_v28, %v3581_v27  ;;  %v3509_v36 = vld [vmem:[%s7844_s1 + $0x220] sm:$0xf] }
  0x24   :  { %2575 = vmatpush.bf16.msrb.mxu0 %v3550_v39  ;;  %2544 = vmatmul.bf16.vlgmr.msra.gmra.mxu1 %v5564_v21  ;;  %v3709_v32 = vld [vmem:[%s7844_s1 + $0x3b0] sm:$0xf]  ;;  %v4955_v33 = vld [vmem:[%s7844_s1 + $0x3b4] sm:$0xf0]  ;;  %v3646_v37 = vor.u32 %v4939_v31, %v3645_v30  ;;  %v4905_v38 = vld [vmem:[%s7844_s1 + $0x224] sm:$0xf0] }
  0x25   :  { %2588 = vmatpush.bf16.msrb.mxu1 %v3614_v40  ;;  %2557 = vmatmul.bf16.vlgmr.msra.gmra.mxu2 %v5532_v6  ;;  %v3573_v39 = vld [vmem:[%s7844_s1 + $0x2a0] sm:$0xf]  ;;  %v4921_v40 = vld [vmem:[%s7844_s1 + $0x2a4] sm:$0xf0]  ;;  %v3710_v41 = vor.u32 %v4955_v33, %v3709_v32  ;;  %v3510_v46 = vor.u32 %v4905_v38, %v3509_v36  ;;  %v3501_v48 = vld [vmem:[%s7844_s1 + $0x210] sm:$0xf] }
  0x26   :  { %2601 = vmatpush.bf16.msrb.mxu2 %v3678_v42  ;;  %2570 = vmatmul.bf16.vlgmr.msra.gmra.mxu3 %v5546_v13  ;;  %v3637_v42 = vld [vmem:[%s7844_s1 + $0x320] sm:$0xf]  ;;  %v4937_v43 = vld [vmem:[%s7844_s1 + $0x324] sm:$0xf0]  ;;  %v4903_v50 = vld [vmem:[%s7844_s1 + $0x214] sm:$0xf0] }
  0x27   :  { %2614 = vmatpush.bf16.msrb.mxu3 %v3742_v47  ;;  %2531 = vmatmul.bf16.vlgmr.msra.gmra.mxu0 %v5561_v20  ;;  %v3701_v44 = vld [vmem:[%s7844_s1 + $0x3a0] sm:$0xf]  ;;  %v4953_v45 = vld [vmem:[%s7844_s1 + $0x3a4] sm:$0xf0]  ;;  %v3574_v47 = vor.u32 %v4921_v40, %v3573_v39  ;;  %v3638_v49 = vor.u32 %v4937_v43, %v3637_v42  ;;  %v3565_v51 = vld [vmem:[%s7844_s1 + $0x290] sm:$0xf] }
  0x28   :  { %2576 = vmatpush.bf16.msrb.mxu0 %v3542_v52  ;;  %v4919_v52 = vld [vmem:[%s7844_s1 + $0x294] sm:$0xf0]  ;;  %v3629_v54 = vld [vmem:[%s7844_s1 + $0x310] sm:$0xf]  ;;  %v3493_v58 = vld [vmem:[%s7844_s1 + $0x200] sm:$0xf] }
  0x29   :  { %2589 = vmatpush.bf16.msrb.mxu1 %v3606_v53  ;;  %v3702_v53 = vor.u32 %v4953_v45, %v3701_v44  ;;  %v4935_v55 = vld [vmem:[%s7844_s1 + $0x314] sm:$0xf0]  ;;  %v4901_v59 = vld [vmem:[%s7844_s1 + $0x204] sm:$0xf0]  ;;  %v3566_v61 = vor.u32 %v4919_v52, %v3565_v51  ;;  %v3557_v62 = vld [vmem:[%s7844_s1 + $0x280] sm:$0xf] }
  0x2a   :  { %2602 = vmatpush.bf16.msrb.mxu2 %v3670_v56  ;;  %v3693_v56 = vld [vmem:[%s7844_s1 + $0x390] sm:$0xf]  ;;  %v4951_v57 = vld [vmem:[%s7844_s1 + $0x394] sm:$0xf0]  ;;  %v4917_v63 = vld [vmem:[%s7844_s1 + $0x284] sm:$0xf0]  ;;  %v3630_v1 = vor.u32 %v4935_v55, %v3629_v54 }
  0x2b   :  { %2615 = vmatpush.bf16.msrb.mxu3 %v3734_v60  ;;  %v3502_v60 = vor.u32 %v4903_v50, %v3501_v48  ;;  %v18_v0 = vld [vmem:[%s7845_s0 + $0x10] sm:$0xff]  ;;  %v3621_v2 = vld [vmem:[%s7844_s1 + $0x300] sm:$0xf]  ;;  %v3694_v5 = vor.u32 %v4951_v57, %v3693_v56  ;;  %v4995_v10 = vld [vmem:[%s7844_s1 + $0x4f4] sm:$0xf0]  ;;  %v3558_v16 = vor.u32 %v4917_v63, %v3557_v62 }
  0x2c   :  { %2577 = vmatpush.bf16.msrb.mxu0 %v3534_v3  ;;  %v4933_v3 = vld [vmem:[%s7844_s1 + $0x304] sm:$0xf0]  ;;  %v3805_v7 = vld [vmem:[%s7844_s1 + $0x470] sm:$0xf]  ;;  %v5011_v12 = vld [vmem:[%s7844_s1 + $0x574] sm:$0xf0]  ;;  %v452_v14 = vunpack.c.l.b16 %v18_v0  ;;  %v453_v26 = vunpack.c.h.b16 %v18_v0 }
  0x2d   :  { %2590 = vmatpush.bf16.msrb.mxu1 %v3598_v4  ;;  %v19_v4 = vld [vmem:[%s7845_s0 + $0x18] sm:$0xff]  ;;  %v3869_v9 = vld [vmem:[%s7844_s1 + $0x4f0] sm:$0xf]  ;;  %v3685_v17 = vld [vmem:[%s7844_s1 + $0x380] sm:$0xf] }
  0x2e   :  { %2603 = vmatpush.bf16.msrb.mxu2 %v3662_v8  ;;  %v4979_v8 = vld [vmem:[%s7844_s1 + $0x474] sm:$0xf0]  ;;  %v3933_v11 = vld [vmem:[%s7844_s1 + $0x570] sm:$0xf]  ;;  %v4949_v18 = vld [vmem:[%s7844_s1 + $0x384] sm:$0xf0]  ;;  %v454_v19 = vunpack.c.l.b16 %v19_v4  ;;  %v3870_v27 = vor.u32 %v4995_v10, %v3869_v9  ;;  %v5712_v36 = vpack.c.b16 %v452_v14, %v452_v14  ;;  %v5722_v43 = vpack.c.b16 %v453_v26, %v453_v26 }
  0x2f   :  { %2616 = vmatpush.bf16.msrb.mxu3 %v3726_v15  ;;  %v3494_v15 = vor.u32 %v4901_v59, %v3493_v58  ;;  %v3997_v24 = vld [vmem:[%s7844_s1 + $0x5f0] sm:$0xf]  ;;  %v3934_v28 = vor.u32 %v5011_v12, %v3933_v11  ;;  %v4977_v30 = vld [vmem:[%s7844_s1 + $0x464] sm:$0xf0]  ;;  %v3861_v31 = vld [vmem:[%s7844_s1 + $0x4e0] sm:$0xf]  ;;  %v3686_v32 = vor.u32 %v4949_v18, %v3685_v17 }
  0x30   :  { %2578 = vmatpush.bf16.msrb.mxu0 %v3526_v22  ;;  %v3622_v22 = vor.u32 %v4933_v3, %v3621_v2  ;;  %v4993_v33 = vld [vmem:[%s7844_s1 + $0x4e4] sm:$0xf0]  ;;  %v5714_v39 = vpack.c.b16 %v454_v19, %v454_v19  ;;  %v3853_v48 = vld [vmem:[%s7844_s1 + $0x4d0] sm:$0xf]  ;;  %v4991_v50 = vld [vmem:[%s7844_s1 + $0x4d4] sm:$0xf0] }
  0x31   :  { %2591 = vmatpush.bf16.msrb.mxu1 %v3590_v23  ;;  %v3806_v23 = vor.u32 %v4979_v8, %v3805_v7  ;;  %v5025_v42 = vld [vmem:[%s7844_s1 + $0x5e4] sm:$0xf0]  ;;  %v3862_v44 = vor.u32 %v4993_v33, %v3861_v31  ;;  %v3917_v51 = vld [vmem:[%s7844_s1 + $0x550] sm:$0xf]  ;;  %v5007_v52 = vld [vmem:[%s7844_s1 + $0x554] sm:$0xf0]  ;;  %v3854_v57 = vor.u32 %v4991_v50, %v3853_v48 }
  0x32   :  { %2604 = vmatpush.bf16.msrb.mxu2 %v3654_v25  ;;  %v5027_v25 = vld [vmem:[%s7844_s1 + $0x5f4] sm:$0xf0]  ;;  %v3981_v55 = vld [vmem:[%s7844_s1 + $0x5d0] sm:$0xf]  ;;  %v3918_v58 = vor.u32 %v5007_v52, %v3917_v51  ;;  %v3781_v59 = vld [vmem:[%s7844_s1 + $0x440] sm:$0xf] }
  0x33   :  { %2617 = vmatpush.bf16.msrb.mxu3 %v3718_v29  ;;  %v3797_v29 = vld [vmem:[%s7844_s1 + $0x460] sm:$0xf]  ;;  %v3998_v38 = vor.u32 %v5027_v25, %v3997_v24  ;;  %v5023_v56 = vld [vmem:[%s7844_s1 + $0x5d4] sm:$0xf0]  ;;  %v4989_v62 = vld [vmem:[%s7844_s1 + $0x4c4] sm:$0xf0] }
  0x34   :  { %2579 = vmatpush.bf16.msrb.mxu0 %v3518_v34  ;;  %v3925_v34 = vld [vmem:[%s7844_s1 + $0x560] sm:$0xf]  ;;  %v3798_v40 = vor.u32 %v4977_v30, %v3797_v29  ;;  %v5005_v0 = vld [vmem:[%s7844_s1 + $0x544] sm:$0xf0]  ;;  %v3773_v8 = vld [vmem:[%s7844_s1 + $0x430] sm:$0xf] }
  0x35   :  { %2592 = vmatpush.bf16.msrb.mxu1 %v3582_v35  ;;  %v5009_v35 = vld [vmem:[%s7844_s1 + $0x564] sm:$0xf0]  ;;  %v3909_v63 = vld [vmem:[%s7844_s1 + $0x540] sm:$0xf]  ;;  %v4971_v9 = vld [vmem:[%s7844_s1 + $0x434] sm:$0xf0] }
  0x36   :  { %2605 = vmatpush.bf16.msrb.mxu2 %v3646_v37  ;;  %v455_v37 = vunpack.c.h.b16 %v19_v4  ;;  %v3926_v45 = vor.u32 %v5009_v35, %v3925_v34  ;;  %v3973_v3 = vld [vmem:[%s7844_s1 + $0x5c0] sm:$0xf]  ;;  %v5021_v4 = vld [vmem:[%s7844_s1 + $0x5c4] sm:$0xf0]  ;;  %v3910_v7 = vor.u32 %v5005_v0, %v3909_v63  ;;  %v3837_v10 = vld [vmem:[%s7844_s1 + $0x4b0] sm:$0xf] }
  0x37   :  { %2618 = vmatpush.bf16.msrb.mxu3 %v3710_v41  ;;  %v3989_v41 = vld [vmem:[%s7844_s1 + $0x5e0] sm:$0xf]  ;;  %v4987_v11 = vld [vmem:[%s7844_s1 + $0x4b4] sm:$0xf0]  ;;  %v3901_v12 = vld [vmem:[%s7844_s1 + $0x530] sm:$0xf] }
  0x38   :  { %2580 = vmatpush.bf16.msrb.mxu0 %v3510_v46  ;;  %v3789_v46 = vld [vmem:[%s7844_s1 + $0x450] sm:$0xf]  ;;  %v5003_v14 = vld [vmem:[%s7844_s1 + $0x534] sm:$0xf0]  ;;  %v3838_v19 = vor.u32 %v4987_v11, %v3837_v10  ;;  %v4969_v24 = vld [vmem:[%s7844_s1 + $0x424] sm:$0xf0] }
  0x39   :  { %2593 = vmatpush.bf16.msrb.mxu1 %v3574_v47  ;;  %v4975_v47 = vld [vmem:[%s7844_s1 + $0x454] sm:$0xf0]  ;;  %v3965_v17 = vld [vmem:[%s7844_s1 + $0x5b0] sm:$0xf]  ;;  %v3829_v25 = vld [vmem:[%s7844_s1 + $0x4a0] sm:$0xf] }
  0x3a   :  { %2606 = vmatpush.bf16.msrb.mxu2 %v3638_v49  ;;  %v5734_v49 = vpack.c.b16 %v455_v37, %v455_v37  ;;  %v3790_v54 = vor.u32 %v4975_v47, %v3789_v46  ;;  %v5019_v18 = vld [vmem:[%s7844_s1 + $0x5b4] sm:$0xf0]  ;;  %v4985_v26 = vld [vmem:[%s7844_s1 + $0x4a4] sm:$0xf0]  ;;  %v3957_v31 = vld [vmem:[%s7844_s1 + $0x5a0] sm:$0xf] }
  0x3b   :  { %2619 = vmatpush.bf16.msrb.mxu3 %v3702_v53  ;;  %v3990_v53 = vor.u32 %v5025_v42, %v3989_v41  ;;  %v3966_v29 = vor.u32 %v5019_v18, %v3965_v17  ;;  %v3830_v33 = vor.u32 %v4985_v26, %v3829_v25  ;;  %v3757_v35 = vld [vmem:[%s7844_s1 + $0x410] sm:$0xf]  ;;  %v4967_v37 = vld [vmem:[%s7844_s1 + $0x414] sm:$0xf0]  ;;  %v3749_v47 = vld [vmem:[%s7844_s1 + $0x400] sm:$0xf] }
  0x3c   :  { %2581 = vmatpush.bf16.msrb.mxu0 %v3502_v60  ;;  %v4973_v60 = vld [vmem:[%s7844_s1 + $0x444] sm:$0xf0]  ;;  %v3885_v41 = vld [vmem:[%s7844_s1 + $0x510] sm:$0xf]  ;;  %v4999_v42 = vld [vmem:[%s7844_s1 + $0x514] sm:$0xf0]  ;;  %v3758_v48 = vor.u32 %v4967_v37, %v3757_v35 }
  0x3d   :  { %2594 = vmatpush.bf16.msrb.mxu1 %v3566_v61  ;;  %v3845_v61 = vld [vmem:[%s7844_s1 + $0x4c0] sm:$0xf]  ;;  %v3782_v2 = vor.u32 %v4973_v60, %v3781_v59  ;;  %v5015_v46 = vld [vmem:[%s7844_s1 + $0x594] sm:$0xf0]  ;;  %v4965_v50 = vld [vmem:[%s7844_s1 + $0x404] sm:$0xf0] }
  0x3e   :  { %2607 = vmatpush.bf16.msrb.mxu2 %v3630_v1  ;;  %v3982_v1 = vor.u32 %v5023_v56, %v3981_v55  ;;  %v3813_v51 = vld [vmem:[%s7844_s1 + $0x480] sm:$0xf]  ;;  %v4981_v52 = vld [vmem:[%s7844_s1 + $0x484] sm:$0xf0]  ;;  %v4061_v59 = vld [vmem:[%s7844_s1 + $0x670] sm:$0xf] }
  0x3f   :  { %2620 = vmatpush.bf16.msrb.mxu3 %v3694_v5  ;;  %v3846_v5 = vor.u32 %v4989_v62, %v3845_v61  ;;  %v3877_v55 = vld [vmem:[%s7844_s1 + $0x500] sm:$0xf]  ;;  %v5043_v60 = vld [vmem:[%s7844_s1 + $0x674] sm:$0xf0]  ;;  %v4125_v62 = vld [vmem:[%s7844_s1 + $0x6f0] sm:$0xf] }
  0x40   :  { %2582 = vmatpush.bf16.msrb.mxu0 %v3494_v15  ;;  %v3974_v15 = vor.u32 %v5021_v4, %v3973_v3  ;;  %v20_v56 = vld [vmem:[%s7845_s0 + $0x20] sm:$0xff]  ;;  %v5059_v63 = vld [vmem:[%s7844_s1 + $0x6f4] sm:$0xf0]  ;;  %v4189_v0 = vld [vmem:[%s7844_s1 + $0x770] sm:$0xf]  ;;  %v4062_v11 = vor.u32 %v5043_v60, %v4061_v59 }
  0x41   :  { %2595 = vmatpush.bf16.msrb.mxu1 %v3558_v16  ;;  %v3774_v16 = vor.u32 %v4971_v9, %v3773_v8  ;;  %v3941_v3 = vld [vmem:[%s7844_s1 + $0x580] sm:$0xf]  ;;  %v5013_v4 = vld [vmem:[%s7844_s1 + $0x584] sm:$0xf0]  ;;  %v3814_v8 = vor.u32 %v4981_v52, %v3813_v51  ;;  %v457_v10 = vunpack.c.h.b16 %v20_v56 }
  0x42   :  { %2608 = vmatpush.bf16.msrb.mxu2 %v3622_v22  ;;  %v3902_v22 = vor.u32 %v5003_v14, %v3901_v12  ;;  %v4126_v12 = vor.u32 %v5059_v63, %v4125_v62  ;;  %v4253_v14 = vld [vmem:[%s7844_s1 + $0x7f0] sm:$0xf]  ;;  %v3942_v18 = vor.u32 %v5013_v4, %v3941_v3  ;;  %v5057_v26 = vld [vmem:[%s7844_s1 + $0x6e4] sm:$0xf0]  ;;  %v5051_v4 = vld [vmem:[%s7844_s1 + $0x6b4] sm:$0xf0] }
  0x43   :  { %2621 = vmatpush.bf16.msrb.mxu3 %v3686_v32  ;;  %2583 = vmatmul.bf16.vlgmr.msrb.gmra.mxu0 %v5712_v36  ;;  %v5017_v32 = vld [vmem:[%s7844_s1 + $0x5a4] sm:$0xf0]  ;;  %v4093_v3 = vld [vmem:[%s7844_s1 + $0x6b0] sm:$0xf] }
  0x44   :  { %2627 = vmatpush.bf16.msra.mxu0 %v3806_v23  ;;  %2596 = vmatmul.bf16.vlgmr.msrb.gmra.mxu1 %v5722_v43  ;;  %v3765_v23 = vld [vmem:[%s7844_s1 + $0x420] sm:$0xf]  ;;  %v5085_v62 = vld [vmem:[%s7844_s1 + $0x7c4] sm:$0xf0] }
  0x45   :  { %2640 = vmatpush.bf16.msra.mxu1 %v3870_v27  ;;  %2609 = vmatmul.bf16.vlgmr.msrb.gmra.mxu2 %v5714_v39  ;;  %v3893_v27 = vld [vmem:[%s7844_s1 + $0x520] sm:$0xf]  ;;  %v3766_v30 = vor.u32 %v4969_v24, %v3765_v23 }
  0x46   :  { %2653 = vmatpush.bf16.msra.mxu2 %v3934_v28  ;;  %2622 = vmatmul.bf16.vlgmr.msrb.gmra.mxu3 %v5734_v49  ;;  %v5001_v28 = vld [vmem:[%s7844_s1 + $0x524] sm:$0xf0]  ;;  %v4117_v23 = vld [vmem:[%s7844_s1 + $0x6e0] sm:$0xf] }
  0x47   :  { %2666 = vmatpush.bf16.msra.mxu3 %v3998_v38  ;;  %v3894_v34 = vor.u32 %v5001_v28, %v3893_v27  ;;  %v3821_v38 = vld [vmem:[%s7844_s1 + $0x490] sm:$0xf]  ;;  %v4181_v27 = vld [vmem:[%s7844_s1 + $0x760] sm:$0xf]  ;;  %v5073_v28 = vld [vmem:[%s7844_s1 + $0x764] sm:$0xf0]  ;;  %v4118_v35 = vor.u32 %v5057_v26, %v4117_v23 }
  0x48   :  { %2628 = vmatpush.bf16.msra.mxu0 %v3798_v40  ;;  %v4983_v40 = vld [vmem:[%s7844_s1 + $0x494] sm:$0xf0]  ;;  %v4182_v37 = vor.u32 %v5073_v28, %v4181_v27  ;;  %v4213_v27 = vld [vmem:[%s7844_s1 + $0x7a0] sm:$0xf]  ;;  %v5081_v28 = vld [vmem:[%s7844_s1 + $0x7a4] sm:$0xf0] }
  0x49   :  { %2641 = vmatpush.bf16.msra.mxu1 %v3862_v44  ;;  %v3958_v44 = vor.u32 %v5017_v32, %v3957_v31 }
  0x4a   :  { %2654 = vmatpush.bf16.msra.mxu2 %v3926_v45  ;;  %v3949_v45 = vld [vmem:[%s7844_s1 + $0x590] sm:$0xf] }
  0x4b   :  { %2667 = vmatpush.bf16.msra.mxu3 %v3990_v53  ;;  %v3822_v53 = vor.u32 %v4983_v40, %v3821_v38  ;;  %v3950_v61 = vor.u32 %v5015_v46, %v3949_v45  ;;  %v4045_v38 = vld [vmem:[%s7844_s1 + $0x650] sm:$0xf]  ;;  %v5039_v40 = vld [vmem:[%s7844_s1 + $0x654] sm:$0xf0] }
  0x4c   :  { %2629 = vmatpush.bf16.msra.mxu0 %v3790_v54  ;;  %v3886_v54 = vor.u32 %v4999_v42, %v3885_v41  ;;  %v4109_v41 = vld [vmem:[%s7844_s1 + $0x6d0] sm:$0xf]  ;;  %v5055_v42 = vld [vmem:[%s7844_s1 + $0x6d4] sm:$0xf0] }
  0x4d   :  { %2642 = vmatpush.bf16.msra.mxu1 %v3854_v57  ;;  %v21_v57 = vld [vmem:[%s7845_s0 + $0x28] sm:$0xff]  ;;  %v5071_v45 = vld [vmem:[%s7844_s1 + $0x754] sm:$0xf0]  ;;  %v4110_v51 = vor.u32 %v5055_v42, %v4109_v41  ;;  %v4214_v41 = vor.u32 %v5081_v28, %v4213_v27  ;;  %v4205_v42 = vld [vmem:[%s7844_s1 + $0x790] sm:$0xf] }
  0x4e   :  { %2655 = vmatpush.bf16.msra.mxu2 %v3918_v58  ;;  %v4997_v58 = vld [vmem:[%s7844_s1 + $0x504] sm:$0xf0]  ;;  %v4437_v27 = vld [vmem:[%s7844_s1 + $0x960] sm:$0xf] }
  0x4f   :  { %2668 = vmatpush.bf16.msra.mxu3 %v3982_v1  ;;  %v3750_v1 = vor.u32 %v4965_v50, %v3749_v47  ;;  %v3878_v9 = vor.u32 %v4997_v58, %v3877_v55  ;;  %v4046_v47 = vor.u32 %v5039_v40, %v4045_v38  ;;  %v5087_v50 = vld [vmem:[%s7844_s1 + $0x7d4] sm:$0xf0]  ;;  %v4101_v55 = vld [vmem:[%s7844_s1 + $0x6c0] sm:$0xf]  ;;  %v5069_v58 = vld [vmem:[%s7844_s1 + $0x744] sm:$0xf0] }
  0x50   :  { %2630 = vmatpush.bf16.msra.mxu0 %v3782_v2  ;;  %v5075_v2 = vld [vmem:[%s7844_s1 + $0x774] sm:$0xf0]  ;;  %v4141_v38 = vld [vmem:[%s7844_s1 + $0x710] sm:$0xf]  ;;  %v5137_v28 = vld [vmem:[%s7844_s1 + $0x964] sm:$0xf0] }
  0x51   :  { %2643 = vmatpush.bf16.msra.mxu1 %v3846_v5  ;;  %v456_v5 = vunpack.c.l.b16 %v20_v56  ;;  %v4190_v17 = vor.u32 %v5075_v2, %v4189_v0  ;;  %v5053_v56 = vld [vmem:[%s7844_s1 + $0x6c4] sm:$0xf0]  ;;  %v5035_v2 = vld [vmem:[%s7844_s1 + $0x634] sm:$0xf0] }
  0x52   :  { %2656 = vmatpush.bf16.msra.mxu2 %v3910_v7  ;;  %v458_v7 = vunpack.c.l.b16 %v21_v57  ;;  %v4102_v63 = vor.u32 %v5053_v56, %v4101_v55  ;;  %v5063_v40 = vld [vmem:[%s7844_s1 + $0x714] sm:$0xf0]  ;;  %v5061_v56 = vld [vmem:[%s7844_s1 + $0x704] sm:$0xf0] }
  0x53   :  { %2669 = vmatpush.bf16.msra.mxu3 %v3974_v15  ;;  %v5091_v15 = vld [vmem:[%s7844_s1 + $0x7f4] sm:$0xf0]  ;;  %v5913_v24 = vpack.c.b16 %v456_v5, %v456_v5  ;;  %v4157_v5 = vld [vmem:[%s7844_s1 + $0x730] sm:$0xf] }
  0x54   :  { %2631 = vmatpush.bf16.msra.mxu0 %v3774_v16  ;;  %v459_v16 = vunpack.c.h.b16 %v21_v57  ;;  %v5915_v25 = vpack.c.b16 %v458_v7, %v458_v7  ;;  %v4165_v57 = vld [vmem:[%s7844_s1 + $0x740] sm:$0xf]  ;;  %v5067_v7 = vld [vmem:[%s7844_s1 + $0x734] sm:$0xf0] }
  0x55   :  { %2644 = vmatpush.bf16.msra.mxu1 %v3838_v19  ;;  %v4053_v19 = vld [vmem:[%s7844_s1 + $0x660] sm:$0xf]  ;;  %v4166_v0 = vor.u32 %v5069_v58, %v4165_v57  ;;  %v23_v55 = vld [vmem:[%s7845_s0 + $0x38] sm:$0xff]  ;;  %v4317_v57 = vld [vmem:[%s7844_s1 + $0x870] sm:$0xf] }
  0x56   :  { %2657 = vmatpush.bf16.msra.mxu2 %v3902_v22  ;;  %v5041_v22 = vld [vmem:[%s7844_s1 + $0x664] sm:$0xf0]  ;;  %v5928_v31 = vpack.c.b16 %v459_v16, %v459_v16  ;;  %v5107_v58 = vld [vmem:[%s7844_s1 + $0x874] sm:$0xf0] }
  0x57   :  { %2670 = vmatpush.bf16.msra.mxu3 %v3966_v29  ;;  %v4254_v29 = vor.u32 %v5091_v15, %v4253_v14  ;;  %v4054_v32 = vor.u32 %v5041_v22, %v4053_v19  ;;  %v4158_v14 = vor.u32 %v5067_v7, %v4157_v5  ;;  %v4021_v15 = vld [vmem:[%s7844_s1 + $0x620] sm:$0xf]  ;;  %v5033_v16 = vld [vmem:[%s7844_s1 + $0x624] sm:$0xf0] }
  0x58   :  { %2632 = vmatpush.bf16.msra.mxu0 %v3766_v30  ;;  %v5926_v30 = vpack.c.b16 %v457_v10, %v457_v10  ;;  %v4221_v10 = vld [vmem:[%s7844_s1 + $0x7b0] sm:$0xf]  ;;  %v4149_v19 = vld [vmem:[%s7844_s1 + $0x720] sm:$0xf]  ;;  %v5065_v22 = vld [vmem:[%s7844_s1 + $0x724] sm:$0xf0]  ;;  %v4022_v26 = vor.u32 %v5033_v16, %v4021_v15 }
  0x59   :  { %2645 = vmatpush.bf16.msra.mxu1 %v3830_v33  ;;  %v4245_v33 = vld [vmem:[%s7844_s1 + $0x7e0] sm:$0xf] }
  0x5a   :  { %2658 = vmatpush.bf16.msra.mxu2 %v3894_v34  ;;  %v5089_v34 = vld [vmem:[%s7844_s1 + $0x7e4] sm:$0xf0] }
  0x5b   :  { %2671 = vmatpush.bf16.msra.mxu3 %v3958_v44  ;;  %v4173_v44 = vld [vmem:[%s7844_s1 + $0x750] sm:$0xf]  ;;  %v4246_v46 = vor.u32 %v5089_v34, %v4245_v33  ;;  %v5031_v34 = vld [vmem:[%s7844_s1 + $0x614] sm:$0xf0] }
  0x5c   :  { %2633 = vmatpush.bf16.msra.mxu0 %v3758_v48  ;;  %v4237_v48 = vld [vmem:[%s7844_s1 + $0x7d0] sm:$0xf]  ;;  %v4174_v52 = vor.u32 %v5071_v45, %v4173_v44  ;;  %v5079_v44 = vld [vmem:[%s7844_s1 + $0x794] sm:$0xf0]  ;;  %v4005_v45 = vld [vmem:[%s7844_s1 + $0x600] sm:$0xf] }
  0x5d   :  { %2646 = vmatpush.bf16.msra.mxu1 %v3822_v53  ;;  %v4037_v53 = vld [vmem:[%s7844_s1 + $0x640] sm:$0xf]  ;;  %v4238_v59 = vor.u32 %v5087_v50, %v4237_v48  ;;  %v4013_v33 = vld [vmem:[%s7844_s1 + $0x610] sm:$0xf]  ;;  %v5045_v50 = vld [vmem:[%s7844_s1 + $0x684] sm:$0xf0] }
  0x5e   :  { %2659 = vmatpush.bf16.msra.mxu2 %v3886_v54  ;;  %v5037_v54 = vld [vmem:[%s7844_s1 + $0x644] sm:$0xf0]  ;;  %v4069_v48 = vld [vmem:[%s7844_s1 + $0x680] sm:$0xf] }
  0x5f   :  { %2672 = vmatpush.bf16.msra.mxu3 %v3950_v61  ;;  %v4038_v60 = vor.u32 %v5037_v54, %v4037_v53  ;;  %v4229_v61 = vld [vmem:[%s7844_s1 + $0x7c0] sm:$0xf]  ;;  %v22_v54 = vld [vmem:[%s7845_s0 + $0x30] sm:$0xff]  ;;  %v4070_v5 = vor.u32 %v5045_v50, %v4069_v48 }
  0x60   :  { %2634 = vmatpush.bf16.msra.mxu0 %v3750_v1  ;;  %v4029_v1 = vld [vmem:[%s7844_s1 + $0x630] sm:$0xf]  ;;  %v4133_v53 = vld [vmem:[%s7844_s1 + $0x700] sm:$0xf] }
  0x61   :  { %2647 = vmatpush.bf16.msra.mxu1 %v3814_v8  ;;  %v4230_v8 = vor.u32 %v5085_v62, %v4229_v61  ;;  %v5123_v61 = vld [vmem:[%s7844_s1 + $0x8f4] sm:$0xf0]  ;;  %v4445_v62 = vld [vmem:[%s7844_s1 + $0x970] sm:$0xf]  ;;  %v4134_v7 = vor.u32 %v5061_v56, %v4133_v53  ;;  %v5101_v56 = vld [vmem:[%s7844_s1 + $0x844] sm:$0xf0] }
  0x62   :  { %2660 = vmatpush.bf16.msra.mxu2 %v3878_v9  ;;  %v4030_v9 = vor.u32 %v5035_v2, %v4029_v1  ;;  %v4197_v1 = vld [vmem:[%s7844_s1 + $0x780] sm:$0xf]  ;;  %v5077_v2 = vld [vmem:[%s7844_s1 + $0x784] sm:$0xf0] }
  0x63   :  { %2673 = vmatpush.bf16.msra.mxu3 %v3942_v18  ;;  %2635 = vmatmul.bf16.vlgmr.msra.gmra.mxu0 %v5913_v24  ;;  %v5049_v18 = vld [vmem:[%s7844_s1 + $0x6a4] sm:$0xf0]  ;;  %v4198_v16 = vor.u32 %v5077_v2, %v4197_v1 }
  0x64   :  { %2679 = vmatpush.bf16.msrb.mxu0 %v4062_v11  ;;  %2648 = vmatmul.bf16.vlgmr.msra.gmra.mxu1 %v5926_v30  ;;  %v5083_v11 = vld [vmem:[%s7844_s1 + $0x7b4] sm:$0xf0] }
  0x65   :  { %2692 = vmatpush.bf16.msrb.mxu1 %v4126_v12  ;;  %2661 = vmatmul.bf16.vlgmr.msra.gmra.mxu2 %v5915_v25  ;;  %v4094_v12 = vor.u32 %v5051_v4, %v4093_v3  ;;  %v4222_v23 = vor.u32 %v5083_v11, %v4221_v10  ;;  %v460_v3 = vunpack.c.l.b16 %v22_v54  ;;  %v462_v4 = vunpack.c.l.b16 %v23_v55  ;;  %v4509_v11 = vld [vmem:[%s7844_s1 + $0x9f0] sm:$0xf] }
  0x66   :  { %2705 = vmatpush.bf16.msrb.mxu2 %v4190_v17  ;;  %2674 = vmatmul.bf16.vlgmr.msra.gmra.mxu3 %v5928_v31  ;;  %v4085_v17 = vld [vmem:[%s7844_s1 + $0x6a0] sm:$0xf] }
  0x67   :  { %2718 = vmatpush.bf16.msrb.mxu3 %v4254_v29  ;;  %v4086_v29 = vor.u32 %v5049_v18, %v4085_v17  ;;  %v4309_v17 = vld [vmem:[%s7844_s1 + $0x860] sm:$0xf]  ;;  %v5105_v18 = vld [vmem:[%s7844_s1 + $0x864] sm:$0xf0] }
  0x68   :  { %2680 = vmatpush.bf16.msrb.mxu0 %v4054_v32  ;;  %v4150_v32 = vor.u32 %v5065_v22, %v4149_v19  ;;  %v4373_v19 = vld [vmem:[%s7844_s1 + $0x8e0] sm:$0xf]  ;;  %v6123_v22 = vpack.c.b16 %v460_v3, %v460_v3  ;;  %v4285_v3 = vld [vmem:[%s7844_s1 + $0x830] sm:$0xf] }
  0x69   :  { %2693 = vmatpush.bf16.msrb.mxu1 %v4118_v35  ;;  %v4077_v35 = vld [vmem:[%s7844_s1 + $0x690] sm:$0xf] }
  0x6a   :  { %2706 = vmatpush.bf16.msrb.mxu2 %v4182_v37  ;;  %v5047_v37 = vld [vmem:[%s7844_s1 + $0x694] sm:$0xf0] }
  0x6b   :  { %2719 = vmatpush.bf16.msrb.mxu3 %v4246_v46  ;;  %v4014_v46 = vor.u32 %v5031_v34, %v4013_v33  ;;  %v4310_v34 = vor.u32 %v5105_v18, %v4309_v17  ;;  %v4277_v17 = vld [vmem:[%s7844_s1 + $0x820] sm:$0xf]  ;;  %v5097_v18 = vld [vmem:[%s7844_s1 + $0x824] sm:$0xf0] }
  0x6c   :  { %2681 = vmatpush.bf16.msrb.mxu0 %v4046_v47  ;;  %v5029_v47 = vld [vmem:[%s7844_s1 + $0x604] sm:$0xf0] }
  0x6d   :  { %2694 = vmatpush.bf16.msrb.mxu1 %v4110_v51  ;;  %v4078_v51 = vor.u32 %v5047_v37, %v4077_v35  ;;  %v4501_v35 = vld [vmem:[%s7844_s1 + $0x9e0] sm:$0xf]  ;;  %v5153_v37 = vld [vmem:[%s7844_s1 + $0x9e4] sm:$0xf0] }
  0x6e   :  { %2707 = vmatpush.bf16.msrb.mxu2 %v4174_v52  ;;  %v4142_v52 = vor.u32 %v5063_v40, %v4141_v38  ;;  %v4438_v40 = vor.u32 %v5137_v28, %v4437_v27  ;;  %v4502_v48 = vor.u32 %v5153_v37, %v4501_v35  ;;  %v4405_v27 = vld [vmem:[%s7844_s1 + $0x920] sm:$0xf]  ;;  %v5129_v28 = vld [vmem:[%s7844_s1 + $0x924] sm:$0xf0] }
  0x6f   :  { %2720 = vmatpush.bf16.msrb.mxu3 %v4238_v59  ;;  %v4206_v59 = vor.u32 %v5079_v44, %v4205_v42  ;;  %v5103_v42 = vld [vmem:[%s7844_s1 + $0x854] sm:$0xf0]  ;;  %v4365_v44 = vld [vmem:[%s7844_s1 + $0x8d0] sm:$0xf]  ;;  %v4469_v35 = vld [vmem:[%s7844_s1 + $0x9a0] sm:$0xf] }
  0x70   :  { %2682 = vmatpush.bf16.msrb.mxu0 %v4038_v60  ;;  %v4381_v60 = vld [vmem:[%s7844_s1 + $0x8f0] sm:$0xf]  ;;  %v5145_v37 = vld [vmem:[%s7844_s1 + $0x9a4] sm:$0xf0] }
  0x71   :  { %2695 = vmatpush.bf16.msrb.mxu1 %v4102_v63  ;;  %v4006_v63 = vor.u32 %v5029_v47, %v4005_v45  ;;  %v4382_v10 = vor.u32 %v5123_v61, %v4381_v60  ;;  %v5119_v45 = vld [vmem:[%s7844_s1 + $0x8d4] sm:$0xf0]  ;;  %v5133_v60 = vld [vmem:[%s7844_s1 + $0x944] sm:$0xf0] }
  0x72   :  { %2708 = vmatpush.bf16.msrb.mxu2 %v4166_v0  ;;  %v5139_v0 = vld [vmem:[%s7844_s1 + $0x974] sm:$0xf0]  ;;  %v4366_v53 = vor.u32 %v5119_v45, %v4365_v44  ;;  %v4333_v44 = vld [vmem:[%s7844_s1 + $0x890] sm:$0xf] }
  0x73   :  { %2721 = vmatpush.bf16.msrb.mxu3 %v4230_v8  ;;  %v461_v8 = vunpack.c.h.b16 %v22_v54  ;;  %v4446_v15 = vor.u32 %v5139_v0, %v4445_v62  ;;  %v5135_v47 = vld [vmem:[%s7844_s1 + $0x954] sm:$0xf0]  ;;  %v5149_v0 = vld [vmem:[%s7844_s1 + $0x9c4] sm:$0xf0] }
  0x74   :  { %2683 = vmatpush.bf16.msrb.mxu0 %v4030_v9  ;;  %v4318_v9 = vor.u32 %v5107_v58, %v4317_v57  ;;  %v4357_v57 = vld [vmem:[%s7844_s1 + $0x8c0] sm:$0xf]  ;;  %v5117_v58 = vld [vmem:[%s7844_s1 + $0x8c4] sm:$0xf0]  ;;  %v5111_v45 = vld [vmem:[%s7844_s1 + $0x894] sm:$0xf0] }
  0x75   :  { %2696 = vmatpush.bf16.msrb.mxu1 %v4094_v12  ;;  %v5155_v12 = vld [vmem:[%s7844_s1 + $0x9f4] sm:$0xf0]  ;;  %v4358_v1 = vor.u32 %v5117_v58, %v4357_v57  ;;  %v4334_v57 = vor.u32 %v5111_v45, %v4333_v44 }
  0x76   :  { %2709 = vmatpush.bf16.msrb.mxu2 %v4158_v14  ;;  %v463_v14 = vunpack.c.h.b16 %v23_v55  ;;  %v4293_v55 = vld [vmem:[%s7844_s1 + $0x840] sm:$0xf] }
  0x77   :  { %2722 = vmatpush.bf16.msrb.mxu3 %v4222_v23  ;;  %v6125_v23 = vpack.c.b16 %v462_v4, %v462_v4  ;;  %v4294_v62 = vor.u32 %v5101_v56, %v4293_v55  ;;  %v5099_v4 = vld [vmem:[%s7844_s1 + $0x834] sm:$0xf0]  ;;  %v4325_v55 = vld [vmem:[%s7844_s1 + $0x880] sm:$0xf]  ;;  %v5109_v56 = vld [vmem:[%s7844_s1 + $0x884] sm:$0xf0] }
  0x78   :  { %2684 = vmatpush.bf16.msrb.mxu0 %v4022_v26  ;;  %v5121_v26 = vld [vmem:[%s7844_s1 + $0x8e4] sm:$0xf0]  ;;  %v6138_v33 = vpack.c.b16 %v463_v14, %v463_v14  ;;  %v5147_v14 = vld [vmem:[%s7844_s1 + $0x9b4] sm:$0xf0] }
  0x79   :  { %2697 = vmatpush.bf16.msrb.mxu1 %v4086_v29  ;;  %v4510_v29 = vor.u32 %v5155_v12, %v4509_v11  ;;  %v4374_v38 = vor.u32 %v5121_v26, %v4373_v19  ;;  %v4286_v11 = vor.u32 %v5099_v4, %v4285_v3  ;;  %v4477_v12 = vld [vmem:[%s7844_s1 + $0x9b0] sm:$0xf]  ;;  %v4341_v19 = vld [vmem:[%s7844_s1 + $0x8a0] sm:$0xf]  ;;  %v5113_v26 = vld [vmem:[%s7844_s1 + $0x8a4] sm:$0xf0] }
  0x7a   :  { %2710 = vmatpush.bf16.msrb.mxu2 %v4150_v32  ;;  %v6136_v32 = vpack.c.b16 %v461_v8, %v461_v8  ;;  %v4413_v8 = vld [vmem:[%s7844_s1 + $0x930] sm:$0xf]  ;;  %v5187_v3 = vld [vmem:[%s7844_s1 + $0xaf4] sm:$0xf0] }
  0x7b   :  { %2723 = vmatpush.bf16.msrb.mxu3 %v4214_v41  ;;  %v4301_v41 = vld [vmem:[%s7844_s1 + $0x850] sm:$0xf] }
  0x7c   :  { %2685 = vmatpush.bf16.msrb.mxu0 %v4014_v46  ;;  %v4429_v46 = vld [vmem:[%s7844_s1 + $0x950] sm:$0xf]  ;;  %v4302_v50 = vor.u32 %v5103_v42, %v4301_v41  ;;  %v5095_v42 = vld [vmem:[%s7844_s1 + $0x814] sm:$0xf0] }
  0x7d   :  { %2698 = vmatpush.bf16.msrb.mxu1 %v4078_v51  ;;  %v4493_v51 = vld [vmem:[%s7844_s1 + $0x9d0] sm:$0xf]  ;;  %v4430_v54 = vor.u32 %v5135_v47, %v4429_v46  ;;  %v5127_v47 = vld [vmem:[%s7844_s1 + $0x914] sm:$0xf0] }
  0x7e   :  { %2711 = vmatpush.bf16.msrb.mxu2 %v4142_v52  ;;  %v5151_v52 = vld [vmem:[%s7844_s1 + $0x9d4] sm:$0xf0]  ;;  %v4269_v41 = vld [vmem:[%s7844_s1 + $0x810] sm:$0xf] }
  0x7f   :  { %2724 = vmatpush.bf16.msrb.mxu3 %v4206_v59  ;;  %v4421_v59 = vld [vmem:[%s7844_s1 + $0x940] sm:$0xf]  ;;  %v4494_v61 = vor.u32 %v5151_v52, %v4493_v51  ;;  %v4397_v46 = vld [vmem:[%s7844_s1 + $0x910] sm:$0xf]  ;;  %v5143_v51 = vld [vmem:[%s7844_s1 + $0x994] sm:$0xf0] }
  0x80   :  { %2686 = vmatpush.bf16.msrb.mxu0 %v4006_v63  ;;  %v4485_v63 = vld [vmem:[%s7844_s1 + $0x9c0] sm:$0xf]  ;;  %v4422_v2 = vor.u32 %v5133_v60, %v4421_v59  ;;  %v4398_v58 = vor.u32 %v5127_v47, %v4397_v46  ;;  %v4701_v4 = vld [vmem:[%s7844_s1 + $0xb70] sm:$0xf] }
  0x81   :  { %2699 = vmatpush.bf16.msrb.mxu1 %v4070_v5  ;;  %v4349_v5 = vld [vmem:[%s7844_s1 + $0x8b0] sm:$0xf]  ;;  %v4261_v52 = vld [vmem:[%s7844_s1 + $0x800] sm:$0xf] }
  0x82   :  { %2712 = vmatpush.bf16.msrb.mxu2 %v4134_v7  ;;  %v5115_v7 = vld [vmem:[%s7844_s1 + $0x8b4] sm:$0xf0]  ;;  %v4389_v59 = vld [vmem:[%s7844_s1 + $0x900] sm:$0xf] }
  0x83   :  { %2725 = vmatpush.bf16.msrb.mxu3 %v4198_v16  ;;  %2687 = vmatmul.bf16.vlgmr.msrb.gmra.mxu0 %v6123_v22  ;;  %v24_v60 = vld [vmem:[%s7845_s0 + $0x40] sm:$0xff] }
  0x84   :  { %2731 = vmatpush.bf16.msra.mxu0 %v4318_v9  ;;  %2700 = vmatmul.bf16.vlgmr.msrb.gmra.mxu1 %v6136_v32  ;;  %v5131_v9 = vld [vmem:[%s7844_s1 + $0x934] sm:$0xf0] }
  0x85   :  { %2744 = vmatpush.bf16.msra.mxu1 %v4382_v10  ;;  %2713 = vmatmul.bf16.vlgmr.msrb.gmra.mxu2 %v6125_v23  ;;  %v4486_v10 = vor.u32 %v5149_v0, %v4485_v63  ;;  %v4414_v16 = vor.u32 %v5131_v9, %v4413_v8  ;;  %v4573_v63 = vld [vmem:[%s7844_s1 + $0xa70] sm:$0xf]  ;;  %v5171_v0 = vld [vmem:[%s7844_s1 + $0xa74] sm:$0xf0]  ;;  %v4453_v8 = vld [vmem:[%s7844_s1 + $0x980] sm:$0xf] }
  0x86   :  { %2757 = vmatpush.bf16.msra.mxu2 %v4446_v15  ;;  %2726 = vmatmul.bf16.vlgmr.msrb.gmra.mxu3 %v6138_v33  ;;  %v4350_v15 = vor.u32 %v5115_v7, %v4349_v5  ;;  %v5203_v7 = vld [vmem:[%s7844_s1 + $0xb74] sm:$0xf0]  ;;  %v5141_v9 = vld [vmem:[%s7844_s1 + $0x984] sm:$0xf0] }
  0x87   :  { %2770 = vmatpush.bf16.msra.mxu3 %v4510_v29  ;;  %v4478_v29 = vor.u32 %v5147_v14, %v4477_v12  ;;  %v4326_v12 = vor.u32 %v5109_v56, %v4325_v55  ;;  %v4621_v55 = vld [vmem:[%s7844_s1 + $0xad0] sm:$0xf]  ;;  %v5183_v56 = vld [vmem:[%s7844_s1 + $0xad4] sm:$0xf0] }
  0x88   :  { %2732 = vmatpush.bf16.msra.mxu0 %v4310_v34  ;;  %v4278_v34 = vor.u32 %v5097_v18, %v4277_v17  ;;  %v4765_v18 = vld [vmem:[%s7844_s1 + $0xbf0] sm:$0xf] }
  0x89   :  { %2745 = vmatpush.bf16.msra.mxu1 %v4374_v38  ;;  %v4342_v38 = vor.u32 %v5113_v26, %v4341_v19  ;;  %v5219_v19 = vld [vmem:[%s7844_s1 + $0xbf4] sm:$0xf0] }
  0x8a   :  { %2758 = vmatpush.bf16.msra.mxu2 %v4438_v40  ;;  %v4406_v40 = vor.u32 %v5129_v28, %v4405_v27  ;;  %v4702_v27 = vor.u32 %v5203_v7, %v4701_v4  ;;  %v4454_v28 = vor.u32 %v5141_v9, %v4453_v8  ;;  %v4766_v44 = vor.u32 %v5219_v19, %v4765_v18  ;;  %v5181_v4 = vld [vmem:[%s7844_s1 + $0xac4] sm:$0xf0]  ;;  %v429_v18 = vld [vmem:[%s7846_s2] sm:$0x3]  ;;  %v5179_v19 = vld [vmem:[%s7844_s1 + $0xab4] sm:$0xf0] }
  0x8b   :  { %2771 = vmatpush.bf16.msra.mxu3 %v4502_v48  ;;  %v4470_v48 = vor.u32 %v5145_v37, %v4469_v35  ;;  %v4629_v35 = vld [vmem:[%s7844_s1 + $0xae0] sm:$0xf]  ;;  %v5197_v7 = vld [vmem:[%s7844_s1 + $0xb44] sm:$0xf0] }
  0x8c   :  { %2733 = vmatpush.bf16.msra.mxu0 %v4302_v50  ;;  %v4461_v50 = vld [vmem:[%s7844_s1 + $0x990] sm:$0xf] }
  0x8d   :  { %2746 = vmatpush.bf16.msra.mxu1 %v4366_v53  ;;  %v4270_v53 = vor.u32 %v5095_v42, %v4269_v41  ;;  %v4693_v41 = vld [vmem:[%s7844_s1 + $0xb60] sm:$0xf]  ;;  %v5201_v42 = vld [vmem:[%s7844_s1 + $0xb64] sm:$0xf0] }
  0x8e   :  { %2759 = vmatpush.bf16.msra.mxu2 %v4430_v54  ;;  %v5093_v54 = vld [vmem:[%s7844_s1 + $0x804] sm:$0xf0] }
  0x8f   :  { %2772 = vmatpush.bf16.msra.mxu3 %v4494_v61  ;;  %v25_v61 = vld [vmem:[%s7845_s0 + $0x48] sm:$0xff]  ;;  %v4262_v5 = vor.u32 %v5093_v54, %v4261_v52  ;;  %v4694_v52 = vor.u32 %v5201_v42, %v4693_v41  ;;  %v5167_v54 = vld [vmem:[%s7844_s1 + $0xa54] sm:$0xf0] }
  0x90   :  { %2734 = vmatpush.bf16.msra.mxu0 %v4294_v62  ;;  %v5125_v62 = vld [vmem:[%s7844_s1 + $0x904] sm:$0xf0]  ;;  %v467_v26 = vunpack.c.h.b16 %v25_v61 }
  0x91   :  { %2747 = vmatpush.bf16.msra.mxu1 %v4358_v1  ;;  %v4462_v1 = vor.u32 %v5143_v51, %v4461_v50  ;;  %v4390_v14 = vor.u32 %v5125_v62, %v4389_v59  ;;  %v5217_v50 = vld [vmem:[%s7844_s1 + $0xbe4] sm:$0xf0]  ;;  %v5215_v62 = vld [vmem:[%s7844_s1 + $0xbd4] sm:$0xf0] }
  0x92   :  { %2760 = vmatpush.bf16.msra.mxu2 %v4422_v2  ;;  %v4637_v2 = vld [vmem:[%s7844_s1 + $0xaf0] sm:$0xf]  ;;  %v6348_v46 = vpack.c.b16 %v467_v26, %v467_v26 }
  0x93   :  { %2773 = vmatpush.bf16.msra.mxu3 %v4486_v10  ;;  %v464_v10 = vunpack.c.l.b16 %v24_v60  ;;  %v4638_v17 = vor.u32 %v5187_v3, %v4637_v2  ;;  %v5165_v2 = vld [vmem:[%s7844_s1 + $0xa44] sm:$0xf0]  ;;  %v4613_v3 = vld [vmem:[%s7844_s1 + $0xac0] sm:$0xf]  ;;  %v4669_v26 = vld [vmem:[%s7844_s1 + $0xb30] sm:$0xf] }
  0x94   :  { %2735 = vmatpush.bf16.msra.mxu0 %v4286_v11  ;;  %v466_v11 = vunpack.c.l.b16 %v25_v61  ;;  %v4749_v61 = vld [vmem:[%s7844_s1 + $0xbd0] sm:$0xf] }
  0x95   :  { %2748 = vmatpush.bf16.msra.mxu1 %v4350_v15  ;;  %v465_v15 = vunpack.c.h.b16 %v24_v60  ;;  %v6333_v37 = vpack.c.b16 %v464_v10, %v464_v10  ;;  %v4750_v8 = vor.u32 %v5215_v62, %v4749_v61  ;;  %v4741_v10 = vld [vmem:[%s7844_s1 + $0xbc0] sm:$0xf]  ;;  %v4525_v62 = vld [vmem:[%s7844_s1 + $0xa10] sm:$0xf] }
  0x96   :  { %2761 = vmatpush.bf16.msra.mxu2 %v4414_v16  ;;  %v4574_v16 = vor.u32 %v5171_v0, %v4573_v63  ;;  %v4622_v63 = vor.u32 %v5183_v56, %v4621_v55  ;;  %v4725_v56 = vld [vmem:[%s7844_s1 + $0xba0] sm:$0xf] }
  0x97   :  { %2774 = vmatpush.bf16.msra.mxu3 %v4478_v29  ;;  %v4565_v29 = vld [vmem:[%s7844_s1 + $0xa60] sm:$0xf]  ;;  %v6346_v45 = vpack.c.b16 %v465_v15, %v465_v15 }
  0x98   :  { %2736 = vmatpush.bf16.msra.mxu0 %v4278_v34  ;;  %v5169_v34 = vld [vmem:[%s7844_s1 + $0xa64] sm:$0xf0] }
  0x99   :  { %2749 = vmatpush.bf16.msra.mxu1 %v4342_v38  ;;  %v6335_v38 = vpack.c.b16 %v466_v11, %v466_v11  ;;  %v4566_v47 = vor.u32 %v5169_v34, %v4565_v29  ;;  %v5213_v11 = vld [vmem:[%s7844_s1 + $0xbc4] sm:$0xf0]  ;;  %v4733_v34 = vld [vmem:[%s7844_s1 + $0xbb0] sm:$0xf] }
  0x9a   :  { %2762 = vmatpush.bf16.msra.mxu2 %v4406_v40  ;;  %v5185_v40 = vld [vmem:[%s7844_s1 + $0xae4] sm:$0xf0] }
  0x9b   :  { %2775 = vmatpush.bf16.msra.mxu3 %v4470_v48  ;;  %v4757_v48 = vld [vmem:[%s7844_s1 + $0xbe0] sm:$0xf]  ;;  %v4630_v51 = vor.u32 %v5185_v40, %v4629_v35  ;;  %v5211_v35 = vld [vmem:[%s7844_s1 + $0xbb4] sm:$0xf0]  ;;  %v431_v40 = vperm.slane %v429_v18, 0 }
  0x9c   :  { %2737 = vmatpush.bf16.msra.mxu0 %v4270_v53  ;;  %v4557_v53 = vld [vmem:[%s7844_s1 + $0xa50] sm:$0xf]  ;;  %v4758_v59 = vor.u32 %v5217_v50, %v4757_v48  ;;  %v4597_v48 = vld [vmem:[%s7844_s1 + $0xaa0] sm:$0xf]  ;;  %v5177_v50 = vld [vmem:[%s7844_s1 + $0xaa4] sm:$0xf0] }
  0x9d   :  { %2750 = vmatpush.bf16.msra.mxu1 %v4334_v57  ;;  %v4685_v57 = vld [vmem:[%s7844_s1 + $0xb50] sm:$0xf]  ;;  %v4558_v60 = vor.u32 %v5167_v54, %v4557_v53  ;;  %v4734_v53 = vor.u32 %v5211_v35, %v4733_v34  ;;  %v5235_v35 = vld [vmem:[%s7844_s1 + $0xc74] sm:$0xf0] }
  0x9e   :  { %2763 = vmatpush.bf16.msra.mxu2 %v4398_v58  ;;  %v5199_v58 = vld [vmem:[%s7844_s1 + $0xb54] sm:$0xf0]  ;;  %v4829_v34 = vld [vmem:[%s7844_s1 + $0xc70] sm:$0xf] }
  0x9f   :  { %2776 = vmatpush.bf16.msra.mxu3 %v4462_v1  ;;  %v4686_v0 = vor.u32 %v5199_v58, %v4685_v57  ;;  %v4549_v1 = vld [vmem:[%s7844_s1 + $0xa40] sm:$0xf]  ;;  %v5209_v57 = vld [vmem:[%s7844_s1 + $0xba4] sm:$0xf0] }
  0xa0   :  { %2738 = vmatpush.bf16.msra.mxu0 %v4262_v5  ;;  %v4677_v5 = vld [vmem:[%s7844_s1 + $0xb40] sm:$0xf]  ;;  %v4550_v9 = vor.u32 %v5165_v2, %v4549_v1  ;;  %v5175_v1 = vld [vmem:[%s7844_s1 + $0xa94] sm:$0xf0]  ;;  %v4653_v2 = vld [vmem:[%s7844_s1 + $0xb10] sm:$0xf] }
  0xa1   :  { %2751 = vmatpush.bf16.msra.mxu1 %v4326_v12  ;;  %v4541_v12 = vld [vmem:[%s7844_s1 + $0xa30] sm:$0xf]  ;;  %v4678_v15 = vor.u32 %v5197_v7, %v4677_v5  ;;  %v4726_v7 = vor.u32 %v5209_v57, %v4725_v56 }
  0xa2   :  { %2764 = vmatpush.bf16.msra.mxu2 %v4390_v14  ;;  %v4614_v14 = vor.u32 %v5181_v4, %v4613_v3  ;;  %v5191_v3 = vld [vmem:[%s7844_s1 + $0xb14] sm:$0xf0] }
  0xa3   :  { %2777 = vmatpush.bf16.msra.mxu3 %v4454_v28  ;;  %2739 = vmatmul.bf16.vlgmr.msra.gmra.mxu0 %v6333_v37  ;;  %v4742_v28 = vor.u32 %v5213_v11, %v4741_v10  ;;  %v4517_v10 = vld [vmem:[%s7844_s1 + $0xa00] sm:$0xf] }
  0xa4   :  { %2783 = vmatpush.bf16.msrb.mxu0 %v4574_v16  ;;  %2752 = vmatmul.bf16.vlgmr.msra.gmra.mxu1 %v6346_v45  ;;  %v5163_v16 = vld [vmem:[%s7844_s1 + $0xa34] sm:$0xf0]  ;;  %v2532_v54 = vpop.f32.mrf.mxu0 }
  0xa5   :  { %2796 = vmatpush.bf16.msrb.mxu1 %v4638_v17  ;;  %2765 = vmatmul.bf16.vlgmr.msra.gmra.mxu2 %v6335_v38  ;;  %v4605_v17 = vld [vmem:[%s7844_s1 + $0xab0] sm:$0xf]  ;;  %v4542_v29 = vor.u32 %v5163_v16, %v4541_v12  ;;  %v2533_v58 = vadd.f32 %v2532_v54, %v431_v40  ;;  %v5173_v16 = vld [vmem:[%s7844_s1 + $0xa84] sm:$0xf0] }
  0xa6   :  { %2809 = vmatpush.bf16.msrb.mxu2 %v4702_v27  ;;  %2778 = vmatmul.bf16.vlgmr.msra.gmra.mxu3 %v6348_v46  ;;  %v5195_v27 = vld [vmem:[%s7844_s1 + $0xb34] sm:$0xf0]  ;;  %v4606_v41 = vor.u32 %v5179_v19, %v4605_v17  ;;  %v4654_v19 = vor.u32 %v5191_v3, %v4653_v2 }
  0xa7   :  { %2822 = vmatpush.bf16.msrb.mxu3 %v4766_v44  ;;  %v4670_v42 = vor.u32 %v5195_v27, %v4669_v26  ;;  %v4533_v44 = vld [vmem:[%s7844_s1 + $0xa20] sm:$0xf]  ;;  %v26_v27 = vld [vmem:[%s7845_s0 + $0x50] sm:$0xff] }
  0xa8   :  { %2784 = vmatpush.bf16.msrb.mxu0 %v4566_v47  ;;  %v5161_v47 = vld [vmem:[%s7844_s1 + $0xa24] sm:$0xf0]  ;;  %v2558_v5 = vpop.f32.mrf.mxu2  ;;  %v4645_v26 = vld [vmem:[%s7844_s1 + $0xb00] sm:$0xf]  ;;  %v468_v54 = vunpack.c.l.b16 %v26_v27 }
  0xa9   :  { %2797 = vmatpush.bf16.msrb.mxu1 %v4630_v51  ;;  %v4661_v51 = vld [vmem:[%s7844_s1 + $0xb20] sm:$0xf]  ;;  %v4534_v55 = vor.u32 %v5161_v47, %v4533_v44  ;;  %v2571_v11 = vpop.f32.mrf.mxu3  ;;  %v3295_v44 = vld [vmem:[%s7844_s1 + $0x78] sm:$0xf0]  ;;  %v4866_v47 = vld [vmem:[%s7844_s1 + $0xf4] sm:$0xf] }
  0xaa   :  { %2810 = vmatpush.bf16.msrb.mxu2 %v4694_v52  ;;  %v5193_v52 = vld [vmem:[%s7844_s1 + $0xb24] sm:$0xf0] }
  0xab   :  { %2823 = vmatpush.bf16.msrb.mxu3 %v4758_v59  ;;  %v2545_v59 = vpop.f32.mrf.mxu1  ;;  %v4662_v61 = vor.u32 %v5193_v52, %v4661_v51  ;;  %v3359_v51 = vld [vmem:[%s7844_s1 + $0xf8] sm:$0xf0]  ;;  %v4709_v52 = vld [vmem:[%s7844_s1 + $0xb80] sm:$0xf] }
  0xac   :  { %2785 = vmatpush.bf16.msrb.mxu0 %v4558_v60  ;;  %v4598_v60 = vor.u32 %v5177_v50, %v4597_v48  ;;  %v2546_v4 = vadd.f32 %v2545_v59, %v2533_v58  ;;  %v2534_v48 = vpop.f32.mrf.mxu0  ;;  %v469_v59 = vunpack.c.h.b16 %v26_v27  ;;  %v3362_v2 = vor.u32 %v4866_v47, %v3359_v51  ;;  %v3407_v51 = vld [vmem:[%s7844_s1 + $0x158] sm:$0xf0] }
  0xad   :  { %2798 = vmatpush.bf16.msrb.mxu1 %v4622_v63  ;;  %v5159_v63 = vld [vmem:[%s7844_s1 + $0xa14] sm:$0xf0] }
  0xae   :  { %2811 = vmatpush.bf16.msrb.mxu2 %v4686_v0  ;;  %v4589_v0 = vld [vmem:[%s7844_s1 + $0xa90] sm:$0xf]  ;;  %v4526_v12 = vor.u32 %v5159_v63, %v4525_v62  ;;  %v2559_v17 = vadd.f32 %v2558_v5, %v2546_v4  ;;  %v4882_v62 = vld [vmem:[%s7844_s1 + $0x174] sm:$0xf]  ;;  %v3423_v63 = vld [vmem:[%s7844_s1 + $0x178] sm:$0xf0] }
  0xaf   :  { %2824 = vmatpush.bf16.msrb.mxu3 %v4750_v8  ;;  %v4717_v8 = vld [vmem:[%s7844_s1 + $0xb90] sm:$0xf]  ;;  %v4590_v18 = vor.u32 %v5175_v1, %v4589_v0  ;;  %v4821_v4 = vld [vmem:[%s7844_s1 + $0xc60] sm:$0xf]  ;;  %v5233_v5 = vld [vmem:[%s7844_s1 + $0xc64] sm:$0xf0] }
  0xb0   :  { %2786 = vmatpush.bf16.msrb.mxu0 %v4550_v9  ;;  %v5207_v9 = vld [vmem:[%s7844_s1 + $0xb94] sm:$0xf0]  ;;  %v6513_v40 = vadd.f32 %v2571_v11, %v2559_v17  ;;  %v2560_v1 = vpop.f32.mrf.mxu2  ;;  %v3287_v11 = vld [vmem:[%s7844_s1 + $0x68] sm:$0xf0] }
  0xb1   :  { %2799 = vmatpush.bf16.msrb.mxu1 %v4614_v14  ;;  %v5157_v14 = vld [vmem:[%s7844_s1 + $0xa04] sm:$0xf0] }
  0xb2   :  { %2812 = vmatpush.bf16.msrb.mxu2 %v4678_v15  ;;  %v4581_v15 = vld [vmem:[%s7844_s1 + $0xa80] sm:$0xf]  ;;  %v4518_v50 = vor.u32 %v5157_v14, %v4517_v10  ;;  %v3351_v14 = vld [vmem:[%s7844_s1 + $0xe8] sm:$0xf0] }
  0xb3   :  { %2825 = vmatpush.bf16.msrb.mxu3 %v4742_v28  ;;  %v27_v28 = vld [vmem:[%s7845_s0 + $0x58] sm:$0xff]  ;;  %v2547_v56 = vpop.f32.mrf.mxu1  ;;  %v4582_v57 = vor.u32 %v5173_v16, %v4581_v15  ;;  %v3426_v15 = vor.u32 %v4882_v62, %v3423_v63  ;;  %v6561_v16 = vpack.c.b16 %v469_v59, %v469_v59  ;;  %v3335_v59 = vld [vmem:[%s7844_s1 + $0xc8] sm:$0xf0]  ;;  %v4876_v63 = vld [vmem:[%s7844_s1 + $0x144] sm:$0xf] }
  0xb4   :  { %2787 = vmatpush.bf16.msrb.mxu0 %v4542_v29  ;;  %v5189_v29 = vld [vmem:[%s7844_s1 + $0xb04] sm:$0xf0]  ;;  %v471_v0 = vunpack.c.h.b16 %v27_v28  ;;  %v4844_v56 = vld [vmem:[%s7844_s1 + $0x44] sm:$0xf] }
  0xb5   :  { %2800 = vmatpush.bf16.msrb.mxu1 %v4606_v41  ;;  %v4718_v41 = vor.u32 %v5207_v9, %v4717_v8  ;;  %v4646_v58 = vor.u32 %v5189_v29, %v4645_v26  ;;  %v2573_v8 = vpop.f32.mrf.mxu3  ;;  %v6548_v9 = vpack.c.b16 %v468_v54, %v468_v54  ;;  %v3415_v26 = vld [vmem:[%s7844_s1 + $0x168] sm:$0xf0]  ;;  %v4813_v29 = vld [vmem:[%s7844_s1 + $0xc50] sm:$0xf]  ;;  %v4805_v54 = vld [vmem:[%s7844_s1 + $0xc40] sm:$0xf] }
  0xb6   :  { %2813 = vmatpush.bf16.msrb.mxu2 %v4670_v42  ;;  %v4850_v42 = vld [vmem:[%s7844_s1 + $0x74] sm:$0xf]  ;;  %v6563_v17 = vpack.c.b16 %v471_v0, %v471_v0  ;;  %v3399_v0 = vld [vmem:[%s7844_s1 + $0x148] sm:$0xf0] }
  0xb7   :  { %2826 = vmatpush.bf16.msrb.mxu3 %v4734_v53  ;;  %v5205_v53 = vld [vmem:[%s7844_s1 + $0xb84] sm:$0xf0] }
  0xb8   :  { %2788 = vmatpush.bf16.msrb.mxu0 %v4534_v55  ;;  %v470_v55 = vunpack.c.l.b16 %v27_v28  ;;  %v4710_v3 = vor.u32 %v5205_v53, %v4709_v52 }
  0xb9   :  { %2801 = vmatpush.bf16.msrb.mxu1 %v4598_v60  ;;  %v4830_v60 = vor.u32 %v5235_v35, %v4829_v34  ;;  %v5231_v34 = vld [vmem:[%s7844_s1 + $0xc54] sm:$0xf0]  ;;  %v4846_v35 = vld [vmem:[%s7844_s1 + $0x54] sm:$0xf] }
  0xba   :  { %2814 = vmatpush.bf16.msrb.mxu2 %v4662_v61  ;;  %v3298_v61 = vor.u32 %v4850_v42, %v3295_v44  ;;  %v6550_v10 = vpack.c.b16 %v470_v55, %v470_v55  ;;  %v4862_v42 = vld [vmem:[%s7844_s1 + $0xd4] sm:$0xf]  ;;  %v3343_v44 = vld [vmem:[%s7844_s1 + $0xd8] sm:$0xf0]  ;;  %v4814_v48 = vor.u32 %v5231_v34, %v4813_v29  ;;  %v5229_v55 = vld [vmem:[%s7844_s1 + $0xc44] sm:$0xf0] }
  0xbb   :  { %2827 = vmatpush.bf16.msrb.mxu3 %v4726_v7  ;;  %v4848_v7 = vld [vmem:[%s7844_s1 + $0x64] sm:$0xf]  ;;  %v3346_v53 = vor.u32 %v4862_v42, %v3343_v44  ;;  %v4806_v62 = vor.u32 %v5229_v55, %v4805_v54  ;;  %v4789_v29 = vld [vmem:[%s7844_s1 + $0xc20] sm:$0xf]  ;;  %v5225_v34 = vld [vmem:[%s7844_s1 + $0xc24] sm:$0xf0] }
  0xbc   :  { %2789 = vmatpush.bf16.msrb.mxu0 %v4526_v12  ;;  %v4864_v12 = vld [vmem:[%s7844_s1 + $0xe4] sm:$0xf]  ;;  %v3290_v27 = vor.u32 %v4848_v7, %v3287_v11  ;;  %v4842_v7 = vld [vmem:[%s7844_s1 + $0x34] sm:$0xf]  ;;  %v3319_v44 = vld [vmem:[%s7844_s1 + $0xa8] sm:$0xf0] }
  0xbd   :  { %2802 = vmatpush.bf16.msrb.mxu1 %v4590_v18  ;;  %v4822_v18 = vor.u32 %v5233_v5, %v4821_v4  ;;  %v3354_v28 = vor.u32 %v4864_v12, %v3351_v14  ;;  %v4797_v4 = vld [vmem:[%s7844_s1 + $0xc30] sm:$0xf]  ;;  %v5227_v5 = vld [vmem:[%s7844_s1 + $0xc34] sm:$0xf0]  ;;  %v4858_v11 = vld [vmem:[%s7844_s1 + $0xb4] sm:$0xf] }
  0xbe   :  { %2815 = vmatpush.bf16.msrb.mxu2 %v4654_v19  ;;  %v4880_v19 = vld [vmem:[%s7844_s1 + $0x164] sm:$0xf]  ;;  %v3327_v12 = vld [vmem:[%s7844_s1 + $0xb8] sm:$0xf0]  ;;  %v3383_v54 = vld [vmem:[%s7844_s1 + $0x128] sm:$0xf0] }
  0xbf   :  { %2828 = vmatpush.bf16.msrb.mxu3 %v4718_v41  ;;  %v3279_v41 = vld [vmem:[%s7844_s1 + $0x58] sm:$0xf0]  ;;  %v3418_v47 = vor.u32 %v4880_v19, %v3415_v26  ;;  %v4874_v19 = vld [vmem:[%s7844_s1 + $0x134] sm:$0xf]  ;;  %v4856_v42 = vld [vmem:[%s7844_s1 + $0xa4] sm:$0xf] }
  0xc0   :  { %2790 = vmatpush.bf16.msrb.mxu0 %v4518_v50  ;;  %v4878_v50 = vld [vmem:[%s7844_s1 + $0x154] sm:$0xf]  ;;  %v3282_v52 = vor.u32 %v4846_v35, %v3279_v41  ;;  %v3391_v26 = vld [vmem:[%s7844_s1 + $0x138] sm:$0xf0]  ;;  %v4840_v35 = vld [vmem:[%s7844_s1 + $0x24] sm:$0xf] }
  0xc1   :  { %2803 = vmatpush.bf16.msrb.mxu1 %v4582_v57  ;;  %v3271_v57 = vld [vmem:[%s7844_s1 + $0x48] sm:$0xf0]  ;;  %v2597_v8 = vpop.f32.mrf.mxu1 }
  0xc2   :  { %2816 = vmatpush.bf16.msrb.mxu2 %v4646_v58  ;;  %v4860_v58 = vld [vmem:[%s7844_s1 + $0xc4] sm:$0xf]  ;;  %v3255_v41 = vld [vmem:[%s7844_s1 + $0x28] sm:$0xf0] }
  0xc3   :  { %2829 = vmatpush.bf16.msrb.mxu3 %v4710_v3  ;;  %2791 = vmatmul.bf16.vlgmr.msrb.gmra.mxu0 %v6548_v9  ;;  %v3338_v3 = vor.u32 %v4860_v58, %v3335_v59  ;;  %v3258_v55 = vor.u32 %v4840_v35, %v3255_v41  ;;  %v4781_v58 = vld [vmem:[%s7844_s1 + $0xc10] sm:$0xf]  ;;  %v5223_v59 = vld [vmem:[%s7844_s1 + $0xc14] sm:$0xf0]  ;;  %v3551_v35 = vld [vmem:[%s7844_s1 + $0x278] sm:$0xf0] }
  0xc4   :  { %2835 = vmatpush.bf16.msra.mxu0 %v4830_v60  ;;  %2804 = vmatmul.bf16.vlgmr.msrb.gmra.mxu1 %v6561_v16  ;;  %v3410_v60 = vor.u32 %v4878_v50, %v3407_v51  ;;  %v4930_v41 = vld [vmem:[%s7844_s1 + $0x2f4] sm:$0xf] }
  0xc5   :  { %2848 = vmatpush.bf16.msra.mxu1 %v3298_v61  ;;  %2817 = vmatmul.bf16.vlgmr.msrb.gmra.mxu2 %v6550_v10  ;;  %v2584_v61 = vpop.f32.mrf.mxu0 }
  0xc6   :  { %2861 = vmatpush.bf16.msra.mxu2 %v3362_v2  ;;  %2830 = vmatmul.bf16.vlgmr.msrb.gmra.mxu3 %v6563_v17  ;;  %v2585_v1 = vadd.f32 %v2584_v61, %v6513_v40  ;;  %v3274_v2 = vor.u32 %v4844_v56, %v3271_v57  ;;  %v3263_v40 = vld [vmem:[%s7844_s1 + $0x38] sm:$0xf0]  ;;  %v3322_v56 = vor.u32 %v4856_v42, %v3319_v44 }
  0xc7   :  { %2874 = vmatpush.bf16.msra.mxu3 %v3426_v15  ;;  %v3402_v15 = vor.u32 %v4876_v63, %v3399_v0  ;;  %v3247_v63 = vld [vmem:[%s7844_s1 + $0x18] sm:$0xf0]  ;;  %v4854_v0 = vld [vmem:[%s7844_s1 + $0x94] sm:$0xf] }
  0xc8   :  { %2836 = vmatpush.bf16.msra.mxu0 %v4822_v18  ;;  %v2598_v14 = vadd.f32 %v2597_v8, %v2585_v1  ;;  %v4798_v18 = vor.u32 %v5227_v5, %v4797_v4  ;;  %v3311_v1 = vld [vmem:[%s7844_s1 + $0x98] sm:$0xf0]  ;;  %v4782_v5 = vor.u32 %v5223_v59, %v4781_v58  ;;  %v5221_v8 = vld [vmem:[%s7844_s1 + $0xc04] sm:$0xf0]  ;;  %v4896_v58 = vld [vmem:[%s7844_s1 + $0x1e4] sm:$0xf] }
  0xc9   :  { %2849 = vmatpush.bf16.msra.mxu1 %v3290_v27  ;;  %v3266_v27 = vor.u32 %v4842_v7, %v3263_v40  ;;  %v2623_v57 = vpop.f32.mrf.mxu3  ;;  %v2599_v61 = vpop.f32.mrf.mxu1  ;;  %v3375_v4 = vld [vmem:[%s7844_s1 + $0x118] sm:$0xf0]  ;;  %v4773_v7 = vld [vmem:[%s7844_s1 + $0xc00] sm:$0xf]  ;;  %v4836_v40 = vld [vmem:[%s7844_s1 + $0x4] sm:$0xf] }
  0xca   :  { %2862 = vmatpush.bf16.msra.mxu2 %v3354_v28  ;;  %v3330_v28 = vor.u32 %v4858_v11, %v3327_v12  ;;  %v3314_v12 = vor.u32 %v4854_v0, %v3311_v1  ;;  %v4774_v42 = vor.u32 %v5221_v8, %v4773_v7  ;;  %v3615_v44 = vld [vmem:[%s7844_s1 + $0x2f8] sm:$0xf0]  ;;  %v3479_v61 = vld [vmem:[%s7844_s1 + $0x1e8] sm:$0xf0] }
  0xcb   :  { %2875 = vmatpush.bf16.msra.mxu3 %v3418_v47  ;;  %v2610_v47 = vpop.f32.mrf.mxu2  ;;  %v3618_v59 = vor.u32 %v4930_v41, %v3615_v44  ;;  %v3543_v0 = vld [vmem:[%s7844_s1 + $0x268] sm:$0xf0]  ;;  %v3482_v8 = vor.u32 %v4896_v58, %v3479_v61  ;;  %v4892_v41 = vld [vmem:[%s7844_s1 + $0x1c4] sm:$0xf] }
  0xcc   :  { %2837 = vmatpush.bf16.msra.mxu0 %v4814_v48  ;;  %v3394_v48 = vor.u32 %v4874_v19, %v3391_v26  ;;  %v2611_v50 = vadd.f32 %v2610_v47, %v2598_v14  ;;  %v3239_v14 = vld [vmem:[%s7844_s1 + $0x8] sm:$0xf0]  ;;  %v4898_v26 = vld [vmem:[%s7844_s1 + $0x1f4] sm:$0xf]  ;;  %v4868_v47 = vld [vmem:[%s7844_s1 + $0x104] sm:$0xf] }
  0xcd   :  { %2850 = vmatpush.bf16.msra.mxu1 %v3282_v52  ;;  %v2586_v51 = vpop.f32.mrf.mxu0  ;;  %v4790_v52 = vor.u32 %v5225_v34, %v4789_v29  ;;  %v3303_v19 = vld [vmem:[%s7844_s1 + $0x88] sm:$0xf0]  ;;  %v4914_v34 = vld [vmem:[%s7844_s1 + $0x274] sm:$0xf] }
  0xce   :  { %2863 = vmatpush.bf16.msra.mxu2 %v3346_v53  ;;  %v4872_v53 = vld [vmem:[%s7844_s1 + $0x124] sm:$0xf]  ;;  %v3242_v51 = vor.u32 %v4836_v40, %v3239_v14  ;;  %v3671_v7 = vld [vmem:[%s7844_s1 + $0x368] sm:$0xf0]  ;;  %v3471_v14 = vld [vmem:[%s7844_s1 + $0x1d8] sm:$0xf0] }
  0xcf   :  { %2876 = vmatpush.bf16.msra.mxu3 %v3410_v60  ;;  %v4838_v60 = vld [vmem:[%s7844_s1 + $0x14] sm:$0xf]  ;;  %v3463_v44 = vld [vmem:[%s7844_s1 + $0x1c8] sm:$0xf0] }
  0xd0   :  { %2838 = vmatpush.bf16.msra.mxu0 %v4806_v62  ;;  %v6681_v62 = vadd.f32 %v2623_v57, %v2611_v50  ;;  %v3250_v11 = vor.u32 %v4838_v60, %v3247_v63  ;;  %v3554_v57 = vor.u32 %v4914_v34, %v3551_v35  ;;  %v4912_v63 = vld [vmem:[%s7844_s1 + $0x264] sm:$0xf] }
  0xd1   :  { %2851 = vmatpush.bf16.msra.mxu1 %v3274_v2  ;;  %v3386_v2 = vor.u32 %v4872_v53, %v3383_v54  ;;  %v4946_v53 = vld [vmem:[%s7844_s1 + $0x374] sm:$0xf]  ;;  %v3679_v54 = vld [vmem:[%s7844_s1 + $0x378] sm:$0xf0]  ;;  %v3546_v40 = vor.u32 %v4912_v63, %v3543_v0 }
  0xd2   :  { %2864 = vmatpush.bf16.msra.mxu2 %v3338_v3  ;;  %v4870_v3 = vld [vmem:[%s7844_s1 + $0x114] sm:$0xf] }
  0xd3   :  { %2877 = vmatpush.bf16.msra.mxu3 %v3402_v15  ;;  %v4852_v15 = vld [vmem:[%s7844_s1 + $0x84] sm:$0xf]  ;;  %v3378_v29 = vor.u32 %v4870_v3, %v3375_v4  ;;  %v3607_v4 = vld [vmem:[%s7844_s1 + $0x2e8] sm:$0xf0]  ;;  %v4922_v0 = vld [vmem:[%s7844_s1 + $0x2b4] sm:$0xf] }
  0xd4   :  { %2839 = vmatpush.bf16.msra.mxu0 %v4798_v18  ;;  %v28_v18 = vld [vmem:[%s7845_s0 + $0x60] sm:$0xf]  ;;  %v4928_v3 = vld [vmem:[%s7844_s1 + $0x2e4] sm:$0xf] }
  0xd5   :  { %2852 = vmatpush.bf16.msra.mxu1 %v3266_v27  ;;  %v3487_v27 = vld [vmem:[%s7844_s1 + $0x1f8] sm:$0xf0]  ;;  %v472_v50 = vunpack.c.l.b16 %v28_v18 }
  0xd6   :  { %2865 = vmatpush.bf16.msra.mxu2 %v3330_v28  ;;  %v2612_v28 = vpop.f32.mrf.mxu2  ;;  %v3535_v18 = vld [vmem:[%s7844_s1 + $0x258] sm:$0xf0] }
  0xd7   :  { %2878 = vmatpush.bf16.msra.mxu3 %v3394_v48  ;;  %v3367_v48 = vld [vmem:[%s7844_s1 + $0x108] sm:$0xf0]  ;;  %v6761_v1 = vpack.c.b16 %v472_v50, %v472_v50  ;;  %v4942_v28 = vld [vmem:[%s7844_s1 + $0x354] sm:$0xf] }
  0xd8   :  { %2840 = vmatpush.bf16.msra.mxu0 %v4790_v52  ;;  %v3306_v52 = vor.u32 %v4852_v15, %v3303_v19  ;;  %v3370_v60 = vor.u32 %v4868_v47, %v3367_v48  ;;  %v4910_v15 = vld [vmem:[%s7844_s1 + $0x254] sm:$0xf]  ;;  %v4924_v48 = vld [vmem:[%s7844_s1 + $0x2c4] sm:$0xf]  ;;  %v3591_v50 = vld [vmem:[%s7844_s1 + $0x2c8] sm:$0xf0] }
  0xd9   :  { %2853 = vmatpush.bf16.msra.mxu1 %v3258_v55  ;;  %v2625_v55 = vpop.f32.mrf.mxu3  ;;  %v3538_v35 = vor.u32 %v4910_v15, %v3535_v18  ;;  %v3594_v58 = vor.u32 %v4924_v48, %v3591_v50  ;;  %v3511_v15 = vld [vmem:[%s7844_s1 + $0x228] sm:$0xf0]  ;;  %v3439_v48 = vld [vmem:[%s7844_s1 + $0x198] sm:$0xf0]  ;;  %v4902_v50 = vld [vmem:[%s7844_s1 + $0x214] sm:$0xf] }
  0xda   :  { %2866 = vmatpush.bf16.msra.mxu2 %v3322_v56  ;;  %v3490_v56 = vor.u32 %v4898_v26, %v3487_v27  ;;  %v4926_v26 = vld [vmem:[%s7844_s1 + $0x2d4] sm:$0xf]  ;;  %v3599_v27 = vld [vmem:[%s7844_s1 + $0x2d8] sm:$0xf0] }
  0xdb   :  { %2879 = vmatpush.bf16.msra.mxu3 %v3386_v2  ;;  %v3682_v2 = vor.u32 %v4946_v53, %v3679_v54  ;;  %v3655_v53 = vld [vmem:[%s7844_s1 + $0x348] sm:$0xf0]  ;;  %v3466_v54 = vor.u32 %v4892_v41, %v3463_v44 }
  0xdc   :  { %2841 = vmatpush.bf16.msra.mxu0 %v4782_v5  ;;  %v4944_v5 = vld [vmem:[%s7844_s1 + $0x364] sm:$0xf] }
  0xdd   :  { %2854 = vmatpush.bf16.msra.mxu1 %v3250_v11  ;;  %v4894_v11 = vld [vmem:[%s7844_s1 + $0x1d4] sm:$0xf]  ;;  %v3674_v19 = vor.u32 %v4944_v5, %v3671_v7 }
  0xde   :  { %2867 = vmatpush.bf16.msra.mxu2 %v3314_v12  ;;  %v3610_v12 = vor.u32 %v4928_v3, %v3607_v4  ;;  %v3474_v34 = vor.u32 %v4894_v11, %v3471_v14  ;;  %v4938_v3 = vld [vmem:[%s7844_s1 + $0x334] sm:$0xf]  ;;  %v3647_v4 = vld [vmem:[%s7844_s1 + $0x338] sm:$0xf0]  ;;  %v4904_v14 = vld [vmem:[%s7844_s1 + $0x224] sm:$0xf] }
  0xdf   :  { %2880 = vmatpush.bf16.msra.mxu3 %v3378_v29  ;;  %v3663_v29 = vld [vmem:[%s7844_s1 + $0x358] sm:$0xf0]  ;;  %v3514_v44 = vor.u32 %v4904_v14, %v3511_v15 }
  0xe0   :  { %2842 = vmatpush.bf16.msra.mxu0 %v4774_v42  ;;  %v3602_v42 = vor.u32 %v4926_v26, %v3599_v27  ;;  %v3666_v47 = vor.u32 %v4942_v28, %v3663_v29  ;;  %v4920_v26 = vld [vmem:[%s7844_s1 + $0x2a4] sm:$0xf]  ;;  %v3575_v27 = vld [vmem:[%s7844_s1 + $0x2a8] sm:$0xf0] }
  0xe1   :  { %2855 = vmatpush.bf16.msra.mxu1 %v3242_v51  ;;  %v2636_v51 = vpop.f32.mrf.mxu0  ;;  %v4936_v29 = vld [vmem:[%s7844_s1 + $0x324] sm:$0xf] }
  0xe2   :  { %2868 = vmatpush.bf16.msra.mxu2 %v3306_v52  ;;  %v4940_v52 = vld [vmem:[%s7844_s1 + $0x344] sm:$0xf] }
  0xe3   :  { %2881 = vmatpush.bf16.msra.mxu3 %v3370_v60  ;;  %2843 = vmatmul.bf16.vlgmr.msra.gmra.mxu0 %v6761_v1  ;;  %v4906_v60 = vld [vmem:[%s7844_s1 + $0x234] sm:$0xf]  ;;  %v3658_v63 = vor.u32 %v4940_v52, %v3655_v53 }
  0xe4   :  { %2887 = vmatpush.bf16.msrb.mxu0 %v3490_v56  ;;  %2856 = vmatmul.bf16.vlgmr.msra.gmra.mxu1 %v5561_v20  ;;  %v3527_v20 = vld [vmem:[%s7844_s1 + $0x248] sm:$0xf0]  ;;  %v2649_v56 = vpop.f32.mrf.mxu1  ;;  %v4918_v53 = vld [vmem:[%s7844_s1 + $0x294] sm:$0xf] }
  0xe5   :  { %2900 = vmatpush.bf16.msrb.mxu1 %v3554_v57  ;;  %2869 = vmatmul.bf16.vlgmr.msra.gmra.mxu2 %v5564_v21  ;;  %v4908_v21 = vld [vmem:[%s7844_s1 + $0x244] sm:$0xf]  ;;  %v4890_v57 = vld [vmem:[%s7844_s1 + $0x1b4] sm:$0xf] }
  0xe6   :  { %2913 = vmatpush.bf16.msrb.mxu2 %v3618_v59  ;;  %2882 = vmatmul.bf16.vlgmr.msra.gmra.mxu3 %v5532_v6  ;;  %v2637_v6 = vadd.f32 %v2636_v51, %v6681_v62  ;;  %v3530_v55 = vor.u32 %v4908_v21, %v3527_v20  ;;  %v3455_v59 = vld [vmem:[%s7844_s1 + $0x1b8] sm:$0xf0]  ;;  %v4886_v21 = vld [vmem:[%s7844_s1 + $0x194] sm:$0xf] }
  0xe7   :  { %2926 = vmatpush.bf16.msrb.mxu3 %v3682_v2  ;;  %v3519_v62 = vld [vmem:[%s7844_s1 + $0x238] sm:$0xf0]  ;;  %v3458_v5 = vor.u32 %v4890_v57, %v3455_v59  ;;  %v3431_v59 = vld [vmem:[%s7844_s1 + $0x188] sm:$0xf0] }
  0xe8   :  { %2888 = vmatpush.bf16.msrb.mxu0 %v3482_v8  ;;  %v2650_v61 = vadd.f32 %v2649_v56, %v2637_v6  ;;  %v3583_v2 = vld [vmem:[%s7844_s1 + $0x2b8] sm:$0xf0]  ;;  %v3522_v7 = vor.u32 %v4906_v60, %v3519_v62  ;;  %v4888_v8 = vld [vmem:[%s7844_s1 + $0x1a4] sm:$0xf]  ;;  %v2662_v11 = vpop.f32.mrf.mxu2  ;;  %v3442_v56 = vor.u32 %v4886_v21, %v3439_v48 }
  0xe9   :  { %2901 = vmatpush.bf16.msrb.mxu1 %v3546_v40  ;;  %v3586_v40 = vor.u32 %v4922_v0, %v3583_v2  ;;  %v2675_v28 = vpop.f32.mrf.mxu3  ;;  %v3503_v51 = vld [vmem:[%s7844_s1 + $0x218] sm:$0xf0]  ;;  %v4900_v60 = vld [vmem:[%s7844_s1 + $0x204] sm:$0xf]  ;;  %v3559_v0 = vld [vmem:[%s7844_s1 + $0x288] sm:$0xf0] }
  0xea   :  { %2914 = vmatpush.bf16.msrb.mxu2 %v3610_v12  ;;  %v3447_v12 = vld [vmem:[%s7844_s1 + $0x1a8] sm:$0xf0]  ;;  %v2663_v18 = vadd.f32 %v2662_v11, %v2650_v61  ;;  %v3567_v6 = vld [vmem:[%s7844_s1 + $0x298] sm:$0xf0]  ;;  %v3506_v57 = vor.u32 %v4902_v50, %v3503_v51  ;;  %v4976_v21 = vld [vmem:[%s7844_s1 + $0x464] sm:$0xf] }
  0xeb   :  { %2927 = vmatpush.bf16.msrb.mxu3 %v3674_v19  ;;  %v3650_v19 = vor.u32 %v4938_v3, %v3647_v4  ;;  %v3570_v62 = vor.u32 %v4918_v53, %v3567_v6  ;;  %v3495_v61 = vld [vmem:[%s7844_s1 + $0x208] sm:$0xf0]  ;;  %v4962_v4 = vld [vmem:[%s7844_s1 + $0x3f4] sm:$0xf]  ;;  %v3871_v11 = vld [vmem:[%s7844_s1 + $0x4f8] sm:$0xf0] }
  0xec   :  { %2889 = vmatpush.bf16.msrb.mxu0 %v3474_v34  ;;  %v3639_v34 = vld [vmem:[%s7844_s1 + $0x328] sm:$0xf0]  ;;  %v6876_v41 = vadd.f32 %v2675_v28, %v2663_v18  ;;  %v2651_v20 = vpop.f32.mrf.mxu1  ;;  %v3498_v15 = vor.u32 %v4900_v60, %v3495_v61  ;;  %v4932_v18 = vld [vmem:[%s7844_s1 + $0x304] sm:$0xf]  ;;  %v5010_v28 = vld [vmem:[%s7844_s1 + $0x574] sm:$0xf] }
  0xed   :  { %2902 = vmatpush.bf16.msrb.mxu1 %v3538_v35  ;;  %v2638_v35 = vpop.f32.mrf.mxu0  ;;  %v3642_v52 = vor.u32 %v4936_v29, %v3639_v34  ;;  %v3935_v29 = vld [vmem:[%s7844_s1 + $0x578] sm:$0xf0]  ;;  %v4992_v48 = vld [vmem:[%s7844_s1 + $0x4e4] sm:$0xf]  ;;  %v3863_v50 = vld [vmem:[%s7844_s1 + $0x4e8] sm:$0xf0] }
  0xee   :  { %2915 = vmatpush.bf16.msrb.mxu2 %v3602_v42  ;;  %v3450_v42 = vor.u32 %v4888_v8, %v3447_v12  ;;  %v3807_v8 = vld [vmem:[%s7844_s1 + $0x478] sm:$0xf0]  ;;  %v3938_v51 = vor.u32 %v5010_v28, %v3935_v29  ;;  %v5008_v53 = vld [vmem:[%s7844_s1 + $0x564] sm:$0xf]  ;;  %v3927_v6 = vld [vmem:[%s7844_s1 + $0x568] sm:$0xf0] }
  0xef   :  { %2928 = vmatpush.bf16.msrb.mxu3 %v3666_v47  ;;  %v3578_v47 = vor.u32 %v4920_v26, %v3575_v27  ;;  %v4990_v60 = vld [vmem:[%s7844_s1 + $0x4d4] sm:$0xf]  ;;  %v3930_v61 = vor.u32 %v5008_v53, %v3927_v6  ;;  %v3711_v28 = vld [vmem:[%s7844_s1 + $0x3b8] sm:$0xf0]  ;;  %v4968_v53 = vld [vmem:[%s7844_s1 + $0x424] sm:$0xf] }
  0xf0   :  { %2890 = vmatpush.bf16.msrb.mxu0 %v3466_v54  ;;  %v4934_v54 = vld [vmem:[%s7844_s1 + $0x314] sm:$0xf]  ;;  %v2664_v2 = vpop.f32.mrf.mxu2 }
  0xf1   :  { %2903 = vmatpush.bf16.msrb.mxu1 %v3530_v55  ;;  %v3631_v55 = vld [vmem:[%s7844_s1 + $0x318] sm:$0xf0]  ;;  %v2677_v12 = vpop.f32.mrf.mxu3  ;;  %v4970_v29 = vld [vmem:[%s7844_s1 + $0x434] sm:$0xf] }
  0xf2   :  { %2916 = vmatpush.bf16.msrb.mxu2 %v3594_v58  ;;  %v4884_v58 = vld [vmem:[%s7844_s1 + $0x184] sm:$0xf]  ;;  %v3634_v3 = vor.u32 %v4934_v54, %v3631_v55  ;;  %v3866_v55 = vor.u32 %v4992_v48, %v3863_v50 }
  0xf3   :  { %2929 = vmatpush.bf16.msrb.mxu3 %v3658_v63  ;;  %v4916_v63 = vld [vmem:[%s7844_s1 + $0x284] sm:$0xf]  ;;  %v3434_v14 = vor.u32 %v4884_v58, %v3431_v59  ;;  %v4974_v58 = vld [vmem:[%s7844_s1 + $0x454] sm:$0xf]  ;;  %v3791_v59 = vld [vmem:[%s7844_s1 + $0x458] sm:$0xf0] }
  0xf4   :  { %2891 = vmatpush.bf16.msrb.mxu0 %v3458_v5  ;;  %v3743_v5 = vld [vmem:[%s7844_s1 + $0x3f8] sm:$0xf0]  ;;  %v3562_v26 = vor.u32 %v4916_v63, %v3559_v0  ;;  %v3794_v2 = vor.u32 %v4974_v58, %v3791_v59 }
  0xf5   :  { %2904 = vmatpush.bf16.msrb.mxu1 %v3522_v7  ;;  %v4978_v7 = vld [vmem:[%s7844_s1 + $0x474] sm:$0xf]  ;;  %v3746_v27 = vor.u32 %v4962_v4, %v3743_v5  ;;  %v3919_v0 = vld [vmem:[%s7844_s1 + $0x558] sm:$0xf0]  ;;  %v4972_v4 = vld [vmem:[%s7844_s1 + $0x444] sm:$0xf] }
  0xf6   :  { %2917 = vmatpush.bf16.msrb.mxu2 %v3586_v40  ;;  %v4994_v40 = vld [vmem:[%s7844_s1 + $0x4f4] sm:$0xf]  ;;  %v3810_v34 = vor.u32 %v4978_v7, %v3807_v8  ;;  %v3783_v5 = vld [vmem:[%s7844_s1 + $0x448] sm:$0xf0]  ;;  %v4988_v7 = vld [vmem:[%s7844_s1 + $0x4c4] sm:$0xf] }
  0xf7   :  { %2930 = vmatpush.bf16.msrb.mxu3 %v3650_v19  ;;  %v3623_v19 = vld [vmem:[%s7844_s1 + $0x308] sm:$0xf0]  ;;  %v3874_v35 = vor.u32 %v4994_v40, %v3871_v11 }
  0xf8   :  { %2892 = vmatpush.bf16.msrb.mxu0 %v3450_v42  ;;  %v4960_v42 = vld [vmem:[%s7844_s1 + $0x3e4] sm:$0xf]  ;;  %v3626_v20 = vor.u32 %v4932_v18, %v3623_v19  ;;  %v3847_v8 = vld [vmem:[%s7844_s1 + $0x4c8] sm:$0xf0]  ;;  %v3786_v18 = vor.u32 %v4972_v4, %v3783_v5  ;;  %v3759_v5 = vld [vmem:[%s7844_s1 + $0x418] sm:$0xf0] }
  0xf9   :  { %2905 = vmatpush.bf16.msrb.mxu1 %v3514_v44  ;;  %v3735_v44 = vld [vmem:[%s7844_s1 + $0x3e8] sm:$0xf0]  ;;  %v3850_v19 = vor.u32 %v4988_v7, %v3847_v8  ;;  %v4982_v7 = vld [vmem:[%s7844_s1 + $0x494] sm:$0xf]  ;;  %v3823_v8 = vld [vmem:[%s7844_s1 + $0x498] sm:$0xf0] }
  0xfa   :  { %2918 = vmatpush.bf16.msrb.mxu2 %v3578_v47  ;;  %v3799_v47 = vld [vmem:[%s7844_s1 + $0x468] sm:$0xf0] }
  0xfb   :  { %2931 = vmatpush.bf16.msrb.mxu3 %v3642_v52  ;;  %v3738_v52 = vor.u32 %v4960_v42, %v3735_v44  ;;  %v3802_v54 = vor.u32 %v4976_v21, %v3799_v47  ;;  %v3903_v47 = vld [vmem:[%s7844_s1 + $0x538] sm:$0xf0] }
  0xfc   :  { %2893 = vmatpush.bf16.msrb.mxu0 %v3442_v56  ;;  %v4958_v56 = vld [vmem:[%s7844_s1 + $0x3d4] sm:$0xf] }
  0xfd   :  { %2906 = vmatpush.bf16.msrb.mxu1 %v3506_v57  ;;  %v3727_v57 = vld [vmem:[%s7844_s1 + $0x3d8] sm:$0xf0] }
  0xfe   :  { %2919 = vmatpush.bf16.msrb.mxu2 %v3570_v62  ;;  %v3855_v62 = vld [vmem:[%s7844_s1 + $0x4d8] sm:$0xf0]  ;;  %v3730_v63 = vor.u32 %v4958_v56, %v3727_v57  ;;  %v3831_v56 = vld [vmem:[%s7844_s1 + $0x4a8] sm:$0xf0] }
  0xff   :  { %2932 = vmatpush.bf16.msrb.mxu3 %v3634_v3  ;;  %v3858_v3 = vor.u32 %v4990_v60, %v3855_v62  ;;  %v5000_v62 = vld [vmem:[%s7844_s1 + $0x524] sm:$0xf] }
 0x100   :  { %2894 = vmatpush.bf16.msrb.mxu0 %v3434_v14  ;;  %v2688_v11 = vpop.f32.mrf.mxu0  ;;  %v3911_v14 = vld [vmem:[%s7844_s1 + $0x548] sm:$0xf0] }
 0x101   :  { %2907 = vmatpush.bf16.msrb.mxu1 %v3498_v15  ;;  %v2689_v15 = vadd.f32 %v2688_v11, %v6876_v41  ;;  %v4986_v41 = vld [vmem:[%s7844_s1 + $0x4b4] sm:$0xf] }
 0x102   :  { %2920 = vmatpush.bf16.msrb.mxu2 %v3562_v26  ;;  %v2701_v26 = vpop.f32.mrf.mxu1  ;;  %v4998_v11 = vld [vmem:[%s7844_s1 + $0x514] sm:$0xf] }
 0x103   :  { %2933 = vmatpush.bf16.msrb.mxu3 %v3626_v20  ;;  %2895 = vmatmul.bf16.vlgmr.msrb.gmra.mxu0 %v5546_v13  ;;  %v5006_v13 = vld [vmem:[%s7844_s1 + $0x554] sm:$0xf]  ;;  %v2702_v42 = vadd.f32 %v2701_v26, %v2689_v15  ;;  %v3687_v15 = vld [vmem:[%s7844_s1 + $0x388] sm:$0xf0]  ;;  %v4964_v26 = vld [vmem:[%s7844_s1 + $0x404] sm:$0xf] }
 0x104   :  { %2939 = vmatpush.bf16.msra.mxu0 %v3746_v27  ;;  %2908 = vmatmul.bf16.vlgmr.msrb.gmra.mxu1 %v5712_v36  ;;  %v3719_v36 = vld [vmem:[%s7844_s1 + $0x3c8] sm:$0xf0]  ;;  %v3922_v40 = vor.u32 %v5006_v13, %v3919_v0  ;;  %v4954_v27 = vld [vmem:[%s7844_s1 + $0x3b4] sm:$0xf] }
 0x105   :  { %2952 = vmatpush.bf16.msra.mxu1 %v3810_v34  ;;  %2921 = vmatmul.bf16.vlgmr.msrb.gmra.mxu2 %v5722_v43  ;;  %v4956_v43 = vld [vmem:[%s7844_s1 + $0x3c4] sm:$0xf]  ;;  %v3775_v34 = vld [vmem:[%s7844_s1 + $0x438] sm:$0xf0]  ;;  %v3714_v21 = vor.u32 %v4954_v27, %v3711_v28  ;;  %v5002_v20 = vld [vmem:[%s7844_s1 + $0x534] sm:$0xf] }
 0x106   :  { %2965 = vmatpush.bf16.msra.mxu2 %v3874_v35  ;;  %2934 = vmatmul.bf16.vlgmr.msrb.gmra.mxu3 %v5714_v39  ;;  %v3722_v12 = vor.u32 %v4956_v43, %v3719_v36  ;;  %v5004_v39 = vld [vmem:[%s7844_s1 + $0x544] sm:$0xf]  ;;  %v3839_v35 = vld [vmem:[%s7844_s1 + $0x4b8] sm:$0xf0]  ;;  %v3778_v48 = vor.u32 %v4970_v29, %v3775_v34  ;;  %v3906_v58 = vor.u32 %v5002_v20, %v3903_v47  ;;  %v4966_v36 = vld [vmem:[%s7844_s1 + $0x414] sm:$0xf] }
 0x107   :  { %2978 = vmatpush.bf16.msra.mxu3 %v3938_v51  ;;  %v3914_v44 = vor.u32 %v5004_v39, %v3911_v14  ;;  %v3842_v50 = vor.u32 %v4986_v41, %v3839_v35  ;;  %v4952_v51 = vld [vmem:[%s7844_s1 + $0x3a4] sm:$0xf]  ;;  %v3695_v43 = vld [vmem:[%s7844_s1 + $0x398] sm:$0xf0]  ;;  %v3751_v27 = vld [vmem:[%s7844_s1 + $0x408] sm:$0xf0] }
 0x108   :  { %2940 = vmatpush.bf16.msra.mxu0 %v3738_v52  ;;  %v3703_v52 = vld [vmem:[%s7844_s1 + $0x3a8] sm:$0xf0]  ;;  %v2714_v6 = vpop.f32.mrf.mxu2  ;;  %v3887_v39 = vld [vmem:[%s7844_s1 + $0x518] sm:$0xf0]  ;;  %v4948_v14 = vld [vmem:[%s7844_s1 + $0x384] sm:$0xf] }
 0x109   :  { %2953 = vmatpush.bf16.msra.mxu1 %v3802_v54  ;;  %v3767_v54 = vld [vmem:[%s7844_s1 + $0x428] sm:$0xf0]  ;;  %v2715_v57 = vadd.f32 %v2714_v6, %v2702_v42  ;;  %v2727_v59 = vpop.f32.mrf.mxu3  ;;  %v3706_v60 = vor.u32 %v4952_v51, %v3703_v52  ;;  %v4980_v28 = vld [vmem:[%s7844_s1 + $0x484] sm:$0xf]  ;;  %v5026_v34 = vld [vmem:[%s7844_s1 + $0x5f4] sm:$0xf]  ;;  %v3890_v42 = vor.u32 %v4998_v11, %v3887_v39  ;;  %v3690_v47 = vor.u32 %v4948_v14, %v3687_v15 }
 0x10a   :  { %2966 = vmatpush.bf16.msra.mxu2 %v3866_v55  ;;  %v4984_v55 = vld [vmem:[%s7844_s1 + $0x4a4] sm:$0xf]  ;;  %v3770_v0 = vor.u32 %v4968_v53, %v3767_v54  ;;  %v2703_v4 = vpop.f32.mrf.mxu1  ;;  %v3815_v29 = vld [vmem:[%s7844_s1 + $0x488] sm:$0xf0]  ;;  %v3999_v41 = vld [vmem:[%s7844_s1 + $0x5f8] sm:$0xf0]  ;;  %v3754_v53 = vor.u32 %v4964_v26, %v3751_v27 }
 0x10b   :  { %2979 = vmatpush.bf16.msra.mxu3 %v3930_v61  ;;  %v3895_v61 = vld [vmem:[%s7844_s1 + $0x528] sm:$0xf0]  ;;  %v7075_v13 = vadd.f32 %v2727_v59, %v2715_v57  ;;  %v5058_v20 = vld [vmem:[%s7844_s1 + $0x6f4] sm:$0xf]  ;;  %v3818_v6 = vor.u32 %v4980_v28, %v3815_v29  ;;  %v4002_v54 = vor.u32 %v5026_v34, %v3999_v41  ;;  %v4191_v57 = vld [vmem:[%s7844_s1 + $0x778] sm:$0xf0] }
 0x10c   :  { %2941 = vmatpush.bf16.msra.mxu0 %v3730_v63  ;;  %v2690_v63 = vpop.f32.mrf.mxu0  ;;  %v3879_v51 = vld [vmem:[%s7844_s1 + $0x508] sm:$0xf0]  ;;  %v5038_v11 = vld [vmem:[%s7844_s1 + $0x654] sm:$0xf]  ;;  %v4111_v14 = vld [vmem:[%s7844_s1 + $0x6d8] sm:$0xf0] }
 0x10d   :  { %2954 = vmatpush.bf16.msra.mxu1 %v3794_v2  ;;  %v3834_v2 = vor.u32 %v4984_v55, %v3831_v56  ;;  %v5074_v56 = vld [vmem:[%s7844_s1 + $0x774] sm:$0xf]  ;;  %v4055_v63 = vld [vmem:[%s7844_s1 + $0x668] sm:$0xf0]  ;;  %v5036_v27 = vld [vmem:[%s7844_s1 + $0x644] sm:$0xf] }
 0x10e   :  { %2967 = vmatpush.bf16.msra.mxu2 %v3858_v3  ;;  %v4950_v3 = vld [vmem:[%s7844_s1 + $0x394] sm:$0xf]  ;;  %v4183_v4 = vld [vmem:[%s7844_s1 + $0x768] sm:$0xf0]  ;;  %v5052_v29 = vld [vmem:[%s7844_s1 + $0x6c4] sm:$0xf] }
 0x10f   :  { %2980 = vmatpush.bf16.msra.mxu3 %v3922_v40  ;;  %v3898_v40 = vor.u32 %v5000_v62, %v3895_v61  ;;  %v3991_v62 = vld [vmem:[%s7844_s1 + $0x5e8] sm:$0xf0]  ;;  %v5040_v61 = vld [vmem:[%s7844_s1 + $0x664] sm:$0xf]  ;;  %v5054_v39 = vld [vmem:[%s7844_s1 + $0x6d4] sm:$0xf] }
 0x110   :  { %2942 = vmatpush.bf16.msra.mxu0 %v3722_v12  ;;  %v3698_v12 = vor.u32 %v4950_v3, %v3695_v43  ;;  %v2716_v35 = vpop.f32.mrf.mxu2  ;;  %v4194_v3 = vor.u32 %v5074_v56, %v4191_v57  ;;  %v4114_v26 = vor.u32 %v5054_v39, %v4111_v14  ;;  %v4039_v28 = vld [vmem:[%s7844_s1 + $0x648] sm:$0xf0] }
 0x111   :  { %2955 = vmatpush.bf16.msra.mxu1 %v3786_v18  ;;  %v3762_v18 = vor.u32 %v4966_v36, %v3759_v5  ;;  %v2729_v52 = vpop.f32.mrf.mxu3  ;;  %v5072_v36 = vld [vmem:[%s7844_s1 + $0x764] sm:$0xf]  ;;  %v4058_v5 = vor.u32 %v5040_v61, %v4055_v63  ;;  %v4103_v34 = vld [vmem:[%s7844_s1 + $0x6c8] sm:$0xf0] }
 0x112   :  { %2968 = vmatpush.bf16.msra.mxu2 %v3850_v19  ;;  %v3826_v19 = vor.u32 %v4982_v7, %v3823_v8  ;;  %v5022_v8 = vld [vmem:[%s7844_s1 + $0x5d4] sm:$0xf]  ;;  %v4186_v15 = vor.u32 %v5072_v36, %v4183_v4  ;;  %v3967_v52 = vld [vmem:[%s7844_s1 + $0x5b8] sm:$0xf0]  ;;  %v5016_v61 = vld [vmem:[%s7844_s1 + $0x5a4] sm:$0xf] }
 0x113   :  { %2981 = vmatpush.bf16.msra.mxu3 %v3914_v44  ;;  %v5042_v44 = vld [vmem:[%s7844_s1 + $0x674] sm:$0xf]  ;;  %v3959_v63 = vld [vmem:[%s7844_s1 + $0x5a8] sm:$0xf0] }
 0x114   :  { %2943 = vmatpush.bf16.msra.mxu0 %v3714_v21  ;;  %v4063_v21 = vld [vmem:[%s7844_s1 + $0x678] sm:$0xf0]  ;;  %v4087_v36 = vld [vmem:[%s7844_s1 + $0x6a8] sm:$0xf0] }
 0x115   :  { %2956 = vmatpush.bf16.msra.mxu1 %v3778_v48  ;;  %v4127_v48 = vld [vmem:[%s7844_s1 + $0x6f8] sm:$0xf0]  ;;  %v4066_v55 = vor.u32 %v5042_v44, %v4063_v21  ;;  %v5068_v44 = vld [vmem:[%s7844_s1 + $0x744] sm:$0xf]  ;;  %v4167_v21 = vld [vmem:[%s7844_s1 + $0x748] sm:$0xf0] }
 0x116   :  { %2969 = vmatpush.bf16.msra.mxu2 %v3842_v50  ;;  %v4996_v50 = vld [vmem:[%s7844_s1 + $0x504] sm:$0xf]  ;;  %v4170_v56 = vor.u32 %v5068_v44, %v4167_v21 }
 0x117   :  { %2982 = vmatpush.bf16.msra.mxu3 %v3906_v58  ;;  %v4130_v58 = vor.u32 %v5058_v20, %v4127_v48  ;;  %v3882_v59 = vor.u32 %v4996_v50, %v3879_v51  ;;  %v4106_v48 = vor.u32 %v5052_v29, %v4103_v34  ;;  %v5018_v51 = vld [vmem:[%s7844_s1 + $0x5b4] sm:$0xf]  ;;  %v4143_v34 = vld [vmem:[%s7844_s1 + $0x718] sm:$0xf0]  ;;  %v5028_v21 = vld [vmem:[%s7844_s1 + $0x604] sm:$0xf] }
 0x118   :  { %2944 = vmatpush.bf16.msra.mxu0 %v3706_v60  ;;  %v5024_v60 = vld [vmem:[%s7844_s1 + $0x5e4] sm:$0xf]  ;;  %v3970_v57 = vor.u32 %v5018_v51, %v3967_v52  ;;  %v4255_v51 = vld [vmem:[%s7844_s1 + $0x7f8] sm:$0xf0] }
 0x119   :  { %2957 = vmatpush.bf16.msra.mxu1 %v3770_v0  ;;  %v5056_v0 = vld [vmem:[%s7844_s1 + $0x6e4] sm:$0xf]  ;;  %v3994_v43 = vor.u32 %v5024_v60, %v3991_v62 }
 0x11a   :  { %2970 = vmatpush.bf16.msra.mxu2 %v3834_v2  ;;  %v4119_v2 = vld [vmem:[%s7844_s1 + $0x6e8] sm:$0xf0] }
 0x11b   :  { %2983 = vmatpush.bf16.msra.mxu3 %v3898_v40  ;;  %v4122_v7 = vor.u32 %v5056_v0, %v4119_v2  ;;  %v3983_v40 = vld [vmem:[%s7844_s1 + $0x5d8] sm:$0xf0]  ;;  %v5032_v0 = vld [vmem:[%s7844_s1 + $0x624] sm:$0xf] }
 0x11c   :  { %2945 = vmatpush.bf16.msra.mxu0 %v3698_v12  ;;  %v4047_v12 = vld [vmem:[%s7844_s1 + $0x658] sm:$0xf0] }
 0x11d   :  { %2958 = vmatpush.bf16.msra.mxu1 %v3762_v18  ;;  %v4175_v18 = vld [vmem:[%s7844_s1 + $0x758] sm:$0xf0] }
 0x11e   :  { %2971 = vmatpush.bf16.msra.mxu2 %v3826_v19  ;;  %v4050_v19 = vor.u32 %v5038_v11, %v4047_v12  ;;  %v4151_v11 = vld [vmem:[%s7844_s1 + $0x728] sm:$0xf0] }
 0x11f   :  { %2984 = vmatpush.bf16.msra.mxu3 %v3890_v42 }
 0x120   :  { %2946 = vmatpush.bf16.msra.mxu0 %v3690_v47  ;;  %v2740_v35 = vpop.f32.mrf.mxu0  ;;  %v4042_v47 = vor.u32 %v5036_v27, %v4039_v28  ;;  %v5062_v28 = vld [vmem:[%s7844_s1 + $0x714] sm:$0xf] }
 0x121   :  { %2959 = vmatpush.bf16.msra.mxu1 %v3754_v53  ;;  %v2741_v20 = vadd.f32 %v2740_v35, %v7075_v13  ;;  %v2753_v50 = vpop.f32.mrf.mxu1  ;;  %v5034_v53 = vld [vmem:[%s7844_s1 + $0x634] sm:$0xf]  ;;  %v3943_v35 = vld [vmem:[%s7844_s1 + $0x588] sm:$0xf0] }
 0x122   :  { %2972 = vmatpush.bf16.msra.mxu2 %v3818_v6  ;;  %v4031_v6 = vld [vmem:[%s7844_s1 + $0x638] sm:$0xf0]  ;;  %v5050_v13 = vld [vmem:[%s7844_s1 + $0x6b4] sm:$0xf] }
 0x123   :  { %2985 = vmatpush.bf16.msra.mxu3 %v3882_v59  ;;  %2947 = vmatmul.bf16.vlgmr.msra.gmra.mxu0 %v5734_v49  ;;  %v3986_v49 = vor.u32 %v5022_v8, %v3983_v40  ;;  %v4159_v59 = vld [vmem:[%s7844_s1 + $0x738] sm:$0xf0]  ;;  %v4034_v60 = vor.u32 %v5034_v53, %v4031_v6  ;;  %v3962_v8 = vor.u32 %v5016_v61, %v3959_v63  ;;  %v5064_v40 = vld [vmem:[%s7844_s1 + $0x724] sm:$0xf]  ;;  %v5106_v6 = vld [vmem:[%s7844_s1 + $0x874] sm:$0xf] }
 0x124   :  { %2991 = vmatpush.bf16.msrb.mxu0 %v4002_v54  ;;  %2960 = vmatmul.bf16.vlgmr.msra.gmra.mxu1 %v5913_v24  ;;  %v5020_v24 = vld [vmem:[%s7844_s1 + $0x5c4] sm:$0xf]  ;;  %v4095_v54 = vld [vmem:[%s7844_s1 + $0x6b8] sm:$0xf0]  ;;  %v4154_v27 = vor.u32 %v5064_v40, %v4151_v11  ;;  %v4146_v53 = vor.u32 %v5062_v28, %v4143_v34  ;;  %v4375_v40 = vld [vmem:[%s7844_s1 + $0x8e8] sm:$0xf0] }
 0x125   :  { %3004 = vmatpush.bf16.msrb.mxu1 %v4066_v55  ;;  %2973 = vmatmul.bf16.vlgmr.msra.gmra.mxu2 %v5926_v30  ;;  %v5070_v30 = vld [vmem:[%s7844_s1 + $0x754] sm:$0xf]  ;;  %v2754_v55 = vadd.f32 %v2753_v50, %v2741_v20  ;;  %v4098_v62 = vor.u32 %v5050_v13, %v4095_v54  ;;  %v4007_v20 = vld [vmem:[%s7844_s1 + $0x608] sm:$0xf0]  ;;  %v4319_v13 = vld [vmem:[%s7844_s1 + $0x878] sm:$0xf0] }
 0x126   :  { %3017 = vmatpush.bf16.msrb.mxu2 %v4130_v58  ;;  %2986 = vmatmul.bf16.vlgmr.msra.gmra.mxu3 %v5915_v25  ;;  %v3975_v25 = vld [vmem:[%s7844_s1 + $0x5c8] sm:$0xf0]  ;;  %v4178_v41 = vor.u32 %v5070_v30, %v4175_v18  ;;  %v5066_v58 = vld [vmem:[%s7844_s1 + $0x734] sm:$0xf]  ;;  %v3951_v30 = vld [vmem:[%s7844_s1 + $0x598] sm:$0xf0]  ;;  %v4322_v63 = vor.u32 %v5106_v6, %v4319_v13 }
 0x127   :  { %3030 = vmatpush.bf16.msrb.mxu3 %v4194_v3  ;;  %v3978_v42 = vor.u32 %v5020_v24, %v3975_v25  ;;  %v4023_v3 = vld [vmem:[%s7844_s1 + $0x628] sm:$0xf0]  ;;  %v5030_v18 = vld [vmem:[%s7844_s1 + $0x614] sm:$0xf]  ;;  %v4079_v25 = vld [vmem:[%s7844_s1 + $0x698] sm:$0xf0] }
 0x128   :  { %2992 = vmatpush.bf16.msrb.mxu0 %v3994_v43  ;;  %v2766_v2 = vpop.f32.mrf.mxu2  ;;  %v5048_v43 = vld [vmem:[%s7844_s1 + $0x6a4] sm:$0xf]  ;;  %v2742_v12 = vpop.f32.mrf.mxu0  ;;  %v4026_v14 = vor.u32 %v5032_v0, %v4023_v3  ;;  %v5046_v24 = vld [vmem:[%s7844_s1 + $0x694] sm:$0xf] }
 0x129   :  { %3005 = vmatpush.bf16.msrb.mxu1 %v4058_v5  ;;  %v2767_v4 = vadd.f32 %v2766_v2, %v2754_v55  ;;  %v4162_v5 = vor.u32 %v5066_v58, %v4159_v59  ;;  %v4082_v44 = vor.u32 %v5046_v24, %v4079_v25  ;;  %v5090_v50 = vld [vmem:[%s7844_s1 + $0x7f4] sm:$0xf]  ;;  %v4135_v58 = vld [vmem:[%s7844_s1 + $0x708] sm:$0xf0]  ;;  %v4447_v2 = vld [vmem:[%s7844_s1 + $0x978] sm:$0xf0] }
 0x12a   :  { %3018 = vmatpush.bf16.msrb.mxu2 %v4122_v7  ;;  %v2779_v7 = vpop.f32.mrf.mxu3  ;;  %v5122_v54 = vld [vmem:[%s7844_s1 + $0x8f4] sm:$0xf]  ;;  %v4258_v61 = vor.u32 %v5090_v50, %v4255_v51  ;;  %v4303_v24 = vld [vmem:[%s7844_s1 + $0x858] sm:$0xf0]  ;;  %v5132_v50 = vld [vmem:[%s7844_s1 + $0x944] sm:$0xf] }
 0x12b   :  { %3031 = vmatpush.bf16.msrb.mxu3 %v4186_v15  ;;  %v7274_v39 = vadd.f32 %v2779_v7, %v2767_v4  ;;  %v4090_v15 = vor.u32 %v5048_v43, %v4087_v36  ;;  %v5138_v0 = vld [vmem:[%s7844_s1 + $0x974] sm:$0xf]  ;;  %v5088_v36 = vld [vmem:[%s7844_s1 + $0x7e4] sm:$0xf]  ;;  %v4247_v4 = vld [vmem:[%s7844_s1 + $0x7e8] sm:$0xf0] }
 0x12c   :  { %2993 = vmatpush.bf16.msrb.mxu0 %v3986_v49  ;;  %v5014_v49 = vld [vmem:[%s7844_s1 + $0x594] sm:$0xf]  ;;  %v4311_v7 = vld [vmem:[%s7844_s1 + $0x868] sm:$0xf0]  ;;  %v4450_v11 = vor.u32 %v5138_v0, %v4447_v2  ;;  %v4250_v12 = vor.u32 %v5088_v36, %v4247_v4  ;;  %v5096_v36 = vld [vmem:[%s7844_s1 + $0x824] sm:$0xf] }
 0x12d   :  { %3006 = vmatpush.bf16.msrb.mxu1 %v4050_v19  ;;  %v2755_v19 = vpop.f32.mrf.mxu1  ;;  %v3954_v29 = vor.u32 %v5014_v49, %v3951_v30  ;;  %v5118_v25 = vld [vmem:[%s7844_s1 + $0x8d4] sm:$0xf]  ;;  %v4423_v51 = vld [vmem:[%s7844_s1 + $0x948] sm:$0xf0] }
 0x12e   :  { %3019 = vmatpush.bf16.msrb.mxu2 %v4114_v26  ;;  %v4015_v26 = vld [vmem:[%s7844_s1 + $0x618] sm:$0xf0] }
 0x12f   :  { %3032 = vmatpush.bf16.msrb.mxu3 %v4178_v41  ;;  %v5012_v41 = vld [vmem:[%s7844_s1 + $0x584] sm:$0xf]  ;;  %v4239_v19 = vld [vmem:[%s7844_s1 + $0x7d8] sm:$0xf0] }
 0x130   :  { %2994 = vmatpush.bf16.msrb.mxu0 %v3978_v42  ;;  %v4018_v42 = vor.u32 %v5030_v18, %v4015_v26  ;;  %v2768_v52 = vpop.f32.mrf.mxu2  ;;  %v3946_v55 = vor.u32 %v5012_v41, %v3943_v35  ;;  %v5086_v18 = vld [vmem:[%s7844_s1 + $0x7d4] sm:$0xf]  ;;  %v5100_v35 = vld [vmem:[%s7844_s1 + $0x844] sm:$0xf] }
 0x131   :  { %3007 = vmatpush.bf16.msrb.mxu1 %v4042_v47  ;;  %v5044_v47 = vld [vmem:[%s7844_s1 + $0x684] sm:$0xf]  ;;  %v5102_v26 = vld [vmem:[%s7844_s1 + $0x854] sm:$0xf] }
 0x132   :  { %3020 = vmatpush.bf16.msrb.mxu2 %v4106_v48  ;;  %v4071_v48 = vld [vmem:[%s7844_s1 + $0x688] sm:$0xf0]  ;;  %v2781_v59 = vpop.f32.mrf.mxu3  ;;  %v4306_v34 = vor.u32 %v5102_v26, %v4303_v24  ;;  %v5078_v24 = vld [vmem:[%s7844_s1 + $0x794] sm:$0xf] }
 0x133   :  { %3033 = vmatpush.bf16.msrb.mxu3 %v4170_v56  ;;  %v4383_v56 = vld [vmem:[%s7844_s1 + $0x8f8] sm:$0xf0] }
 0x134   :  { %2995 = vmatpush.bf16.msrb.mxu0 %v3970_v57  ;;  %v5060_v57 = vld [vmem:[%s7844_s1 + $0x704] sm:$0xf]  ;;  %v4386_v3 = vor.u32 %v5122_v54, %v4383_v56  ;;  %v5082_v54 = vld [vmem:[%s7844_s1 + $0x7b4] sm:$0xf] }
 0x135   :  { %3008 = vmatpush.bf16.msrb.mxu1 %v4034_v60  ;;  %v4010_v60 = vor.u32 %v5028_v21, %v4007_v20  ;;  %v4138_v43 = vor.u32 %v5060_v57, %v4135_v58  ;;  %v4359_v21 = vld [vmem:[%s7844_s1 + $0x8c8] sm:$0xf0]  ;;  %v5098_v56 = vld [vmem:[%s7844_s1 + $0x834] sm:$0xf]  ;;  %v4287_v57 = vld [vmem:[%s7844_s1 + $0x838] sm:$0xf0] }
 0x136   :  { %3021 = vmatpush.bf16.msrb.mxu2 %v4098_v62  ;;  %v4074_v62 = vor.u32 %v5044_v47, %v4071_v48  ;;  %v4351_v58 = vld [vmem:[%s7844_s1 + $0x8b8] sm:$0xf0]  ;;  %v4290_v0 = vor.u32 %v5098_v56, %v4287_v57 }
 0x137   :  { %3034 = vmatpush.bf16.msrb.mxu3 %v4162_v5  ;;  %v5104_v5 = vld [vmem:[%s7844_s1 + $0x864] sm:$0xf]  ;;  %v4639_v57 = vld [vmem:[%s7844_s1 + $0xaf8] sm:$0xf0] }
 0x138   :  { %2996 = vmatpush.bf16.msrb.mxu0 %v3962_v8  ;;  %v5120_v8 = vld [vmem:[%s7844_s1 + $0x8e4] sm:$0xf]  ;;  %v4314_v49 = vor.u32 %v5104_v5, %v4311_v7  ;;  %v4279_v5 = vld [vmem:[%s7844_s1 + $0x828] sm:$0xf0] }
 0x139   :  { %3009 = vmatpush.bf16.msrb.mxu1 %v4026_v14  ;;  %v5136_v14 = vld [vmem:[%s7844_s1 + $0x964] sm:$0xf]  ;;  %v4378_v30 = vor.u32 %v5120_v8, %v4375_v40  ;;  %v4343_v8 = vld [vmem:[%s7844_s1 + $0x8a8] sm:$0xf0] }
 0x13a   :  { %3022 = vmatpush.bf16.msrb.mxu2 %v4090_v15  ;;  %v4439_v15 = vld [vmem:[%s7844_s1 + $0x968] sm:$0xf0]  ;;  %v5112_v7 = vld [vmem:[%s7844_s1 + $0x8a4] sm:$0xf] }
 0x13b   :  { %3035 = vmatpush.bf16.msrb.mxu3 %v4154_v27  ;;  %v4367_v27 = vld [vmem:[%s7844_s1 + $0x8d8] sm:$0xf0]  ;;  %v4442_v28 = vor.u32 %v5136_v14, %v4439_v15  ;;  %v5128_v15 = vld [vmem:[%s7844_s1 + $0x924] sm:$0xf]  ;;  %v4346_v26 = vor.u32 %v5112_v7, %v4343_v8  ;;  %v4567_v7 = vld [vmem:[%s7844_s1 + $0xa68] sm:$0xf0] }
 0x13c   :  { %2997 = vmatpush.bf16.msrb.mxu0 %v3954_v29  ;;  %v4431_v29 = vld [vmem:[%s7844_s1 + $0x958] sm:$0xf0]  ;;  %v4370_v41 = vor.u32 %v5118_v25, %v4367_v27  ;;  %v5094_v27 = vld [vmem:[%s7844_s1 + $0x814] sm:$0xf]  ;;  %v5184_v8 = vld [vmem:[%s7844_s1 + $0xae4] sm:$0xf] }
 0x13d   :  { %3010 = vmatpush.bf16.msrb.mxu1 %v4018_v42  ;;  %v4295_v42 = vld [vmem:[%s7844_s1 + $0x848] sm:$0xf0]  ;;  %v4207_v25 = vld [vmem:[%s7844_s1 + $0x798] sm:$0xf0] }
 0x13e   :  { %3023 = vmatpush.bf16.msrb.mxu2 %v4082_v44  ;;  %v5116_v44 = vld [vmem:[%s7844_s1 + $0x8c4] sm:$0xf] }
 0x13f   :  { %3036 = vmatpush.bf16.msrb.mxu3 %v4146_v53  ;;  %v4298_v53 = vor.u32 %v5100_v35, %v4295_v42  ;;  %v4362_v6 = vor.u32 %v5116_v44, %v4359_v21  ;;  %v5076_v35 = vld [vmem:[%s7844_s1 + $0x784] sm:$0xf]  ;;  %v4199_v42 = vld [vmem:[%s7844_s1 + $0x788] sm:$0xf0] }
 0x140   :  { %2998 = vmatpush.bf16.msrb.mxu0 %v3946_v55  ;;  %v2792_v47 = vpop.f32.mrf.mxu0  ;;  %v4223_v55 = vld [vmem:[%s7844_s1 + $0x7b8] sm:$0xf0]  ;;  %v4202_v56 = vor.u32 %v5076_v35, %v4199_v42  ;;  %v4615_v35 = vld [vmem:[%s7844_s1 + $0xac8] sm:$0xf0] }
 0x141   :  { %3011 = vmatpush.bf16.msrb.mxu1 %v4010_v60  ;;  %v2793_v52 = vadd.f32 %v2792_v47, %v7274_v39  ;;  %v2805_v13 = vpop.f32.mrf.mxu1  ;;  %v5114_v39 = vld [vmem:[%s7844_s1 + $0x8b4] sm:$0xf]  ;;  %v4426_v60 = vor.u32 %v5132_v50, %v4423_v51  ;;  %v4263_v47 = vld [vmem:[%s7844_s1 + $0x808] sm:$0xf0] }
 0x142   :  { %3024 = vmatpush.bf16.msrb.mxu2 %v4074_v62  ;;  %v4226_v62 = vor.u32 %v5082_v54, %v4223_v55  ;;  %v4354_v2 = vor.u32 %v5114_v39, %v4351_v58  ;;  %v4327_v50 = vld [vmem:[%s7844_s1 + $0x888] sm:$0xf0]  ;;  %v5154_v51 = vld [vmem:[%s7844_s1 + $0x9f4] sm:$0xf]  ;;  %v4575_v54 = vld [vmem:[%s7844_s1 + $0xa78] sm:$0xf0] }
 0x143   :  { %3037 = vmatpush.bf16.msrb.mxu3 %v4138_v43  ;;  %2999 = vmatmul.bf16.vlgmr.msrb.gmra.mxu0 %v5928_v31  ;;  %v4242_v31 = vor.u32 %v5086_v18, %v4239_v19  ;;  %v2806_v59 = vadd.f32 %v2805_v13, %v2793_v52  ;;  %v4215_v43 = vld [vmem:[%s7844_s1 + $0x7a8] sm:$0xf0]  ;;  %v4282_v19 = vor.u32 %v5096_v36, %v4279_v5  ;;  %v4511_v52 = vld [vmem:[%s7844_s1 + $0x9f8] sm:$0xf0]  ;;  %v5170_v13 = vld [vmem:[%s7844_s1 + $0xa74] sm:$0xf] }
 0x144   :  { %3043 = vmatpush.bf16.msra.mxu0 %v4258_v61  ;;  %3012 = vmatmul.bf16.vlgmr.msrb.gmra.mxu1 %v6123_v22  ;;  %v5084_v22 = vld [vmem:[%s7844_s1 + $0x7c4] sm:$0xf]  ;;  %v5130_v61 = vld [vmem:[%s7844_s1 + $0x934] sm:$0xf]  ;;  %v4391_v58 = vld [vmem:[%s7844_s1 + $0x908] sm:$0xf0] }
 0x145   :  { %3056 = vmatpush.bf16.msra.mxu1 %v4322_v63  ;;  %3025 = vmatmul.bf16.vlgmr.msrb.gmra.mxu2 %v6136_v32  ;;  %v5134_v32 = vld [vmem:[%s7844_s1 + $0x954] sm:$0xf]  ;;  %v4415_v63 = vld [vmem:[%s7844_s1 + $0x938] sm:$0xf0]  ;;  %v5124_v39 = vld [vmem:[%s7844_s1 + $0x904] sm:$0xf] }
 0x146   :  { %3069 = vmatpush.bf16.msra.mxu2 %v4386_v3  ;;  %3038 = vmatmul.bf16.vlgmr.msrb.gmra.mxu3 %v6125_v23  ;;  %v4231_v23 = vld [vmem:[%s7844_s1 + $0x7c8] sm:$0xf0]  ;;  %v4434_v20 = vor.u32 %v5134_v32, %v4431_v29  ;;  %v5080_v3 = vld [vmem:[%s7844_s1 + $0x7a4] sm:$0xf]  ;;  %v5110_v32 = vld [vmem:[%s7844_s1 + $0x894] sm:$0xf] }
 0x147   :  { %3082 = vmatpush.bf16.msra.mxu3 %v4450_v11  ;;  %v4234_v48 = vor.u32 %v5084_v22, %v4231_v23  ;;  %v4418_v11 = vor.u32 %v5130_v61, %v4415_v63  ;;  %v4218_v14 = vor.u32 %v5080_v3, %v4215_v43  ;;  %v4335_v29 = vld [vmem:[%s7844_s1 + $0x898] sm:$0xf0]  ;;  %v4210_v22 = vor.u32 %v5078_v24, %v4207_v25  ;;  %v5186_v55 = vld [vmem:[%s7844_s1 + $0xaf4] sm:$0xf]  ;;  %v5152_v36 = vld [vmem:[%s7844_s1 + $0x9e4] sm:$0xf] }
 0x148   :  { %3044 = vmatpush.bf16.msra.mxu0 %v4250_v12  ;;  %v2818_v4 = vpop.f32.mrf.mxu2  ;;  %v4399_v23 = vld [vmem:[%s7844_s1 + $0x918] sm:$0xf0]  ;;  %v4338_v21 = vor.u32 %v5110_v32, %v4335_v29  ;;  %v4514_v61 = vor.u32 %v5154_v51, %v4511_v52  ;;  %v4578_v63 = vor.u32 %v5170_v13, %v4575_v54  ;;  %v4642_v3 = vor.u32 %v5186_v55, %v4639_v57  ;;  %v5168_v5 = vld [vmem:[%s7844_s1 + $0xa64] sm:$0xf]  ;;  %v5166_v24 = vld [vmem:[%s7844_s1 + $0xa54] sm:$0xf] }
 0x149   :  { %3057 = vmatpush.bf16.msra.mxu1 %v4314_v49  ;;  %v2819_v40 = vadd.f32 %v2818_v4, %v2806_v59  ;;  %v2831_v12 = vpop.f32.mrf.mxu3  ;;  %v4407_v49 = vld [vmem:[%s7844_s1 + $0x928] sm:$0xf0]  ;;  %v4394_v43 = vor.u32 %v5124_v39, %v4391_v58  ;;  %v4559_v25 = vld [vmem:[%s7844_s1 + $0xa58] sm:$0xf0]  ;;  %v5162_v54 = vld [vmem:[%s7844_s1 + $0xa34] sm:$0xf] }
 0x14a   :  { %3070 = vmatpush.bf16.msra.mxu2 %v4378_v30  ;;  %v2794_v30 = vpop.f32.mrf.mxu0  ;;  %v4503_v4 = vld [vmem:[%s7844_s1 + $0x9e8] sm:$0xf0]  ;;  %v4687_v32 = vld [vmem:[%s7844_s1 + $0xb58] sm:$0xf0]  ;;  %v4562_v29 = vor.u32 %v5166_v24, %v4559_v25 }
 0x14b   :  { %3083 = vmatpush.bf16.msra.mxu3 %v4442_v28  ;;  %v7473_v18 = vadd.f32 %v2831_v12, %v2819_v40  ;;  %v2807_v28 = vpop.f32.mrf.mxu1  ;;  %v4631_v40 = vld [vmem:[%s7844_s1 + $0xae8] sm:$0xf0]  ;;  %v4506_v12 = vor.u32 %v5152_v36, %v4503_v4  ;;  %v4479_v13 = vld [vmem:[%s7844_s1 + $0x9b8] sm:$0xf0]  ;;  %v5176_v36 = vld [vmem:[%s7844_s1 + $0xaa4] sm:$0xf] }
 0x14c   :  { %3045 = vmatpush.bf16.msra.mxu0 %v4242_v31  ;;  %v4271_v31 = vld [vmem:[%s7844_s1 + $0x818] sm:$0xf0]  ;;  %v4634_v30 = vor.u32 %v5184_v8, %v4631_v40  ;;  %v4599_v4 = vld [vmem:[%s7844_s1 + $0xaa8] sm:$0xf0]  ;;  %v5192_v40 = vld [vmem:[%s7844_s1 + $0xb24] sm:$0xf] }
 0x14d   :  { %3058 = vmatpush.bf16.msra.mxu1 %v4306_v34  ;;  %v4410_v34 = vor.u32 %v5128_v15, %v4407_v49  ;;  %v4274_v44 = vor.u32 %v5094_v27, %v4271_v31  ;;  %v4695_v15 = vld [vmem:[%s7844_s1 + $0xb68] sm:$0xf0]  ;;  %v4570_v49 = vor.u32 %v5168_v5, %v4567_v7  ;;  %v5182_v27 = vld [vmem:[%s7844_s1 + $0xad4] sm:$0xf]  ;;  %v4623_v28 = vld [vmem:[%s7844_s1 + $0xad8] sm:$0xf0] }
 0x14e   :  { %3071 = vmatpush.bf16.msra.mxu2 %v4370_v41  ;;  %v5126_v41 = vld [vmem:[%s7844_s1 + $0x914] sm:$0xf]  ;;  %v4607_v57 = vld [vmem:[%s7844_s1 + $0xab8] sm:$0xf0] }
 0x14f   :  { %3084 = vmatpush.bf16.msra.mxu3 %v4434_v20  ;;  %v5092_v20 = vld [vmem:[%s7844_s1 + $0x804] sm:$0xf] }
 0x150   :  { %3046 = vmatpush.bf16.msra.mxu0 %v4234_v48  ;;  %v5108_v48 = vld [vmem:[%s7844_s1 + $0x884] sm:$0xf] }
 0x151   :  { %3059 = vmatpush.bf16.msra.mxu1 %v4298_v53  ;;  %v2820_v53 = vpop.f32.mrf.mxu2  ;;  %v2833_v59 = vpop.f32.mrf.mxu3 }
 0x152   :  { %3072 = vmatpush.bf16.msra.mxu2 %v4362_v6  ;;  %v4402_v6 = vor.u32 %v5126_v41, %v4399_v23  ;;  %v5164_v41 = vld [vmem:[%s7844_s1 + $0xa44] sm:$0xf]  ;;  %v5194_v59 = vld [vmem:[%s7844_s1 + $0xb34] sm:$0xf] }
 0x153   :  { %3085 = vmatpush.bf16.msra.mxu3 %v4426_v60  ;;  %v4266_v60 = vor.u32 %v5092_v20, %v4263_v47  ;;  %v5180_v23 = vld [vmem:[%s7844_s1 + $0xac4] sm:$0xf]  ;;  %v4679_v47 = vld [vmem:[%s7844_s1 + $0xb48] sm:$0xf0] }
 0x154   :  { %3047 = vmatpush.bf16.msra.mxu0 %v4226_v62  ;;  %v4330_v62 = vor.u32 %v5108_v48, %v4327_v50  ;;  %v5196_v20 = vld [vmem:[%s7844_s1 + $0xb44] sm:$0xf]  ;;  %v5236_v48 = vld [vmem:[%s7846_s2] sm:$0x3]  ;;  %v4618_v53 = vor.u32 %v5180_v23, %v4615_v35  ;;  %v4519_v35 = vld [vmem:[%s7844_s1 + $0xa08] sm:$0xf0] }
 0x155   :  { %3060 = vmatpush.bf16.msra.mxu1 %v4290_v0  ;;  %v5202_v0 = vld [vmem:[%s7844_s1 + $0xb74] sm:$0xf]  ;;  %v432_v50 = vperm.slane %v5236_v48, 1  ;;  %v4682_v39 = vor.u32 %v5196_v20, %v4679_v47  ;;  %v5156_v23 = vld [vmem:[%s7844_s1 + $0xa04] sm:$0xf] }
 0x156   :  { %3073 = vmatpush.bf16.msra.mxu2 %v4354_v2  ;;  %v4703_v2 = vld [vmem:[%s7844_s1 + $0xb78] sm:$0xf0]  ;;  %v5234_v48 = vld [vmem:[%s7844_s1 + $0xc74] sm:$0xf] }
 0x157   :  { %3086 = vmatpush.bf16.msra.mxu3 %v4418_v11  ;;  %v4706_v11 = vor.u32 %v5202_v0, %v4703_v2  ;;  %v5144_v0 = vld [vmem:[%s7844_s1 + $0x9a4] sm:$0xf]  ;;  %v4471_v2 = vld [vmem:[%s7844_s1 + $0x9a8] sm:$0xf0]  ;;  %v4767_v47 = vld [vmem:[%s7844_s1 + $0xbf8] sm:$0xf0] }
 0x158   :  { %3048 = vmatpush.bf16.msra.mxu0 %v4218_v14  ;;  %v5200_v14 = vld [vmem:[%s7844_s1 + $0xb64] sm:$0xf]  ;;  %v4474_v8 = vor.u32 %v5144_v0, %v4471_v2  ;;  %v5214_v0 = vld [vmem:[%s7844_s1 + $0xbd4] sm:$0xf]  ;;  %v4751_v2 = vld [vmem:[%s7844_s1 + $0xbd8] sm:$0xf0] }
 0x159   :  { %3061 = vmatpush.bf16.msra.mxu1 %v4282_v19  ;;  %v5150_v19 = vld [vmem:[%s7844_s1 + $0x9d4] sm:$0xf]  ;;  %v4698_v31 = vor.u32 %v5200_v14, %v4695_v15 }
 0x15a   :  { %3074 = vmatpush.bf16.msra.mxu2 %v4346_v26  ;;  %v4495_v26 = vld [vmem:[%s7844_s1 + $0x9d8] sm:$0xf0] }
 0x15b   :  { %3087 = vmatpush.bf16.msra.mxu3 %v4410_v34  ;;  %v4626_v34 = vor.u32 %v5182_v27, %v4623_v28  ;;  %v4527_v27 = vld [vmem:[%s7844_s1 + $0xa18] sm:$0xf0]  ;;  %v5174_v28 = vld [vmem:[%s7844_s1 + $0xa94] sm:$0xf] }
 0x15c   :  { %3049 = vmatpush.bf16.msra.mxu0 %v4210_v22  ;;  %v4551_v22 = vld [vmem:[%s7844_s1 + $0xa48] sm:$0xf0] }
 0x15d   :  { %3062 = vmatpush.bf16.msra.mxu1 %v4274_v44  ;;  %v4554_v52 = vor.u32 %v5164_v41, %v4551_v22  ;;  %v4455_v22 = vld [vmem:[%s7844_s1 + $0x988] sm:$0xf0] }
 0x15e   :  { %3075 = vmatpush.bf16.msra.mxu2 %v4338_v21 }
 0x15f   :  { %3088 = vmatpush.bf16.msra.mxu3 %v4402_v6  ;;  %v5146_v6 = vld [vmem:[%s7844_s1 + $0x9b4] sm:$0xf] }
 0x160   :  { %3050 = vmatpush.bf16.msra.mxu0 %v4202_v56  ;;  %v2844_v44 = vpop.f32.mrf.mxu0  ;;  %v5178_v56 = vld [vmem:[%s7844_s1 + $0xab4] sm:$0xf]  ;;  %v4482_v58 = vor.u32 %v5146_v6, %v4479_v13  ;;  %v5188_v6 = vld [vmem:[%s7844_s1 + $0xb04] sm:$0xf]  ;;  %v4647_v13 = vld [vmem:[%s7844_s1 + $0xb08] sm:$0xf0] }
 0x161   :  { %3063 = vmatpush.bf16.msra.mxu1 %v4266_v60  ;;  %v7627_v51 = vadd.f32 %v2844_v44, %v7473_v18  ;;  %v2857_v55 = vpop.f32.mrf.mxu1  ;;  %v4543_v18 = vld [vmem:[%s7844_s1 + $0xa38] sm:$0xf0]  ;;  %v4583_v44 = vld [vmem:[%s7844_s1 + $0xa88] sm:$0xf0] }
 0x162   :  { %3076 = vmatpush.bf16.msra.mxu2 %v4330_v62  ;;  %v4671_v60 = vld [vmem:[%s7844_s1 + $0xb38] sm:$0xf0]  ;;  %v2858_v62 = vadd.f32 %v2857_v55, %v432_v50 }
 0x163   :  { %3089 = vmatpush.bf16.msra.mxu3 %v4394_v43  ;;  %3051 = vmatmul.bf16.vlgmr.msra.gmra.mxu0 %v6138_v33  ;;  %v4498_v33 = vor.u32 %v5150_v19, %v4495_v26  ;;  %v4535_v43 = vld [vmem:[%s7844_s1 + $0xa28] sm:$0xf0]  ;;  %v4674_v5 = vor.u32 %v5194_v59, %v4671_v60  ;;  %v4463_v19 = vld [vmem:[%s7844_s1 + $0x998] sm:$0xf0]  ;;  %v5158_v26 = vld [vmem:[%s7844_s1 + $0xa14] sm:$0xf] }
 0x164   :  { %3095 = vmatpush.bf16.msrb.mxu0 %v4514_v61  ;;  %3064 = vmatmul.bf16.vlgmr.msra.gmra.mxu1 %v6333_v37  ;;  %v5148_v37 = vld [vmem:[%s7844_s1 + $0x9c4] sm:$0xf]  ;;  %v4546_v61 = vor.u32 %v5162_v54, %v4543_v18  ;;  %v4831_v50 = vld [vmem:[%s7844_s1 + $0xc78] sm:$0xf0]  ;;  %v4522_v54 = vor.u32 %v5156_v23, %v4519_v35  ;;  %v4759_v59 = vld [vmem:[%s7844_s1 + $0xbe8] sm:$0xf0] }
 0x165   :  { %3108 = vmatpush.bf16.msrb.mxu1 %v4578_v63  ;;  %3077 = vmatmul.bf16.vlgmr.msra.gmra.mxu2 %v6346_v45  ;;  %v5198_v45 = vld [vmem:[%s7844_s1 + $0xb54] sm:$0xf]  ;;  %v4610_v63 = vor.u32 %v5178_v56, %v4607_v57  ;;  %v4834_v57 = vor.u32 %v5234_v48, %v4831_v50  ;;  %v5232_v60 = vld [vmem:[%s7844_s1 + $0xc64] sm:$0xf]  ;;  %v4783_v35 = vld [vmem:[%s7844_s1 + $0xc18] sm:$0xf0] }
 0x166   :  { %3121 = vmatpush.bf16.msrb.mxu2 %v4642_v3  ;;  %3090 = vmatmul.bf16.vlgmr.msra.gmra.mxu3 %v6335_v38  ;;  %v4487_v38 = vld [vmem:[%s7844_s1 + $0x9c8] sm:$0xf0]  ;;  %v4690_v42 = vor.u32 %v5198_v45, %v4687_v32  ;;  %v5160_v3 = vld [vmem:[%s7844_s1 + $0xa24] sm:$0xf]  ;;  %v5222_v23 = vld [vmem:[%s7844_s1 + $0xc14] sm:$0xf] }
 0x167   :  { %3134 = vmatpush.bf16.msrb.mxu3 %v4706_v11  ;;  %v4490_v21 = vor.u32 %v5148_v37, %v4487_v38  ;;  %v4663_v11 = vld [vmem:[%s7844_s1 + $0xb28] sm:$0xf0]  ;;  %v4538_v15 = vor.u32 %v5160_v3, %v4535_v43  ;;  %v5140_v37 = vld [vmem:[%s7844_s1 + $0x984] sm:$0xf]  ;;  %v4530_v38 = vor.u32 %v5158_v26, %v4527_v27  ;;  %v5230_v3 = vld [vmem:[%s7844_s1 + $0xc54] sm:$0xf]  ;;  %v4754_v43 = vor.u32 %v5214_v0, %v4751_v2 }
 0x168   :  { %3096 = vmatpush.bf16.msrb.mxu0 %v4506_v12  ;;  %v2870_v7 = vpop.f32.mrf.mxu2  ;;  %v2846_v14 = vpop.f32.mrf.mxu0  ;;  %v4666_v45 = vor.u32 %v5192_v40, %v4663_v11  ;;  %v5210_v11 = vld [vmem:[%s7844_s1 + $0xbb4] sm:$0xf]  ;;  %v5224_v27 = vld [vmem:[%s7844_s1 + $0xc24] sm:$0xf]  ;;  %v4775_v48 = vld [vmem:[%s7844_s1 + $0xc08] sm:$0xf0] }
 0x169   :  { %3109 = vmatpush.bf16.msrb.mxu1 %v4570_v49  ;;  %v2871_v12 = vadd.f32 %v2870_v7, %v2858_v62  ;;  %v4602_v49 = vor.u32 %v5176_v36, %v4599_v4  ;;  %v2883_v24 = vpop.f32.mrf.mxu3  ;;  %v2859_v25 = vpop.f32.mrf.mxu1  ;;  %v4823_v62 = vld [vmem:[%s7844_s1 + $0xc68] sm:$0xf0]  ;;  %v5228_v4 = vld [vmem:[%s7844_s1 + $0xc44] sm:$0xf] }
 0x16a   :  { %3122 = vmatpush.bf16.msrb.mxu2 %v4634_v30  ;;  %v5142_v30 = vld [vmem:[%s7844_s1 + $0x994] sm:$0xf]  ;;  %v4727_v25 = vld [vmem:[%s7844_s1 + $0xba8] sm:$0xf0] }
 0x16b   :  { %3135 = vmatpush.bf16.msrb.mxu3 %v4698_v31  ;;  %v4591_v31 = vld [vmem:[%s7844_s1 + $0xa98] sm:$0xf0]  ;;  %v4466_v32 = vor.u32 %v5142_v30, %v4463_v19 }
 0x16c   :  { %3097 = vmatpush.bf16.msrb.mxu0 %v4498_v33  ;;  %v7695_v33 = vadd.f32 %v2883_v24, %v2871_v12  ;;  %v4594_v41 = vor.u32 %v5174_v28, %v4591_v31  ;;  %v4735_v12 = vld [vmem:[%s7844_s1 + $0xbb8] sm:$0xf0]  ;;  %v5208_v24 = vld [vmem:[%s7844_s1 + $0xba4] sm:$0xf]  ;;  %v4791_v28 = vld [vmem:[%s7844_s1 + $0xc28] sm:$0xf0] }
 0x16d   :  { %3110 = vmatpush.bf16.msrb.mxu1 %v4562_v29  ;;  %v5190_v29 = vld [vmem:[%s7844_s1 + $0xb14] sm:$0xf]  ;;  %v4738_v19 = vor.u32 %v5210_v11, %v4735_v12 }
 0x16e   :  { %3123 = vmatpush.bf16.msrb.mxu2 %v4626_v34  ;;  %v4655_v34 = vld [vmem:[%s7844_s1 + $0xb18] sm:$0xf0] }
 0x16f   :  { %3136 = vmatpush.bf16.msrb.mxu3 %v4690_v42  ;;  %v5172_v42 = vld [vmem:[%s7844_s1 + $0xa84] sm:$0xf]  ;;  %v4658_v20 = vor.u32 %v5190_v29, %v4655_v34  ;;  %v4794_v29 = vor.u32 %v5224_v27, %v4791_v28 }
 0x170   :  { %3098 = vmatpush.bf16.msrb.mxu0 %v4490_v21  ;;  %v5218_v21 = vld [vmem:[%s7844_s1 + $0xbf4] sm:$0xf]  ;;  %v4586_v55 = vor.u32 %v5172_v42, %v4583_v44  ;;  %v4786_v44 = vor.u32 %v5222_v23, %v4783_v35 }
 0x171   :  { %3111 = vmatpush.bf16.msrb.mxu1 %v4554_v52  ;;  %v2872_v52 = vpop.f32.mrf.mxu2  ;;  %v2885_v18 = vpop.f32.mrf.mxu3  ;;  %v4770_v56 = vor.u32 %v5218_v21, %v4767_v47  ;;  %v5204_v21 = vld [vmem:[%s7844_s1 + $0xb84] sm:$0xf] }
 0x172   :  { %3124 = vmatpush.bf16.msrb.mxu2 %v4618_v53  ;;  %v4458_v53 = vor.u32 %v5140_v37, %v4455_v22  ;;  %v5206_v37 = vld [vmem:[%s7844_s1 + $0xb94] sm:$0xf]  ;;  %v5220_v47 = vld [vmem:[%s7844_s1 + $0xc04] sm:$0xf] }
 0x173   :  { %3137 = vmatpush.bf16.msrb.mxu3 %v4682_v39  ;;  %v4650_v39 = vor.u32 %v5188_v6, %v4647_v13 }
 0x174   :  { %3099 = vmatpush.bf16.msrb.mxu0 %v4482_v58  ;;  %v5216_v58 = vld [vmem:[%s7844_s1 + $0xbe4] sm:$0xf] }
 0x175   :  { %3112 = vmatpush.bf16.msrb.mxu1 %v4546_v61  ;;  %v4762_v61 = vor.u32 %v5216_v58, %v4759_v59 }
 0x176   :  { %3125 = vmatpush.bf16.msrb.mxu2 %v4610_v63  ;;  %v4826_v63 = vor.u32 %v5232_v60, %v4823_v62 }
 0x177   :  { %3138 = vmatpush.bf16.msrb.mxu3 %v4674_v5 }
 0x178   :  { %3100 = vmatpush.bf16.msrb.mxu0 %v4474_v8 }
 0x179   :  { %3113 = vmatpush.bf16.msrb.mxu1 %v4538_v15  ;;  %v5226_v15 = vld [vmem:[%s7844_s1 + $0xc34] sm:$0xf] }
 0x17a   :  { %3126 = vmatpush.bf16.msrb.mxu2 %v4602_v49  ;;  %v4799_v49 = vld [vmem:[%s7844_s1 + $0xc38] sm:$0xf0] }
 0x17b   :  { %3139 = vmatpush.bf16.msrb.mxu3 %v4666_v45  ;;  %v4802_v26 = vor.u32 %v5226_v15, %v4799_v49 }
 0x17c   :  { %3101 = vmatpush.bf16.msrb.mxu0 %v4466_v32  ;;  %v4730_v32 = vor.u32 %v5208_v24, %v4727_v25 }
 0x17d   :  { %3114 = vmatpush.bf16.msrb.mxu1 %v4530_v38  ;;  %v4719_v38 = vld [vmem:[%s7844_s1 + $0xb98] sm:$0xf0] }
 0x17e   :  { %3127 = vmatpush.bf16.msrb.mxu2 %v4594_v41  ;;  %v4722_v42 = vor.u32 %v5206_v37, %v4719_v38  ;;  %v3183_v38 = vrot.slane %v7627_v51, 4 }
 0x17f   :  { %3140 = vmatpush.bf16.msrb.mxu3 %v4658_v20  ;;  %v4711_v20 = vld [vmem:[%s7844_s1 + $0xb88] sm:$0xf0] }
 0x180   :  { %3102 = vmatpush.bf16.msrb.mxu0 %v4458_v53  ;;  %v2896_v5 = vpop.f32.mrf.mxu0  ;;  %v4714_v52 = vor.u32 %v5204_v21, %v4711_v20  ;;  %v4778_v53 = vor.u32 %v5220_v47, %v4775_v48  ;;  %v3184_v35 = vadd.f32 %v3183_v38, %v7627_v51 }
 0x181   :  { %3115 = vmatpush.bf16.msrb.mxu1 %v4522_v54  ;;  %v2897_v8 = vadd.f32 %v2896_v5, %v7695_v33  ;;  %v2909_v14 = vpop.f32.mrf.mxu1 }
 0x182   :  { %3128 = vmatpush.bf16.msrb.mxu2 %v4586_v55  ;;  %v3185_v47 = vrot.slane %v3184_v35, 2 }
 0x183   :  { %3141 = vmatpush.bf16.msrb.mxu3 %v4650_v39  ;;  %3103 = vmatmul.bf16.vlgmr.msrb.gmra.mxu0 %v6348_v46  ;;  %v4815_v46 = vld [vmem:[%s7844_s1 + $0xc58] sm:$0xf0]  ;;  %v2910_v30 = vadd.f32 %v2909_v14, %v2897_v8 }
 0x184   :  { %3147 = vmatpush.bf16.msra.mxu0 %v4770_v56  ;;  %3116 = vmatmul.bf16.vlgmr.msrb.gmra.mxu1 %v6548_v9  ;;  %v4818_v36 = vor.u32 %v5230_v3, %v4815_v46  ;;  %v4743_v9 = vld [vmem:[%s7844_s1 + $0xbc8] sm:$0xf0] }
 0x185   :  { %3160 = vmatpush.bf16.msra.mxu1 %v4834_v57  ;;  %3129 = vmatmul.bf16.vlgmr.msrb.gmra.mxu2 %v6561_v16  ;;  %v5212_v16 = vld [vmem:[%s7844_s1 + $0xbc4] sm:$0xf] }
 0x186   :  { %3142 = vmatmul.bf16.vlgmr.msrb.gmra.mxu3 %v6550_v10  ;;  %v4807_v10 = vld [vmem:[%s7844_s1 + $0xc48] sm:$0xf0]  ;;  %v4746_v7 = vor.u32 %v5212_v16, %v4743_v9 }
 0x187   :  { %v4810_v40 = vor.u32 %v5228_v4, %v4807_v10 }
 0x188   :  { %3148 = vmatpush.bf16.msra.mxu0 %v4762_v61  ;;  %v2922_v31 = vpop.f32.mrf.mxu2  ;;  %v2898_v45 = vpop.f32.mrf.mxu0 }
 0x189   :  { %3161 = vmatpush.bf16.msra.mxu1 %v4826_v63  ;;  %v2923_v33 = vadd.f32 %v2922_v31, %v2910_v30  ;;  %v2935_v34 = vpop.f32.mrf.mxu3  ;;  %v2911_v41 = vpop.f32.mrf.mxu1 }
 0x18b   :  { %v2936_v22 = vadd.f32 %v2935_v34, %v2923_v33  ;;  %v3206_v34 = vmul.f32 %v7627_v51, %v7627_v51 }
 0x18c   :  { %3149 = vmatpush.bf16.msra.mxu0 %v4754_v43 }
 0x18d   :  { %3162 = vmatpush.bf16.msra.mxu1 %v4818_v36  ;;  %v3208_v41 = vrot.slane %v3206_v34, 4 }
 0x18f   :  { %v3209_v21 = vadd.f32 %v3208_v41, %v3206_v34 }
 0x190   :  { %3150 = vmatpush.bf16.msra.mxu0 %v4746_v7  ;;  %v2924_v50 = vpop.f32.mrf.mxu2 }
 0x191   :  { %3163 = vmatpush.bf16.msra.mxu1 %v4810_v40  ;;  %v2937_v6 = vpop.f32.mrf.mxu3 }
 0x194   :  { %3151 = vmatpush.bf16.msra.mxu0 %v4738_v19 }
 0x195   :  { %3164 = vmatpush.bf16.msra.mxu1 %v4802_v26 }
 0x198   :  { %3152 = vmatpush.bf16.msra.mxu0 %v4730_v32 }
 0x199   :  { %3165 = vmatpush.bf16.msra.mxu1 %v4794_v29 }
 0x19c   :  { %3153 = vmatpush.bf16.msra.mxu0 %v4722_v42 }
 0x19d   :  { %3166 = vmatpush.bf16.msra.mxu1 %v4786_v44 }
 0x1a0   :  { %3154 = vmatpush.bf16.msra.mxu0 %v4714_v52  ;;  %v2948_v13 = vpop.f32.mrf.mxu0 }
 0x1a1   :  { %3167 = vmatpush.bf16.msra.mxu1 %v4778_v53  ;;  %v2949_v54 = vadd.f32 %v2948_v13, %v2936_v22  ;;  %v2961_v55 = vpop.f32.mrf.mxu1  ;;  %v3210_v53 = vrot.slane %v3209_v21, 2 }
 0x1a3   :  { %3155 = vmatmul.bf16.vlgmr.msra.gmra.mxu0 %v6563_v17  ;;  %v2962_v18 = vadd.f32 %v2961_v55, %v2949_v54  ;;  %v3186_v55 = vadd.f32 %v3185_v47, %v3184_v35 }
 0x1a4   :  { %3168 = vmatmul.bf16.vlgmr.msra.gmra.mxu1 %v6761_v1 }
 0x1a8   :  { %v2974_v56 = vpop.f32.mrf.mxu2  ;;  %v2950_v58 = vpop.f32.mrf.mxu0 }
 0x1a9   :  { %v2975_v57 = vadd.f32 %v2974_v56, %v2962_v18  ;;  %v2987_v39 = vpop.f32.mrf.mxu3  ;;  %v2963_v60 = vpop.f32.mrf.mxu1 }
 0x1aa   :  { %v3187_v60 = vrot.slane %v3186_v55, 1 }
 0x1ab   :  { %v2988_v59 = vadd.f32 %v2987_v39, %v2975_v57  ;;  %v3211_v39 = vadd.f32 %v3210_v53, %v3209_v21 }
 0x1b0   :  { %v2976_v62 = vpop.f32.mrf.mxu2 }
 0x1b1   :  { %v2989_v61 = vpop.f32.mrf.mxu3 }
 0x1c0   :  { %v3000_v63 = vpop.f32.mrf.mxu0 }
 0x1c1   :  { %v3001_v0 = vadd.f32 %v3000_v63, %v2988_v59  ;;  %v3013_v2 = vpop.f32.mrf.mxu1  ;;  %v3212_v63 = vrot.slane %v3211_v39, 1 }
 0x1c3   :  { %v3014_v3 = vadd.f32 %v3013_v2, %v3001_v0 }
 0x1c8   :  { %v3026_v46 = vpop.f32.mrf.mxu2  ;;  %v3002_v43 = vpop.f32.mrf.mxu0 }
 0x1c9   :  { %v3039_v17 = vpop.f32.mrf.mxu3  ;;  %v3015_v1 = vpop.f32.mrf.mxu1  ;;  %v3027_v14 = vadd.f32 %v3026_v46, %v3014_v3  ;;  %v3188_v3 = vadd.f32 %v3187_v60, %v3186_v55  ;;  %v3213_v43 = vadd.f32 %v3212_v63, %v3211_v39 }
 0x1cb   :  { %v3040_v49 = vadd.f32 %v3039_v17, %v3027_v14 }
 0x1d0   :  { %v3028_v36 = vpop.f32.mrf.mxu2 }
 0x1d1   :  { %v3041_v16 = vpop.f32.mrf.mxu3 }
 0x1e0   :  { %v3052_v9 = vpop.f32.mrf.mxu0 }
 0x1e1   :  { %v3065_v4 = vpop.f32.mrf.mxu1  ;;  %v3053_v30 = vadd.f32 %v3052_v9, %v3040_v49 }
 0x1e3   :  { %v3066_v27 = vadd.f32 %v3065_v4, %v3053_v30 }
 0x1e8   :  { %v3078_v10 = vpop.f32.mrf.mxu2  ;;  %v3054_v7 = vpop.f32.mrf.mxu0 }
 0x1e9   :  { %v3091_v5 = vpop.f32.mrf.mxu3  ;;  %v3067_v8 = vpop.f32.mrf.mxu1  ;;  %v3079_v28 = vadd.f32 %v3078_v10, %v3066_v27 }
 0x1eb   :  { %v3092_v33 = vadd.f32 %v3091_v5, %v3079_v28 }
 0x1f0   :  { %v3080_v40 = vpop.f32.mrf.mxu2 }
 0x1f1   :  { %v3093_v11 = vpop.f32.mrf.mxu3 }
 0x200   :  { %v3104_v12 = vpop.f32.mrf.mxu0 }
 0x201   :  { %v3117_v15 = vpop.f32.mrf.mxu1  ;;  %v3105_v32 = vadd.f32 %v3104_v12, %v3092_v33 }
 0x203   :  { %v3118_v29 = vadd.f32 %v3117_v15, %v3105_v32 }
 0x208   :  { %v3130_v19 = vpop.f32.mrf.mxu2  ;;  %v3106_v26 = vpop.f32.mrf.mxu0 }
 0x209   :  { %v3143_v24 = vpop.f32.mrf.mxu3  ;;  %v3119_v25 = vpop.f32.mrf.mxu1  ;;  %v3131_v37 = vadd.f32 %v3130_v19, %v3118_v29 }
 0x20b   :  { %v3144_v22 = vadd.f32 %v3143_v24, %v3131_v37 }
 0x210   :  { %v3132_v31 = vpop.f32.mrf.mxu2 }
 0x211   :  { %v3145_v45 = vpop.f32.mrf.mxu3 }
 0x220   :  { %v3156_v23 = vpop.f32.mrf.mxu0 }
 0x221   :  { %v3157_v42 = vadd.f32 %v3156_v23, %v3144_v22  ;;  %v3169_v44 = vpop.f32.mrf.mxu1 }
 0x223   :  { %v3170_v20 = vadd.f32 %v3169_v44, %v3157_v42 }
 0x225   :  { %v3173_v48 = vpack.c.bf16 %v3170_v20, %v7627_v51  ;;  %v3189_v50 = vrot.slane %v3170_v20, 4  ;;  %v3207_v52 = vmul.f32 %v3170_v20, %v3170_v20  ;;  %v3201_v51 = vlaneseq }
 0x227   :  { %3174 = vst [vmem:[%s7847_s3] sm:$0xff] %v3173_v48  ;;  %v3190_v6 = vadd.f32 %v3189_v50, %v3170_v20  ;;  %v3214_v13 = vrot.slane %v3207_v52, 4  ;;  %vm3203_vm1 = vcmp.lt.s32.totalorder %v3201_v51, 256 }
 0x228   :  { %v3158_v54 = vpop.f32.mrf.mxu0 }
 0x229   :  { %v3191_v18 = vrot.slane %v3190_v6, 2  ;;  %v3215_v56 = vadd.f32 %v3214_v13, %v3207_v52  ;;  %v3171_v57 = vpop.f32.mrf.mxu1 }
 0x22b   :  { %v3192_v58 = vadd.f32 %v3191_v18, %v3190_v6  ;;  %v3216_v59 = vrot.slane %v3215_v56, 2 }
 0x22d   :  { %v3193_v62 = vrot.slane %v3192_v58, 1  ;;  %v3217_v61 = vadd.f32 %v3216_v59, %v3215_v56 }
 0x22f   :  { %v3194_v0 = vadd.f32 %v3193_v62, %v3192_v58  ;;  %v3218_v2 = vrot.slane %v3217_v61, 1 }
 0x231   :  { %v3197_v46 = vrot.slane %v3194_v0, 7  ;;  %v3219_v17 = vadd.f32 %v3218_v2, %v3217_v61 }
 0x233   :  { %v3199_v1 = vsel %vm3198_vm0, %v3188_v3, %v3197_v46  ;;  %v3222_v36 = vrot.slane %v3219_v17, 7 }
 0x234   :  { %3205 = vst.msk [vmem:[%s7848_s4] ss:$2 sm:$0x3] %vm3203_vm1, %v3199_v1 }
 0x235   :  { %v3223_v16 = vsel %vm3198_vm0, %v3213_v43, %v3222_v36 }
 0x236   :  { %4835 = vst.msk [vmem:[%s7848_s4 + $0x1] ss:$2 sm:$0x3] %vm3203_vm1, %v3223_v16 }

// kernel: encoder_cnn_forward.9
= control target key start
LH: loop header
LB: loop body
LE: loop exit
PB: predicated region body
PF: predicated region fallthrough
CT: control target
= control target key end

     0   :  { %s66_s0 = inlined_call_operand.vmem [shape: bf16[8,128], index: 0, kind: input, shape index: {}]   ;;  %s67_s1 = inlined_call_operand.vmem [shape: f32[1,128], index: 1, kind: input, shape index: {}]   ;;  %s68_s2 = inlined_call_operand.vmem [shape: f32[1,128], index: 2, kind: input, shape index: {}]   ;;  %s69_s3 = inlined_call_operand.vmem [shape: f32[8,128], index: 3, kind: output, shape index: {}]  }
   0x1   :  { %v14_v0 = vld [vmem:[%s66_s0] sm:$0xf] }
   0x2   :  { %v32_v1 = vld [vmem:[%s67_s1] ss:$0 sm:$0xff]  ;;  %v15_v2 = vunpack.c.l.bf16 %v14_v0 }
   0x3   :  { %v33_v3 = vld [vmem:[%s68_s2] ss:$0 sm:$0xff] }
   0x4   :  { %v20_v4 = vmul.f32 %v32_v1, %v15_v2 }
   0x6   :  { %v25_v5 = vadd.f32 %v33_v3, %v20_v4 }
   0x8   :  { %v26_v6 = vmax.f32 %v25_v5, 0.0 }
   0xa   :  { %27 = vst [vmem:[%s69_s3] sm:$0xff] %v26_v6 }

// kernel: encoder_cnn_forward.8
= control target key start
LH: loop header
LB: loop body
LE: loop exit
PB: predicated region body
PF: predicated region fallthrough
CT: control target
= control target key end

     0   :  { %s7430_s1 = inlined_call_operand.vmem [shape: bf16[6400,128], index: 1, kind: input, shape index: {}]   ;;  %s7431_s0 = inlined_call_operand.vmem [shape: bf16[8,6400], index: 0, kind: input, shape index: {}]   ;;  %s7432_s2 = inlined_call_operand.vmem [shape: f32[1,128], index: 2, kind: input, shape index: {}]   ;;  %s7433_s3 = inlined_call_operand.vmem [shape: bf16[8,128], index: 3, kind: output, shape index: {0}]   ;;  %s7434_s4 = inlined_call_operand.vmem [shape: f32[1,2,128], index: 4, kind: output, shape index: {1}]  }
   0x1   :  { %v5709_v0 = vld [vmem:[%s7430_s1 + $0x38] sm:$0xff]  ;;  %v5708_v4 = vld [vmem:[%s7430_s1 + $0x30] sm:$0xff]  ;;  %v5707_v8 = vld [vmem:[%s7430_s1 + $0x28] sm:$0xff] }
   0x2   :  { %v5717_v1 = vld [vmem:[%s7430_s1 + $0x78] sm:$0xff]  ;;  %3420 = vmatpush.bf16.msra.mxu0 %v5709_v0  ;;  %v5716_v5 = vld [vmem:[%s7430_s1 + $0x70] sm:$0xff]  ;;  %v5715_v9 = vld [vmem:[%s7430_s1 + $0x68] sm:$0xff] }
   0x3   :  { %v5725_v2 = vld [vmem:[%s7430_s1 + $0xb8] sm:$0xff]  ;;  %3433 = vmatpush.bf16.msra.mxu1 %v5717_v1  ;;  %v5724_v6 = vld [vmem:[%s7430_s1 + $0xb0] sm:$0xff]  ;;  %v5723_v10 = vld [vmem:[%s7430_s1 + $0xa8] sm:$0xff] }
   0x4   :  { %v5733_v3 = vld [vmem:[%s7430_s1 + $0xf8] sm:$0xff]  ;;  %3446 = vmatpush.bf16.msra.mxu2 %v5725_v2  ;;  %v5732_v7 = vld [vmem:[%s7430_s1 + $0xf0] sm:$0xff]  ;;  %v5731_v11 = vld [vmem:[%s7430_s1 + $0xe8] sm:$0xff] }
   0x5   :  { %3459 = vmatpush.bf16.msra.mxu3 %v5733_v3  ;;  %v5706_v12 = vld [vmem:[%s7430_s1 + $0x20] sm:$0xff]  ;;  %v5705_v16 = vld [vmem:[%s7430_s1 + $0x18] sm:$0xff]  ;;  %v5704_v20 = vld [vmem:[%s7430_s1 + $0x10] sm:$0xff] }
   0x6   :  { %3421 = vmatpush.bf16.msra.mxu0 %v5708_v4  ;;  %v5714_v13 = vld [vmem:[%s7430_s1 + $0x60] sm:$0xff]  ;;  %v5713_v17 = vld [vmem:[%s7430_s1 + $0x58] sm:$0xff]  ;;  %v5712_v21 = vld [vmem:[%s7430_s1 + $0x50] sm:$0xff] }
   0x7   :  { %3434 = vmatpush.bf16.msra.mxu1 %v5716_v5  ;;  %v5722_v14 = vld [vmem:[%s7430_s1 + $0xa0] sm:$0xff]  ;;  %v5721_v18 = vld [vmem:[%s7430_s1 + $0x98] sm:$0xff]  ;;  %v5720_v22 = vld [vmem:[%s7430_s1 + $0x90] sm:$0xff] }
   0x8   :  { %3447 = vmatpush.bf16.msra.mxu2 %v5724_v6  ;;  %v5730_v15 = vld [vmem:[%s7430_s1 + $0xe0] sm:$0xff]  ;;  %v5729_v19 = vld [vmem:[%s7430_s1 + $0xd8] sm:$0xff]  ;;  %v5728_v23 = vld [vmem:[%s7430_s1 + $0xd0] sm:$0xff] }
   0x9   :  { %3460 = vmatpush.bf16.msra.mxu3 %v5732_v7  ;;  %v5703_v24 = vld [vmem:[%s7430_s1 + $0x8] sm:$0xff]  ;;  %v16_v26 = vld [vmem:[%s7431_s0] sm:$0xff]  ;;  %v5741_v35 = vld [vmem:[%s7430_s1 + $0x138] sm:$0xff] }
   0xa   :  { %3422 = vmatpush.bf16.msra.mxu0 %v5707_v8  ;;  %v5711_v25 = vld [vmem:[%s7430_s1 + $0x48] sm:$0xff]  ;;  %v870_v30 = vunpack.c.l.b16 %v16_v26  ;;  %v5702_v31 = vld [vmem:[%s7430_s1] sm:$0xff]  ;;  %v871_v36 = vunpack.c.h.b16 %v16_v26  ;;  %v5749_v37 = vld [vmem:[%s7430_s1 + $0x178] sm:$0xff] }
   0xb   :  { %3435 = vmatpush.bf16.msra.mxu1 %v5715_v9  ;;  %v5719_v27 = vld [vmem:[%s7430_s1 + $0x88] sm:$0xff]  ;;  %v5710_v32 = vld [vmem:[%s7430_s1 + $0x40] sm:$0xff]  ;;  %v5757_v38 = vld [vmem:[%s7430_s1 + $0x1b8] sm:$0xff] }
   0xc   :  { %3448 = vmatpush.bf16.msra.mxu2 %v5723_v10  ;;  %v5727_v28 = vld [vmem:[%s7430_s1 + $0xc8] sm:$0xff]  ;;  %v5718_v34 = vld [vmem:[%s7430_s1 + $0x80] sm:$0xff]  ;;  %v920_v40 = vpack.c.b16 %v870_v30, %v870_v30  ;;  %v5765_v42 = vld [vmem:[%s7430_s1 + $0x1f8] sm:$0xff]  ;;  %v921_v45 = vpack.c.b16 %v871_v36, %v871_v36 }
   0xd   :  { %3461 = vmatpush.bf16.msra.mxu3 %v5731_v11  ;;  %v17_v29 = vld [vmem:[%s7431_s0 + $0x8] sm:$0xff]  ;;  %v5726_v39 = vld [vmem:[%s7430_s1 + $0xc0] sm:$0xff]  ;;  %v5740_v44 = vld [vmem:[%s7430_s1 + $0x130] sm:$0xff] }
   0xe   :  { %3423 = vmatpush.bf16.msra.mxu0 %v5706_v12  ;;  %v872_v33 = vunpack.c.l.b16 %v17_v29  ;;  %v873_v41 = vunpack.c.h.b16 %v17_v29  ;;  %v5748_v46 = vld [vmem:[%s7430_s1 + $0x170] sm:$0xff]  ;;  %v5739_v50 = vld [vmem:[%s7430_s1 + $0x128] sm:$0xff]  ;;  %v5738_v54 = vld [vmem:[%s7430_s1 + $0x120] sm:$0xff] }
   0xf   :  { %3436 = vmatpush.bf16.msra.mxu1 %v5714_v13  ;;  %v5756_v47 = vld [vmem:[%s7430_s1 + $0x1b0] sm:$0xff]  ;;  %v5747_v51 = vld [vmem:[%s7430_s1 + $0x168] sm:$0xff]  ;;  %v5746_v55 = vld [vmem:[%s7430_s1 + $0x160] sm:$0xff] }
  0x10   :  { %3449 = vmatpush.bf16.msra.mxu2 %v5722_v14  ;;  %v922_v43 = vpack.c.b16 %v872_v33, %v872_v33  ;;  %v923_v48 = vpack.c.b16 %v873_v41, %v873_v41  ;;  %v5764_v49 = vld [vmem:[%s7430_s1 + $0x1f0] sm:$0xff]  ;;  %v5755_v52 = vld [vmem:[%s7430_s1 + $0x1a8] sm:$0xff]  ;;  %v5754_v56 = vld [vmem:[%s7430_s1 + $0x1a0] sm:$0xff] }
  0x11   :  { %3462 = vmatpush.bf16.msra.mxu3 %v5730_v15  ;;  %v5763_v53 = vld [vmem:[%s7430_s1 + $0x1e8] sm:$0xff]  ;;  %v5762_v57 = vld [vmem:[%s7430_s1 + $0x1e0] sm:$0xff]  ;;  %v5737_v58 = vld [vmem:[%s7430_s1 + $0x118] sm:$0xff] }
  0x12   :  { %3424 = vmatpush.bf16.msra.mxu0 %v5705_v16  ;;  %v5745_v59 = vld [vmem:[%s7430_s1 + $0x158] sm:$0xff]  ;;  %v5736_v62 = vld [vmem:[%s7430_s1 + $0x110] sm:$0xff]  ;;  %v5735_v2 = vld [vmem:[%s7430_s1 + $0x108] sm:$0xff] }
  0x13   :  { %3437 = vmatpush.bf16.msra.mxu1 %v5713_v17  ;;  %v5753_v60 = vld [vmem:[%s7430_s1 + $0x198] sm:$0xff]  ;;  %v5744_v63 = vld [vmem:[%s7430_s1 + $0x150] sm:$0xff]  ;;  %v5743_v3 = vld [vmem:[%s7430_s1 + $0x148] sm:$0xff] }
  0x14   :  { %3450 = vmatpush.bf16.msra.mxu2 %v5721_v18  ;;  %v5761_v61 = vld [vmem:[%s7430_s1 + $0x1d8] sm:$0xff]  ;;  %v5752_v0 = vld [vmem:[%s7430_s1 + $0x190] sm:$0xff]  ;;  %v5751_v4 = vld [vmem:[%s7430_s1 + $0x188] sm:$0xff] }
  0x15   :  { %3463 = vmatpush.bf16.msra.mxu3 %v5729_v19  ;;  %v5760_v1 = vld [vmem:[%s7430_s1 + $0x1d0] sm:$0xff]  ;;  %v19_v5 = vld [vmem:[%s7431_s0 + $0x18] sm:$0xff]  ;;  %v5759_v7 = vld [vmem:[%s7430_s1 + $0x1c8] sm:$0xff] }
  0x16   :  { %3425 = vmatpush.bf16.msra.mxu0 %v5704_v20  ;;  %v18_v6 = vld [vmem:[%s7431_s0 + $0x10] sm:$0xff]  ;;  %v5734_v8 = vld [vmem:[%s7430_s1 + $0x100] sm:$0xff]  ;;  %v876_v9 = vunpack.c.l.b16 %v19_v5  ;;  %v5773_v14 = vld [vmem:[%s7430_s1 + $0x238] sm:$0xff]  ;;  %v877_v18 = vunpack.c.h.b16 %v19_v5 }
  0x17   :  { %3438 = vmatpush.bf16.msra.mxu1 %v5712_v21  ;;  %v5742_v10 = vld [vmem:[%s7430_s1 + $0x140] sm:$0xff]  ;;  %v874_v12 = vunpack.c.l.b16 %v18_v6  ;;  %v875_v13 = vunpack.c.h.b16 %v18_v6  ;;  %v5781_v15 = vld [vmem:[%s7430_s1 + $0x278] sm:$0xff]  ;;  %v5779_v29 = vld [vmem:[%s7430_s1 + $0x268] sm:$0xff] }
  0x18   :  { %3451 = vmatpush.bf16.msra.mxu2 %v5720_v22  ;;  %v5750_v11 = vld [vmem:[%s7430_s1 + $0x180] sm:$0xff]  ;;  %v5789_v16 = vld [vmem:[%s7430_s1 + $0x2b8] sm:$0xff]  ;;  %v926_v20 = vpack.c.b16 %v876_v9, %v876_v9  ;;  %v927_v26 = vpack.c.b16 %v877_v18, %v877_v18  ;;  %v5787_v30 = vld [vmem:[%s7430_s1 + $0x2a8] sm:$0xff] }
  0x19   :  { %3464 = vmatpush.bf16.msra.mxu3 %v5728_v23  ;;  %v5758_v17 = vld [vmem:[%s7430_s1 + $0x1c0] sm:$0xff]  ;;  %v5797_v19 = vld [vmem:[%s7430_s1 + $0x2f8] sm:$0xff]  ;;  %v924_v21 = vpack.c.b16 %v874_v12, %v874_v12  ;;  %v925_v22 = vpack.c.b16 %v875_v13, %v875_v13  ;;  %v5772_v23 = vld [vmem:[%s7430_s1 + $0x230] sm:$0xff] }
  0x1a   :  { %3426 = vmatpush.bf16.msra.mxu0 %v5703_v24  ;;  %v5780_v24 = vld [vmem:[%s7430_s1 + $0x270] sm:$0xff]  ;;  %v5778_v33 = vld [vmem:[%s7430_s1 + $0x260] sm:$0xff]  ;;  %v5769_v36 = vld [vmem:[%s7430_s1 + $0x218] sm:$0xff] }
  0x1b   :  { %3439 = vmatpush.bf16.msra.mxu1 %v5711_v25  ;;  %v5788_v25 = vld [vmem:[%s7430_s1 + $0x2b0] sm:$0xff]  ;;  %v5803_v6 = vld [vmem:[%s7430_s1 + $0x328] sm:$0xff]  ;;  %v5818_v12 = vld [vmem:[%s7430_s1 + $0x3a0] sm:$0xff] }
  0x1c   :  { %3452 = vmatpush.bf16.msra.mxu2 %v5719_v27  ;;  %v5796_v27 = vld [vmem:[%s7430_s1 + $0x2f0] sm:$0xff]  ;;  %v5827_v9 = vld [vmem:[%s7430_s1 + $0x3e8] sm:$0xff]  ;;  %v5826_v13 = vld [vmem:[%s7430_s1 + $0x3e0] sm:$0xff] }
  0x1d   :  { %3465 = vmatpush.bf16.msra.mxu3 %v5727_v28  ;;  %v5771_v28 = vld [vmem:[%s7430_s1 + $0x228] sm:$0xff]  ;;  %v5776_v41 = vld [vmem:[%s7430_s1 + $0x250] sm:$0xff] }
  0x1e   :  { %3427 = vmatpush.bf16.msra.mxu0 %v5702_v31  ;;  %v5795_v31 = vld [vmem:[%s7430_s1 + $0x2e8] sm:$0xff]  ;;  %v5828_v5 = vld [vmem:[%s7430_s1 + $0x3f0] sm:$0xff] }
  0x1f   :  { %3440 = vmatpush.bf16.msra.mxu1 %v5710_v32  ;;  %v5770_v32 = vld [vmem:[%s7430_s1 + $0x220] sm:$0xff]  ;;  %v5800_v18 = vld [vmem:[%s7430_s1 + $0x310] sm:$0xff] }
  0x20   :  { %3453 = vmatpush.bf16.msra.mxu2 %v5718_v34  ;;  %v5786_v34 = vld [vmem:[%s7430_s1 + $0x2a0] sm:$0xff] }
  0x21   :  { %3466 = vmatpush.bf16.msra.mxu3 %v5726_v39  ;;  %3428 = vmatmul.bf16.vlgmr.msra.gmra.mxu0 %v920_v40  ;;  %v5793_v39 = vld [vmem:[%s7430_s1 + $0x2d8] sm:$0xff]  ;;  %v5768_v40 = vld [vmem:[%s7430_s1 + $0x210] sm:$0xff] }
  0x22   :  { %3472 = vmatpush.bf16.msrb.mxu0 %v5741_v35  ;;  %3441 = vmatmul.bf16.vlgmr.msra.gmra.mxu1 %v921_v45  ;;  %v5794_v35 = vld [vmem:[%s7430_s1 + $0x2e0] sm:$0xff]  ;;  %v5775_v45 = vld [vmem:[%s7430_s1 + $0x248] sm:$0xff] }
  0x23   :  { %3485 = vmatpush.bf16.msrb.mxu1 %v5749_v37  ;;  %3454 = vmatmul.bf16.vlgmr.msra.gmra.mxu2 %v922_v43  ;;  %v5777_v37 = vld [vmem:[%s7430_s1 + $0x258] sm:$0xff]  ;;  %v5792_v43 = vld [vmem:[%s7430_s1 + $0x2d0] sm:$0xff] }
  0x24   :  { %3498 = vmatpush.bf16.msrb.mxu2 %v5757_v38  ;;  %3467 = vmatmul.bf16.vlgmr.msra.gmra.mxu3 %v923_v48  ;;  %v5785_v38 = vld [vmem:[%s7430_s1 + $0x298] sm:$0xff]  ;;  %v21_v48 = vld [vmem:[%s7431_s0 + $0x28] sm:$0xff] }
  0x25   :  { %3511 = vmatpush.bf16.msrb.mxu3 %v5765_v42  ;;  %v5784_v42 = vld [vmem:[%s7430_s1 + $0x290] sm:$0xff] }
  0x26   :  { %3473 = vmatpush.bf16.msrb.mxu0 %v5740_v44  ;;  %v5767_v44 = vld [vmem:[%s7430_s1 + $0x208] sm:$0xff] }
  0x27   :  { %3486 = vmatpush.bf16.msrb.mxu1 %v5748_v46  ;;  %v20_v46 = vld [vmem:[%s7431_s0 + $0x20] sm:$0xff] }
  0x28   :  { %3499 = vmatpush.bf16.msrb.mxu2 %v5756_v47  ;;  %v5783_v47 = vld [vmem:[%s7430_s1 + $0x288] sm:$0xff] }
  0x29   :  { %3512 = vmatpush.bf16.msrb.mxu3 %v5764_v49  ;;  %v5791_v49 = vld [vmem:[%s7430_s1 + $0x2c8] sm:$0xff] }
  0x2a   :  { %3474 = vmatpush.bf16.msrb.mxu0 %v5739_v50  ;;  %v878_v50 = vunpack.c.l.b16 %v20_v46 }
  0x2b   :  { %3487 = vmatpush.bf16.msrb.mxu1 %v5747_v51  ;;  %v5766_v51 = vld [vmem:[%s7430_s1 + $0x200] sm:$0xff] }
  0x2c   :  { %3500 = vmatpush.bf16.msrb.mxu2 %v5755_v52  ;;  %v5774_v52 = vld [vmem:[%s7430_s1 + $0x240] sm:$0xff] }
  0x2d   :  { %3513 = vmatpush.bf16.msrb.mxu3 %v5763_v53  ;;  %v880_v53 = vunpack.c.l.b16 %v21_v48 }
  0x2e   :  { %3475 = vmatpush.bf16.msrb.mxu0 %v5738_v54  ;;  %v5782_v54 = vld [vmem:[%s7430_s1 + $0x280] sm:$0xff] }
  0x2f   :  { %3488 = vmatpush.bf16.msrb.mxu1 %v5746_v55  ;;  %v5805_v55 = vld [vmem:[%s7430_s1 + $0x338] sm:$0xff] }
  0x30   :  { %3501 = vmatpush.bf16.msrb.mxu2 %v5754_v56  ;;  %v879_v56 = vunpack.c.h.b16 %v20_v46  ;;  %v5852_v46 = vld [vmem:[%s7430_s1 + $0x4b0] sm:$0xff] }
  0x31   :  { %3514 = vmatpush.bf16.msrb.mxu3 %v5762_v57  ;;  %v5813_v57 = vld [vmem:[%s7430_s1 + $0x378] sm:$0xff] }
  0x32   :  { %3476 = vmatpush.bf16.msrb.mxu0 %v5737_v58  ;;  %v5821_v58 = vld [vmem:[%s7430_s1 + $0x3b8] sm:$0xff] }
  0x33   :  { %3489 = vmatpush.bf16.msrb.mxu1 %v5745_v59  ;;  %v881_v59 = vunpack.c.h.b16 %v21_v48  ;;  %v5835_v48 = vld [vmem:[%s7430_s1 + $0x428] sm:$0xff] }
  0x34   :  { %3502 = vmatpush.bf16.msrb.mxu2 %v5753_v60  ;;  %v5790_v60 = vld [vmem:[%s7430_s1 + $0x2c0] sm:$0xff] }
  0x35   :  { %3515 = vmatpush.bf16.msrb.mxu3 %v5761_v61  ;;  %v928_v61 = vpack.c.b16 %v878_v50, %v878_v50  ;;  %v5851_v50 = vld [vmem:[%s7430_s1 + $0x4a8] sm:$0xff] }
  0x36   :  { %3477 = vmatpush.bf16.msrb.mxu0 %v5736_v62  ;;  %v930_v62 = vpack.c.b16 %v880_v53, %v880_v53  ;;  %v5842_v53 = vld [vmem:[%s7430_s1 + $0x460] sm:$0xff] }
  0x37   :  { %3490 = vmatpush.bf16.msrb.mxu1 %v5744_v63  ;;  %v5829_v63 = vld [vmem:[%s7430_s1 + $0x3f8] sm:$0xff] }
  0x38   :  { %3503 = vmatpush.bf16.msrb.mxu2 %v5752_v0  ;;  %v929_v0 = vpack.c.b16 %v879_v56, %v879_v56  ;;  %v5833_v56 = vld [vmem:[%s7430_s1 + $0x418] sm:$0xff] }
  0x39   :  { %3516 = vmatpush.bf16.msrb.mxu3 %v5760_v1  ;;  %v5804_v1 = vld [vmem:[%s7430_s1 + $0x330] sm:$0xff] }
  0x3a   :  { %3478 = vmatpush.bf16.msrb.mxu0 %v5735_v2  ;;  %v931_v2 = vpack.c.b16 %v881_v59, %v881_v59  ;;  %v5857_v59 = vld [vmem:[%s7430_s1 + $0x4d8] sm:$0xff] }
  0x3b   :  { %3491 = vmatpush.bf16.msrb.mxu1 %v5743_v3  ;;  %v5812_v3 = vld [vmem:[%s7430_s1 + $0x370] sm:$0xff] }
  0x3c   :  { %3504 = vmatpush.bf16.msrb.mxu2 %v5751_v4  ;;  %v5820_v4 = vld [vmem:[%s7430_s1 + $0x3b0] sm:$0xff] }
  0x3d   :  { %3517 = vmatpush.bf16.msrb.mxu3 %v5759_v7  ;;  %v5811_v7 = vld [vmem:[%s7430_s1 + $0x368] sm:$0xff] }
  0x3e   :  { %3479 = vmatpush.bf16.msrb.mxu0 %v5734_v8  ;;  %v5819_v8 = vld [vmem:[%s7430_s1 + $0x3a8] sm:$0xff] }
  0x3f   :  { %3492 = vmatpush.bf16.msrb.mxu1 %v5742_v10  ;;  %v5802_v10 = vld [vmem:[%s7430_s1 + $0x320] sm:$0xff] }
  0x40   :  { %3505 = vmatpush.bf16.msrb.mxu2 %v5750_v11  ;;  %v5810_v11 = vld [vmem:[%s7430_s1 + $0x360] sm:$0xff] }
  0x41   :  { %3518 = vmatpush.bf16.msrb.mxu3 %v5758_v17  ;;  %3480 = vmatmul.bf16.vlgmr.msrb.gmra.mxu0 %v924_v21  ;;  %v5825_v17 = vld [vmem:[%s7430_s1 + $0x3d8] sm:$0xff]  ;;  %v5824_v21 = vld [vmem:[%s7430_s1 + $0x3d0] sm:$0xff] }
  0x42   :  { %3524 = vmatpush.bf16.msra.mxu0 %v5773_v14  ;;  %3493 = vmatmul.bf16.vlgmr.msrb.gmra.mxu1 %v925_v22  ;;  %v5801_v14 = vld [vmem:[%s7430_s1 + $0x318] sm:$0xff]  ;;  %v5799_v22 = vld [vmem:[%s7430_s1 + $0x308] sm:$0xff] }
  0x43   :  { %3537 = vmatpush.bf16.msra.mxu1 %v5781_v15  ;;  %3506 = vmatmul.bf16.vlgmr.msrb.gmra.mxu2 %v926_v20  ;;  %v5809_v15 = vld [vmem:[%s7430_s1 + $0x358] sm:$0xff]  ;;  %v5816_v20 = vld [vmem:[%s7430_s1 + $0x390] sm:$0xff] }
  0x44   :  { %3550 = vmatpush.bf16.msra.mxu2 %v5789_v16  ;;  %3519 = vmatmul.bf16.vlgmr.msrb.gmra.mxu3 %v927_v26  ;;  %v5817_v16 = vld [vmem:[%s7430_s1 + $0x398] sm:$0xff] }
  0x45   :  { %3563 = vmatpush.bf16.msra.mxu3 %v5797_v19  ;;  %v5808_v19 = vld [vmem:[%s7430_s1 + $0x350] sm:$0xff]  ;;  %v23_v26 = vld [vmem:[%s7431_s0 + $0x38] sm:$0xff] }
  0x46   :  { %3525 = vmatpush.bf16.msra.mxu0 %v5772_v23  ;;  %v5807_v23 = vld [vmem:[%s7430_s1 + $0x348] sm:$0xff] }
  0x47   :  { %3538 = vmatpush.bf16.msra.mxu1 %v5780_v24  ;;  %v22_v24 = vld [vmem:[%s7431_s0 + $0x30] sm:$0xff] }
  0x48   :  { %3551 = vmatpush.bf16.msra.mxu2 %v5788_v25  ;;  %v5815_v25 = vld [vmem:[%s7430_s1 + $0x388] sm:$0xff] }
  0x49   :  { %3564 = vmatpush.bf16.msra.mxu3 %v5796_v27  ;;  %v5823_v27 = vld [vmem:[%s7430_s1 + $0x3c8] sm:$0xff] }
  0x4a   :  { %3526 = vmatpush.bf16.msra.mxu0 %v5771_v28  ;;  %v5798_v28 = vld [vmem:[%s7430_s1 + $0x300] sm:$0xff] }
  0x4b   :  { %3539 = vmatpush.bf16.msra.mxu1 %v5779_v29  ;;  %v882_v29 = vunpack.c.l.b16 %v22_v24 }
  0x4c   :  { %3552 = vmatpush.bf16.msra.mxu2 %v5787_v30  ;;  %v5806_v30 = vld [vmem:[%s7430_s1 + $0x340] sm:$0xff] }
  0x4d   :  { %3565 = vmatpush.bf16.msra.mxu3 %v5795_v31  ;;  %v5837_v31 = vld [vmem:[%s7430_s1 + $0x438] sm:$0xff] }
  0x4e   :  { %3527 = vmatpush.bf16.msra.mxu0 %v5770_v32  ;;  %v884_v32 = vunpack.c.l.b16 %v23_v26 }
  0x4f   :  { %3540 = vmatpush.bf16.msra.mxu1 %v5778_v33  ;;  %v883_v33 = vunpack.c.h.b16 %v22_v24  ;;  %v5884_v24 = vld [vmem:[%s7430_s1 + $0x5b0] sm:$0xff] }
  0x50   :  { %3553 = vmatpush.bf16.msra.mxu2 %v5786_v34  ;;  %v5814_v34 = vld [vmem:[%s7430_s1 + $0x380] sm:$0xff] }
  0x51   :  { %3566 = vmatpush.bf16.msra.mxu3 %v5794_v35  ;;  %v5845_v35 = vld [vmem:[%s7430_s1 + $0x478] sm:$0xff] }
  0x52   :  { %3528 = vmatpush.bf16.msra.mxu0 %v5769_v36  ;;  %v885_v36 = vunpack.c.h.b16 %v23_v26  ;;  %v5867_v26 = vld [vmem:[%s7430_s1 + $0x528] sm:$0xff] }
  0x53   :  { %3541 = vmatpush.bf16.msra.mxu1 %v5777_v37  ;;  %v5853_v37 = vld [vmem:[%s7430_s1 + $0x4b8] sm:$0xff] }
  0x54   :  { %3554 = vmatpush.bf16.msra.mxu2 %v5785_v38  ;;  %v5822_v38 = vld [vmem:[%s7430_s1 + $0x3c0] sm:$0xff] }
  0x55   :  { %3567 = vmatpush.bf16.msra.mxu3 %v5793_v39  ;;  %v932_v39 = vpack.c.b16 %v882_v29, %v882_v29  ;;  %v6102_v29 = vld [vmem:[%s7432_s2] ss:$0 sm:$0xff] }
  0x56   :  { %3529 = vmatpush.bf16.msra.mxu0 %v5768_v40  ;;  %v5861_v40 = vld [vmem:[%s7430_s1 + $0x4f8] sm:$0xff] }
  0x57   :  { %3542 = vmatpush.bf16.msra.mxu1 %v5776_v41  ;;  %v934_v41 = vpack.c.b16 %v884_v32, %v884_v32 }
  0x58   :  { %3555 = vmatpush.bf16.msra.mxu2 %v5784_v42  ;;  %v933_v42 = vpack.c.b16 %v883_v33, %v883_v33  ;;  %v5874_v33 = vld [vmem:[%s7430_s1 + $0x560] sm:$0xff] }
  0x59   :  { %3568 = vmatpush.bf16.msra.mxu3 %v5792_v43  ;;  %v935_v43 = vpack.c.b16 %v885_v36, %v885_v36 }
  0x5a   :  { %3530 = vmatpush.bf16.msra.mxu0 %v5767_v44  ;;  %v5836_v44 = vld [vmem:[%s7430_s1 + $0x430] sm:$0xff] }
  0x5b   :  { %3543 = vmatpush.bf16.msra.mxu1 %v5775_v45  ;;  %v5844_v45 = vld [vmem:[%s7430_s1 + $0x470] sm:$0xff] }
  0x5c   :  { %3556 = vmatpush.bf16.msra.mxu2 %v5783_v47  ;;  %v5860_v47 = vld [vmem:[%s7430_s1 + $0x4f0] sm:$0xff] }
  0x5d   :  { %3569 = vmatpush.bf16.msra.mxu3 %v5791_v49  ;;  %v5843_v49 = vld [vmem:[%s7430_s1 + $0x468] sm:$0xff] }
  0x5e   :  { %3531 = vmatpush.bf16.msra.mxu0 %v5766_v51  ;;  %v5859_v51 = vld [vmem:[%s7430_s1 + $0x4e8] sm:$0xff] }
  0x5f   :  { %3544 = vmatpush.bf16.msra.mxu1 %v5774_v52  ;;  %v5834_v52 = vld [vmem:[%s7430_s1 + $0x420] sm:$0xff] }
  0x60   :  { %3557 = vmatpush.bf16.msra.mxu2 %v5782_v54  ;;  %v5850_v54 = vld [vmem:[%s7430_s1 + $0x4a0] sm:$0xff] }
  0x61   :  { %3570 = vmatpush.bf16.msra.mxu3 %v5790_v60  ;;  %3532 = vmatmul.bf16.vlgmr.msra.gmra.mxu0 %v928_v61  ;;  %v5832_v60 = vld [vmem:[%s7430_s1 + $0x410] sm:$0xff] }
  0x62   :  { %3576 = vmatpush.bf16.msrb.mxu0 %v5805_v55  ;;  %3545 = vmatmul.bf16.vlgmr.msra.gmra.mxu1 %v929_v0  ;;  %v5858_v55 = vld [vmem:[%s7430_s1 + $0x4e0] sm:$0xff]  ;;  %v5840_v61 = vld [vmem:[%s7430_s1 + $0x450] sm:$0xff]  ;;  %v5831_v0 = vld [vmem:[%s7430_s1 + $0x408] sm:$0xff] }
  0x63   :  { %3589 = vmatpush.bf16.msrb.mxu1 %v5813_v57  ;;  %3558 = vmatmul.bf16.vlgmr.msra.gmra.mxu2 %v930_v62  ;;  %v5841_v57 = vld [vmem:[%s7430_s1 + $0x458] sm:$0xff]  ;;  %v5848_v62 = vld [vmem:[%s7430_s1 + $0x490] sm:$0xff] }
  0x64   :  { %3602 = vmatpush.bf16.msrb.mxu2 %v5821_v58  ;;  %3571 = vmatmul.bf16.vlgmr.msra.gmra.mxu3 %v931_v2  ;;  %v5849_v58 = vld [vmem:[%s7430_s1 + $0x498] sm:$0xff]  ;;  %v5847_v2 = vld [vmem:[%s7430_s1 + $0x488] sm:$0xff] }
  0x65   :  { %3615 = vmatpush.bf16.msrb.mxu3 %v5829_v63  ;;  %v5856_v63 = vld [vmem:[%s7430_s1 + $0x4d0] sm:$0xff] }
  0x66   :  { %3577 = vmatpush.bf16.msrb.mxu0 %v5804_v1  ;;  %v5839_v1 = vld [vmem:[%s7430_s1 + $0x448] sm:$0xff] }
  0x67   :  { %3590 = vmatpush.bf16.msrb.mxu1 %v5812_v3  ;;  %v24_v3 = vld [vmem:[%s7431_s0 + $0x40] sm:$0xff] }
  0x68   :  { %3603 = vmatpush.bf16.msrb.mxu2 %v5820_v4  ;;  %v25_v4 = vld [vmem:[%s7431_s0 + $0x48] sm:$0xff] }
  0x69   :  { %3616 = vmatpush.bf16.msrb.mxu3 %v5828_v5  ;;  %v5855_v5 = vld [vmem:[%s7430_s1 + $0x4c8] sm:$0xff] }
  0x6a   :  { %3578 = vmatpush.bf16.msrb.mxu0 %v5803_v6  ;;  %v5830_v6 = vld [vmem:[%s7430_s1 + $0x400] sm:$0xff] }
  0x6b   :  { %3591 = vmatpush.bf16.msrb.mxu1 %v5811_v7  ;;  %v886_v7 = vunpack.c.l.b16 %v24_v3 }
  0x6c   :  { %3604 = vmatpush.bf16.msrb.mxu2 %v5819_v8  ;;  %v888_v8 = vunpack.c.l.b16 %v25_v4 }
  0x6d   :  { %3617 = vmatpush.bf16.msrb.mxu3 %v5827_v9  ;;  %v5838_v9 = vld [vmem:[%s7430_s1 + $0x440] sm:$0xff] }
  0x6e   :  { %3579 = vmatpush.bf16.msrb.mxu0 %v5802_v10  ;;  %v5846_v10 = vld [vmem:[%s7430_s1 + $0x480] sm:$0xff] }
  0x6f   :  { %3592 = vmatpush.bf16.msrb.mxu1 %v5810_v11  ;;  %v887_v11 = vunpack.c.h.b16 %v24_v3  ;;  %v5909_v3 = vld [vmem:[%s7430_s1 + $0x678] sm:$0xff] }
  0x70   :  { %3605 = vmatpush.bf16.msrb.mxu2 %v5818_v12  ;;  %v5869_v12 = vld [vmem:[%s7430_s1 + $0x538] sm:$0xff] }
  0x71   :  { %3618 = vmatpush.bf16.msrb.mxu3 %v5826_v13  ;;  %v5877_v13 = vld [vmem:[%s7430_s1 + $0x578] sm:$0xff] }
  0x72   :  { %3580 = vmatpush.bf16.msrb.mxu0 %v5801_v14  ;;  %v889_v14 = vunpack.c.h.b16 %v25_v4 }
  0x73   :  { %3593 = vmatpush.bf16.msrb.mxu1 %v5809_v15  ;;  %v5885_v15 = vld [vmem:[%s7430_s1 + $0x5b8] sm:$0xff] }
  0x74   :  { %3606 = vmatpush.bf16.msrb.mxu2 %v5817_v16  ;;  %v5854_v16 = vld [vmem:[%s7430_s1 + $0x4c0] sm:$0xff] }
  0x75   :  { %3619 = vmatpush.bf16.msrb.mxu3 %v5825_v17  ;;  %v936_v17 = vpack.c.b16 %v886_v7, %v886_v7  ;;  %v5886_v7 = vld [vmem:[%s7430_s1 + $0x5c0] sm:$0xff] }
  0x76   :  { %3581 = vmatpush.bf16.msrb.mxu0 %v5800_v18  ;;  %v938_v18 = vpack.c.b16 %v888_v8, %v888_v8 }
  0x77   :  { %3594 = vmatpush.bf16.msrb.mxu1 %v5808_v19  ;;  %v5893_v19 = vld [vmem:[%s7430_s1 + $0x5f8] sm:$0xff] }
  0x78   :  { %3607 = vmatpush.bf16.msrb.mxu2 %v5816_v20  ;;  %v937_v20 = vpack.c.b16 %v887_v11, %v887_v11 }
  0x79   :  { %3620 = vmatpush.bf16.msrb.mxu3 %v5824_v21  ;;  %v939_v21 = vpack.c.b16 %v889_v14, %v889_v14  ;;  %v5908_v14 = vld [vmem:[%s7430_s1 + $0x670] sm:$0xff] }
  0x7a   :  { %3582 = vmatpush.bf16.msrb.mxu0 %v5799_v22  ;;  %v5868_v22 = vld [vmem:[%s7430_s1 + $0x530] sm:$0xff] }
  0x7b   :  { %3595 = vmatpush.bf16.msrb.mxu1 %v5807_v23  ;;  %v5876_v23 = vld [vmem:[%s7430_s1 + $0x570] sm:$0xff] }
  0x7c   :  { %3608 = vmatpush.bf16.msrb.mxu2 %v5815_v25  ;;  %v5892_v25 = vld [vmem:[%s7430_s1 + $0x5f0] sm:$0xff] }
  0x7d   :  { %3621 = vmatpush.bf16.msrb.mxu3 %v5823_v27  ;;  %v5875_v27 = vld [vmem:[%s7430_s1 + $0x568] sm:$0xff] }
  0x7e   :  { %3583 = vmatpush.bf16.msrb.mxu0 %v5798_v28  ;;  %v5883_v28 = vld [vmem:[%s7430_s1 + $0x5a8] sm:$0xff] }
  0x7f   :  { %3596 = vmatpush.bf16.msrb.mxu1 %v5806_v30  ;;  %v5891_v30 = vld [vmem:[%s7430_s1 + $0x5e8] sm:$0xff] }
  0x80   :  { %3609 = vmatpush.bf16.msrb.mxu2 %v5814_v34  ;;  %v5882_v34 = vld [vmem:[%s7430_s1 + $0x5a0] sm:$0xff] }
  0x81   :  { %3622 = vmatpush.bf16.msrb.mxu3 %v5822_v38  ;;  %3584 = vmatmul.bf16.vlgmr.msrb.gmra.mxu0 %v932_v39  ;;  %v5865_v39 = vld [vmem:[%s7430_s1 + $0x518] sm:$0xff] }
  0x82   :  { %3628 = vmatpush.bf16.msra.mxu0 %v5837_v31  ;;  %3597 = vmatmul.bf16.vlgmr.msrb.gmra.mxu1 %v933_v42  ;;  %v5866_v31 = vld [vmem:[%s7430_s1 + $0x520] sm:$0xff]  ;;  %v5889_v42 = vld [vmem:[%s7430_s1 + $0x5d8] sm:$0xff] }
  0x83   :  { %3641 = vmatpush.bf16.msra.mxu1 %v5845_v35  ;;  %3610 = vmatmul.bf16.vlgmr.msrb.gmra.mxu2 %v934_v41  ;;  %v5881_v41 = vld [vmem:[%s7430_s1 + $0x598] sm:$0xff] }
  0x84   :  { %3654 = vmatpush.bf16.msra.mxu2 %v5853_v37  ;;  %3623 = vmatmul.bf16.vlgmr.msrb.gmra.mxu3 %v935_v43  ;;  %v5890_v37 = vld [vmem:[%s7430_s1 + $0x5e0] sm:$0xff] }
  0x85   :  { %3667 = vmatpush.bf16.msra.mxu3 %v5861_v40  ;;  %v5873_v40 = vld [vmem:[%s7430_s1 + $0x558] sm:$0xff] }
  0x86   :  { %3629 = vmatpush.bf16.msra.mxu0 %v5836_v44  ;;  %v5864_v44 = vld [vmem:[%s7430_s1 + $0x510] sm:$0xff] }
  0x87   :  { %3642 = vmatpush.bf16.msra.mxu1 %v5844_v45 }
  0x88   :  { %3655 = vmatpush.bf16.msra.mxu2 %v5852_v46 }
  0x89   :  { %3668 = vmatpush.bf16.msra.mxu3 %v5860_v47  ;;  %v5872_v47 = vld [vmem:[%s7430_s1 + $0x550] sm:$0xff] }
  0x8a   :  { %3630 = vmatpush.bf16.msra.mxu0 %v5835_v48  ;;  %v5880_v48 = vld [vmem:[%s7430_s1 + $0x590] sm:$0xff] }
  0x8b   :  { %3643 = vmatpush.bf16.msra.mxu1 %v5843_v49 }
  0x8c   :  { %3656 = vmatpush.bf16.msra.mxu2 %v5851_v50 }
  0x8d   :  { %3669 = vmatpush.bf16.msra.mxu3 %v5859_v51  ;;  %v5888_v51 = vld [vmem:[%s7430_s1 + $0x5d0] sm:$0xff] }
  0x8e   :  { %3631 = vmatpush.bf16.msra.mxu0 %v5834_v52 }
  0x8f   :  { %3644 = vmatpush.bf16.msra.mxu1 %v5842_v53  ;;  %v5863_v53 = vld [vmem:[%s7430_s1 + $0x508] sm:$0xff] }
  0x90   :  { %3657 = vmatpush.bf16.msra.mxu2 %v5850_v54  ;;  %v5871_v54 = vld [vmem:[%s7430_s1 + $0x548] sm:$0xff] }
  0x91   :  { %3670 = vmatpush.bf16.msra.mxu3 %v5858_v55  ;;  %v5879_v55 = vld [vmem:[%s7430_s1 + $0x588] sm:$0xff] }
  0x92   :  { %3632 = vmatpush.bf16.msra.mxu0 %v5833_v56  ;;  %v26_v56 = vld [vmem:[%s7431_s0 + $0x50] sm:$0xff] }
  0x93   :  { %3645 = vmatpush.bf16.msra.mxu1 %v5841_v57  ;;  %v27_v57 = vld [vmem:[%s7431_s0 + $0x58] sm:$0xff] }
  0x94   :  { %3658 = vmatpush.bf16.msra.mxu2 %v5849_v58  ;;  %v5887_v58 = vld [vmem:[%s7430_s1 + $0x5c8] sm:$0xff]  ;;  %v893_v4 = vunpack.c.h.b16 %v27_v57 }
  0x95   :  { %3671 = vmatpush.bf16.msra.mxu3 %v5857_v59 }
  0x96   :  { %3633 = vmatpush.bf16.msra.mxu0 %v5832_v60  ;;  %v5862_v60 = vld [vmem:[%s7430_s1 + $0x500] sm:$0xff] }
  0x97   :  { %3646 = vmatpush.bf16.msra.mxu1 %v5840_v61  ;;  %v890_v61 = vunpack.c.l.b16 %v26_v56 }
  0x98   :  { %3659 = vmatpush.bf16.msra.mxu2 %v5848_v62  ;;  %v892_v62 = vunpack.c.l.b16 %v27_v57  ;;  %v5933_v57 = vld [vmem:[%s7430_s1 + $0x738] sm:$0xff] }
  0x99   :  { %3672 = vmatpush.bf16.msra.mxu3 %v5856_v63  ;;  %v5870_v63 = vld [vmem:[%s7430_s1 + $0x540] sm:$0xff]  ;;  %v940_v8 = vpack.c.b16 %v890_v61, %v890_v61 }
  0x9a   :  { %3634 = vmatpush.bf16.msra.mxu0 %v5831_v0  ;;  %v5878_v0 = vld [vmem:[%s7430_s1 + $0x580] sm:$0xff] }
  0x9b   :  { %3647 = vmatpush.bf16.msra.mxu1 %v5839_v1  ;;  %v891_v1 = vunpack.c.h.b16 %v26_v56  ;;  %v5918_v61 = vld [vmem:[%s7430_s1 + $0x6c0] sm:$0xff] }
  0x9c   :  { %3660 = vmatpush.bf16.msra.mxu2 %v5847_v2  ;;  %v5901_v2 = vld [vmem:[%s7430_s1 + $0x638] sm:$0xff] }
  0x9d   :  { %3673 = vmatpush.bf16.msra.mxu3 %v5855_v5  ;;  %v941_v11 = vpack.c.b16 %v891_v1, %v891_v1 }
  0x9e   :  { %3635 = vmatpush.bf16.msra.mxu0 %v5830_v6  ;;  %v3429_v32 = vpop.f32.mrf.mxu0  ;;  %v5917_v6 = vld [vmem:[%s7430_s1 + $0x6b8] sm:$0xff] }
  0x9f   :  { %3648 = vmatpush.bf16.msra.mxu1 %v5838_v9  ;;  %v3430_v35 = vadd.f32 %v6102_v29, %v3429_v32  ;;  %v3442_v36 = vpop.f32.mrf.mxu1  ;;  %v942_v9 = vpack.c.b16 %v892_v62, %v892_v62 }
  0xa0   :  { %3661 = vmatpush.bf16.msra.mxu2 %v5846_v10  ;;  %v5925_v10 = vld [vmem:[%s7430_s1 + $0x6f8] sm:$0xff] }
  0xa1   :  { %3674 = vmatpush.bf16.msra.mxu3 %v5854_v16  ;;  %3636 = vmatmul.bf16.vlgmr.msra.gmra.mxu0 %v936_v17  ;;  %v3443_v38 = vadd.f32 %v3442_v36, %v3430_v35  ;;  %v5924_v16 = vld [vmem:[%s7430_s1 + $0x6f0] sm:$0xff]  ;;  %v5899_v17 = vld [vmem:[%s7430_s1 + $0x628] sm:$0xff] }
  0xa2   :  { %3680 = vmatpush.bf16.msrb.mxu0 %v5869_v12  ;;  %3649 = vmatmul.bf16.vlgmr.msra.gmra.mxu1 %v937_v20  ;;  %v943_v12 = vpack.c.b16 %v893_v4, %v893_v4  ;;  %v5923_v20 = vld [vmem:[%s7430_s1 + $0x6e8] sm:$0xff]  ;;  %v5896_v35 = vld [vmem:[%s7430_s1 + $0x610] sm:$0xff] }
  0xa3   :  { %3693 = vmatpush.bf16.msrb.mxu1 %v5877_v13  ;;  %3662 = vmatmul.bf16.vlgmr.msra.gmra.mxu2 %v938_v18  ;;  %v5900_v13 = vld [vmem:[%s7430_s1 + $0x630] sm:$0xff]  ;;  %v5907_v18 = vld [vmem:[%s7430_s1 + $0x668] sm:$0xff] }
  0xa4   :  { %3706 = vmatpush.bf16.msrb.mxu2 %v5885_v15  ;;  %3675 = vmatmul.bf16.vlgmr.msra.gmra.mxu3 %v939_v21  ;;  %v5916_v15 = vld [vmem:[%s7430_s1 + $0x6b0] sm:$0xff]  ;;  %v5898_v21 = vld [vmem:[%s7430_s1 + $0x620] sm:$0xff] }
  0xa5   :  { %3719 = vmatpush.bf16.msrb.mxu3 %v5893_v19  ;;  %v5915_v19 = vld [vmem:[%s7430_s1 + $0x6a8] sm:$0xff]  ;;  %v5904_v36 = vld [vmem:[%s7430_s1 + $0x650] sm:$0xff] }
  0xa6   :  { %3681 = vmatpush.bf16.msrb.mxu0 %v5868_v22  ;;  %v3455_v43 = vpop.f32.mrf.mxu2  ;;  %v3431_v46 = vpop.f32.mrf.mxu0  ;;  %v5906_v22 = vld [vmem:[%s7430_s1 + $0x660] sm:$0xff]  ;;  %v5940_v4 = vld [vmem:[%s7430_s1 + $0x770] sm:$0xff] }
  0xa7   :  { %3694 = vmatpush.bf16.msrb.mxu1 %v5876_v23  ;;  %v3456_v45 = vadd.f32 %v3455_v43, %v3443_v38  ;;  %v3468_v49 = vpop.f32.mrf.mxu3  ;;  %v3444_v50 = vpop.f32.mrf.mxu1  ;;  %v5914_v23 = vld [vmem:[%s7430_s1 + $0x6a0] sm:$0xff]  ;;  %v5895_v43 = vld [vmem:[%s7430_s1 + $0x608] sm:$0xff] }
  0xa8   :  { %3707 = vmatpush.bf16.msrb.mxu2 %v5884_v24  ;;  %v28_v46 = vld [vmem:[%s7431_s0 + $0x60] sm:$0xff] }
  0xa9   :  { %3720 = vmatpush.bf16.msrb.mxu3 %v5892_v25  ;;  %v6713_v52 = vadd.f32 %v3468_v49, %v3456_v45  ;;  %v5911_v45 = vld [vmem:[%s7430_s1 + $0x688] sm:$0xff]  ;;  %v5894_v50 = vld [vmem:[%s7430_s1 + $0x600] sm:$0xff] }
  0xaa   :  { %3682 = vmatpush.bf16.msrb.mxu0 %v5867_v26  ;;  %v5919_v49 = vld [vmem:[%s7430_s1 + $0x6c8] sm:$0xff] }
  0xab   :  { %3695 = vmatpush.bf16.msrb.mxu1 %v5875_v27  ;;  %v5922_v27 = vld [vmem:[%s7430_s1 + $0x6e0] sm:$0xff] }
  0xac   :  { %3708 = vmatpush.bf16.msrb.mxu2 %v5883_v28  ;;  %v5897_v28 = vld [vmem:[%s7430_s1 + $0x618] sm:$0xff] }
  0xad   :  { %3721 = vmatpush.bf16.msrb.mxu3 %v5891_v30  ;;  %v5905_v30 = vld [vmem:[%s7430_s1 + $0x658] sm:$0xff] }
  0xae   :  { %3683 = vmatpush.bf16.msrb.mxu0 %v5866_v31  ;;  %v3457_v59 = vpop.f32.mrf.mxu2  ;;  %v5913_v31 = vld [vmem:[%s7430_s1 + $0x698] sm:$0xff] }
  0xaf   :  { %3696 = vmatpush.bf16.msrb.mxu1 %v5874_v33  ;;  %v3470_v5 = vpop.f32.mrf.mxu3  ;;  %v5921_v33 = vld [vmem:[%s7430_s1 + $0x6d8] sm:$0xff] }
  0xb0   :  { %3709 = vmatpush.bf16.msrb.mxu2 %v5882_v34  ;;  %v5948_v5 = vld [vmem:[%s7430_s1 + $0x7b0] sm:$0xff] }
  0xb1   :  { %3722 = vmatpush.bf16.msrb.mxu3 %v5890_v37  ;;  %v5912_v37 = vld [vmem:[%s7430_s1 + $0x690] sm:$0xff] }
  0xb2   :  { %3684 = vmatpush.bf16.msrb.mxu0 %v5865_v39 }
  0xb3   :  { %3697 = vmatpush.bf16.msrb.mxu1 %v5873_v40 }
  0xb4   :  { %3710 = vmatpush.bf16.msrb.mxu2 %v5881_v41 }
  0xb5   :  { %3723 = vmatpush.bf16.msrb.mxu3 %v5889_v42  ;;  %v5920_v42 = vld [vmem:[%s7430_s1 + $0x6d0] sm:$0xff] }
  0xb6   :  { %3685 = vmatpush.bf16.msrb.mxu0 %v5864_v44  ;;  %v5903_v44 = vld [vmem:[%s7430_s1 + $0x648] sm:$0xff] }
  0xb7   :  { %3698 = vmatpush.bf16.msrb.mxu1 %v5872_v47  ;;  %v29_v47 = vld [vmem:[%s7431_s0 + $0x68] sm:$0xff] }
  0xb8   :  { %3711 = vmatpush.bf16.msrb.mxu2 %v5880_v48  ;;  %v897_v59 = vunpack.c.h.b16 %v29_v47 }
  0xb9   :  { %3724 = vmatpush.bf16.msrb.mxu3 %v5888_v51  ;;  %v894_v51 = vunpack.c.l.b16 %v28_v46 }
  0xba   :  { %3686 = vmatpush.bf16.msrb.mxu0 %v5863_v53  ;;  %v5902_v53 = vld [vmem:[%s7430_s1 + $0x640] sm:$0xff] }
  0xbb   :  { %3699 = vmatpush.bf16.msrb.mxu1 %v5871_v54  ;;  %v5910_v54 = vld [vmem:[%s7430_s1 + $0x680] sm:$0xff]  ;;  %v944_v62 = vpack.c.b16 %v894_v51, %v894_v51 }
  0xbc   :  { %3712 = vmatpush.bf16.msrb.mxu2 %v5879_v55  ;;  %v895_v55 = vunpack.c.h.b16 %v28_v46  ;;  %v5950_v51 = vld [vmem:[%s7430_s1 + $0x7c0] sm:$0xff] }
  0xbd   :  { %3725 = vmatpush.bf16.msrb.mxu3 %v5887_v58  ;;  %v5941_v58 = vld [vmem:[%s7430_s1 + $0x778] sm:$0xff] }
  0xbe   :  { %3687 = vmatpush.bf16.msrb.mxu0 %v5862_v60  ;;  %v3481_v24 = vpop.f32.mrf.mxu0  ;;  %v5949_v60 = vld [vmem:[%s7430_s1 + $0x7b8] sm:$0xff]  ;;  %v945_v1 = vpack.c.b16 %v895_v55, %v895_v55 }
  0xbf   :  { %3700 = vmatpush.bf16.msrb.mxu1 %v5870_v63  ;;  %v3494_v25 = vpop.f32.mrf.mxu1  ;;  %v3482_v26 = vadd.f32 %v3481_v24, %v6713_v52  ;;  %v896_v52 = vunpack.c.l.b16 %v29_v47  ;;  %v5953_v24 = vld [vmem:[%s7430_s1 + $0x7d8] sm:$0xff] }
  0xc0   :  { %3713 = vmatpush.bf16.msrb.mxu2 %v5878_v0  ;;  %v5957_v0 = vld [vmem:[%s7430_s1 + $0x7f8] sm:$0xff] }
  0xc1   :  { %3726 = vmatpush.bf16.msrb.mxu3 %v5886_v7  ;;  %3688 = vmatmul.bf16.vlgmr.msrb.gmra.mxu0 %v940_v8  ;;  %v3495_v29 = vadd.f32 %v3494_v25, %v3482_v26  ;;  %v946_v63 = vpack.c.b16 %v896_v52, %v896_v52  ;;  %v5931_v7 = vld [vmem:[%s7430_s1 + $0x728] sm:$0xff]  ;;  %v5965_v47 = vld [vmem:[%s7430_s1 + $0x838] sm:$0xff] }
  0xc2   :  { %3732 = vmatpush.bf16.msra.mxu0 %v5901_v2  ;;  %3701 = vmatmul.bf16.vlgmr.msrb.gmra.mxu1 %v941_v11  ;;  %v947_v2 = vpack.c.b16 %v897_v59, %v897_v59  ;;  %v5939_v8 = vld [vmem:[%s7430_s1 + $0x768] sm:$0xff]  ;;  %v5980_v59 = vld [vmem:[%s7430_s1 + $0x8b0] sm:$0xff] }
  0xc3   :  { %3745 = vmatpush.bf16.msra.mxu1 %v5909_v3  ;;  %3714 = vmatmul.bf16.vlgmr.msrb.gmra.mxu2 %v942_v9  ;;  %v5932_v3 = vld [vmem:[%s7430_s1 + $0x730] sm:$0xff]  ;;  %v5947_v9 = vld [vmem:[%s7430_s1 + $0x7a8] sm:$0xff] }
  0xc4   :  { %3758 = vmatpush.bf16.msra.mxu2 %v5917_v6  ;;  %3727 = vmatmul.bf16.vlgmr.msrb.gmra.mxu3 %v943_v12  ;;  %v5956_v6 = vld [vmem:[%s7430_s1 + $0x7f0] sm:$0xff] }
  0xc5   :  { %3771 = vmatpush.bf16.msra.mxu3 %v5925_v10  ;;  %v5955_v10 = vld [vmem:[%s7430_s1 + $0x7e8] sm:$0xff] }
  0xc6   :  { %3733 = vmatpush.bf16.msra.mxu0 %v5900_v13  ;;  %v3507_v32 = vpop.f32.mrf.mxu2  ;;  %v3483_v39 = vpop.f32.mrf.mxu0  ;;  %v5930_v13 = vld [vmem:[%s7430_s1 + $0x720] sm:$0xff] }
  0xc7   :  { %3746 = vmatpush.bf16.msra.mxu1 %v5908_v14  ;;  %v3508_v34 = vadd.f32 %v3507_v32, %v3495_v29  ;;  %v3520_v38 = vpop.f32.mrf.mxu3  ;;  %v3496_v41 = vpop.f32.mrf.mxu1  ;;  %v5938_v14 = vld [vmem:[%s7430_s1 + $0x760] sm:$0xff]  ;;  %v5936_v29 = vld [vmem:[%s7430_s1 + $0x750] sm:$0xff]  ;;  %v5951_v39 = vld [vmem:[%s7430_s1 + $0x7c8] sm:$0xff] }
  0xc8   :  { %3759 = vmatpush.bf16.msra.mxu2 %v5916_v15  ;;  %v5946_v15 = vld [vmem:[%s7430_s1 + $0x7a0] sm:$0xff]  ;;  %v5952_v32 = vld [vmem:[%s7430_s1 + $0x7d0] sm:$0xff] }
  0xc9   :  { %3772 = vmatpush.bf16.msra.mxu3 %v5924_v16  ;;  %v3521_v40 = vadd.f32 %v3520_v38, %v3508_v34  ;;  %v5935_v34 = vld [vmem:[%s7430_s1 + $0x748] sm:$0xff] }
  0xca   :  { %3734 = vmatpush.bf16.msra.mxu0 %v5899_v17 }
  0xcb   :  { %3747 = vmatpush.bf16.msra.mxu1 %v5907_v18  ;;  %v5954_v18 = vld [vmem:[%s7430_s1 + $0x7e0] sm:$0xff] }
  0xcc   :  { %3760 = vmatpush.bf16.msra.mxu2 %v5915_v19  ;;  %v5929_v19 = vld [vmem:[%s7430_s1 + $0x718] sm:$0xff] }
  0xcd   :  { %3773 = vmatpush.bf16.msra.mxu3 %v5923_v20  ;;  %v5937_v20 = vld [vmem:[%s7430_s1 + $0x758] sm:$0xff] }
  0xce   :  { %3735 = vmatpush.bf16.msra.mxu0 %v5898_v21  ;;  %v3509_v48 = vpop.f32.mrf.mxu2  ;;  %v5945_v21 = vld [vmem:[%s7430_s1 + $0x798] sm:$0xff] }
  0xcf   :  { %3748 = vmatpush.bf16.msra.mxu1 %v5906_v22  ;;  %v3522_v56 = vpop.f32.mrf.mxu3  ;;  %v5973_v48 = vld [vmem:[%s7430_s1 + $0x878] sm:$0xff] }
  0xd0   :  { %3761 = vmatpush.bf16.msra.mxu2 %v5914_v23 }
  0xd1   :  { %3774 = vmatpush.bf16.msra.mxu3 %v5922_v27  ;;  %v5928_v27 = vld [vmem:[%s7430_s1 + $0x710] sm:$0xff] }
  0xd2   :  { %3736 = vmatpush.bf16.msra.mxu0 %v5897_v28 }
  0xd3   :  { %3749 = vmatpush.bf16.msra.mxu1 %v5905_v30  ;;  %v5944_v30 = vld [vmem:[%s7430_s1 + $0x790] sm:$0xff] }
  0xd4   :  { %3762 = vmatpush.bf16.msra.mxu2 %v5913_v31 }
  0xd5   :  { %3775 = vmatpush.bf16.msra.mxu3 %v5921_v33  ;;  %v5927_v33 = vld [vmem:[%s7430_s1 + $0x708] sm:$0xff] }
  0xd6   :  { %3737 = vmatpush.bf16.msra.mxu0 %v5896_v35  ;;  %v5943_v35 = vld [vmem:[%s7430_s1 + $0x788] sm:$0xff] }
  0xd7   :  { %3750 = vmatpush.bf16.msra.mxu1 %v5904_v36  ;;  %v30_v36 = vld [vmem:[%s7431_s0 + $0x70] sm:$0xff] }
  0xd8   :  { %3763 = vmatpush.bf16.msra.mxu2 %v5912_v37  ;;  %v31_v37 = vld [vmem:[%s7431_s0 + $0x78] sm:$0xff]  ;;  %v898_v41 = vunpack.c.l.b16 %v30_v36  ;;  %v899_v46 = vunpack.c.h.b16 %v30_v36 }
  0xd9   :  { %3776 = vmatpush.bf16.msra.mxu3 %v5920_v42  ;;  %v900_v42 = vunpack.c.l.b16 %v31_v37 }
  0xda   :  { %3738 = vmatpush.bf16.msra.mxu0 %v5895_v43  ;;  %v948_v52 = vpack.c.b16 %v898_v41, %v898_v41  ;;  %v949_v55 = vpack.c.b16 %v899_v46, %v899_v46  ;;  %v5982_v41 = vld [vmem:[%s7430_s1 + $0x8c0] sm:$0xff] }
  0xdb   :  { %3751 = vmatpush.bf16.msra.mxu1 %v5903_v44  ;;  %v5934_v44 = vld [vmem:[%s7430_s1 + $0x740] sm:$0xff] }
  0xdc   :  { %3764 = vmatpush.bf16.msra.mxu2 %v5911_v45  ;;  %v5942_v45 = vld [vmem:[%s7430_s1 + $0x780] sm:$0xff] }
  0xdd   :  { %3777 = vmatpush.bf16.msra.mxu3 %v5919_v49  ;;  %v901_v49 = vunpack.c.h.b16 %v31_v37  ;;  %v5997_v37 = vld [vmem:[%s7430_s1 + $0x938] sm:$0xff] }
  0xde   :  { %3739 = vmatpush.bf16.msra.mxu0 %v5894_v50  ;;  %v3533_v11 = vpop.f32.mrf.mxu0  ;;  %v5981_v50 = vld [vmem:[%s7430_s1 + $0x8b8] sm:$0xff] }
  0xdf   :  { %3752 = vmatpush.bf16.msra.mxu1 %v5902_v53  ;;  %v3534_v12 = vadd.f32 %v3533_v11, %v3521_v40  ;;  %v3546_v16 = vpop.f32.mrf.mxu1  ;;  %v5926_v40 = vld [vmem:[%s7430_s1 + $0x700] sm:$0xff]  ;;  %v950_v53 = vpack.c.b16 %v900_v42, %v900_v42  ;;  %v951_v56 = vpack.c.b16 %v901_v49, %v901_v49  ;;  %v5977_v11 = vld [vmem:[%s7430_s1 + $0x898] sm:$0xff]  ;;  %v6012_v49 = vld [vmem:[%s7430_s1 + $0x9b0] sm:$0xff] }
  0xe0   :  { %3765 = vmatpush.bf16.msra.mxu2 %v5910_v54  ;;  %v5989_v54 = vld [vmem:[%s7430_s1 + $0x8f8] sm:$0xff] }
  0xe1   :  { %3778 = vmatpush.bf16.msra.mxu3 %v5918_v61  ;;  %3740 = vmatmul.bf16.vlgmr.msra.gmra.mxu0 %v944_v62  ;;  %v3547_v17 = vadd.f32 %v3546_v16, %v3534_v12  ;;  %v5963_v61 = vld [vmem:[%s7430_s1 + $0x828] sm:$0xff] }
  0xe2   :  { %3784 = vmatpush.bf16.msrb.mxu0 %v5933_v57  ;;  %3753 = vmatmul.bf16.vlgmr.msra.gmra.mxu1 %v945_v1  ;;  %v5964_v57 = vld [vmem:[%s7430_s1 + $0x830] sm:$0xff]  ;;  %v5971_v62 = vld [vmem:[%s7430_s1 + $0x868] sm:$0xff] }
  0xe3   :  { %3797 = vmatpush.bf16.msrb.mxu1 %v5941_v58  ;;  %3766 = vmatmul.bf16.vlgmr.msra.gmra.mxu2 %v946_v63  ;;  %v5972_v58 = vld [vmem:[%s7430_s1 + $0x870] sm:$0xff]  ;;  %v5979_v63 = vld [vmem:[%s7430_s1 + $0x8a8] sm:$0xff] }
  0xe4   :  { %3810 = vmatpush.bf16.msrb.mxu2 %v5949_v60  ;;  %3779 = vmatmul.bf16.vlgmr.msra.gmra.mxu3 %v947_v2  ;;  %v5988_v60 = vld [vmem:[%s7430_s1 + $0x8f0] sm:$0xff] }
  0xe5   :  { %3823 = vmatpush.bf16.msrb.mxu3 %v5957_v0  ;;  %v5987_v0 = vld [vmem:[%s7430_s1 + $0x8e8] sm:$0xff] }
  0xe6   :  { %3785 = vmatpush.bf16.msrb.mxu0 %v5932_v3  ;;  %v3559_v22 = vpop.f32.mrf.mxu2  ;;  %v3535_v25 = vpop.f32.mrf.mxu0  ;;  %v5962_v3 = vld [vmem:[%s7430_s1 + $0x820] sm:$0xff] }
  0xe7   :  { %3798 = vmatpush.bf16.msrb.mxu1 %v5940_v4  ;;  %v3560_v23 = vadd.f32 %v3559_v22, %v3547_v17  ;;  %v3572_v26 = vpop.f32.mrf.mxu3  ;;  %v3548_v31 = vpop.f32.mrf.mxu1  ;;  %v5960_v17 = vld [vmem:[%s7430_s1 + $0x810] sm:$0xff]  ;;  %v5975_v25 = vld [vmem:[%s7430_s1 + $0x888] sm:$0xff] }
  0xe8   :  { %3811 = vmatpush.bf16.msrb.mxu2 %v5948_v5  ;;  %v5970_v5 = vld [vmem:[%s7430_s1 + $0x860] sm:$0xff]  ;;  %v5984_v22 = vld [vmem:[%s7430_s1 + $0x8d0] sm:$0xff] }
  0xe9   :  { %3824 = vmatpush.bf16.msrb.mxu3 %v5956_v6  ;;  %v6911_v28 = vadd.f32 %v3572_v26, %v3560_v23  ;;  %v5978_v6 = vld [vmem:[%s7430_s1 + $0x8a0] sm:$0xff]  ;;  %v5959_v23 = vld [vmem:[%s7430_s1 + $0x808] sm:$0xff] }
  0xea   :  { %3786 = vmatpush.bf16.msrb.mxu0 %v5931_v7  ;;  %v32_v26 = vld [vmem:[%s7431_s0 + $0x80] sm:$0xff] }
  0xeb   :  { %3799 = vmatpush.bf16.msrb.mxu1 %v5939_v8  ;;  %v5986_v8 = vld [vmem:[%s7430_s1 + $0x8e0] sm:$0xff]  ;;  %v903_v36 = vunpack.c.h.b16 %v32_v26 }
  0xec   :  { %3812 = vmatpush.bf16.msrb.mxu2 %v5947_v9  ;;  %v5961_v9 = vld [vmem:[%s7430_s1 + $0x818] sm:$0xff]  ;;  %v5958_v31 = vld [vmem:[%s7430_s1 + $0x800] sm:$0xff] }
  0xed   :  { %3825 = vmatpush.bf16.msrb.mxu3 %v5955_v10  ;;  %v5969_v10 = vld [vmem:[%s7430_s1 + $0x858] sm:$0xff] }
  0xee   :  { %3787 = vmatpush.bf16.msrb.mxu0 %v5930_v13  ;;  %v3561_v38 = vpop.f32.mrf.mxu2 }
  0xef   :  { %3800 = vmatpush.bf16.msrb.mxu1 %v5938_v14  ;;  %v3574_v43 = vpop.f32.mrf.mxu3  ;;  %v5985_v14 = vld [vmem:[%s7430_s1 + $0x8d8] sm:$0xff] }
  0xf0   :  { %3813 = vmatpush.bf16.msrb.mxu2 %v5946_v15  ;;  %v6005_v38 = vld [vmem:[%s7430_s1 + $0x978] sm:$0xff] }
  0xf1   :  { %3826 = vmatpush.bf16.msrb.mxu3 %v5954_v18 }
  0xf2   :  { %3788 = vmatpush.bf16.msrb.mxu0 %v5929_v19 }
  0xf3   :  { %3801 = vmatpush.bf16.msrb.mxu1 %v5937_v20  ;;  %v5968_v20 = vld [vmem:[%s7430_s1 + $0x850] sm:$0xff] }
  0xf4   :  { %3814 = vmatpush.bf16.msrb.mxu2 %v5945_v21  ;;  %v5976_v21 = vld [vmem:[%s7430_s1 + $0x890] sm:$0xff] }
  0xf5   :  { %3827 = vmatpush.bf16.msrb.mxu3 %v5953_v24  ;;  %v5967_v24 = vld [vmem:[%s7430_s1 + $0x848] sm:$0xff] }
  0xf6   :  { %3789 = vmatpush.bf16.msrb.mxu0 %v5928_v27  ;;  %v33_v27 = vld [vmem:[%s7431_s0 + $0x88] sm:$0xff] }
  0xf7   :  { %3802 = vmatpush.bf16.msrb.mxu1 %v5936_v29  ;;  %v5983_v29 = vld [vmem:[%s7430_s1 + $0x8c8] sm:$0xff] }
  0xf8   :  { %3815 = vmatpush.bf16.msrb.mxu2 %v5944_v30 }
  0xf9   :  { %3828 = vmatpush.bf16.msrb.mxu3 %v5952_v32  ;;  %v902_v32 = vunpack.c.l.b16 %v32_v26 }
  0xfa   :  { %3790 = vmatpush.bf16.msrb.mxu0 %v5927_v33  ;;  %v904_v33 = vunpack.c.l.b16 %v33_v27 }
  0xfb   :  { %3803 = vmatpush.bf16.msrb.mxu1 %v5935_v34  ;;  %v5966_v34 = vld [vmem:[%s7430_s1 + $0x840] sm:$0xff]  ;;  %v952_v42 = vpack.c.b16 %v902_v32, %v902_v32 }
  0xfc   :  { %3816 = vmatpush.bf16.msrb.mxu2 %v5943_v35  ;;  %v5974_v35 = vld [vmem:[%s7430_s1 + $0x880] sm:$0xff]  ;;  %v954_v43 = vpack.c.b16 %v904_v33, %v904_v33 }
  0xfd   :  { %3829 = vmatpush.bf16.msrb.mxu3 %v5951_v39  ;;  %v905_v39 = vunpack.c.h.b16 %v33_v27  ;;  %v6029_v27 = vld [vmem:[%s7430_s1 + $0xa38] sm:$0xff] }
  0xfe   :  { %3791 = vmatpush.bf16.msrb.mxu0 %v5926_v40  ;;  %v3585_v1 = vpop.f32.mrf.mxu0  ;;  %v6013_v40 = vld [vmem:[%s7430_s1 + $0x9b8] sm:$0xff] }
  0xff   :  { %3804 = vmatpush.bf16.msrb.mxu1 %v5934_v44  ;;  %v3586_v2 = vadd.f32 %v3585_v1, %v6911_v28  ;;  %v3598_v4 = vpop.f32.mrf.mxu1  ;;  %v6021_v44 = vld [vmem:[%s7430_s1 + $0x9f8] sm:$0xff]  ;;  %v955_v46 = vpack.c.b16 %v905_v39, %v905_v39  ;;  %v6044_v39 = vld [vmem:[%s7430_s1 + $0xab0] sm:$0xff] }
 0x100   :  { %3817 = vmatpush.bf16.msrb.mxu2 %v5942_v45  ;;  %v953_v45 = vpack.c.b16 %v903_v36, %v903_v36  ;;  %v6009_v1 = vld [vmem:[%s7430_s1 + $0x998] sm:$0xff] }
 0x101   :  { %3830 = vmatpush.bf16.msrb.mxu3 %v5950_v51  ;;  %3792 = vmatmul.bf16.vlgmr.msrb.gmra.mxu0 %v948_v52  ;;  %v3599_v7 = vadd.f32 %v3598_v4, %v3586_v2  ;;  %v5995_v51 = vld [vmem:[%s7430_s1 + $0x928] sm:$0xff]  ;;  %v6017_v4 = vld [vmem:[%s7430_s1 + $0x9d8] sm:$0xff] }
 0x102   :  { %3836 = vmatpush.bf16.msra.mxu0 %v5965_v47  ;;  %3805 = vmatmul.bf16.vlgmr.msrb.gmra.mxu1 %v949_v55  ;;  %v5996_v47 = vld [vmem:[%s7430_s1 + $0x930] sm:$0xff]  ;;  %v6003_v52 = vld [vmem:[%s7430_s1 + $0x968] sm:$0xff] }
 0x103   :  { %3849 = vmatpush.bf16.msra.mxu1 %v5973_v48  ;;  %3818 = vmatmul.bf16.vlgmr.msrb.gmra.mxu2 %v950_v53  ;;  %v6004_v48 = vld [vmem:[%s7430_s1 + $0x970] sm:$0xff]  ;;  %v6011_v53 = vld [vmem:[%s7430_s1 + $0x9a8] sm:$0xff] }
 0x104   :  { %3862 = vmatpush.bf16.msra.mxu2 %v5981_v50  ;;  %3831 = vmatmul.bf16.vlgmr.msrb.gmra.mxu3 %v951_v56  ;;  %v6020_v50 = vld [vmem:[%s7430_s1 + $0x9f0] sm:$0xff] }
 0x105   :  { %3875 = vmatpush.bf16.msra.mxu3 %v5989_v54  ;;  %v6019_v54 = vld [vmem:[%s7430_s1 + $0x9e8] sm:$0xff] }
 0x106   :  { %3837 = vmatpush.bf16.msra.mxu0 %v5964_v57  ;;  %v3611_v12 = vpop.f32.mrf.mxu2  ;;  %v3587_v16 = vpop.f32.mrf.mxu0  ;;  %v5994_v57 = vld [vmem:[%s7430_s1 + $0x920] sm:$0xff] }
 0x107   :  { %3850 = vmatpush.bf16.msra.mxu1 %v5972_v58  ;;  %v3612_v13 = vadd.f32 %v3611_v12, %v3599_v7  ;;  %v3624_v15 = vpop.f32.mrf.mxu3  ;;  %v3600_v18 = vpop.f32.mrf.mxu1  ;;  %v6016_v12 = vld [vmem:[%s7430_s1 + $0x9d0] sm:$0xff] }
 0x108   :  { %3863 = vmatpush.bf16.msra.mxu2 %v5980_v59  ;;  %v6002_v59 = vld [vmem:[%s7430_s1 + $0x960] sm:$0xff]  ;;  %v34_v16 = vld [vmem:[%s7431_s0 + $0x90] sm:$0xff] }
 0x109   :  { %3876 = vmatpush.bf16.msra.mxu3 %v5988_v60  ;;  %v7016_v19 = vadd.f32 %v3624_v15, %v3612_v13  ;;  %v6010_v60 = vld [vmem:[%s7430_s1 + $0x9a0] sm:$0xff]  ;;  %v5991_v13 = vld [vmem:[%s7430_s1 + $0x908] sm:$0xff]  ;;  %v907_v26 = vunpack.c.h.b16 %v34_v16 }
 0x10a   :  { %3838 = vmatpush.bf16.msra.mxu0 %v5963_v61  ;;  %v6007_v15 = vld [vmem:[%s7430_s1 + $0x988] sm:$0xff] }
 0x10b   :  { %3851 = vmatpush.bf16.msra.mxu1 %v5971_v62  ;;  %v6018_v62 = vld [vmem:[%s7430_s1 + $0x9e0] sm:$0xff] }
 0x10c   :  { %3864 = vmatpush.bf16.msra.mxu2 %v5979_v63  ;;  %v5993_v63 = vld [vmem:[%s7430_s1 + $0x918] sm:$0xff] }
 0x10d   :  { %3877 = vmatpush.bf16.msra.mxu3 %v5987_v0  ;;  %v6001_v0 = vld [vmem:[%s7430_s1 + $0x958] sm:$0xff] }
 0x10e   :  { %3839 = vmatpush.bf16.msra.mxu0 %v5962_v3  ;;  %v3613_v28 = vpop.f32.mrf.mxu2 }
 0x10f   :  { %3852 = vmatpush.bf16.msra.mxu1 %v5970_v5  ;;  %v3626_v30 = vpop.f32.mrf.mxu3  ;;  %v6037_v28 = vld [vmem:[%s7430_s1 + $0xa78] sm:$0xff] }
 0x110   :  { %3865 = vmatpush.bf16.msra.mxu2 %v5978_v6  ;;  %v6045_v30 = vld [vmem:[%s7430_s1 + $0xab8] sm:$0xff] }
 0x111   :  { %3878 = vmatpush.bf16.msra.mxu3 %v5986_v8  ;;  %v5992_v8 = vld [vmem:[%s7430_s1 + $0x910] sm:$0xff] }
 0x112   :  { %3840 = vmatpush.bf16.msra.mxu0 %v5961_v9 }
 0x113   :  { %3853 = vmatpush.bf16.msra.mxu1 %v5969_v10  ;;  %v6000_v10 = vld [vmem:[%s7430_s1 + $0x950] sm:$0xff] }
 0x114   :  { %3866 = vmatpush.bf16.msra.mxu2 %v5977_v11  ;;  %v6008_v11 = vld [vmem:[%s7430_s1 + $0x990] sm:$0xff] }
 0x115   :  { %3879 = vmatpush.bf16.msra.mxu3 %v5985_v14  ;;  %v5999_v14 = vld [vmem:[%s7430_s1 + $0x948] sm:$0xff] }
 0x116   :  { %3841 = vmatpush.bf16.msra.mxu0 %v5960_v17  ;;  %v35_v17 = vld [vmem:[%s7431_s0 + $0x98] sm:$0xff] }
 0x117   :  { %3854 = vmatpush.bf16.msra.mxu1 %v5968_v20 }
 0x118   :  { %3867 = vmatpush.bf16.msra.mxu2 %v5976_v21  ;;  %v5990_v21 = vld [vmem:[%s7430_s1 + $0x900] sm:$0xff] }
 0x119   :  { %3880 = vmatpush.bf16.msra.mxu3 %v5984_v22  ;;  %v906_v22 = vunpack.c.l.b16 %v34_v16 }
 0x11a   :  { %3842 = vmatpush.bf16.msra.mxu0 %v5959_v23  ;;  %v908_v23 = vunpack.c.l.b16 %v35_v17 }
 0x11b   :  { %3855 = vmatpush.bf16.msra.mxu1 %v5967_v24  ;;  %v5998_v24 = vld [vmem:[%s7430_s1 + $0x940] sm:$0xff]  ;;  %v956_v32 = vpack.c.b16 %v906_v22, %v906_v22 }
 0x11c   :  { %3868 = vmatpush.bf16.msra.mxu2 %v5975_v25  ;;  %v6006_v25 = vld [vmem:[%s7430_s1 + $0x980] sm:$0xff]  ;;  %v958_v33 = vpack.c.b16 %v908_v23, %v908_v23 }
 0x11d   :  { %3881 = vmatpush.bf16.msra.mxu3 %v5983_v29  ;;  %v909_v29 = vunpack.c.h.b16 %v35_v17  ;;  %v6061_v17 = vld [vmem:[%s7430_s1 + $0xb38] sm:$0xff] }
 0x11e   :  { %3843 = vmatpush.bf16.msra.mxu0 %v5958_v31  ;;  %v3637_v55 = vpop.f32.mrf.mxu0  ;;  %v6014_v31 = vld [vmem:[%s7430_s1 + $0x9c0] sm:$0xff] }
 0x11f   :  { %3856 = vmatpush.bf16.msra.mxu1 %v5966_v34  ;;  %v3638_v56 = vadd.f32 %v3637_v55, %v7016_v19  ;;  %v3650_v58 = vpop.f32.mrf.mxu1  ;;  %v6015_v19 = vld [vmem:[%s7430_s1 + $0x9c8] sm:$0xff]  ;;  %v6053_v34 = vld [vmem:[%s7430_s1 + $0xaf8] sm:$0xff]  ;;  %v959_v36 = vpack.c.b16 %v909_v29, %v909_v29  ;;  %v6076_v29 = vld [vmem:[%s7430_s1 + $0xbb0] sm:$0xff] }
 0x120   :  { %3869 = vmatpush.bf16.msra.mxu2 %v5974_v35  ;;  %v957_v35 = vpack.c.b16 %v907_v26, %v907_v26  ;;  %v6041_v55 = vld [vmem:[%s7430_s1 + $0xa98] sm:$0xff] }
 0x121   :  { %3882 = vmatpush.bf16.msra.mxu3 %v5982_v41  ;;  %3844 = vmatmul.bf16.vlgmr.msra.gmra.mxu0 %v952_v42  ;;  %v3651_v61 = vadd.f32 %v3650_v58, %v3638_v56  ;;  %v6027_v41 = vld [vmem:[%s7430_s1 + $0xa28] sm:$0xff]  ;;  %v6049_v58 = vld [vmem:[%s7430_s1 + $0xad8] sm:$0xff] }
 0x122   :  { %3888 = vmatpush.bf16.msrb.mxu0 %v5997_v37  ;;  %3857 = vmatmul.bf16.vlgmr.msra.gmra.mxu1 %v953_v45  ;;  %v6028_v37 = vld [vmem:[%s7430_s1 + $0xa30] sm:$0xff]  ;;  %v6035_v42 = vld [vmem:[%s7430_s1 + $0xa68] sm:$0xff] }
 0x123   :  { %3901 = vmatpush.bf16.msrb.mxu1 %v6005_v38  ;;  %3870 = vmatmul.bf16.vlgmr.msra.gmra.mxu2 %v954_v43  ;;  %v6036_v38 = vld [vmem:[%s7430_s1 + $0xa70] sm:$0xff]  ;;  %v6043_v43 = vld [vmem:[%s7430_s1 + $0xaa8] sm:$0xff] }
 0x124   :  { %3914 = vmatpush.bf16.msrb.mxu2 %v6013_v40  ;;  %3883 = vmatmul.bf16.vlgmr.msra.gmra.mxu3 %v955_v46  ;;  %v6052_v40 = vld [vmem:[%s7430_s1 + $0xaf0] sm:$0xff] }
 0x125   :  { %3927 = vmatpush.bf16.msrb.mxu3 %v6021_v44  ;;  %v6051_v44 = vld [vmem:[%s7430_s1 + $0xae8] sm:$0xff] }
 0x126   :  { %3889 = vmatpush.bf16.msrb.mxu0 %v5996_v47  ;;  %v3663_v2 = vpop.f32.mrf.mxu2  ;;  %v3639_v6 = vpop.f32.mrf.mxu0  ;;  %v6026_v47 = vld [vmem:[%s7430_s1 + $0xa20] sm:$0xff] }
 0x127   :  { %3902 = vmatpush.bf16.msrb.mxu1 %v6004_v48  ;;  %v3664_v3 = vadd.f32 %v3663_v2, %v3651_v61  ;;  %v3676_v5 = vpop.f32.mrf.mxu3  ;;  %v3652_v9 = vpop.f32.mrf.mxu1  ;;  %v6048_v2 = vld [vmem:[%s7430_s1 + $0xad0] sm:$0xff]  ;;  %v36_v6 = vld [vmem:[%s7431_s0 + $0xa0] sm:$0xff] }
 0x128   :  { %3915 = vmatpush.bf16.msrb.mxu2 %v6012_v49  ;;  %v6034_v49 = vld [vmem:[%s7430_s1 + $0xa60] sm:$0xff]  ;;  %v6047_v9 = vld [vmem:[%s7430_s1 + $0xac8] sm:$0xff]  ;;  %v911_v16 = vunpack.c.h.b16 %v36_v6 }
 0x129   :  { %3928 = vmatpush.bf16.msrb.mxu3 %v6020_v50  ;;  %v7118_v7 = vadd.f32 %v3676_v5, %v3664_v3  ;;  %v6042_v50 = vld [vmem:[%s7430_s1 + $0xaa0] sm:$0xff]  ;;  %v6023_v3 = vld [vmem:[%s7430_s1 + $0xa08] sm:$0xff] }
 0x12a   :  { %3890 = vmatpush.bf16.msrb.mxu0 %v5995_v51  ;;  %v6039_v5 = vld [vmem:[%s7430_s1 + $0xa88] sm:$0xff] }
 0x12b   :  { %3903 = vmatpush.bf16.msrb.mxu1 %v6003_v52  ;;  %v6050_v52 = vld [vmem:[%s7430_s1 + $0xae0] sm:$0xff] }
 0x12c   :  { %3916 = vmatpush.bf16.msrb.mxu2 %v6011_v53  ;;  %v6025_v53 = vld [vmem:[%s7430_s1 + $0xa18] sm:$0xff] }
 0x12d   :  { %3929 = vmatpush.bf16.msrb.mxu3 %v6019_v54  ;;  %v6033_v54 = vld [vmem:[%s7430_s1 + $0xa58] sm:$0xff] }
 0x12e   :  { %3891 = vmatpush.bf16.msrb.mxu0 %v5994_v57  ;;  %v3665_v18 = vpop.f32.mrf.mxu2 }
 0x12f   :  { %3904 = vmatpush.bf16.msrb.mxu1 %v6002_v59  ;;  %v3678_v20 = vpop.f32.mrf.mxu3  ;;  %v6069_v18 = vld [vmem:[%s7430_s1 + $0xb78] sm:$0xff] }
 0x130   :  { %3917 = vmatpush.bf16.msrb.mxu2 %v6010_v60  ;;  %v6077_v20 = vld [vmem:[%s7430_s1 + $0xbb8] sm:$0xff] }
 0x131   :  { %3930 = vmatpush.bf16.msrb.mxu3 %v6018_v62  ;;  %v6024_v62 = vld [vmem:[%s7430_s1 + $0xa10] sm:$0xff] }
 0x132   :  { %3892 = vmatpush.bf16.msrb.mxu0 %v5993_v63 }
 0x133   :  { %3905 = vmatpush.bf16.msrb.mxu1 %v6001_v0  ;;  %v6032_v0 = vld [vmem:[%s7430_s1 + $0xa50] sm:$0xff] }
 0x134   :  { %3918 = vmatpush.bf16.msrb.mxu2 %v6009_v1  ;;  %v6040_v1 = vld [vmem:[%s7430_s1 + $0xa90] sm:$0xff] }
 0x135   :  { %3931 = vmatpush.bf16.msrb.mxu3 %v6017_v4  ;;  %v6031_v4 = vld [vmem:[%s7430_s1 + $0xa48] sm:$0xff] }
 0x136   :  { %3893 = vmatpush.bf16.msrb.mxu0 %v5992_v8 }
 0x137   :  { %3906 = vmatpush.bf16.msrb.mxu1 %v6000_v10 }
 0x138   :  { %3919 = vmatpush.bf16.msrb.mxu2 %v6008_v11  ;;  %v6022_v11 = vld [vmem:[%s7430_s1 + $0xa00] sm:$0xff] }
 0x139   :  { %3932 = vmatpush.bf16.msrb.mxu3 %v6016_v12  ;;  %v910_v12 = vunpack.c.l.b16 %v36_v6  ;;  %v6070_v6 = vld [vmem:[%s7430_s1 + $0xb80] sm:$0xff] }
 0x13a   :  { %3894 = vmatpush.bf16.msrb.mxu0 %v5991_v13 }
 0x13b   :  { %3907 = vmatpush.bf16.msrb.mxu1 %v5999_v14  ;;  %v6030_v14 = vld [vmem:[%s7430_s1 + $0xa40] sm:$0xff]  ;;  %v960_v22 = vpack.c.b16 %v910_v12, %v910_v12 }
 0x13c   :  { %3920 = vmatpush.bf16.msrb.mxu2 %v6007_v15  ;;  %v6038_v15 = vld [vmem:[%s7430_s1 + $0xa80] sm:$0xff] }
 0x13d   :  { %3933 = vmatpush.bf16.msrb.mxu3 %v6015_v19 }
 0x13e   :  { %3895 = vmatpush.bf16.msrb.mxu0 %v5990_v21  ;;  %v3689_v45 = vpop.f32.mrf.mxu0  ;;  %v6046_v21 = vld [vmem:[%s7430_s1 + $0xac0] sm:$0xff] }
 0x13f   :  { %3908 = vmatpush.bf16.msrb.mxu1 %v5998_v24  ;;  %v3690_v46 = vadd.f32 %v3689_v45, %v7118_v7  ;;  %v3702_v48 = vpop.f32.mrf.mxu1  ;;  %v37_v7 = vld [vmem:[%s7431_s0 + $0xa8] sm:$0xff]  ;;  %v6085_v24 = vld [vmem:[%s7430_s1 + $0xbf8] sm:$0xff] }
 0x140   :  { %3921 = vmatpush.bf16.msrb.mxu2 %v6006_v25  ;;  %v912_v13 = vunpack.c.l.b16 %v37_v7  ;;  %v913_v19 = vunpack.c.h.b16 %v37_v7  ;;  %v961_v25 = vpack.c.b16 %v911_v16, %v911_v16  ;;  %v6073_v45 = vld [vmem:[%s7430_s1 + $0xb98] sm:$0xff]  ;;  %v6100_v16 = vld [vmem:[%s7430_s1 + $0xc70] sm:$0xff] }
 0x141   :  { %3934 = vmatpush.bf16.msrb.mxu3 %v6014_v31  ;;  %3896 = vmatmul.bf16.vlgmr.msrb.gmra.mxu0 %v956_v32  ;;  %v3703_v51 = vadd.f32 %v3702_v48, %v3690_v46  ;;  %v6059_v31 = vld [vmem:[%s7430_s1 + $0xb28] sm:$0xff]  ;;  %v6081_v48 = vld [vmem:[%s7430_s1 + $0xbd8] sm:$0xff] }
 0x142   :  { %3940 = vmatpush.bf16.msra.mxu0 %v6029_v27  ;;  %3909 = vmatmul.bf16.vlgmr.msrb.gmra.mxu1 %v957_v35  ;;  %v962_v23 = vpack.c.b16 %v912_v13, %v912_v13  ;;  %v963_v26 = vpack.c.b16 %v913_v19, %v913_v19  ;;  %v6060_v27 = vld [vmem:[%s7430_s1 + $0xb30] sm:$0xff]  ;;  %v6067_v32 = vld [vmem:[%s7430_s1 + $0xb68] sm:$0xff]  ;;  %v6093_v7 = vld [vmem:[%s7430_s1 + $0xc38] sm:$0xff] }
 0x143   :  { %3953 = vmatpush.bf16.msra.mxu1 %v6037_v28  ;;  %3922 = vmatmul.bf16.vlgmr.msrb.gmra.mxu2 %v958_v33  ;;  %v6068_v28 = vld [vmem:[%s7430_s1 + $0xb70] sm:$0xff]  ;;  %v6075_v33 = vld [vmem:[%s7430_s1 + $0xba8] sm:$0xff] }
 0x144   :  { %3966 = vmatpush.bf16.msra.mxu2 %v6045_v30  ;;  %3935 = vmatmul.bf16.vlgmr.msrb.gmra.mxu3 %v959_v36  ;;  %v6084_v30 = vld [vmem:[%s7430_s1 + $0xbf0] sm:$0xff] }
 0x145   :  { %3979 = vmatpush.bf16.msra.mxu3 %v6053_v34  ;;  %v6083_v34 = vld [vmem:[%s7430_s1 + $0xbe8] sm:$0xff] }
 0x146   :  { %3941 = vmatpush.bf16.msra.mxu0 %v6028_v37  ;;  %v3715_v56 = vpop.f32.mrf.mxu2  ;;  %v3691_v60 = vpop.f32.mrf.mxu0  ;;  %v6058_v37 = vld [vmem:[%s7430_s1 + $0xb20] sm:$0xff] }
 0x147   :  { %3954 = vmatpush.bf16.msra.mxu1 %v6036_v38  ;;  %v3716_v57 = vadd.f32 %v3715_v56, %v3703_v51  ;;  %v3728_v59 = vpop.f32.mrf.mxu3  ;;  %v3704_v63 = vpop.f32.mrf.mxu1  ;;  %v6080_v56 = vld [vmem:[%s7430_s1 + $0xbd0] sm:$0xff]  ;;  %v6071_v60 = vld [vmem:[%s7430_s1 + $0xb88] sm:$0xff] }
 0x148   :  { %3967 = vmatpush.bf16.msra.mxu2 %v6044_v39  ;;  %v6066_v39 = vld [vmem:[%s7430_s1 + $0xb60] sm:$0xff]  ;;  %v6079_v63 = vld [vmem:[%s7430_s1 + $0xbc8] sm:$0xff] }
 0x149   :  { %3980 = vmatpush.bf16.msra.mxu3 %v6052_v40  ;;  %v7223_v61 = vadd.f32 %v3728_v59, %v3716_v57  ;;  %v6074_v40 = vld [vmem:[%s7430_s1 + $0xba0] sm:$0xff]  ;;  %v6055_v57 = vld [vmem:[%s7430_s1 + $0xb08] sm:$0xff] }
 0x14a   :  { %3942 = vmatpush.bf16.msra.mxu0 %v6027_v41  ;;  %v6063_v59 = vld [vmem:[%s7430_s1 + $0xb48] sm:$0xff] }
 0x14b   :  { %3955 = vmatpush.bf16.msra.mxu1 %v6035_v42  ;;  %v6082_v42 = vld [vmem:[%s7430_s1 + $0xbe0] sm:$0xff] }
 0x14c   :  { %3968 = vmatpush.bf16.msra.mxu2 %v6043_v43  ;;  %v6057_v43 = vld [vmem:[%s7430_s1 + $0xb18] sm:$0xff] }
 0x14d   :  { %3981 = vmatpush.bf16.msra.mxu3 %v6051_v44  ;;  %v6065_v44 = vld [vmem:[%s7430_s1 + $0xb58] sm:$0xff] }
 0x14e   :  { %3943 = vmatpush.bf16.msra.mxu0 %v6026_v47  ;;  %v3717_v8 = vpop.f32.mrf.mxu2 }
 0x14f   :  { %3956 = vmatpush.bf16.msra.mxu1 %v6034_v49  ;;  %v3730_v10 = vpop.f32.mrf.mxu3  ;;  %v6101_v8 = vld [vmem:[%s7430_s1 + $0xc78] sm:$0xff] }
 0x150   :  { %3969 = vmatpush.bf16.msra.mxu2 %v6042_v50  ;;  %v6078_v10 = vld [vmem:[%s7430_s1 + $0xbc0] sm:$0xff] }
 0x151   :  { %3982 = vmatpush.bf16.msra.mxu3 %v6050_v52  ;;  %v6056_v52 = vld [vmem:[%s7430_s1 + $0xb10] sm:$0xff] }
 0x152   :  { %3944 = vmatpush.bf16.msra.mxu0 %v6025_v53 }
 0x153   :  { %3957 = vmatpush.bf16.msra.mxu1 %v6033_v54  ;;  %v6064_v54 = vld [vmem:[%s7430_s1 + $0xb50] sm:$0xff] }
 0x154   :  { %3970 = vmatpush.bf16.msra.mxu2 %v6041_v55  ;;  %v6072_v55 = vld [vmem:[%s7430_s1 + $0xb90] sm:$0xff] }
 0x155   :  { %3983 = vmatpush.bf16.msra.mxu3 %v6049_v58  ;;  %v38_v58 = vld [vmem:[%s7431_s0 + $0xb0] sm:$0xff] }
 0x156   :  { %3945 = vmatpush.bf16.msra.mxu0 %v6024_v62 }
 0x157   :  { %3958 = vmatpush.bf16.msra.mxu1 %v6032_v0  ;;  %v914_v0 = vunpack.c.l.b16 %v38_v58 }
 0x158   :  { %3971 = vmatpush.bf16.msra.mxu2 %v6040_v1 }
 0x159   :  { %3984 = vmatpush.bf16.msra.mxu3 %v6048_v2  ;;  %v6054_v2 = vld [vmem:[%s7430_s1 + $0xb00] sm:$0xff] }
 0x15a   :  { %3946 = vmatpush.bf16.msra.mxu0 %v6023_v3 }
 0x15b   :  { %3959 = vmatpush.bf16.msra.mxu1 %v6031_v4  ;;  %v915_v4 = vunpack.c.h.b16 %v38_v58 }
 0x15c   :  { %3972 = vmatpush.bf16.msra.mxu2 %v6039_v5  ;;  %v6062_v5 = vld [vmem:[%s7430_s1 + $0xb40] sm:$0xff] }
 0x15d   :  { %3985 = vmatpush.bf16.msra.mxu3 %v6047_v9  ;;  %v965_v13 = vpack.c.b16 %v915_v4, %v915_v4 }
 0x15e   :  { %3947 = vmatpush.bf16.msra.mxu0 %v6022_v11  ;;  %v3741_v35 = vpop.f32.mrf.mxu0  ;;  %v964_v11 = vpack.c.b16 %v914_v0, %v914_v0 }
 0x15f   :  { %3960 = vmatpush.bf16.msra.mxu1 %v6030_v14  ;;  %v3742_v36 = vadd.f32 %v3741_v35, %v7223_v61  ;;  %v3754_v38 = vpop.f32.mrf.mxu1  ;;  %v39_v61 = vld [vmem:[%s7431_s0 + $0xb8] sm:$0xff]  ;;  %v6087_v35 = vld [vmem:[%s7430_s1 + $0xc08] sm:$0xff] }
 0x160   :  { %3973 = vmatpush.bf16.msra.mxu2 %v6038_v15  ;;  %v916_v3 = vunpack.c.l.b16 %v39_v61  ;;  %v917_v9 = vunpack.c.h.b16 %v39_v61  ;;  %v6092_v15 = vld [vmem:[%s7430_s1 + $0xc30] sm:$0xff] }
 0x161   :  { %3986 = vmatpush.bf16.msra.mxu3 %v6046_v21  ;;  %3948 = vmatmul.bf16.vlgmr.msra.gmra.mxu0 %v960_v22  ;;  %v3755_v41 = vadd.f32 %v3754_v38, %v3742_v36  ;;  %v6090_v21 = vld [vmem:[%s7430_s1 + $0xc20] sm:$0xff] }
 0x162   :  { %3992 = vmatpush.bf16.msrb.mxu0 %v6061_v17  ;;  %3961 = vmatmul.bf16.vlgmr.msra.gmra.mxu1 %v961_v25  ;;  %v966_v12 = vpack.c.b16 %v916_v3, %v916_v3  ;;  %v967_v14 = vpack.c.b16 %v917_v9, %v917_v9  ;;  %v6091_v17 = vld [vmem:[%s7430_s1 + $0xc28] sm:$0xff]  ;;  %v6089_v25 = vld [vmem:[%s7430_s1 + $0xc18] sm:$0xff]  ;;  %v40_v36 = vld [vmem:[%s7431_s0 + $0xc0] sm:$0xff] }
 0x163   :  { %4005 = vmatpush.bf16.msrb.mxu1 %v6069_v18  ;;  %3974 = vmatmul.bf16.vlgmr.msra.gmra.mxu2 %v962_v23  ;;  %v6099_v18 = vld [vmem:[%s7430_s1 + $0xc68] sm:$0xff]  ;;  %v6098_v23 = vld [vmem:[%s7430_s1 + $0xc60] sm:$0xff] }
 0x164   :  { %4018 = vmatpush.bf16.msrb.mxu2 %v6077_v20  ;;  %3987 = vmatmul.bf16.vlgmr.msra.gmra.mxu3 %v963_v26  ;;  %v6097_v26 = vld [vmem:[%s7430_s1 + $0xc58] sm:$0xff] }
 0x165   :  { %4031 = vmatpush.bf16.msrb.mxu3 %v6085_v24 }
 0x166   :  { %3993 = vmatpush.bf16.msrb.mxu0 %v6060_v27  ;;  %v3767_v46 = vpop.f32.mrf.mxu2  ;;  %v3743_v50 = vpop.f32.mrf.mxu0 }
 0x167   :  { %4006 = vmatpush.bf16.msrb.mxu1 %v6068_v28  ;;  %v3768_v47 = vadd.f32 %v3767_v46, %v3755_v41  ;;  %v3780_v49 = vpop.f32.mrf.mxu3  ;;  %v3756_v53 = vpop.f32.mrf.mxu1  ;;  %v6086_v41 = vld [vmem:[%s7430_s1 + $0xc00] sm:$0xff] }
 0x168   :  { %4019 = vmatpush.bf16.msrb.mxu2 %v6076_v29 }
 0x169   :  { %4032 = vmatpush.bf16.msrb.mxu3 %v6084_v30  ;;  %v3781_v51 = vadd.f32 %v3780_v49, %v3768_v47 }
 0x16a   :  { %3994 = vmatpush.bf16.msrb.mxu0 %v6059_v31 }
 0x16b   :  { %4007 = vmatpush.bf16.msrb.mxu1 %v6067_v32  ;;  %v6088_v32 = vld [vmem:[%s7430_s1 + $0xc10] sm:$0xff] }
 0x16c   :  { %4020 = vmatpush.bf16.msrb.mxu2 %v6075_v33 }
 0x16d   :  { %4033 = vmatpush.bf16.msrb.mxu3 %v6083_v34  ;;  %v6096_v34 = vld [vmem:[%s7430_s1 + $0xc50] sm:$0xff] }
 0x16e   :  { %3995 = vmatpush.bf16.msrb.mxu0 %v6058_v37  ;;  %v3769_v62 = vpop.f32.mrf.mxu2  ;;  %v6095_v37 = vld [vmem:[%s7430_s1 + $0xc48] sm:$0xff] }
 0x16f   :  { %4008 = vmatpush.bf16.msrb.mxu1 %v6066_v39  ;;  %v3782_v1 = vpop.f32.mrf.mxu3  ;;  %v918_v39 = vunpack.c.l.b16 %v40_v36 }
 0x170   :  { %4021 = vmatpush.bf16.msrb.mxu2 %v6074_v40 }
 0x171   :  { %4034 = vmatpush.bf16.msrb.mxu3 %v6082_v42  ;;  %v919_v42 = vunpack.c.h.b16 %v40_v36 }
 0x172   :  { %3996 = vmatpush.bf16.msrb.mxu0 %v6057_v43  ;;  %v6094_v43 = vld [vmem:[%s7430_s1 + $0xc40] sm:$0xff] }
 0x173   :  { %4009 = vmatpush.bf16.msrb.mxu1 %v6065_v44  ;;  %v968_v44 = vpack.c.b16 %v918_v39, %v918_v39 }
 0x174   :  { %4022 = vmatpush.bf16.msrb.mxu2 %v6073_v45  ;;  %v969_v45 = vpack.c.b16 %v919_v42, %v919_v42 }
 0x175   :  { %4035 = vmatpush.bf16.msrb.mxu3 %v6081_v48 }
 0x176   :  { %3997 = vmatpush.bf16.msrb.mxu0 %v6056_v52 }
 0x177   :  { %4010 = vmatpush.bf16.msrb.mxu1 %v6064_v54 }
 0x178   :  { %4023 = vmatpush.bf16.msrb.mxu2 %v6072_v55 }
 0x179   :  { %4036 = vmatpush.bf16.msrb.mxu3 %v6080_v56 }
 0x17a   :  { %3998 = vmatpush.bf16.msrb.mxu0 %v6055_v57 }
 0x17b   :  { %4011 = vmatpush.bf16.msrb.mxu1 %v6063_v59 }
 0x17c   :  { %4024 = vmatpush.bf16.msrb.mxu2 %v6071_v60 }
 0x17d   :  { %4037 = vmatpush.bf16.msrb.mxu3 %v6079_v63 }
 0x17e   :  { %3999 = vmatpush.bf16.msrb.mxu0 %v6054_v2  ;;  %v3793_v19 = vpop.f32.mrf.mxu0 }
 0x17f   :  { %4012 = vmatpush.bf16.msrb.mxu1 %v6062_v5  ;;  %v3794_v20 = vadd.f32 %v3793_v19, %v3781_v51  ;;  %v3806_v22 = vpop.f32.mrf.mxu1 }
 0x180   :  { %4025 = vmatpush.bf16.msrb.mxu2 %v6070_v6 }
 0x181   :  { %4038 = vmatpush.bf16.msrb.mxu3 %v6078_v10  ;;  %4000 = vmatmul.bf16.vlgmr.msrb.gmra.mxu0 %v964_v11  ;;  %v3807_v24 = vadd.f32 %v3806_v22, %v3794_v20 }
 0x182   :  { %4044 = vmatpush.bf16.msra.mxu0 %v6093_v7  ;;  %4013 = vmatmul.bf16.vlgmr.msrb.gmra.mxu1 %v965_v13 }
 0x183   :  { %4057 = vmatpush.bf16.msra.mxu1 %v6101_v8  ;;  %4026 = vmatmul.bf16.vlgmr.msrb.gmra.mxu2 %v966_v12 }
 0x184   :  { %4039 = vmatmul.bf16.vlgmr.msrb.gmra.mxu3 %v967_v14 }
 0x186   :  { %4045 = vmatpush.bf16.msra.mxu0 %v6092_v15  ;;  %v3819_v27 = vpop.f32.mrf.mxu2  ;;  %v3795_v30 = vpop.f32.mrf.mxu0 }
 0x187   :  { %4058 = vmatpush.bf16.msra.mxu1 %v6100_v16  ;;  %v3820_v28 = vadd.f32 %v3819_v27, %v3807_v24  ;;  %v3832_v29 = vpop.f32.mrf.mxu3  ;;  %v3808_v33 = vpop.f32.mrf.mxu1 }
 0x189   :  { %v3833_v31 = vadd.f32 %v3832_v29, %v3820_v28  ;;  %v4073_v28 = vlaneseq }
 0x18a   :  { %4046 = vmatpush.bf16.msra.mxu0 %v6091_v17 }
 0x18b   :  { %4059 = vmatpush.bf16.msra.mxu1 %v6099_v18  ;;  %v4074_v30 = vshrl.u32 %v4073_v28, 7 }
 0x18d   :  { %vm4077_vm0 = vcmp.lt.s32.totalorder %v4074_v30, 2 }
 0x18e   :  { %4047 = vmatpush.bf16.msra.mxu0 %v6090_v21  ;;  %v3821_v38 = vpop.f32.mrf.mxu2 }
 0x18f   :  { %4060 = vmatpush.bf16.msra.mxu1 %v6098_v23  ;;  %v3834_v40 = vpop.f32.mrf.mxu3 }
 0x192   :  { %4048 = vmatpush.bf16.msra.mxu0 %v6089_v25 }
 0x193   :  { %4061 = vmatpush.bf16.msra.mxu1 %v6097_v26 }
 0x196   :  { %4049 = vmatpush.bf16.msra.mxu0 %v6088_v32 }
 0x197   :  { %4062 = vmatpush.bf16.msra.mxu1 %v6096_v34 }
 0x19a   :  { %4050 = vmatpush.bf16.msra.mxu0 %v6087_v35 }
 0x19b   :  { %4063 = vmatpush.bf16.msra.mxu1 %v6095_v37 }
 0x19e   :  { %4051 = vmatpush.bf16.msra.mxu0 %v6086_v41  ;;  %v3845_v46 = vpop.f32.mrf.mxu0 }
 0x19f   :  { %4064 = vmatpush.bf16.msra.mxu1 %v6094_v43  ;;  %v3846_v47 = vadd.f32 %v3845_v46, %v3833_v31  ;;  %v3858_v48 = vpop.f32.mrf.mxu1 }
 0x1a1   :  { %4052 = vmatmul.bf16.vlgmr.msra.gmra.mxu0 %v968_v44  ;;  %v3859_v49 = vadd.f32 %v3858_v48, %v3846_v47 }
 0x1a2   :  { %4065 = vmatmul.bf16.vlgmr.msra.gmra.mxu1 %v969_v45 }
 0x1a6   :  { %v3871_v50 = vpop.f32.mrf.mxu2  ;;  %v3847_v53 = vpop.f32.mrf.mxu0 }
 0x1a7   :  { %v3872_v51 = vadd.f32 %v3871_v50, %v3859_v49  ;;  %v3884_v52 = vpop.f32.mrf.mxu3  ;;  %v3860_v55 = vpop.f32.mrf.mxu1 }
 0x1a9   :  { %v3885_v54 = vadd.f32 %v3884_v52, %v3872_v51 }
 0x1ae   :  { %v3873_v56 = vpop.f32.mrf.mxu2 }
 0x1af   :  { %v3886_v57 = vpop.f32.mrf.mxu3 }
 0x1be   :  { %v3897_v58 = vpop.f32.mrf.mxu0 }
 0x1bf   :  { %v3898_v59 = vadd.f32 %v3897_v58, %v3885_v54  ;;  %v3910_v60 = vpop.f32.mrf.mxu1 }
 0x1c1   :  { %v3911_v61 = vadd.f32 %v3910_v60, %v3898_v59 }
 0x1c6   :  { %v3923_v62 = vpop.f32.mrf.mxu2  ;;  %v3899_v0 = vpop.f32.mrf.mxu0 }
 0x1c7   :  { %v3936_v63 = vpop.f32.mrf.mxu3  ;;  %v3912_v1 = vpop.f32.mrf.mxu1  ;;  %v3924_v13 = vadd.f32 %v3923_v62, %v3911_v61 }
 0x1c9   :  { %v3937_v15 = vadd.f32 %v3936_v63, %v3924_v13 }
 0x1ce   :  { %v3925_v2 = vpop.f32.mrf.mxu2 }
 0x1cf   :  { %v3938_v3 = vpop.f32.mrf.mxu3 }
 0x1de   :  { %v3949_v4 = vpop.f32.mrf.mxu0 }
 0x1df   :  { %v3962_v5 = vpop.f32.mrf.mxu1  ;;  %v3950_v16 = vadd.f32 %v3949_v4, %v3937_v15 }
 0x1e1   :  { %v3963_v21 = vadd.f32 %v3962_v5, %v3950_v16 }
 0x1e6   :  { %v3975_v6 = vpop.f32.mrf.mxu2  ;;  %v3951_v8 = vpop.f32.mrf.mxu0 }
 0x1e7   :  { %v3988_v7 = vpop.f32.mrf.mxu3  ;;  %v3964_v9 = vpop.f32.mrf.mxu1  ;;  %v3976_v22 = vadd.f32 %v3975_v6, %v3963_v21 }
 0x1e9   :  { %v3989_v24 = vadd.f32 %v3988_v7, %v3976_v22 }
 0x1ee   :  { %v3977_v10 = vpop.f32.mrf.mxu2 }
 0x1ef   :  { %v3990_v11 = vpop.f32.mrf.mxu3 }
 0x1fe   :  { %v4001_v12 = vpop.f32.mrf.mxu0 }
 0x1ff   :  { %v4014_v14 = vpop.f32.mrf.mxu1  ;;  %v4002_v26 = vadd.f32 %v4001_v12, %v3989_v24 }
 0x201   :  { %v4015_v27 = vadd.f32 %v4014_v14, %v4002_v26 }
 0x206   :  { %v4027_v17 = vpop.f32.mrf.mxu2  ;;  %v4003_v18 = vpop.f32.mrf.mxu0 }
 0x207   :  { %v4040_v19 = vpop.f32.mrf.mxu3  ;;  %v4016_v20 = vpop.f32.mrf.mxu1  ;;  %v4028_v29 = vadd.f32 %v4027_v17, %v4015_v27 }
 0x209   :  { %v4041_v31 = vadd.f32 %v4040_v19, %v4028_v29 }
 0x20e   :  { %v4029_v23 = vpop.f32.mrf.mxu2 }
 0x20f   :  { %v4042_v25 = vpop.f32.mrf.mxu3 }
 0x21e   :  { %v4053_v32 = vpop.f32.mrf.mxu0 }
 0x21f   :  { %v4054_v33 = vadd.f32 %v4053_v32, %v4041_v31  ;;  %v4066_v34 = vpop.f32.mrf.mxu1 }
 0x221   :  { %v4067_v35 = vadd.f32 %v4066_v34, %v4054_v33 }
 0x223   :  { %v4070_v36 = vpack.c.bf16 %v4067_v35, %v4067_v35  ;;  %v4078_v37 = vsel %vm4077_vm0, %v4067_v35, 0.0 }
 0x224   :  { %v4079_v38 = vrot.slane %v4078_v37, 4  ;;  %v4086_v39 = vmul.f32 %v4078_v37, %v4067_v35 }
 0x225   :  { %4071 = vst [vmem:[%s7433_s3] sm:$0xf] %v4070_v36 }
 0x226   :  { %v4080_v40 = vadd.f32 %v4079_v38, %v4078_v37  ;;  %v4087_v41 = vrot.slane %v4086_v39, 4  ;;  %v4055_v42 = vpop.f32.mrf.mxu0 }
 0x227   :  { %v4068_v43 = vpop.f32.mrf.mxu1 }
 0x228   :  { %v4081_v44 = vrot.slane %v4080_v40, 2  ;;  %v4088_v45 = vadd.f32 %v4087_v41, %v4086_v39 }
 0x22a   :  { %v4082_v46 = vadd.f32 %v4081_v44, %v4080_v40  ;;  %v4089_v47 = vrot.slane %v4088_v45, 2 }
 0x22c   :  { %v4083_v48 = vrot.slane %v4082_v46, 1  ;;  %v4090_v49 = vadd.f32 %v4089_v47, %v4088_v45 }
 0x22e   :  { %v4084_v50 = vadd.f32 %v4083_v48, %v4082_v46  ;;  %v4091_v51 = vrot.slane %v4090_v49, 1 }
 0x230   :  { %4085 = vst [vmem:[%s7434_s4] sm:$0x1] %v4084_v50  ;;  %v4092_v52 = vadd.f32 %v4091_v51, %v4090_v49 }
 0x232   :  { %4093 = vst [vmem:[%s7434_s4 + $0x1] sm:$0x1] %v4092_v52 }

</bundles_post_ra>
